<compile_context>
chip_gen: v7x
topology: tpu7x:2x2x1
jax: 0.10.0
libtpu: 0.0.40
codegen_flags: <defaults>
</compile_context>

<pallas_src>
import functools
import math

import jax
import jax.numpy as jnp
from jax import lax
from jax.experimental import pallas as pl
from jax.experimental.pallas import tpu as pltpu

COMPUTE_DTYPE = jnp.bfloat16   # MXU-native inputs; accumulation is f32 in-kernel.
_LANE = 128


# ----------------------------------------------------------------------------
# Pallas kernels
# ----------------------------------------------------------------------------
def _matmul_bias_act_kernel(x_ref, w_ref, b_ref, o_ref, *, apply_relu):
    acc = jnp.dot(x_ref[...], w_ref[...], preferred_element_type=jnp.float32)
    acc = acc + b_ref[...]                      # (1, Np) broadcast over rows
    if apply_relu:
        acc = jnp.maximum(acc, 0.0)
    o_ref[...] = acc.astype(o_ref.dtype)


def _fc_head_fused_kernel(x_ref, w4_ref, b4_ref, w5_ref, b5_ref, o_ref):
    # fc4 (+ReLU) and head fused; hidden activation lives only in VMEM/vregs.
    h = jnp.dot(x_ref[...], w4_ref[...], preferred_element_type=jnp.float32)
    h = jnp.maximum(h + b4_ref[...], 0.0).astype(w5_ref.dtype)
    o = jnp.dot(h, w5_ref[...], preferred_element_type=jnp.float32)
    o_ref[...] = (o + b5_ref[...]).astype(o_ref.dtype)


# ----------------------------------------------------------------------------
# Pallas wrappers
# ----------------------------------------------------------------------------
def conv_matmul(patches, w_p, b_p, *, block_m=None):
    """relu(patches @ w_p + b_p) -> bf16, lane-dense (w_p cols multiple of 128).

    patches: (M, K) exact (no padding); w_p: (K, Np); b_p: (1, Np) f32.
    If block_m divides M the grid splits rows (v7x megacore); otherwise a
    single full-extent block is used (allowed even for odd M).
    """
    M, K = patches.shape
    Kw, Np = w_p.shape
    assert K == Kw, (K, Kw)
    if block_m is None or M % block_m != 0:
        block_m = M
    grid = M // block_m

    return pl.pallas_call(
        functools.partial(_matmul_bias_act_kernel, apply_relu=True),
        out_shape=jax.ShapeDtypeStruct((M, Np), COMPUTE_DTYPE),
        grid=(grid,),
        in_specs=[
            pl.BlockSpec((block_m, K), lambda i: (i, 0)),
            pl.BlockSpec((K, Np), lambda i: (0, 0)),
            pl.BlockSpec((1, Np), lambda i: (0, 0)),
        ],
        out_specs=pl.BlockSpec((block_m, Np), lambda i: (i, 0)),
        compiler_params=pltpu.CompilerParams(
            dimension_semantics=("parallel",)),   # lets v7x split rows across TCs
    )(patches, w_p, b_p)


def fc_head_fused(x, w4_p, b4_p, w5_p, b5_p):
    """out = relu(x @ w4 + b4) @ w5 + b5 in a single pallas_call (f32 out)."""
    M, K = x.shape
    _, H = w4_p.shape
    _, Np = w5_p.shape
    return pl.pallas_call(
        _fc_head_fused_kernel,
        out_shape=jax.ShapeDtypeStruct((M, Np), jnp.float32),
        grid=(1,),
        in_specs=[
            pl.BlockSpec((M, K), lambda i: (0, 0)),      # full-extent, no re-pad
            pl.BlockSpec((K, H), lambda i: (0, 0)),
            pl.BlockSpec((1, H), lambda i: (0, 0)),
            pl.BlockSpec((H, Np), lambda i: (0, 0)),
            pl.BlockSpec((1, Np), lambda i: (0, 0)),
        ],
        out_specs=pl.BlockSpec((M, Np), lambda i: (0, 0)),
        compiler_params=pltpu.CompilerParams(
            dimension_semantics=("arbitrary",)),
    )(x.astype(w4_p.dtype), w4_p, b4_p, w5_p, b5_p)


# ----------------------------------------------------------------------------
# XLA glue: lane-dense patch extraction + space-to-depth (no gathers).
# ----------------------------------------------------------------------------
def extract_patches(x, k, stride):
    """x: (N, H, W, C) NHWC -> (N*Ho*Wo, k*k*C); column order (kh, kw, c)."""
    N, H, W, C = x.shape
    Ho = (H - k) // stride + 1
    Wo = (W - k) // stride + 1
    cols = []
    for kh in range(k):
        for kw in range(k):
            sl = lax.slice(
                x,
                (0, kh, kw, 0),
                (N, kh + (Ho - 1) * stride + 1, kw + (Wo - 1) * stride + 1, C),
                (1, stride, stride, 1))
            cols.append(sl)                              # (N, Ho, Wo, C)
    patches = jnp.concatenate(cols, axis=-1)             # (N, Ho, Wo, k*k*C)
    return patches.reshape(N * Ho * Wo, k * k * C), Ho, Wo


def space_to_depth_nhwc(x, block):
    """(N, C, H, W) -> (N, H/b, W/b, b*b*C); channel order (dh, dw, c)."""
    N, C, H, W = x.shape
    Hb, Wb = H // block, W // block
    x = x.reshape(N, C, Hb, block, Wb, block)            # (n, c, i, dh, j, dw)
    x = x.transpose(0, 2, 4, 3, 5, 1)                    # (n, i, j, dh, dw, c)
    return x.reshape(N, Hb, Wb, block * block * C)


# ----------------------------------------------------------------------------
# Forward pass (semantics identical to the PyTorch module).
# ----------------------------------------------------------------------------
def convq_forward(x, pp, *, action_dim, c3):
    """x: (N, C, H, W) raw pixels (0..255).  Returns (N, action_dim) f32."""
    N = x.shape[0]
    # /255 is folded into w1; space-to-depth (block 4) also performs the
    # NCHW->NHWC relayout, turning conv1 into a 2x2/stride-1 conv over 64 ch.
    z = space_to_depth_nhwc(x.astype(COMPUTE_DTYPE), 4)          # (N,21,21,64)

    # conv1 (as 2x2/stride-1 on s2d input): -> (N,20,20,32) in 128 padded lanes
    p, Ho, Wo = extract_patches(z, 2, 1)                         # (N*400, 256)
    y = conv_matmul(p, pp["w1"], pp["b1"], block_m=400)          # (N*400, 128)
    x1 = y.reshape(N, Ho, Wo, _LANE)

    # conv2: 4x4 stride 2, 32->64 (both sides held at 128 lanes, zero-padded)
    p, Ho, Wo = extract_patches(x1, 4, 2)                        # (N*81, 2048)
    y = conv_matmul(p, pp["w2"], pp["b2"])                       # (N*81, 128)
    x2 = y.reshape(N, Ho, Wo, _LANE)

    # conv3: 3x3 stride 1, 64->64 (input held at 128 lanes)
    p, Ho, Wo = extract_patches(x2, 3, 1)                        # (N*49, 1152)
    y = conv_matmul(p, pp["w3"], pp["b3"])                       # (N*49, 128)

    # NHWC flatten of the c3 valid channels; w4 rows were permuted at prep
    # time so this matches torch's NCHW .view(N, -1) semantics exactly.
    flat = y[:, :c3].reshape(N, Ho * Wo * c3)                    # (N, 3136)

    out = fc_head_fused(flat, pp["w4"], pp["b4"], pp["w5"], pp["b5"])
    return out[:, :action_dim]


# ----------------------------------------------------------------------------
# One-time weight relayout (run once, outside the per-step forward).
# All values stored here are arrays (no Python ints -> nothing turns into a
# tracer when the dict is passed through jit).
# ----------------------------------------------------------------------------
def prepare_params(params, dtype=COMPUTE_DTYPE):
    def pad_cols(a, n):
        return jnp.pad(a, ((0, 0), (0, n - a.shape[1])))

    # conv1 on the space-to-depth input: rows ordered (kh, kw, dh, dw, cin).
    w1 = params["conv1_w"] * (1.0 / 255.0)               # fold x/255 into conv1
    co1, ci1, _, _ = w1.shape                            # (32, 4, 8, 8)
    w1 = w1.reshape(co1, ci1, 2, 4, 2, 4)                # (co, ci, kh, dh, kw, dw)
    w1 = w1.transpose(2, 4, 3, 5, 1, 0).reshape(2 * 2 * 4 * 4 * ci1, co1)
    w1 = pad_cols(w1, _LANE).astype(dtype)
    b1 = jnp.pad(params["conv1_b"], (0, _LANE - co1)).astype(jnp.float32)[None]

    def prep_conv(w, b):
        # Zero rows for the phantom (padded) input channels so the previous
        # layer's activations can stay at the 128-lane padded width.
        co, ci, k, _ = w.shape
        w = jnp.pad(w, ((0, 0), (0, _LANE - ci), (0, 0), (0, 0)))
        w = w.transpose(2, 3, 1, 0).reshape(k * k * _LANE, co)   # rows (kh,kw,ci)
        w = pad_cols(w, _LANE).astype(dtype)
        b = jnp.pad(b, (0, _LANE - co)).astype(jnp.float32)[None]
        return w, b

    w2, b2 = prep_conv(params["conv2_w"], params["conv2_b"])
    w3, b3 = prep_conv(params["conv3_w"], params["conv3_b"])

    # fc4: torch columns are NCHW-flatten (c, h, w); our activation flatten is
    # NHWC (h, w, c) -> permute the rows once here.  K stays exactly 3136.
    h4, k4 = params["fc4_w"].shape                        # (512, 3136)
    c3 = params["conv3_w"].shape[0]                       # 64
    s3 = int(round(math.sqrt(k4 // c3)))                  # 7
    w4 = params["fc4_w"].reshape(h4, c3, s3, s3).transpose(2, 3, 1, 0)
    w4 = w4.reshape(k4, h4).astype(dtype)
    b4 = params["fc4_b"].astype(jnp.float32)[None]

    action_dim = params["head_w"].shape[0]
    w5 = pad_cols(params["head_w"].T, _LANE).astype(dtype)
    b5 = jnp.pad(params["head_b"], (0, _LANE - action_dim)).astype(jnp.float32)[None]

    return {"w1": w1, "b1": b1, "w2": w2, "b2": b2, "w3": w3, "b3": b3,
            "w4": w4, "b4": b4, "w5": w5, "b5": b5}


# ----------------------------------------------------------------------------
# Pure-JAX f32 reference (torch-equivalent) for a runtime numerical check.
# ----------------------------------------------------------------------------
def reference_forward(x, params):
    dn = ("NCHW", "OIHW", "NCHW")

    def conv(h, w, b, s):
        return jax.nn.relu(
            lax.conv_general_dilated(h, w, (s, s), "VALID", dimension_numbers=dn)
            + b[None, :, None, None])

    h = x.astype(jnp.float32) / 255.0
    h = conv(h, params["conv1_w"], params["conv1_b"], 4)
    h = conv(h, params["conv2_w"], params["conv2_b"], 2)
    h = conv(h, params["conv3_w"], params["conv3_b"], 1)
    h = h.reshape(h.shape[0], -1)                         # NCHW flatten
    h = jax.nn.relu(h @ params["fc4_w"].T + params["fc4_b"])
    return h @ params["head_w"].T + params["head_b"]


# ----------------------------------------------------------------------------
# Deterministic parameter init (PyTorch-style U(-1/sqrt(fan_in), 1/sqrt(fan_in))).
# ----------------------------------------------------------------------------
def init_params(key, action_dim=3, in_channels=4):
    def uinit(k, shape, fan_in):
        bound = 1.0 / math.sqrt(fan_in)
        return jax.random.uniform(k, shape, jnp.float32, -bound, bound)

    ks = jax.random.split(key, 10)
    return {
        "conv1_w": uinit(ks[0], (32, in_channels, 8, 8), in_channels * 8 * 8),
        "conv1_b": uinit(ks[1], (32,), in_channels * 8 * 8),
        "conv2_w": uinit(ks[2], (64, 32, 4, 4), 32 * 4 * 4),
        "conv2_b": uinit(ks[3], (64,), 32 * 4 * 4),
        "conv3_w": uinit(ks[4], (64, 64, 3, 3), 64 * 3 * 3),
        "conv3_b": uinit(ks[5], (64,), 64 * 3 * 3),
        "fc4_w":   uinit(ks[6], (512, 7 * 7 * 64), 7 * 7 * 64),
        "fc4_b":   uinit(ks[7], (512,), 7 * 7 * 64),
        "head_w":  uinit(ks[8], (action_dim, 512), 512),
        "head_b":  uinit(ks[9], (action_dim,), 512),
    }


if __name__ == "__main__":
    key = jax.random.PRNGKey(0)
    k_x, k_p = jax.random.split(key)

    # Acrobot-v1 has 3 discrete actions; fc4 (7*7*64 in_features) pins the
    # spatial input to the standard 84x84 DQN preprocessing.
    action_dim = 3
    batch = 2
    x = jax.random.uniform(k_x, (batch, 4, 84, 84), jnp.float32, 0.0, 255.0)
    params = init_params(k_p, action_dim=action_dim, in_channels=4)
    prepped = prepare_params(params)              # one-time weight relayout

    fwd = jax.jit(functools.partial(
        convq_forward, action_dim=action_dim,
        c3=params["conv3_w"].shape[0]))           # static ints bound via partial
    q_values = fwd(x, prepped)
    jax.block_until_ready(q_values)

    assert q_values.shape == (batch, action_dim), q_values.shape
    assert q_values.dtype == jnp.float32
    assert bool(jnp.all(jnp.isfinite(q_values)))

    # Numerical check vs. the f32 reference (bf16 compute -> loose tolerance).
    ref = reference_forward(x, params)
    max_ref = float(jnp.max(jnp.abs(ref)))
    max_diff = float(jnp.max(jnp.abs(q_values - ref)))
    assert max_diff <= 2e-2 + 1e-2 * max_ref, (max_diff, max_ref)

    print("KERNEL_OK")
</pallas_src>

<mosaic_0001>
module attributes {stable_mosaic.version = 11 : i64} {
  func.func @_matmul_bias_act_kernel(%arg0: i32, %arg1: memref<400x256xbf16, #tpu.memory_space<vmem>>, %arg2: memref<256x128xbf16, #tpu.memory_space<vmem>>, %arg3: memref<1x128xf32, #tpu.memory_space<vmem>>, %arg4: memref<400x128xbf16, #tpu.memory_space<vmem>>) attributes {dimension_semantics = [#tpu.dimension_semantics<parallel>], iteration_bounds = array<i64: 2>, scalar_prefetch = 0 : i64, scratch_operands = 0 : i64, tpu.core_type = #tpu.core_type<tc>, window_params = [{transform_indices = @transform_0, window_bounds = array<i64: 400, 256>}, {pipeline_mode = #tpu.pipeline_mode<synchronous>, transform_indices = @transform_1, window_bounds = array<i64: 256, 128>}, {pipeline_mode = #tpu.pipeline_mode<synchronous>, transform_indices = @transform_2, window_bounds = array<i64: 1, 128>}, {transform_indices = @transform_3, window_bounds = array<i64: 400, 128>}]} {
    %c0 = arith.constant 0 : index
    %c0_0 = arith.constant 0 : index
    %0 = vector.load %arg1[%c0, %c0_0] : memref<400x256xbf16, #tpu.memory_space<vmem>>, vector<400x256xbf16>
    %c0_1 = arith.constant 0 : index
    %c0_2 = arith.constant 0 : index
    %1 = vector.load %arg2[%c0_1, %c0_2] : memref<256x128xbf16, #tpu.memory_space<vmem>>, vector<256x128xbf16>
    %cst = arith.constant dense<0.000000e+00> : vector<400x128xf32>
    %2 = tpu.matmul %0, %1, %cst {dimension_numbers = #tpu.dot_dimension_numbers<[1], [0], [0], [1], [0, 0, 1, 1], [], []>} : vector<400x256xbf16>, vector<256x128xbf16>, vector<400x128xf32> -> vector<400x128xf32>
    %c0_3 = arith.constant 0 : index
    %c0_4 = arith.constant 0 : index
    %3 = vector.load %arg3[%c0_3, %c0_4] : memref<1x128xf32, #tpu.memory_space<vmem>>, vector<1x128xf32>
    %4 = vector.broadcast %3 : vector<1x128xf32> to vector<400x128xf32>
    %5 = arith.addf %2, %4 : vector<400x128xf32>
    %cst_5 = arith.constant 0.000000e+00 : f32
    %6 = vector.broadcast %cst_5 : f32 to vector<400x128xf32>
    %7 = arith.maximumf %5, %6 : vector<400x128xf32>
    %8 = arith.truncf %7 : vector<400x128xf32> to vector<400x128xbf16>
    %c0_6 = arith.constant 0 : index
    %c0_7 = arith.constant 0 : index
    %9 = vector.load %arg4[%c0_6, %c0_7] : memref<400x128xbf16, #tpu.memory_space<vmem>>, vector<400x128xbf16>
    tpu.vector_store %arg4[%c0_6, %c0_7], %8 {strides = array<i32>} : memref<400x128xbf16, #tpu.memory_space<vmem>>, vector<400x128xbf16>,
    return
  }
  func.func @transform_0(%arg0: i32) -> (i32, i32) {
    %c0_i32 = arith.constant 0 : i32
    %c0_i32_0 = arith.constant 0 : i32
    return %arg0, %c0_i32 : i32, i32
  }
  func.func @transform_1(%arg0: i32) -> (i32, i32) {
    %c0_i32 = arith.constant 0 : i32
    %c0_i32_0 = arith.constant 0 : i32
    %c0_i32_1 = arith.constant 0 : i32
    return %c0_i32, %c0_i32_0 : i32, i32
  }
  func.func @transform_2(%arg0: i32) -> (i32, i32) {
    %c0_i32 = arith.constant 0 : i32
    %c0_i32_0 = arith.constant 0 : i32
    %c0_i32_1 = arith.constant 0 : i32
    return %c0_i32, %c0_i32_0 : i32, i32
  }
  func.func @transform_3(%arg0: i32) -> (i32, i32) {
    %c0_i32 = arith.constant 0 : i32
    %c0_i32_0 = arith.constant 0 : i32
    return %arg0, %c0_i32 : i32, i32
  }
}

module attributes {stable_mosaic.version = 11 : i64} {
  func.func @_matmul_bias_act_kernel(%arg0: i32, %arg1: memref<162x2048xbf16, #tpu.memory_space<vmem>>, %arg2: memref<2048x128xbf16, #tpu.memory_space<vmem>>, %arg3: memref<1x128xf32, #tpu.memory_space<vmem>>, %arg4: memref<162x128xbf16, #tpu.memory_space<vmem>>) attributes {dimension_semantics = [#tpu.dimension_semantics<parallel>], iteration_bounds = array<i64: 1>, scalar_prefetch = 0 : i64, scratch_operands = 0 : i64, tpu.core_type = #tpu.core_type<tc>, window_params = [{transform_indices = @transform_0, window_bounds = array<i64: 162, 2048>}, {pipeline_mode = #tpu.pipeline_mode<synchronous>, transform_indices = @transform_1, window_bounds = array<i64: 2048, 128>}, {pipeline_mode = #tpu.pipeline_mode<synchronous>, transform_indices = @transform_2, window_bounds = array<i64: 1, 128>}, {transform_indices = @transform_3, window_bounds = array<i64: 162, 128>}]} {
    %c0 = arith.constant 0 : index
    %c0_0 = arith.constant 0 : index
    %0 = vector.load %arg1[%c0, %c0_0] : memref<162x2048xbf16, #tpu.memory_space<vmem>>, vector<162x2048xbf16>
    %c0_1 = arith.constant 0 : index
    %c0_2 = arith.constant 0 : index
    %1 = vector.load %arg2[%c0_1, %c0_2] : memref<2048x128xbf16, #tpu.memory_space<vmem>>, vector<2048x128xbf16>
    %cst = arith.constant dense<0.000000e+00> : vector<162x128xf32>
    %2 = tpu.matmul %0, %1, %cst {dimension_numbers = #tpu.dot_dimension_numbers<[1], [0], [0], [1], [0, 0, 1, 1], [], []>} : vector<162x2048xbf16>, vector<2048x128xbf16>, vector<162x128xf32> -> vector<162x128xf32>
    %c0_3 = arith.constant 0 : index
    %c0_4 = arith.constant 0 : index
    %3 = vector.load %arg3[%c0_3, %c0_4] : memref<1x128xf32, #tpu.memory_space<vmem>>, vector<1x128xf32>
    %4 = vector.broadcast %3 : vector<1x128xf32> to vector<162x128xf32>
    %5 = arith.addf %2, %4 : vector<162x128xf32>
    %cst_5 = arith.constant 0.000000e+00 : f32
    %6 = vector.broadcast %cst_5 : f32 to vector<162x128xf32>
    %7 = arith.maximumf %5, %6 : vector<162x128xf32>
    %8 = arith.truncf %7 : vector<162x128xf32> to vector<162x128xbf16>
    %c0_6 = arith.constant 0 : index
    %c0_7 = arith.constant 0 : index
    %9 = vector.load %arg4[%c0_6, %c0_7] : memref<162x128xbf16, #tpu.memory_space<vmem>>, vector<162x128xbf16>
    tpu.vector_store %arg4[%c0_6, %c0_7], %8 {strides = array<i32>} : memref<162x128xbf16, #tpu.memory_space<vmem>>, vector<162x128xbf16>,
    return
  }
  func.func @transform_0(%arg0: i32) -> (i32, i32) {
    %c0_i32 = arith.constant 0 : i32
    %c0_i32_0 = arith.constant 0 : i32
    return %arg0, %c0_i32 : i32, i32
  }
  func.func @transform_1(%arg0: i32) -> (i32, i32) {
    %c0_i32 = arith.constant 0 : i32
    %c0_i32_0 = arith.constant 0 : i32
    %c0_i32_1 = arith.constant 0 : i32
    return %c0_i32, %c0_i32_0 : i32, i32
  }
  func.func @transform_2(%arg0: i32) -> (i32, i32) {
    %c0_i32 = arith.constant 0 : i32
    %c0_i32_0 = arith.constant 0 : i32
    %c0_i32_1 = arith.constant 0 : i32
    return %c0_i32, %c0_i32_0 : i32, i32
  }
  func.func @transform_3(%arg0: i32) -> (i32, i32) {
    %c0_i32 = arith.constant 0 : i32
    %c0_i32_0 = arith.constant 0 : i32
    return %arg0, %c0_i32 : i32, i32
  }
}

module attributes {stable_mosaic.version = 11 : i64} {
  func.func @_matmul_bias_act_kernel(%arg0: i32, %arg1: memref<98x1152xbf16, #tpu.memory_space<vmem>>, %arg2: memref<1152x128xbf16, #tpu.memory_space<vmem>>, %arg3: memref<1x128xf32, #tpu.memory_space<vmem>>, %arg4: memref<98x128xbf16, #tpu.memory_space<vmem>>) attributes {dimension_semantics = [#tpu.dimension_semantics<parallel>], iteration_bounds = array<i64: 1>, scalar_prefetch = 0 : i64, scratch_operands = 0 : i64, tpu.core_type = #tpu.core_type<tc>, window_params = [{transform_indices = @transform_0, window_bounds = array<i64: 98, 1152>}, {pipeline_mode = #tpu.pipeline_mode<synchronous>, transform_indices = @transform_1, window_bounds = array<i64: 1152, 128>}, {pipeline_mode = #tpu.pipeline_mode<synchronous>, transform_indices = @transform_2, window_bounds = array<i64: 1, 128>}, {transform_indices = @transform_3, window_bounds = array<i64: 98, 128>}]} {
    %c0 = arith.constant 0 : index
    %c0_0 = arith.constant 0 : index
    %0 = vector.load %arg1[%c0, %c0_0] : memref<98x1152xbf16, #tpu.memory_space<vmem>>, vector<98x1152xbf16>
    %c0_1 = arith.constant 0 : index
    %c0_2 = arith.constant 0 : index
    %1 = vector.load %arg2[%c0_1, %c0_2] : memref<1152x128xbf16, #tpu.memory_space<vmem>>, vector<1152x128xbf16>
    %cst = arith.constant dense<0.000000e+00> : vector<98x128xf32>
    %2 = tpu.matmul %0, %1, %cst {dimension_numbers = #tpu.dot_dimension_numbers<[1], [0], [0], [1], [0, 0, 1, 1], [], []>} : vector<98x1152xbf16>, vector<1152x128xbf16>, vector<98x128xf32> -> vector<98x128xf32>
    %c0_3 = arith.constant 0 : index
    %c0_4 = arith.constant 0 : index
    %3 = vector.load %arg3[%c0_3, %c0_4] : memref<1x128xf32, #tpu.memory_space<vmem>>, vector<1x128xf32>
    %4 = vector.broadcast %3 : vector<1x128xf32> to vector<98x128xf32>
    %5 = arith.addf %2, %4 : vector<98x128xf32>
    %cst_5 = arith.constant 0.000000e+00 : f32
    %6 = vector.broadcast %cst_5 : f32 to vector<98x128xf32>
    %7 = arith.maximumf %5, %6 : vector<98x128xf32>
    %8 = arith.truncf %7 : vector<98x128xf32> to vector<98x128xbf16>
    %c0_6 = arith.constant 0 : index
    %c0_7 = arith.constant 0 : index
    %9 = vector.load %arg4[%c0_6, %c0_7] : memref<98x128xbf16, #tpu.memory_space<vmem>>, vector<98x128xbf16>
    tpu.vector_store %arg4[%c0_6, %c0_7], %8 {strides = array<i32>} : memref<98x128xbf16, #tpu.memory_space<vmem>>, vector<98x128xbf16>,
    return
  }
  func.func @transform_0(%arg0: i32) -> (i32, i32) {
    %c0_i32 = arith.constant 0 : i32
    %c0_i32_0 = arith.constant 0 : i32
    return %arg0, %c0_i32 : i32, i32
  }
  func.func @transform_1(%arg0: i32) -> (i32, i32) {
    %c0_i32 = arith.constant 0 : i32
    %c0_i32_0 = arith.constant 0 : i32
    %c0_i32_1 = arith.constant 0 : i32
    return %c0_i32, %c0_i32_0 : i32, i32
  }
  func.func @transform_2(%arg0: i32) -> (i32, i32) {
    %c0_i32 = arith.constant 0 : i32
    %c0_i32_0 = arith.constant 0 : i32
    %c0_i32_1 = arith.constant 0 : i32
    return %c0_i32, %c0_i32_0 : i32, i32
  }
  func.func @transform_3(%arg0: i32) -> (i32, i32) {
    %c0_i32 = arith.constant 0 : i32
    %c0_i32_0 = arith.constant 0 : i32
    return %arg0, %c0_i32 : i32, i32
  }
}

module attributes {stable_mosaic.version = 11 : i64} {
  func.func @_fc_head_fused_kernel(%arg0: i32, %arg1: memref<2x3136xbf16, #tpu.memory_space<vmem>>, %arg2: memref<3136x512xbf16, #tpu.memory_space<vmem>>, %arg3: memref<1x512xf32, #tpu.memory_space<vmem>>, %arg4: memref<512x128xbf16, #tpu.memory_space<vmem>>, %arg5: memref<1x128xf32, #tpu.memory_space<vmem>>, %arg6: memref<2x128xf32, #tpu.memory_space<vmem>>) attributes {dimension_semantics = [#tpu.dimension_semantics<arbitrary>], iteration_bounds = array<i64: 1>, scalar_prefetch = 0 : i64, scratch_operands = 0 : i64, tpu.core_type = #tpu.core_type<tc>, window_params = [{pipeline_mode = #tpu.pipeline_mode<synchronous>, transform_indices = @transform_0, window_bounds = array<i64: 2, 3136>}, {pipeline_mode = #tpu.pipeline_mode<synchronous>, transform_indices = @transform_1, window_bounds = array<i64: 3136, 512>}, {pipeline_mode = #tpu.pipeline_mode<synchronous>, transform_indices = @transform_2, window_bounds = array<i64: 1, 512>}, {pipeline_mode = #tpu.pipeline_mode<synchronous>, transform_indices = @transform_3, window_bounds = array<i64: 512, 128>}, {pipeline_mode = #tpu.pipeline_mode<synchronous>, transform_indices = @transform_4, window_bounds = array<i64: 1, 128>}, {pipeline_mode = #tpu.pipeline_mode<synchronous>, transform_indices = @transform_5, window_bounds = array<i64: 2, 128>}]} {
    %c0 = arith.constant 0 : index
    %c0_0 = arith.constant 0 : index
    %0 = vector.load %arg1[%c0, %c0_0] : memref<2x3136xbf16, #tpu.memory_space<vmem>>, vector<2x3136xbf16>
    %c0_1 = arith.constant 0 : index
    %c0_2 = arith.constant 0 : index
    %1 = vector.load %arg2[%c0_1, %c0_2] : memref<3136x512xbf16, #tpu.memory_space<vmem>>, vector<3136x512xbf16>
    %cst = arith.constant dense<0.000000e+00> : vector<2x512xf32>
    %2 = tpu.matmul %0, %1, %cst {dimension_numbers = #tpu.dot_dimension_numbers<[1], [0], [0], [1], [0, 0, 1, 1], [], []>} : vector<2x3136xbf16>, vector<3136x512xbf16>, vector<2x512xf32> -> vector<2x512xf32>
    %c0_3 = arith.constant 0 : index
    %c0_4 = arith.constant 0 : index
    %3 = vector.load %arg3[%c0_3, %c0_4] : memref<1x512xf32, #tpu.memory_space<vmem>>, vector<1x512xf32>
    %4 = vector.broadcast %3 : vector<1x512xf32> to vector<2x512xf32>
    %5 = arith.addf %2, %4 : vector<2x512xf32>
    %cst_5 = arith.constant 0.000000e+00 : f32
    %6 = vector.broadcast %cst_5 : f32 to vector<2x512xf32>
    %7 = arith.maximumf %5, %6 : vector<2x512xf32>
    %8 = arith.truncf %7 : vector<2x512xf32> to vector<2x512xbf16>
    %c0_6 = arith.constant 0 : index
    %c0_7 = arith.constant 0 : index
    %9 = vector.load %arg4[%c0_6, %c0_7] : memref<512x128xbf16, #tpu.memory_space<vmem>>, vector<512x128xbf16>
    %cst_8 = arith.constant dense<0.000000e+00> : vector<2x128xf32>
    %10 = tpu.matmul %8, %9, %cst_8 {dimension_numbers = #tpu.dot_dimension_numbers<[1], [0], [0], [1], [0, 0, 1, 1], [], []>} : vector<2x512xbf16>, vector<512x128xbf16>, vector<2x128xf32> -> vector<2x128xf32>
    %c0_9 = arith.constant 0 : index
    %c0_10 = arith.constant 0 : index
    %11 = vector.load %arg5[%c0_9, %c0_10] : memref<1x128xf32, #tpu.memory_space<vmem>>, vector<1x128xf32>
    %12 = vector.broadcast %11 : vector<1x128xf32> to vector<2x128xf32>
    %13 = arith.addf %10, %12 : vector<2x128xf32>
    %c0_11 = arith.constant 0 : index
    %c0_12 = arith.constant 0 : index
    %14 = vector.load %arg6[%c0_11, %c0_12] : memref<2x128xf32, #tpu.memory_space<vmem>>, vector<2x128xf32>
    tpu.vector_store %arg6[%c0_11, %c0_12], %13 {strides = array<i32>} : memref<2x128xf32, #tpu.memory_space<vmem>>, vector<2x128xf32>,
    return
  }
  func.func @transform_0(%arg0: i32) -> (i32, i32) {
    %c0_i32 = arith.constant 0 : i32
    %c0_i32_0 = arith.constant 0 : i32
    %c0_i32_1 = arith.constant 0 : i32
    return %c0_i32, %c0_i32_0 : i32, i32
  }
  func.func @transform_1(%arg0: i32) -> (i32, i32) {
    %c0_i32 = arith.constant 0 : i32
    %c0_i32_0 = arith.constant 0 : i32
    %c0_i32_1 = arith.constant 0 : i32
    return %c0_i32, %c0_i32_0 : i32, i32
  }
  func.func @transform_2(%arg0: i32) -> (i32, i32) {
    %c0_i32 = arith.constant 0 : i32
    %c0_i32_0 = arith.constant 0 : i32
    %c0_i32_1 = arith.constant 0 : i32
    return %c0_i32, %c0_i32_0 : i32, i32
  }
  func.func @transform_3(%arg0: i32) -> (i32, i32) {
    %c0_i32 = arith.constant 0 : i32
    %c0_i32_0 = arith.constant 0 : i32
    %c0_i32_1 = arith.constant 0 : i32
    return %c0_i32, %c0_i32_0 : i32, i32
  }
  func.func @transform_4(%arg0: i32) -> (i32, i32) {
    %c0_i32 = arith.constant 0 : i32
    %c0_i32_0 = arith.constant 0 : i32
    %c0_i32_1 = arith.constant 0 : i32
    return %c0_i32, %c0_i32_0 : i32, i32
  }
  func.func @transform_5(%arg0: i32) -> (i32, i32) {
    %c0_i32 = arith.constant 0 : i32
    %c0_i32_0 = arith.constant 0 : i32
    %c0_i32_1 = arith.constant 0 : i32
    return %c0_i32, %c0_i32_0 : i32, i32
  }
}

</mosaic_0001>

<bundles_post_ra>
// kernel: convq_forward.4
= control target key start
LH: loop header
LB: loop body
LE: loop exit
PB: predicated region body
PF: predicated region fallthrough
CT: control target
= control target key end

     0   :  { %s1690_s12 = smov 0   ;;  %s1925_s0 = inlined_call_operand.vmem [shape: bf16[800,256], index: 0, kind: input, shape index: {}]   ;;  %s1926_s1 = inlined_call_operand.vmem [shape: bf16[256,128], index: 1, kind: input, shape index: {}]   ;;  %s1927_s2 = inlined_call_operand.vmem [shape: f32[1,128], index: 2, kind: input, shape index: {}]   ;;  %s1928_s3 = inlined_call_operand.vmem [shape: bf16[800,128], index: 3, kind: output, shape index: {}]  }
   0x1 LB: > { %s1202_s13 = sadd.s32 4294967295, %s1667_s12   ;;  %p1206_p0 = scmp.ge.s32.totalorder %s1667_s12, 1  ;;  %s1667_s12 = sphi %s1690_s12, %s13_s12  }
   0x2   : > { %p139_p1 = scmp.lt.s32.totalorder %s1667_s12, 3 }
   0x4   : > { %p140_p2 = pnand %p1206_p0, %p139_p1 }
   0x5   : > { %v1570_v0 = vld [vmem:[%s1926_s1] sm:$0xff] (!%p140_p2)   ;;  %v1669_v1 = vmov (!%p140_p2), 0   ;;  %s164_s16 = smul.u32 (!%p140_p2), 50, %s1202_s13  ;;  %v1571_v2 = vld [vmem:[%s1926_s1 + $0x8] sm:$0xff] (!%p140_p2)   ;;  %v1572_v3 = vld [vmem:[%s1926_s1 + $0x10] sm:$0xff] (!%p140_p2)  }
   0x6   : > { %143 = sbr.rel (%p140_p2) target bundleno = 387 (0x183), region = 32  ;;  %613 = vmatprep.subr.bf16.mxu0 (!%p140_p2), %v1669_v1  ;;  %1529 = vmatprep.subr.bf16.mxu1 (!%p140_p2), %v1669_v1  ;;  %v1573_v4 = vld [vmem:[%s1926_s1 + $0x18] sm:$0xff] (!%p140_p2)   ;;  %v1574_v5 = vld [vmem:[%s1926_s1 + $0x20] sm:$0xff] (!%p140_p2)   ;;  %v1575_v7 = vld [vmem:[%s1926_s1 + $0x28] sm:$0xff] (!%p140_p2)  }
   0x7   : > { %614 = vmatpush1.bf16.msra.mxu0 (!%p140_p2), %v1570_v0  ;;  %1545 = vmatpush1.bf16.msra.mxu1 (!%p140_p2), %v1570_v0  ;;  %p165_p3 = scmp.lt.s32.totalorder (!%p140_p2), %s164_s16, 99  ;;  %v1576_v9 = vld [vmem:[%s1926_s1 + $0x30] sm:$0xff] (!%p140_p2)   ;;  %v1577_v10 = vld [vmem:[%s1926_s1 + $0x38] sm:$0xff] (!%p140_p2)   ;;  %v1578_v11 = vld [vmem:[%s1926_s1 + $0x40] sm:$0xff] (!%p140_p2)  }
   0x8   : > { %615 = vmatprep.subr.bf16.mxu0 (!%p140_p2), %v1669_v1  ;;  %1530 = vmatprep.subr.bf16.mxu1 (!%p140_p2), %v1669_v1  ;;  %v1579_v12 = vld [vmem:[%s1926_s1 + $0x48] sm:$0xff] (!%p140_p2)   ;;  %v1580_v13 = vld [vmem:[%s1926_s1 + $0x50] sm:$0xff] (!%p140_p2)   ;;  %v1581_v14 = vld [vmem:[%s1926_s1 + $0x58] sm:$0xff] (!%p140_p2)  }
   0x9   : > { %v1582_v15 = vld [vmem:[%s1926_s1 + $0x60] sm:$0xff] (!%p140_p2)   ;;  %v1583_v16 = vld [vmem:[%s1926_s1 + $0x68] sm:$0xff] (!%p140_p2)   ;;  %v1584_v17 = vld [vmem:[%s1926_s1 + $0x70] sm:$0xff] (!%p140_p2)  }
   0xa   : > { %v1585_v18 = vld [vmem:[%s1926_s1 + $0x78] sm:$0xff] (!%p140_p2)  }
   0xb   : > { %616 = vmatpush1.bf16.msra.mxu0 (!%p140_p2), %v1571_v2  ;;  %1546 = vmatpush1.bf16.msra.mxu1 (!%p140_p2), %v1571_v2 }
   0xc   : > { %617 = vmatprep.subr.bf16.mxu0 (!%p140_p2), %v1669_v1  ;;  %1531 = vmatprep.subr.bf16.mxu1 (!%p140_p2), %v1669_v1 }
   0xd   : > { %s1930_s16 = smov (!%p165_p3, %s164_s16), 99 }
   0xe   : > { %s1329_s23 = sshll.u32 %s1930_s16, 3  ;;  %s1209_s29 = sshll.u32 %s1930_s16, 2 }
   0xf   : > { %618 = vmatpush1.bf16.msra.mxu0 %v1572_v3  ;;  %1547 = vmatpush1.bf16.msra.mxu1 %v1572_v3  ;;  %s1727_s28 = scalar_lea.vmem %s1925_s0, %s1329_s23  ;;  %v1839_v3 = vld [vmem:[%s1927_s2] ss:$0 sm:$0xff]  ;;  %s1849_s4 = scalar_lea.vmem %s1928_s3, %s1209_s29 }
  0x10   : > { %619 = vmatprep.subr.bf16.mxu0 %v1669_v1  ;;  %1532 = vmatprep.subr.bf16.mxu1 %v1669_v1  ;;  %v1588_v6 = vld [vmem:[%s1727_s28 + $0x4] ss:$8 sps:$4 sm:$0xff]   ;;  %v1591_v8 = vld [vmem:[%s1727_s28 + $0xd4] ss:$8 sps:$4 sm:$0xff]   ;;  %v1586_v19 = vld [vmem:[%s1727_s28] ss:$8 sps:$4 sm:$0xff]  }
  0x11   : > { %645 = vmatprep.mubr.bf16.mxu0 %v1588_v6  ;;  %749 = vmatprep.mubr.bf16.mxu1 %v1591_v8  ;;  %v1589_v20 = vld [vmem:[%s1727_s28 + $0xd0] ss:$8 sps:$4 sm:$0xff]   ;;  %v1592_v21 = vld [vmem:[%s1727_s28 + $0x14] ss:$8 sps:$4 sm:$0xff]   ;;  %v1595_v22 = vld [vmem:[%s1727_s28 + $0xe4] ss:$8 sps:$4 sm:$0xff]  }
  0x12   : > { %v1594_v23 = vld [vmem:[%s1727_s28 + $0x10] ss:$8 sps:$4 sm:$0xff]   ;;  %v1597_v24 = vld [vmem:[%s1727_s28 + $0xe0] ss:$8 sps:$4 sm:$0xff]   ;;  %v1598_v25 = vld [vmem:[%s1727_s28 + $0x24] ss:$8 sps:$4 sm:$0xff]  }
  0x13   : > { %620 = vmatpush1.bf16.msra.mxu0 %v1573_v4  ;;  %1548 = vmatpush1.bf16.msra.mxu1 %v1573_v4  ;;  %v1601_v26 = vld [vmem:[%s1727_s28 + $0xf4] ss:$8 sps:$4 sm:$0xff]   ;;  %v1600_v27 = vld [vmem:[%s1727_s28 + $0x20] ss:$8 sps:$4 sm:$0xff]   ;;  %v1603_v28 = vld [vmem:[%s1727_s28 + $0xf0] ss:$8 sps:$4 sm:$0xff]  }
  0x14   : > { %621 = vmatprep.subr.bf16.mxu0 %v1669_v1  ;;  %1533 = vmatprep.subr.bf16.mxu1 %v1669_v1  ;;  %v1604_v29 = vld [vmem:[%s1727_s28 + $0x34] ss:$8 sps:$4 sm:$0xff]   ;;  %v1607_v30 = vld [vmem:[%s1727_s28 + $0x104] ss:$8 sps:$4 sm:$0xff]   ;;  %v1606_v31 = vld [vmem:[%s1727_s28 + $0x30] ss:$8 sps:$4 sm:$0xff]  }
  0x15   : > { %v1609_v32 = vld [vmem:[%s1727_s28 + $0x100] ss:$8 sps:$4 sm:$0xff]   ;;  %v1610_v33 = vld [vmem:[%s1727_s28 + $0x44] ss:$8 sps:$4 sm:$0xff]   ;;  %v1613_v34 = vld [vmem:[%s1727_s28 + $0x114] ss:$8 sps:$4 sm:$0xff]  }
  0x16   : > { %v1612_v35 = vld [vmem:[%s1727_s28 + $0x40] ss:$8 sps:$4 sm:$0xff]   ;;  %v1615_v36 = vld [vmem:[%s1727_s28 + $0x110] ss:$8 sps:$4 sm:$0xff]   ;;  %v1616_v37 = vld [vmem:[%s1727_s28 + $0x54] ss:$8 sps:$4 sm:$0xff]  }
  0x17   : > { %622 = vmatpush1.bf16.msra.mxu0 %v1574_v5  ;;  %1549 = vmatpush1.bf16.msra.mxu1 %v1574_v5  ;;  %v1619_v38 = vld [vmem:[%s1727_s28 + $0x124] ss:$8 sps:$4 sm:$0xff]   ;;  %v1618_v39 = vld [vmem:[%s1727_s28 + $0x50] ss:$8 sps:$4 sm:$0xff]   ;;  %v1621_v40 = vld [vmem:[%s1727_s28 + $0x120] ss:$8 sps:$4 sm:$0xff]  }
  0x18   : > { %623 = vmatprep.subr.bf16.mxu0 %v1669_v1  ;;  %1534 = vmatprep.subr.bf16.mxu1 %v1669_v1  ;;  %v1622_v41 = vld [vmem:[%s1727_s28 + $0x64] ss:$8 sps:$4 sm:$0xff]   ;;  %v1625_v42 = vld [vmem:[%s1727_s28 + $0x134] ss:$8 sps:$4 sm:$0xff]   ;;  %v1624_v43 = vld [vmem:[%s1727_s28 + $0x60] ss:$8 sps:$4 sm:$0xff]  }
  0x19   : > { %v1627_v44 = vld [vmem:[%s1727_s28 + $0x130] ss:$8 sps:$4 sm:$0xff]   ;;  %v1628_v45 = vld [vmem:[%s1727_s28 + $0x74] ss:$8 sps:$4 sm:$0xff]   ;;  %v1631_v46 = vld [vmem:[%s1727_s28 + $0x144] ss:$8 sps:$4 sm:$0xff]  }
  0x1a   : > { %v1630_v47 = vld [vmem:[%s1727_s28 + $0x70] ss:$8 sps:$4 sm:$0xff]   ;;  %v1633_v48 = vld [vmem:[%s1727_s28 + $0x140] ss:$8 sps:$4 sm:$0xff]   ;;  %v1634_v49 = vld [vmem:[%s1727_s28 + $0x84] ss:$8 sps:$4 sm:$0xff]  }
  0x1b   : > { %624 = vmatpush1.bf16.msra.mxu0 %v1575_v7  ;;  %1550 = vmatpush1.bf16.msra.mxu1 %v1575_v7  ;;  %v1637_v50 = vld [vmem:[%s1727_s28 + $0x154] ss:$8 sps:$4 sm:$0xff]   ;;  %v1636_v51 = vld [vmem:[%s1727_s28 + $0x80] ss:$8 sps:$4 sm:$0xff]   ;;  %v1639_v52 = vld [vmem:[%s1727_s28 + $0x150] ss:$8 sps:$4 sm:$0xff]  }
  0x1c   : > { %625 = vmatprep.subr.bf16.mxu0 %v1669_v1  ;;  %1535 = vmatprep.subr.bf16.mxu1 %v1669_v1  ;;  %v1640_v53 = vld [vmem:[%s1727_s28 + $0x94] ss:$8 sps:$4 sm:$0xff]   ;;  %v1643_v54 = vld [vmem:[%s1727_s28 + $0x164] ss:$8 sps:$4 sm:$0xff]   ;;  %v1642_v55 = vld [vmem:[%s1727_s28 + $0x90] ss:$8 sps:$4 sm:$0xff]  }
  0x1d   : > { %v1645_v56 = vld [vmem:[%s1727_s28 + $0x160] ss:$8 sps:$4 sm:$0xff]   ;;  %v1646_v57 = vld [vmem:[%s1727_s28 + $0xa4] ss:$8 sps:$4 sm:$0xff]   ;;  %v1649_v58 = vld [vmem:[%s1727_s28 + $0x174] ss:$8 sps:$4 sm:$0xff]  }
  0x1e   : > { %v1648_v59 = vld [vmem:[%s1727_s28 + $0xa0] ss:$8 sps:$4 sm:$0xff]   ;;  %v1651_v60 = vld [vmem:[%s1727_s28 + $0x170] ss:$8 sps:$4 sm:$0xff]   ;;  %v1652_v61 = vld [vmem:[%s1727_s28 + $0xb4] ss:$8 sps:$4 sm:$0xff]  }
  0x1f   : > { %626 = vmatpush1.bf16.msra.mxu0 %v1576_v9  ;;  %1551 = vmatpush1.bf16.msra.mxu1 %v1576_v9  ;;  %v1655_v62 = vld [vmem:[%s1727_s28 + $0x184] ss:$8 sps:$4 sm:$0xff]   ;;  %v1654_v63 = vld [vmem:[%s1727_s28 + $0xb0] ss:$8 sps:$4 sm:$0xff]   ;;  %v1657_v0 = vld [vmem:[%s1727_s28 + $0x180] ss:$8 sps:$4 sm:$0xff]  }
  0x20   : > { %627 = vmatprep.subr.bf16.mxu0 %v1669_v1  ;;  %1536 = vmatprep.subr.bf16.mxu1 %v1669_v1  ;;  %v1660_v2 = vld [vmem:[%s1727_s28 + $0xc0] ss:$8 sps:$4 sm:$0xff]  }
  0x23   : > { %628 = vmatpush1.bf16.msra.mxu0 %v1577_v10  ;;  %1552 = vmatpush1.bf16.msra.mxu1 %v1577_v10 }
  0x24   : > { %629 = vmatprep.subr.bf16.mxu0 %v1669_v1  ;;  %1537 = vmatprep.subr.bf16.mxu1 %v1669_v1 }
  0x27   : > { %630 = vmatpush1.bf16.msra.mxu0 %v1578_v11  ;;  %1553 = vmatpush1.bf16.msra.mxu1 %v1578_v11 }
  0x28   : > { %631 = vmatprep.subr.bf16.mxu0 %v1669_v1  ;;  %1538 = vmatprep.subr.bf16.mxu1 %v1669_v1 }
  0x2b   : > { %632 = vmatpush1.bf16.msra.mxu0 %v1579_v12  ;;  %1554 = vmatpush1.bf16.msra.mxu1 %v1579_v12 }
  0x2c   : > { %633 = vmatprep.subr.bf16.mxu0 %v1669_v1  ;;  %1539 = vmatprep.subr.bf16.mxu1 %v1669_v1 }
  0x2f   : > { %634 = vmatpush1.bf16.msra.mxu0 %v1580_v13  ;;  %1555 = vmatpush1.bf16.msra.mxu1 %v1580_v13 }
  0x30   : > { %635 = vmatprep.subr.bf16.mxu0 %v1669_v1  ;;  %1540 = vmatprep.subr.bf16.mxu1 %v1669_v1 }
  0x33   : > { %636 = vmatpush1.bf16.msra.mxu0 %v1581_v14  ;;  %1556 = vmatpush1.bf16.msra.mxu1 %v1581_v14 }
  0x34   : > { %637 = vmatprep.subr.bf16.mxu0 %v1669_v1  ;;  %1541 = vmatprep.subr.bf16.mxu1 %v1669_v1 }
  0x37   : > { %638 = vmatpush1.bf16.msra.mxu0 %v1582_v15  ;;  %1557 = vmatpush1.bf16.msra.mxu1 %v1582_v15 }
  0x38   : > { %639 = vmatprep.subr.bf16.mxu0 %v1669_v1  ;;  %1542 = vmatprep.subr.bf16.mxu1 %v1669_v1 }
  0x3b   : > { %640 = vmatpush1.bf16.msra.mxu0 %v1583_v16  ;;  %1558 = vmatpush1.bf16.msra.mxu1 %v1583_v16 }
  0x3c   : > { %641 = vmatprep.subr.bf16.mxu0 %v1669_v1  ;;  %1543 = vmatprep.subr.bf16.mxu1 %v1669_v1 }
  0x3f   : > { %642 = vmatpush1.bf16.msra.mxu0 %v1584_v17  ;;  %1559 = vmatpush1.bf16.msra.mxu1 %v1584_v17 }
  0x40   : > { %643 = vmatprep.subr.bf16.mxu0 %v1669_v1  ;;  %1544 = vmatprep.subr.bf16.mxu1 %v1669_v1  ;;  %v1658_v1 = vld [vmem:[%s1727_s28 + $0xc4] ss:$8 sps:$4 sm:$0xff]  }
  0x43   : > { %644 = vmatpush1.bf16.msra.mxu0 %v1585_v18  ;;  %1560 = vmatpush1.bf16.msra.mxu1 %v1585_v18 }
  0x46   : > { %646 = vmatmul.mubr.bf16.vlgmr.msra.gmra.mrb[0].mxu0 %v1586_v19  ;;  %750 = vmatmul.mubr.bf16.vlgmr.msra.gmra.mrb[0].mxu1 %v1589_v20 }
  0x47   : > { %653 = vmatprep.mubr.bf16.mxu0 %v1592_v21  ;;  %757 = vmatprep.mubr.bf16.mxu1 %v1595_v22 }
  0x4e   : > { %654 = vmatmul.mubr.bf16.gmra.mrb[4].mxu0 %v1594_v23  ;;  %758 = vmatmul.mubr.bf16.gmra.mrb[4].mxu1 %v1597_v24 }
  0x4f   : > { %661 = vmatprep.mubr.bf16.mxu0 %v1598_v25  ;;  %765 = vmatprep.mubr.bf16.mxu1 %v1601_v26 }
  0x56   : > { %662 = vmatmul.mubr.bf16.gmra.mrb[8].mxu0 %v1600_v27  ;;  %766 = vmatmul.mubr.bf16.gmra.mrb[8].mxu1 %v1603_v28 }
  0x57   : > { %669 = vmatprep.mubr.bf16.mxu0 %v1604_v29  ;;  %773 = vmatprep.mubr.bf16.mxu1 %v1607_v30 }
  0x5e   : > { %670 = vmatmul.mubr.bf16.gmra.mrb[12].mxu0 %v1606_v31  ;;  %774 = vmatmul.mubr.bf16.gmra.mrb[12].mxu1 %v1609_v32 }
  0x5f   : > { %677 = vmatprep.mubr.bf16.mxu0 %v1610_v33  ;;  %781 = vmatprep.mubr.bf16.mxu1 %v1613_v34 }
  0x66   : > { %678 = vmatmul.mubr.bf16.gmra.mrb[16].mxu0 %v1612_v35  ;;  %782 = vmatmul.mubr.bf16.gmra.mrb[16].mxu1 %v1615_v36 }
  0x67   : > { %685 = vmatprep.mubr.bf16.mxu0 %v1616_v37  ;;  %789 = vmatprep.mubr.bf16.mxu1 %v1619_v38 }
  0x6e   : > { %686 = vmatmul.mubr.bf16.gmra.mrb[20].mxu0 %v1618_v39  ;;  %790 = vmatmul.mubr.bf16.gmra.mrb[20].mxu1 %v1621_v40 }
  0x6f   : > { %693 = vmatprep.mubr.bf16.mxu0 %v1622_v41  ;;  %797 = vmatprep.mubr.bf16.mxu1 %v1625_v42 }
  0x76   : > { %694 = vmatmul.mubr.bf16.gmra.mrb[24].mxu0 %v1624_v43  ;;  %798 = vmatmul.mubr.bf16.gmra.mrb[24].mxu1 %v1627_v44 }
  0x77   : > { %701 = vmatprep.mubr.bf16.mxu0 %v1628_v45  ;;  %805 = vmatprep.mubr.bf16.mxu1 %v1631_v46 }
  0x7e   : > { %702 = vmatmul.mubr.bf16.gmra.mrb[28].mxu0 %v1630_v47  ;;  %806 = vmatmul.mubr.bf16.gmra.mrb[28].mxu1 %v1633_v48 }
  0x7f   : > { %709 = vmatprep.mubr.bf16.mxu0 %v1634_v49  ;;  %813 = vmatprep.mubr.bf16.mxu1 %v1637_v50 }
  0x86   : > { %710 = vmatmul.mubr.bf16.gmra.mrb[32].mxu0 %v1636_v51  ;;  %814 = vmatmul.mubr.bf16.gmra.mrb[32].mxu1 %v1639_v52 }
  0x87   : > { %717 = vmatprep.mubr.bf16.mxu0 %v1640_v53  ;;  %821 = vmatprep.mubr.bf16.mxu1 %v1643_v54 }
  0x8e   : > { %718 = vmatmul.mubr.bf16.gmra.mrb[36].mxu0 %v1642_v55  ;;  %822 = vmatmul.mubr.bf16.gmra.mrb[36].mxu1 %v1645_v56 }
  0x8f   : > { %725 = vmatprep.mubr.bf16.mxu0 %v1646_v57  ;;  %829 = vmatprep.mubr.bf16.mxu1 %v1649_v58 }
  0x96   : > { %726 = vmatmul.mubr.bf16.gmra.mrb[40].mxu0 %v1648_v59  ;;  %830 = vmatmul.mubr.bf16.gmra.mrb[40].mxu1 %v1651_v60 }
  0x97   : > { %733 = vmatprep.mubr.bf16.mxu0 %v1652_v61  ;;  %837 = vmatprep.mubr.bf16.mxu1 %v1655_v62 }
  0x9e   : > { %734 = vmatmul.mubr.bf16.gmra.mrb[44].mxu0 %v1654_v63  ;;  %838 = vmatmul.mubr.bf16.gmra.mrb[44].mxu1 %v1657_v0 }
  0x9f   : > { %741 = vmatprep.mubr.bf16.mxu0 %v1658_v1 }
  0xa6   : > { %742 = vmatmul.mubr.bf16.gmra.mrb[48].mxu0 %v1660_v2 }
 0x119   : > { %v647_v4 = vpop.f32.mrb[0].mxu0  ;;  %v751_v5 = vpop.f32.mrb[0].mxu1 }
 0x11a   : > { %v648_v6 = vadd.f32 %v1839_v3, %v647_v4  ;;  %v649_v7 = vpop.f32.mrb[1].mxu0  ;;  %v752_v8 = vadd.f32 %v1839_v3, %v751_v5  ;;  %v753_v9 = vpop.f32.mrb[1].mxu1 }
 0x11b   : > { %v650_v10 = vpop.f32.mrb[2].mxu0  ;;  %v754_v11 = vpop.f32.mrb[2].mxu1 }
 0x11c   : > { %v651_v12 = vadd.f32 %v1839_v3, %v650_v10  ;;  %v652_v13 = vpop.f32.mrb[3].mxu0  ;;  %v872_v14 = vmax.f32 %v752_v8, 0.0  ;;  %v755_v15 = vadd.f32 %v1839_v3, %v754_v11  ;;  %v756_v16 = vpop.f32.mrb[3].mxu1  ;;  %v846_v17 = vmax.f32 %v648_v6, 0.0 }
 0x11e   : > { %v847_v18 = vmax.f32 %v651_v12, 0.0  ;;  %v873_v19 = vmax.f32 %v755_v15, 0.0 }
 0x120   : > { %v1383_v20 = vpack.c.bf16 %v847_v18, %v846_v17  ;;  %v1448_v21 = vpack.c.bf16 %v873_v19, %v872_v14 }
 0x121   : > { %v655_v22 = vpop.f32.mrb[4].mxu0  ;;  %v759_v23 = vpop.f32.mrb[4].mxu1 }
 0x122   : > { %1384 = vst [vmem:[%s1849_s4] sm:$0xff] %v1383_v20   ;;  %1517 = vst [vmem:[%s1849_s4 + $0x68] sm:$0xff] %v1448_v21   ;;  %v656_v24 = vadd.f32 %v1839_v3, %v655_v22  ;;  %v657_v25 = vpop.f32.mrb[5].mxu0  ;;  %v760_v26 = vadd.f32 %v1839_v3, %v759_v23  ;;  %v761_v27 = vpop.f32.mrb[5].mxu1 }
 0x123   : > { %v658_v28 = vpop.f32.mrb[6].mxu0  ;;  %v762_v29 = vpop.f32.mrb[6].mxu1 }
 0x124   : > { %v659_v30 = vadd.f32 %v1839_v3, %v658_v28  ;;  %v660_v31 = vpop.f32.mrb[7].mxu0  ;;  %v874_v32 = vmax.f32 %v760_v26, 0.0  ;;  %v763_v33 = vadd.f32 %v1839_v3, %v762_v29  ;;  %v764_v34 = vpop.f32.mrb[7].mxu1  ;;  %v848_v35 = vmax.f32 %v656_v24, 0.0 }
 0x126   : > { %v849_v36 = vmax.f32 %v659_v30, 0.0  ;;  %v875_v37 = vmax.f32 %v763_v33, 0.0 }
 0x128   : > { %v1388_v38 = vpack.c.bf16 %v849_v36, %v848_v35  ;;  %v1453_v39 = vpack.c.bf16 %v875_v37, %v874_v32 }
 0x129   : > { %v663_v40 = vpop.f32.mrb[8].mxu0  ;;  %v767_v41 = vpop.f32.mrb[8].mxu1 }
 0x12a   : > { %1505 = vst [vmem:[%s1849_s4 + $0x8] sm:$0xff] %v1388_v38   ;;  %1518 = vst [vmem:[%s1849_s4 + $0x70] sm:$0xff] %v1453_v39   ;;  %v664_v42 = vadd.f32 %v1839_v3, %v663_v40  ;;  %v665_v43 = vpop.f32.mrb[9].mxu0  ;;  %v768_v44 = vadd.f32 %v1839_v3, %v767_v41  ;;  %v769_v45 = vpop.f32.mrb[9].mxu1 }
 0x12b   : > { %v666_v46 = vpop.f32.mrb[10].mxu0  ;;  %v770_v47 = vpop.f32.mrb[10].mxu1 }
 0x12c   : > { %v667_v48 = vadd.f32 %v1839_v3, %v666_v46  ;;  %v668_v49 = vpop.f32.mrb[11].mxu0  ;;  %v876_v50 = vmax.f32 %v768_v44, 0.0  ;;  %v771_v51 = vadd.f32 %v1839_v3, %v770_v47  ;;  %v772_v52 = vpop.f32.mrb[11].mxu1  ;;  %v850_v53 = vmax.f32 %v664_v42, 0.0 }
 0x12e   : > { %v851_v54 = vmax.f32 %v667_v48, 0.0  ;;  %v877_v55 = vmax.f32 %v771_v51, 0.0 }
 0x130   : > { %v1393_v56 = vpack.c.bf16 %v851_v54, %v850_v53  ;;  %v1458_v57 = vpack.c.bf16 %v877_v55, %v876_v50 }
 0x131   : > { %v671_v58 = vpop.f32.mrb[12].mxu0  ;;  %v775_v59 = vpop.f32.mrb[12].mxu1 }
 0x132   : > { %1506 = vst [vmem:[%s1849_s4 + $0x10] sm:$0xff] %v1393_v56   ;;  %1519 = vst [vmem:[%s1849_s4 + $0x78] sm:$0xff] %v1458_v57   ;;  %v672_v60 = vadd.f32 %v1839_v3, %v671_v58  ;;  %v673_v61 = vpop.f32.mrb[13].mxu0  ;;  %v776_v62 = vadd.f32 %v1839_v3, %v775_v59  ;;  %v777_v63 = vpop.f32.mrb[13].mxu1 }
 0x133   : > { %v674_v0 = vpop.f32.mrb[14].mxu0  ;;  %v778_v1 = vpop.f32.mrb[14].mxu1 }
 0x134   : > { %v675_v2 = vadd.f32 %v1839_v3, %v674_v0  ;;  %v676_v4 = vpop.f32.mrb[15].mxu0  ;;  %v878_v5 = vmax.f32 %v776_v62, 0.0  ;;  %v779_v6 = vadd.f32 %v1839_v3, %v778_v1  ;;  %v780_v7 = vpop.f32.mrb[15].mxu1  ;;  %v852_v8 = vmax.f32 %v672_v60, 0.0 }
 0x136   : > { %v853_v9 = vmax.f32 %v675_v2, 0.0  ;;  %v879_v10 = vmax.f32 %v779_v6, 0.0 }
 0x138   : > { %v1398_v11 = vpack.c.bf16 %v853_v9, %v852_v8  ;;  %v1463_v12 = vpack.c.bf16 %v879_v10, %v878_v5 }
 0x139   : > { %v679_v13 = vpop.f32.mrb[16].mxu0  ;;  %v783_v14 = vpop.f32.mrb[16].mxu1 }
 0x13a   : > { %1507 = vst [vmem:[%s1849_s4 + $0x18] sm:$0xff] %v1398_v11   ;;  %1520 = vst [vmem:[%s1849_s4 + $0x80] sm:$0xff] %v1463_v12   ;;  %v680_v15 = vadd.f32 %v1839_v3, %v679_v13  ;;  %v681_v16 = vpop.f32.mrb[17].mxu0  ;;  %v784_v17 = vadd.f32 %v1839_v3, %v783_v14  ;;  %v785_v18 = vpop.f32.mrb[17].mxu1 }
 0x13b   : > { %v682_v19 = vpop.f32.mrb[18].mxu0  ;;  %v786_v20 = vpop.f32.mrb[18].mxu1 }
 0x13c   : > { %v683_v21 = vadd.f32 %v1839_v3, %v682_v19  ;;  %v684_v22 = vpop.f32.mrb[19].mxu0  ;;  %v880_v23 = vmax.f32 %v784_v17, 0.0  ;;  %v787_v24 = vadd.f32 %v1839_v3, %v786_v20  ;;  %v788_v25 = vpop.f32.mrb[19].mxu1  ;;  %v854_v26 = vmax.f32 %v680_v15, 0.0 }
 0x13e   : > { %v855_v27 = vmax.f32 %v683_v21, 0.0  ;;  %v881_v28 = vmax.f32 %v787_v24, 0.0 }
 0x140   : > { %v1403_v29 = vpack.c.bf16 %v855_v27, %v854_v26  ;;  %v1468_v30 = vpack.c.bf16 %v881_v28, %v880_v23 }
 0x141   : > { %v687_v31 = vpop.f32.mrb[20].mxu0  ;;  %v791_v32 = vpop.f32.mrb[20].mxu1 }
 0x142   : > { %1508 = vst [vmem:[%s1849_s4 + $0x20] sm:$0xff] %v1403_v29   ;;  %1521 = vst [vmem:[%s1849_s4 + $0x88] sm:$0xff] %v1468_v30   ;;  %v688_v33 = vadd.f32 %v1839_v3, %v687_v31  ;;  %v689_v34 = vpop.f32.mrb[21].mxu0  ;;  %v792_v35 = vadd.f32 %v1839_v3, %v791_v32  ;;  %v793_v36 = vpop.f32.mrb[21].mxu1 }
 0x143   : > { %v690_v37 = vpop.f32.mrb[22].mxu0  ;;  %v794_v38 = vpop.f32.mrb[22].mxu1 }
 0x144   : > { %v691_v39 = vadd.f32 %v1839_v3, %v690_v37  ;;  %v692_v40 = vpop.f32.mrb[23].mxu0  ;;  %v882_v41 = vmax.f32 %v792_v35, 0.0  ;;  %v795_v42 = vadd.f32 %v1839_v3, %v794_v38  ;;  %v796_v43 = vpop.f32.mrb[23].mxu1  ;;  %v856_v44 = vmax.f32 %v688_v33, 0.0 }
 0x146   : > { %v857_v45 = vmax.f32 %v691_v39, 0.0  ;;  %v883_v46 = vmax.f32 %v795_v42, 0.0 }
 0x148   : > { %v1408_v47 = vpack.c.bf16 %v857_v45, %v856_v44  ;;  %v1473_v48 = vpack.c.bf16 %v883_v46, %v882_v41 }
 0x149   : > { %v695_v49 = vpop.f32.mrb[24].mxu0  ;;  %v799_v50 = vpop.f32.mrb[24].mxu1 }
 0x14a   : > { %1509 = vst [vmem:[%s1849_s4 + $0x28] sm:$0xff] %v1408_v47   ;;  %1522 = vst [vmem:[%s1849_s4 + $0x90] sm:$0xff] %v1473_v48   ;;  %v696_v51 = vadd.f32 %v1839_v3, %v695_v49  ;;  %v697_v52 = vpop.f32.mrb[25].mxu0  ;;  %v800_v53 = vadd.f32 %v1839_v3, %v799_v50  ;;  %v801_v54 = vpop.f32.mrb[25].mxu1 }
 0x14b   : > { %v698_v55 = vpop.f32.mrb[26].mxu0  ;;  %v802_v56 = vpop.f32.mrb[26].mxu1 }
 0x14c   : > { %v699_v57 = vadd.f32 %v1839_v3, %v698_v55  ;;  %v700_v58 = vpop.f32.mrb[27].mxu0  ;;  %v884_v59 = vmax.f32 %v800_v53, 0.0  ;;  %v803_v60 = vadd.f32 %v1839_v3, %v802_v56  ;;  %v804_v61 = vpop.f32.mrb[27].mxu1  ;;  %v858_v62 = vmax.f32 %v696_v51, 0.0 }
 0x14e   : > { %v859_v63 = vmax.f32 %v699_v57, 0.0  ;;  %v885_v0 = vmax.f32 %v803_v60, 0.0 }
 0x150   : > { %v1413_v1 = vpack.c.bf16 %v859_v63, %v858_v62  ;;  %v1478_v2 = vpack.c.bf16 %v885_v0, %v884_v59 }
 0x151   : > { %v703_v4 = vpop.f32.mrb[28].mxu0  ;;  %v807_v5 = vpop.f32.mrb[28].mxu1 }
 0x152   : > { %1510 = vst [vmem:[%s1849_s4 + $0x30] sm:$0xff] %v1413_v1   ;;  %1523 = vst [vmem:[%s1849_s4 + $0x98] sm:$0xff] %v1478_v2   ;;  %v704_v6 = vadd.f32 %v1839_v3, %v703_v4  ;;  %v705_v7 = vpop.f32.mrb[29].mxu0  ;;  %v808_v8 = vadd.f32 %v1839_v3, %v807_v5  ;;  %v809_v9 = vpop.f32.mrb[29].mxu1 }
 0x153   : > { %v706_v10 = vpop.f32.mrb[30].mxu0  ;;  %v810_v11 = vpop.f32.mrb[30].mxu1 }
 0x154   : > { %v707_v12 = vadd.f32 %v1839_v3, %v706_v10  ;;  %v708_v13 = vpop.f32.mrb[31].mxu0  ;;  %v886_v14 = vmax.f32 %v808_v8, 0.0  ;;  %v811_v15 = vadd.f32 %v1839_v3, %v810_v11  ;;  %v812_v16 = vpop.f32.mrb[31].mxu1  ;;  %v860_v17 = vmax.f32 %v704_v6, 0.0 }
 0x156   : > { %v861_v18 = vmax.f32 %v707_v12, 0.0  ;;  %v887_v19 = vmax.f32 %v811_v15, 0.0 }
 0x158   : > { %v1418_v20 = vpack.c.bf16 %v861_v18, %v860_v17  ;;  %v1483_v21 = vpack.c.bf16 %v887_v19, %v886_v14 }
 0x159   : > { %v711_v22 = vpop.f32.mrb[32].mxu0  ;;  %v815_v23 = vpop.f32.mrb[32].mxu1 }
 0x15a   : > { %1511 = vst [vmem:[%s1849_s4 + $0x38] sm:$0xff] %v1418_v20   ;;  %1524 = vst [vmem:[%s1849_s4 + $0xa0] sm:$0xff] %v1483_v21   ;;  %v712_v24 = vadd.f32 %v1839_v3, %v711_v22  ;;  %v713_v25 = vpop.f32.mrb[33].mxu0  ;;  %v816_v26 = vadd.f32 %v1839_v3, %v815_v23  ;;  %v817_v27 = vpop.f32.mrb[33].mxu1 }
 0x15b   : > { %v714_v28 = vpop.f32.mrb[34].mxu0  ;;  %v818_v29 = vpop.f32.mrb[34].mxu1 }
 0x15c   : > { %v715_v30 = vadd.f32 %v1839_v3, %v714_v28  ;;  %v716_v31 = vpop.f32.mrb[35].mxu0  ;;  %v888_v32 = vmax.f32 %v816_v26, 0.0  ;;  %v819_v33 = vadd.f32 %v1839_v3, %v818_v29  ;;  %v820_v34 = vpop.f32.mrb[35].mxu1  ;;  %v862_v35 = vmax.f32 %v712_v24, 0.0 }
 0x15e   : > { %v863_v36 = vmax.f32 %v715_v30, 0.0  ;;  %v889_v37 = vmax.f32 %v819_v33, 0.0 }
 0x160   : > { %v1423_v38 = vpack.c.bf16 %v863_v36, %v862_v35  ;;  %v1488_v39 = vpack.c.bf16 %v889_v37, %v888_v32 }
 0x161   : > { %v719_v40 = vpop.f32.mrb[36].mxu0  ;;  %v823_v41 = vpop.f32.mrb[36].mxu1 }
 0x162   : > { %1512 = vst [vmem:[%s1849_s4 + $0x40] sm:$0xff] %v1423_v38   ;;  %1525 = vst [vmem:[%s1849_s4 + $0xa8] sm:$0xff] %v1488_v39   ;;  %v720_v42 = vadd.f32 %v1839_v3, %v719_v40  ;;  %v721_v43 = vpop.f32.mrb[37].mxu0  ;;  %v824_v44 = vadd.f32 %v1839_v3, %v823_v41  ;;  %v825_v45 = vpop.f32.mrb[37].mxu1 }
 0x163   : > { %v722_v46 = vpop.f32.mrb[38].mxu0  ;;  %v826_v47 = vpop.f32.mrb[38].mxu1 }
 0x164   : > { %v723_v48 = vadd.f32 %v1839_v3, %v722_v46  ;;  %v724_v49 = vpop.f32.mrb[39].mxu0  ;;  %v890_v50 = vmax.f32 %v824_v44, 0.0  ;;  %v827_v51 = vadd.f32 %v1839_v3, %v826_v47  ;;  %v828_v52 = vpop.f32.mrb[39].mxu1  ;;  %v864_v53 = vmax.f32 %v720_v42, 0.0 }
 0x166   : > { %v865_v54 = vmax.f32 %v723_v48, 0.0  ;;  %v891_v55 = vmax.f32 %v827_v51, 0.0 }
 0x168   : > { %v1428_v56 = vpack.c.bf16 %v865_v54, %v864_v53  ;;  %v1493_v57 = vpack.c.bf16 %v891_v55, %v890_v50 }
 0x169   : > { %v727_v58 = vpop.f32.mrb[40].mxu0  ;;  %v831_v59 = vpop.f32.mrb[40].mxu1 }
 0x16a   : > { %1513 = vst [vmem:[%s1849_s4 + $0x48] sm:$0xff] %v1428_v56   ;;  %1526 = vst [vmem:[%s1849_s4 + $0xb0] sm:$0xff] %v1493_v57   ;;  %v728_v60 = vadd.f32 %v1839_v3, %v727_v58  ;;  %v729_v61 = vpop.f32.mrb[41].mxu0  ;;  %v832_v62 = vadd.f32 %v1839_v3, %v831_v59  ;;  %v833_v63 = vpop.f32.mrb[41].mxu1 }
 0x16b   : > { %v730_v0 = vpop.f32.mrb[42].mxu0  ;;  %v834_v1 = vpop.f32.mrb[42].mxu1 }
 0x16c   : > { %v731_v2 = vadd.f32 %v1839_v3, %v730_v0  ;;  %v732_v4 = vpop.f32.mrb[43].mxu0  ;;  %v892_v5 = vmax.f32 %v832_v62, 0.0  ;;  %v835_v6 = vadd.f32 %v1839_v3, %v834_v1  ;;  %v836_v7 = vpop.f32.mrb[43].mxu1  ;;  %v866_v8 = vmax.f32 %v728_v60, 0.0 }
 0x16e   : > { %v867_v9 = vmax.f32 %v731_v2, 0.0  ;;  %v893_v10 = vmax.f32 %v835_v6, 0.0 }
 0x170   : > { %v1433_v11 = vpack.c.bf16 %v867_v9, %v866_v8  ;;  %v1498_v12 = vpack.c.bf16 %v893_v10, %v892_v5 }
 0x171   : > { %v735_v13 = vpop.f32.mrb[44].mxu0  ;;  %v839_v14 = vpop.f32.mrb[44].mxu1 }
 0x172   : > { %1514 = vst [vmem:[%s1849_s4 + $0x50] sm:$0xff] %v1433_v11   ;;  %1527 = vst [vmem:[%s1849_s4 + $0xb8] sm:$0xff] %v1498_v12   ;;  %v736_v15 = vadd.f32 %v1839_v3, %v735_v13  ;;  %v737_v16 = vpop.f32.mrb[45].mxu0  ;;  %v840_v17 = vadd.f32 %v1839_v3, %v839_v14  ;;  %v841_v18 = vpop.f32.mrb[45].mxu1 }
 0x173   : > { %v738_v19 = vpop.f32.mrb[46].mxu0  ;;  %v842_v20 = vpop.f32.mrb[46].mxu1 }
 0x174   : > { %v739_v21 = vadd.f32 %v1839_v3, %v738_v19  ;;  %v740_v22 = vpop.f32.mrb[47].mxu0  ;;  %v894_v23 = vmax.f32 %v840_v17, 0.0  ;;  %v843_v24 = vadd.f32 %v1839_v3, %v842_v20  ;;  %v844_v25 = vpop.f32.mrb[47].mxu1  ;;  %v868_v26 = vmax.f32 %v736_v15, 0.0 }
 0x176   : > { %v869_v27 = vmax.f32 %v739_v21, 0.0  ;;  %v895_v28 = vmax.f32 %v843_v24, 0.0 }
 0x178   : > { %v1438_v29 = vpack.c.bf16 %v869_v27, %v868_v26  ;;  %v1503_v30 = vpack.c.bf16 %v895_v28, %v894_v23 }
 0x179   : > { %v743_v31 = vpop.f32.mrb[48].mxu0 }
 0x17a   : > { %1515 = vst [vmem:[%s1849_s4 + $0x58] sm:$0xff] %v1438_v29   ;;  %1528 = vst [vmem:[%s1849_s4 + $0xc0] sm:$0xff] %v1503_v30   ;;  %v744_v32 = vadd.f32 %v1839_v3, %v743_v31  ;;  %v745_v33 = vpop.f32.mrb[49].mxu0 }
 0x17b   : > { %v746_v34 = vpop.f32.mrb[50].mxu0 }
 0x17c   : > { %v747_v35 = vadd.f32 %v1839_v3, %v746_v34  ;;  %v748_v36 = vpop.f32.mrb[51].mxu0  ;;  %v870_v37 = vmax.f32 %v744_v32, 0.0 }
 0x17e   : > { %v871_v38 = vmax.f32 %v747_v35, 0.0 }
 0x180   : > { %v1443_v39 = vpack.c.bf16 %v871_v38, %v870_v37 }
 0x182   : > { %1516 = vst [vmem:[%s1849_s4 + $0x60] sm:$0xff] %v1443_v39  }
 0x183 PF: > { %s13_s12 = sadd.s32 1, %s1667_s12  }
 0x184   : > { %p10_p4 = scmp.ge.s32.totalorder %s13_s12, 4  }
 0x186   :  { %12 = sbr.rel (!%p10_p4) target bundleno = 1 (0x1), region = 62 }

// kernel: convq_forward.5
= control target key start
LH: loop header
LB: loop body
LE: loop exit
PB: predicated region body
PF: predicated region fallthrough
CT: control target
= control target key end

     0   :  { %s5523_s1 = inlined_call_operand.vmem [shape: bf16[2048,128], index: 1, kind: input, shape index: {}]   ;;  %s5524_s0 = inlined_call_operand.vmem [shape: bf16[162,2048], index: 0, kind: input, shape index: {}]   ;;  %s5525_s2 = inlined_call_operand.vmem [shape: f32[1,128], index: 2, kind: input, shape index: {}]   ;;  %s5526_s3 = inlined_call_operand.vmem [shape: bf16[162,128], index: 3, kind: output, shape index: {}]  }
   0x1   :  { %v4223_v0 = vld [vmem:[%s5523_s1 + $0x40] sm:$0xff]   ;;  %v4227_v4 = vld [vmem:[%s5523_s1 + $0x48] sm:$0xff]   ;;  %v4231_v8 = vld [vmem:[%s5523_s1 + $0x50] sm:$0xff]  }
   0x2   :  { %v4224_v1 = vld [vmem:[%s5523_s1 + $0xc0] sm:$0xff]   ;;  %3567 = vmatprep.subr.bf16.mxu0 %v4223_v0  ;;  %v4228_v5 = vld [vmem:[%s5523_s1 + $0xc8] sm:$0xff]   ;;  %v4232_v9 = vld [vmem:[%s5523_s1 + $0xd0] sm:$0xff]  }
   0x3   :  { %v4225_v2 = vld [vmem:[%s5523_s1] sm:$0xff]   ;;  %3649 = vmatprep.subr.bf16.mxu1 %v4224_v1  ;;  %v4229_v6 = vld [vmem:[%s5523_s1 + $0x8] sm:$0xff]   ;;  %v4233_v10 = vld [vmem:[%s5523_s1 + $0x10] sm:$0xff]  }
   0x4   :  { %v4226_v3 = vld [vmem:[%s5523_s1 + $0x80] sm:$0xff]   ;;  %3568 = vmatpush3.bf16.msra.mxu0 %v4225_v2  ;;  %v4230_v7 = vld [vmem:[%s5523_s1 + $0x88] sm:$0xff]   ;;  %v4234_v11 = vld [vmem:[%s5523_s1 + $0x90] sm:$0xff]  }
   0x5   :  { %3650 = vmatpush3.bf16.msra.mxu1 %v4226_v3  ;;  %3569 = vmatprep.subr.bf16.mxu0 %v4227_v4  ;;  %v4235_v12 = vld [vmem:[%s5523_s1 + $0x58] sm:$0xff]   ;;  %v4239_v16 = vld [vmem:[%s5523_s1 + $0x60] sm:$0xff]   ;;  %v4243_v20 = vld [vmem:[%s5523_s1 + $0x68] sm:$0xff]  }
   0x6   :  { %3651 = vmatprep.subr.bf16.mxu1 %v4228_v5  ;;  %v4236_v13 = vld [vmem:[%s5523_s1 + $0xd8] sm:$0xff]   ;;  %v4240_v17 = vld [vmem:[%s5523_s1 + $0xe0] sm:$0xff]   ;;  %v4244_v21 = vld [vmem:[%s5523_s1 + $0xe8] sm:$0xff]  }
   0x7   :  { %v4237_v14 = vld [vmem:[%s5523_s1 + $0x18] sm:$0xff]   ;;  %v4241_v18 = vld [vmem:[%s5523_s1 + $0x20] sm:$0xff]   ;;  %v4245_v22 = vld [vmem:[%s5523_s1 + $0x28] sm:$0xff]  }
   0x8   :  { %3570 = vmatpush3.bf16.msra.mxu0 %v4229_v6  ;;  %v4238_v15 = vld [vmem:[%s5523_s1 + $0x98] sm:$0xff]   ;;  %v4242_v19 = vld [vmem:[%s5523_s1 + $0xa0] sm:$0xff]   ;;  %v4246_v23 = vld [vmem:[%s5523_s1 + $0xa8] sm:$0xff]  }
   0x9   :  { %3652 = vmatpush3.bf16.msra.mxu1 %v4230_v7  ;;  %3571 = vmatprep.subr.bf16.mxu0 %v4231_v8  ;;  %v4247_v24 = vld [vmem:[%s5523_s1 + $0x70] sm:$0xff]   ;;  %v4251_v28 = vld [vmem:[%s5523_s1 + $0x78] sm:$0xff]   ;;  %v15_v32 = vld [vmem:[%s5524_s0] sm:$0xff] }
   0xa   :  { %3653 = vmatprep.subr.bf16.mxu1 %v4232_v9  ;;  %v4248_v25 = vld [vmem:[%s5523_s1 + $0xf0] sm:$0xff]   ;;  %v4252_v29 = vld [vmem:[%s5523_s1 + $0xf8] sm:$0xff]   ;;  %v23_v33 = vld [vmem:[%s5524_s0 + $0x40] sm:$0xff] }
   0xb   :  { %v4249_v26 = vld [vmem:[%s5523_s1 + $0x30] sm:$0xff]   ;;  %v4253_v30 = vld [vmem:[%s5523_s1 + $0x38] sm:$0xff]   ;;  %v16_v34 = vld [vmem:[%s5524_s0 + $0x8] sm:$0xff]  ;;  %v3162_v35 = vcombine.low %v15_v32, %v23_v33  ;;  %v3163_v36 = vcombine.high %v15_v32, %v23_v33 }
   0xc   :  { %3572 = vmatpush3.bf16.msra.mxu0 %v4233_v10  ;;  %v4250_v27 = vld [vmem:[%s5523_s1 + $0xb0] sm:$0xff]   ;;  %v4254_v31 = vld [vmem:[%s5523_s1 + $0xb8] sm:$0xff]   ;;  %v24_v37 = vld [vmem:[%s5524_s0 + $0x48] sm:$0xff] }
   0xd   :  { %3654 = vmatpush3.bf16.msra.mxu1 %v4234_v11  ;;  %3573 = vmatprep.subr.bf16.mxu0 %v4235_v12  ;;  %v3164_v38 = vcombine.low %v16_v34, %v24_v37  ;;  %v3165_v39 = vcombine.high %v16_v34, %v24_v37  ;;  %v4255_v40 = vld [vmem:[%s5523_s1 + $0x140] sm:$0xff]   ;;  %v32_v47 = vld [vmem:[%s5524_s0 + $0x88] sm:$0xff]  ;;  %v4263_v62 = vld [vmem:[%s5523_s1 + $0x150] sm:$0xff]  }
   0xe   :  { %3655 = vmatprep.subr.bf16.mxu1 %v4236_v13  ;;  %2102 = vmatprep.mubr.bf16.mxu0 %v3163_v36  ;;  %v4256_v41 = vld [vmem:[%s5523_s1 + $0x100] sm:$0xff]   ;;  %v40_v48 = vld [vmem:[%s5524_s0 + $0xc8] sm:$0xff]  ;;  %v4264_v3 = vld [vmem:[%s5523_s1 + $0x110] sm:$0xff]  }
   0xf   :  { %2222 = vmatprep.mubr.bf16.mxu1 %v3165_v39  ;;  %v4257_v42 = vld [vmem:[%s5523_s1 + $0x1c0] sm:$0xff]   ;;  %v3181_v49 = vcombine.high %v32_v47, %v40_v48  ;;  %v4259_v50 = vld [vmem:[%s5523_s1 + $0x148] sm:$0xff]   ;;  %v3180_v53 = vcombine.low %v32_v47, %v40_v48  ;;  %v4265_v5 = vld [vmem:[%s5523_s1 + $0x1d0] sm:$0xff]  }
  0x10   :  { %3574 = vmatpush3.bf16.msra.mxu0 %v4237_v14  ;;  %v4258_v43 = vld [vmem:[%s5523_s1 + $0x180] sm:$0xff]   ;;  %v4260_v52 = vld [vmem:[%s5523_s1 + $0x108] sm:$0xff]   ;;  %v4266_v8 = vld [vmem:[%s5523_s1 + $0x190] sm:$0xff]  }
  0x11   :  { %3656 = vmatpush3.bf16.msra.mxu1 %v4238_v15  ;;  %3575 = vmatprep.subr.bf16.mxu0 %v4239_v16  ;;  %v31_v44 = vld [vmem:[%s5524_s0 + $0x80] sm:$0xff]  ;;  %v4261_v54 = vld [vmem:[%s5523_s1 + $0x1c8] sm:$0xff]   ;;  %v4267_v10 = vld [vmem:[%s5523_s1 + $0x158] sm:$0xff]  }
  0x12   :  { %3657 = vmatprep.subr.bf16.mxu1 %v4240_v17  ;;  %v39_v45 = vld [vmem:[%s5524_s0 + $0xc0] sm:$0xff]  ;;  %v4262_v55 = vld [vmem:[%s5523_s1 + $0x188] sm:$0xff]   ;;  %v4268_v12 = vld [vmem:[%s5523_s1 + $0x118] sm:$0xff]  }
  0x13   :  { %v3179_v46 = vcombine.high %v31_v44, %v39_v45  ;;  %v3178_v51 = vcombine.low %v31_v44, %v39_v45  ;;  %v47_v56 = vld [vmem:[%s5524_s0 + $0x100] sm:$0xff]  ;;  %v48_v58 = vld [vmem:[%s5524_s0 + $0x108] sm:$0xff]  ;;  %v4269_v13 = vld [vmem:[%s5523_s1 + $0x1d8] sm:$0xff]  }
  0x14   :  { %3576 = vmatpush3.bf16.msra.mxu0 %v4241_v18  ;;  %v55_v57 = vld [vmem:[%s5524_s0 + $0x140] sm:$0xff]  ;;  %v56_v59 = vld [vmem:[%s5524_s0 + $0x148] sm:$0xff]  ;;  %v4270_v15 = vld [vmem:[%s5523_s1 + $0x198] sm:$0xff]  }
  0x15   :  { %3658 = vmatpush3.bf16.msra.mxu1 %v4242_v19  ;;  %3577 = vmatprep.subr.bf16.mxu0 %v4243_v20  ;;  %v3195_v60 = vcombine.high %v47_v56, %v55_v57  ;;  %v3197_v61 = vcombine.high %v48_v58, %v56_v59  ;;  %v63_v63 = vld [vmem:[%s5524_s0 + $0x180] sm:$0xff]  ;;  %v64_v1 = vld [vmem:[%s5524_s0 + $0x188] sm:$0xff]  ;;  %v3194_v4 = vcombine.low %v47_v56, %v55_v57  ;;  %v4281_v44 = vld [vmem:[%s5523_s1 + $0x1f0] sm:$0xff]  }
  0x16   :  { %3659 = vmatprep.subr.bf16.mxu1 %v4244_v21  ;;  %v71_v0 = vld [vmem:[%s5524_s0 + $0x1c0] sm:$0xff]  ;;  %v72_v2 = vld [vmem:[%s5524_s0 + $0x1c8] sm:$0xff]  ;;  %v3196_v6 = vcombine.low %v48_v58, %v56_v59  ;;  %v4282_v45 = vld [vmem:[%s5523_s1 + $0x1b0] sm:$0xff]  }
  0x17   :  { %v3211_v7 = vcombine.high %v63_v63, %v71_v0  ;;  %v3213_v9 = vcombine.high %v64_v1, %v72_v2  ;;  %v79_v11 = vld [vmem:[%s5524_s0 + $0x200] sm:$0xff]  ;;  %v80_v16 = vld [vmem:[%s5524_s0 + $0x208] sm:$0xff]  ;;  %v3210_v18 = vcombine.low %v63_v63, %v71_v0  ;;  %v3212_v20 = vcombine.low %v64_v1, %v72_v2 }
  0x18   :  { %3578 = vmatpush3.bf16.msra.mxu0 %v4245_v22  ;;  %v87_v14 = vld [vmem:[%s5524_s0 + $0x240] sm:$0xff]  ;;  %v88_v17 = vld [vmem:[%s5524_s0 + $0x248] sm:$0xff] }
  0x19   :  { %3660 = vmatpush3.bf16.msra.mxu1 %v4246_v23  ;;  %3579 = vmatprep.subr.bf16.mxu0 %v4247_v24  ;;  %v4271_v19 = vld [vmem:[%s5523_s1 + $0x160] sm:$0xff]   ;;  %v3227_v21 = vcombine.high %v79_v11, %v87_v14  ;;  %v3229_v23 = vcombine.high %v80_v16, %v88_v17  ;;  %v4276_v32 = vld [vmem:[%s5523_s1 + $0x128] sm:$0xff]   ;;  %v3228_v33 = vcombine.low %v80_v16, %v88_v17 }
  0x1a   :  { %3661 = vmatprep.subr.bf16.mxu1 %v4248_v25  ;;  %v4272_v22 = vld [vmem:[%s5523_s1 + $0x120] sm:$0xff]   ;;  %v4278_v37 = vld [vmem:[%s5523_s1 + $0x1a8] sm:$0xff]  }
  0x1b   :  { %v4273_v24 = vld [vmem:[%s5523_s1 + $0x1e0] sm:$0xff]   ;;  %v128_v56 = vld [vmem:[%s5524_s0 + $0x388] sm:$0xff] }
  0x1c   :  { %3580 = vmatpush3.bf16.msra.mxu0 %v4249_v26  ;;  %v95_v25 = vld [vmem:[%s5524_s0 + $0x280] sm:$0xff]  ;;  %v136_v57 = vld [vmem:[%s5524_s0 + $0x3c8] sm:$0xff] }
  0x1d   :  { %3662 = vmatpush3.bf16.msra.mxu1 %v4250_v27  ;;  %3581 = vmatprep.subr.bf16.mxu0 %v4251_v28  ;;  %v103_v26 = vld [vmem:[%s5524_s0 + $0x2c0] sm:$0xff]  ;;  %v96_v28 = vld [vmem:[%s5524_s0 + $0x288] sm:$0xff] }
  0x1e   :  { %3663 = vmatprep.subr.bf16.mxu1 %v4252_v29  ;;  %v4274_v27 = vld [vmem:[%s5523_s1 + $0x1a0] sm:$0xff]   ;;  %v104_v29 = vld [vmem:[%s5524_s0 + $0x2c8] sm:$0xff]  ;;  %v3243_v34 = vcombine.high %v95_v25, %v103_v26 }
  0x1f   :  { %v3245_v36 = vcombine.high %v96_v28, %v104_v29  ;;  %v119_v39 = vld [vmem:[%s5524_s0 + $0x340] sm:$0xff]  ;;  %v3244_v47 = vcombine.low %v96_v28, %v104_v29  ;;  %v144_v2 = vld [vmem:[%s5524_s0 + $0x408] sm:$0xff] }
  0x20   :  { %3582 = vmatpush3.bf16.msra.mxu0 %v4253_v30  ;;  %v4275_v30 = vld [vmem:[%s5523_s1 + $0x168] sm:$0xff]   ;;  %v4291_v59 = vld [vmem:[%s5523_s1 + $0x240] sm:$0xff]  }
  0x21   :  { %3664 = vmatpush3.bf16.msra.mxu1 %v4254_v31  ;;  %3731 = vmatprep.subr.bf16.mxu0 %v4255_v40  ;;  %v3226_v31 = vcombine.low %v79_v11, %v87_v14  ;;  %v4279_v40 = vld [vmem:[%s5523_s1 + $0x170] sm:$0xff]   ;;  %v4293_v63 = vld [vmem:[%s5523_s1 + $0x2c0] sm:$0xff]   ;;  %v168_v11 = vld [vmem:[%s5524_s0 + $0x4c8] sm:$0xff] }
  0x22   :  { %3813 = vmatprep.subr.bf16.mxu1 %v4257_v42  ;;  %v120_v42 = vld [vmem:[%s5524_s0 + $0x348] sm:$0xff]  ;;  %v143_v0 = vld [vmem:[%s5524_s0 + $0x400] sm:$0xff] }
  0x23   :  { %2103 = vmatmul.mubr.bf16.vlgmr.msra.gmra.mrb[0].mxu0 %v3162_v35  ;;  %v4277_v35 = vld [vmem:[%s5523_s1 + $0x1e8] sm:$0xff]   ;;  %v151_v1 = vld [vmem:[%s5524_s0 + $0x440] sm:$0xff] }
  0x24   :  { %2223 = vmatmul.mubr.bf16.vlgmr.msra.gmra.mrb[0].mxu1 %v3164_v38  ;;  %3732 = vmatpush3.bf16.msra.mxu0 %v4256_v41  ;;  %v111_v38 = vld [vmem:[%s5524_s0 + $0x300] sm:$0xff]  ;;  %v112_v41 = vld [vmem:[%s5524_s0 + $0x308] sm:$0xff] }
  0x25   :  { %3814 = vmatpush3.bf16.msra.mxu1 %v4258_v43  ;;  %2110 = vmatprep.mubr.bf16.mxu0 %v3179_v46  ;;  %v4280_v43 = vld [vmem:[%s5523_s1 + $0x130] sm:$0xff]   ;;  %v3242_v46 = vcombine.low %v95_v25, %v103_v26  ;;  %v3259_v48 = vcombine.high %v111_v38, %v119_v39  ;;  %v3258_v58 = vcombine.low %v111_v38, %v119_v39  ;;  %v175_v16 = vld [vmem:[%s5524_s0 + $0x500] sm:$0x11]  ;;  %v176_v17 = vld [vmem:[%s5524_s0 + $0x508] sm:$0x11] }
  0x26   :  { %2230 = vmatprep.mubr.bf16.mxu1 %v3181_v49  ;;  %3733 = vmatprep.subr.bf16.mxu0 %v4259_v50  ;;  %v3261_v49 = vcombine.high %v112_v41, %v120_v42  ;;  %v4283_v50 = vld [vmem:[%s5523_s1 + $0x178] sm:$0xff]   ;;  %v3322_v26 = vcombine.low %v175_v16, %v175_v16  ;;  %v4295_v39 = vld [vmem:[%s5523_s1 + $0x248] sm:$0xff]  }
  0x27   :  { %3815 = vmatprep.subr.bf16.mxu1 %v4261_v54  ;;  %v127_v54 = vld [vmem:[%s5524_s0 + $0x380] sm:$0xff]  ;;  %v26_v25 = vld [vmem:[%s5524_s0 + $0x58] sm:$0xff] }
  0x28   :  { %3734 = vmatpush3.bf16.msra.mxu0 %v4260_v52  ;;  %v4287_v52 = vld [vmem:[%s5523_s1 + $0x1f8] sm:$0xff]  }
  0x29   :  { %3816 = vmatpush3.bf16.msra.mxu1 %v4262_v55  ;;  %3735 = vmatprep.subr.bf16.mxu0 %v4263_v62  ;;  %v135_v55 = vld [vmem:[%s5524_s0 + $0x3c0] sm:$0xff]  ;;  %v3277_v62 = vcombine.high %v128_v56, %v136_v57 }
  0x2a   :  { %3817 = vmatprep.subr.bf16.mxu1 %v4265_v5  ;;  %v3276_v5 = vcombine.low %v128_v56, %v136_v57  ;;  %v4303_v56 = vld [vmem:[%s5523_s1 + $0x258] sm:$0xff]   ;;  %v65_v57 = vld [vmem:[%s5524_s0 + $0x190] sm:$0xff] }
  0x2b   :  { %2111 = vmatmul.mubr.bf16.gmra.mrb[4].mxu0 %v3178_v51  ;;  %v4284_v51 = vld [vmem:[%s5523_s1 + $0x138] sm:$0xff]  }
  0x2c   :  { %2231 = vmatmul.mubr.bf16.gmra.mrb[4].mxu1 %v3180_v53  ;;  %2118 = vmatprep.mubr.bf16.mxu0 %v3195_v60  ;;  %v4290_v53 = vld [vmem:[%s5523_s1 + $0x1b8] sm:$0xff]   ;;  %v3260_v60 = vcombine.low %v112_v41, %v120_v42  ;;  %v4296_v41 = vld [vmem:[%s5523_s1 + $0x208] sm:$0xff]  }
  0x2d   :  { %2238 = vmatprep.mubr.bf16.mxu1 %v3197_v61  ;;  %3736 = vmatpush3.bf16.msra.mxu0 %v4264_v3  ;;  %v3275_v61 = vcombine.high %v127_v54, %v135_v55  ;;  %v152_v3 = vld [vmem:[%s5524_s0 + $0x448] sm:$0xff] }
  0x2e   :  { %3818 = vmatpush3.bf16.msra.mxu1 %v4266_v8  ;;  %3737 = vmatprep.subr.bf16.mxu0 %v4267_v10  ;;  %v159_v8 = vld [vmem:[%s5524_s0 + $0x480] sm:$0xff]  ;;  %v160_v10 = vld [vmem:[%s5524_s0 + $0x488] sm:$0xff] }
  0x2f   :  { %3819 = vmatprep.subr.bf16.mxu1 %v4269_v13  ;;  %v3292_v13 = vcombine.low %v144_v2, %v152_v3  ;;  %v4297_v42 = vld [vmem:[%s5523_s1 + $0x2c8] sm:$0xff]  }
  0x31   :  { %3738 = vmatpush3.bf16.msra.mxu0 %v4268_v12  ;;  %v3290_v12 = vcombine.low %v143_v0, %v151_v1 }
  0x32   :  { %3820 = vmatpush3.bf16.msra.mxu1 %v4270_v15  ;;  %3739 = vmatprep.subr.bf16.mxu0 %v4271_v19  ;;  %v3309_v15 = vcombine.high %v160_v10, %v168_v11  ;;  %v3308_v19 = vcombine.low %v160_v10, %v168_v11  ;;  %v4313_v10 = vld [vmem:[%s5523_s1 + $0x2e8] sm:$0xff]   ;;  %v89_v11 = vld [vmem:[%s5524_s0 + $0x250] sm:$0xff] }
  0x33   :  { %2119 = vmatmul.mubr.bf16.gmra.mrb[8].mxu0 %v3194_v4  ;;  %3821 = vmatprep.subr.bf16.mxu1 %v4273_v24  ;;  %v3274_v4 = vcombine.low %v127_v54, %v135_v55  ;;  %v18_v24 = vld [vmem:[%s5524_s0 + $0x18] sm:$0xff]  ;;  %v4300_v54 = vld [vmem:[%s5523_s1 + $0x210] sm:$0xff]  }
  0x34   :  { %2239 = vmatmul.mubr.bf16.gmra.mrb[8].mxu1 %v3196_v6  ;;  %2126 = vmatprep.mubr.bf16.mxu0 %v3211_v7  ;;  %v3291_v6 = vcombine.high %v143_v0, %v151_v1  ;;  %v3293_v7 = vcombine.high %v144_v2, %v152_v3  ;;  %v3169_v29 = vcombine.high %v18_v24, %v26_v25  ;;  %v4302_v55 = vld [vmem:[%s5523_s1 + $0x290] sm:$0xff]   ;;  %v4307_v0 = vld [vmem:[%s5523_s1 + $0x260] sm:$0xff]  }
  0x35   :  { %2246 = vmatprep.mubr.bf16.mxu1 %v3213_v9  ;;  %3740 = vmatpush3.bf16.msra.mxu0 %v4272_v22  ;;  %v167_v9 = vld [vmem:[%s5524_s0 + $0x4c0] sm:$0xff]  ;;  %v17_v22 = vld [vmem:[%s5524_s0 + $0x10] sm:$0xff] }
  0x36   :  { %3822 = vmatpush3.bf16.msra.mxu1 %v4274_v27  ;;  %3741 = vmatprep.subr.bf16.mxu0 %v4275_v30  ;;  %v3307_v14 = vcombine.high %v159_v8, %v167_v9  ;;  %v3324_v27 = vcombine.low %v176_v17, %v176_v17  ;;  %v33_v30 = vld [vmem:[%s5524_s0 + $0x90] sm:$0xff]  ;;  %v4309_v2 = vld [vmem:[%s5523_s1 + $0x2e0] sm:$0xff]  }
  0x37   :  { %3823 = vmatprep.subr.bf16.mxu1 %v4277_v35  ;;  %v3168_v35 = vcombine.low %v18_v24, %v26_v25  ;;  %v4319_v24 = vld [vmem:[%s5523_s1 + $0x278] sm:$0xff]   ;;  %v97_v25 = vld [vmem:[%s5524_s0 + $0x290] sm:$0xff] }
  0x39   :  { %3742 = vmatpush3.bf16.msra.mxu0 %v4276_v32  ;;  %v34_v32 = vld [vmem:[%s5524_s0 + $0x98] sm:$0xff] }
  0x3a   :  { %3824 = vmatpush3.bf16.msra.mxu1 %v4278_v37  ;;  %3743 = vmatprep.subr.bf16.mxu0 %v4279_v40  ;;  %v4294_v37 = vld [vmem:[%s5523_s1 + $0x280] sm:$0xff]  }
  0x3b   :  { %2127 = vmatmul.mubr.bf16.gmra.mrb[12].mxu0 %v3210_v18  ;;  %3825 = vmatprep.subr.bf16.mxu1 %v4281_v44  ;;  %v3306_v18 = vcombine.low %v159_v8, %v167_v9  ;;  %v49_v44 = vld [vmem:[%s5524_s0 + $0x110] sm:$0xff]  ;;  %v4311_v8 = vld [vmem:[%s5523_s1 + $0x268] sm:$0xff]  }
  0x3c   :  { %2247 = vmatmul.mubr.bf16.gmra.mrb[12].mxu1 %v3212_v20  ;;  %2134 = vmatprep.mubr.bf16.mxu0 %v3227_v21  ;;  %v3323_v20 = vcombine.high %v175_v16, %v175_v16  ;;  %v3325_v21 = vcombine.high %v176_v17, %v176_v17  ;;  %v81_v9 = vld [vmem:[%s5524_s0 + $0x210] sm:$0xff] }
  0x3d   :  { %2254 = vmatprep.mubr.bf16.mxu1 %v3229_v23  ;;  %3744 = vmatpush3.bf16.msra.mxu0 %v4280_v43  ;;  %v25_v23 = vld [vmem:[%s5524_s0 + $0x50] sm:$0xff]  ;;  %v4298_v43 = vld [vmem:[%s5523_s1 + $0x288] sm:$0xff]  }
  0x3e   :  { %3826 = vmatpush3.bf16.msra.mxu1 %v4282_v45  ;;  %3745 = vmatprep.subr.bf16.mxu0 %v4283_v50  ;;  %v3167_v28 = vcombine.high %v17_v22, %v25_v23  ;;  %v57_v45 = vld [vmem:[%s5524_s0 + $0x150] sm:$0xff] }
  0x3f   :  { %3827 = vmatprep.subr.bf16.mxu1 %v4287_v52  ;;  %v3199_v52 = vcombine.high %v49_v44, %v57_v45  ;;  %v3198_v1 = vcombine.low %v49_v44, %v57_v45  ;;  %v4315_v16 = vld [vmem:[%s5523_s1 + $0x270] sm:$0xff]  }
  0x41   :  { %3746 = vmatpush3.bf16.msra.mxu0 %v4284_v51 }
  0x42   :  { %3828 = vmatpush3.bf16.msra.mxu1 %v4290_v53  ;;  %3895 = vmatprep.subr.bf16.mxu0 %v4291_v59  ;;  %v73_v59 = vld [vmem:[%s5524_s0 + $0x1d0] sm:$0xff] }
  0x43   :  { %2135 = vmatmul.mubr.bf16.gmra.mrb[16].mxu0 %v3226_v31  ;;  %3977 = vmatprep.subr.bf16.mxu1 %v4293_v63  ;;  %v41_v31 = vld [vmem:[%s5524_s0 + $0xd0] sm:$0xff]  ;;  %v4306_v63 = vld [vmem:[%s5523_s1 + $0x298] sm:$0xff]   ;;  %v3214_v17 = vcombine.low %v65_v57, %v73_v59 }
  0x44   :  { %2255 = vmatmul.mubr.bf16.gmra.mrb[16].mxu1 %v3228_v33  ;;  %2142 = vmatprep.mubr.bf16.mxu0 %v3243_v34  ;;  %v3166_v33 = vcombine.low %v17_v22, %v25_v23  ;;  %v42_v34 = vld [vmem:[%s5524_s0 + $0xd8] sm:$0xff]  ;;  %v3183_v38 = vcombine.high %v33_v30, %v41_v31  ;;  %v3182_v50 = vcombine.low %v33_v30, %v41_v31  ;;  %v4316_v22 = vld [vmem:[%s5523_s1 + $0x230] sm:$0xff]  }
  0x45   :  { %2262 = vmatprep.mubr.bf16.mxu1 %v3245_v36  ;;  %v4292_v36 = vld [vmem:[%s5523_s1 + $0x200] sm:$0xff]   ;;  %v3185_v40 = vcombine.high %v34_v32, %v42_v34  ;;  %v3184_v51 = vcombine.low %v34_v32, %v42_v34  ;;  %v4318_v23 = vld [vmem:[%s5523_s1 + $0x2b0] sm:$0xff]   ;;  %v106_v30 = vld [vmem:[%s5524_s0 + $0x2d8] sm:$0xff] }
  0x46   :  { %v4326_v31 = vld [vmem:[%s5523_s1 + $0x2b8] sm:$0xff]   ;;  %v4327_v32 = vld [vmem:[%s5523_s1 + $0x340] sm:$0xff]  }
  0x47   :  { %v4329_v34 = vld [vmem:[%s5523_s1 + $0x3c0] sm:$0xff]  }
  0x4b   :  { %2143 = vmatmul.mubr.bf16.gmra.mrb[20].mxu0 %v3242_v46  ;;  %v50_v46 = vld [vmem:[%s5524_s0 + $0x118] sm:$0xff] }
  0x4c   :  { %2263 = vmatmul.mubr.bf16.gmra.mrb[20].mxu1 %v3244_v47  ;;  %2150 = vmatprep.mubr.bf16.mxu0 %v3259_v48  ;;  %v58_v47 = vld [vmem:[%s5524_s0 + $0x158] sm:$0xff]  ;;  %v4299_v48 = vld [vmem:[%s5523_s1 + $0x250] sm:$0xff]  }
  0x4d   :  { %2270 = vmatprep.mubr.bf16.mxu1 %v3261_v49  ;;  %v4301_v49 = vld [vmem:[%s5523_s1 + $0x2d0] sm:$0xff]   ;;  %v3201_v53 = vcombine.high %v50_v46, %v58_v47  ;;  %v3200_v3 = vcombine.low %v50_v46, %v58_v47 }
  0x4e   :  { %v129_v46 = vld [vmem:[%s5524_s0 + $0x390] sm:$0xff] }
  0x4f   :  { %v137_v47 = vld [vmem:[%s5524_s0 + $0x3d0] sm:$0xff] }
  0x53   :  { %2151 = vmatmul.mubr.bf16.gmra.mrb[24].mxu0 %v3258_v58  ;;  %v4305_v58 = vld [vmem:[%s5523_s1 + $0x2d8] sm:$0xff]  }
  0x54   :  { %2271 = vmatmul.mubr.bf16.gmra.mrb[24].mxu1 %v3260_v60  ;;  %2158 = vmatprep.mubr.bf16.mxu0 %v3275_v61  ;;  %v66_v60 = vld [vmem:[%s5524_s0 + $0x198] sm:$0xff] }
  0x55   :  { %2278 = vmatprep.mubr.bf16.mxu1 %v3277_v62  ;;  %v4304_v61 = vld [vmem:[%s5523_s1 + $0x218] sm:$0xff]  }
  0x56   :  { %v74_v62 = vld [vmem:[%s5524_s0 + $0x1d8] sm:$0xff] }
  0x5b   :  { %2159 = vmatmul.mubr.bf16.gmra.mrb[28].mxu0 %v3274_v4  ;;  %v3215_v4 = vcombine.high %v65_v57, %v73_v59  ;;  %v154_v57 = vld [vmem:[%s5524_s0 + $0x458] sm:$0xff] }
  0x5c   :  { %2279 = vmatmul.mubr.bf16.gmra.mrb[28].mxu1 %v3276_v5  ;;  %2166 = vmatprep.mubr.bf16.mxu0 %v3291_v6  ;;  %v4308_v5 = vld [vmem:[%s5523_s1 + $0x220] sm:$0xff]   ;;  %v3217_v6 = vcombine.high %v66_v60, %v74_v62 }
  0x5d   :  { %2286 = vmatprep.mubr.bf16.mxu1 %v3293_v7  ;;  %v4310_v7 = vld [vmem:[%s5523_s1 + $0x2a0] sm:$0xff]  }
  0x63   :  { %2167 = vmatmul.mubr.bf16.gmra.mrb[32].mxu0 %v3290_v12  ;;  %v82_v12 = vld [vmem:[%s5524_s0 + $0x218] sm:$0xff] }
  0x64   :  { %2287 = vmatmul.mubr.bf16.gmra.mrb[32].mxu1 %v3292_v13  ;;  %2174 = vmatprep.mubr.bf16.mxu0 %v3307_v14  ;;  %v90_v13 = vld [vmem:[%s5524_s0 + $0x258] sm:$0xff]  ;;  %v4312_v14 = vld [vmem:[%s5523_s1 + $0x228] sm:$0xff]  }
  0x65   :  { %2294 = vmatprep.mubr.bf16.mxu1 %v3309_v15  ;;  %v4314_v15 = vld [vmem:[%s5523_s1 + $0x2a8] sm:$0xff]  }
  0x6b   :  { %2175 = vmatmul.mubr.bf16.gmra.mrb[36].mxu0 %v3306_v18  ;;  %v4317_v18 = vld [vmem:[%s5523_s1 + $0x2f0] sm:$0xff]  }
  0x6c   :  { %2295 = vmatmul.mubr.bf16.gmra.mrb[36].mxu1 %v3308_v19  ;;  %2182 = vmatprep.mubr.bf16.mxu0 %v3323_v20  ;;  %v3216_v19 = vcombine.low %v66_v60, %v74_v62  ;;  %v3231_v20 = vcombine.high %v81_v9, %v89_v11  ;;  %v161_v62 = vld [vmem:[%s5524_s0 + $0x490] sm:$0xff] }
  0x6d   :  { %2302 = vmatprep.mubr.bf16.mxu1 %v3325_v21  ;;  %v3233_v21 = vcombine.high %v82_v12, %v90_v13 }
  0x73   :  { %2183 = vmatmul.mubr.bf16.gmra.mrb[40].mxu0 %v3322_v26  ;;  %v105_v26 = vld [vmem:[%s5524_s0 + $0x2d0] sm:$0xff] }
  0x74   :  { %2303 = vmatmul.mubr.bf16.gmra.mrb[40].mxu1 %v3324_v27  ;;  %2342 = vmatprep.mubr.bf16.mxu0 %v3167_v28  ;;  %v4323_v27 = vld [vmem:[%s5523_s1 + $0x2f8] sm:$0xff]  }
  0x75   :  { %2462 = vmatprep.mubr.bf16.mxu1 %v3169_v29  ;;  %v98_v28 = vld [vmem:[%s5524_s0 + $0x298] sm:$0xff] }
  0x76   :  { %v4320_v29 = vld [vmem:[%s5523_s1 + $0x238] sm:$0xff]  }
  0x7b   :  { %2343 = vmatmul.mubr.bf16.vlgmr.msra.gmra.mrb[44].mxu0 %v3166_v33  ;;  %v3230_v33 = vcombine.low %v81_v9, %v89_v11 }
  0x7c   :  { %2463 = vmatmul.mubr.bf16.vlgmr.msra.gmra.mrb[44].mxu1 %v3168_v35  ;;  %3896 = vmatpush3.bf16.msra.mxu0 %v4292_v36  ;;  %v3232_v35 = vcombine.low %v82_v12, %v90_v13  ;;  %v3247_v36 = vcombine.high %v97_v25, %v105_v26  ;;  %v19_v12 = vld [vmem:[%s5524_s0 + $0x20] sm:$0xff] }
  0x7d   :  { %3978 = vmatpush3.bf16.msra.mxu1 %v4294_v37  ;;  %2350 = vmatprep.mubr.bf16.mxu0 %v3183_v38  ;;  %v3249_v37 = vcombine.high %v98_v28, %v106_v30  ;;  %v113_v38 = vld [vmem:[%s5524_s0 + $0x310] sm:$0xff]  ;;  %v27_v13 = vld [vmem:[%s5524_s0 + $0x60] sm:$0xff] }
  0x7e   :  { %2470 = vmatprep.mubr.bf16.mxu1 %v3185_v40  ;;  %3897 = vmatprep.subr.bf16.mxu0 %v4295_v39  ;;  %v121_v39 = vld [vmem:[%s5524_s0 + $0x350] sm:$0xff]  ;;  %v114_v40 = vld [vmem:[%s5524_s0 + $0x318] sm:$0xff] }
  0x7f   :  { %3979 = vmatprep.subr.bf16.mxu1 %v4297_v42  ;;  %v3246_v42 = vcombine.low %v97_v25, %v105_v26  ;;  %v3263_v44 = vcombine.high %v113_v38, %v121_v39  ;;  %v4328_v26 = vld [vmem:[%s5523_s1 + $0x300] sm:$0xff]  }
  0x80   :  { %3898 = vmatpush3.bf16.msra.mxu0 %v4296_v41  ;;  %v122_v41 = vld [vmem:[%s5524_s0 + $0x358] sm:$0xff] }
  0x81   :  { %3980 = vmatpush3.bf16.msra.mxu1 %v4298_v43  ;;  %3899 = vmatprep.subr.bf16.mxu0 %v4299_v48  ;;  %v3248_v43 = vcombine.low %v98_v28, %v106_v30  ;;  %v3265_v45 = vcombine.high %v114_v40, %v122_v41  ;;  %v130_v48 = vld [vmem:[%s5524_s0 + $0x398] sm:$0xff]  ;;  %v4331_v30 = vld [vmem:[%s5523_s1 + $0x348] sm:$0xff]  }
  0x82   :  { %3981 = vmatprep.subr.bf16.mxu1 %v4301_v49  ;;  %v138_v49 = vld [vmem:[%s5524_s0 + $0x3d8] sm:$0xff] }
  0x83   :  { %2351 = vmatmul.mubr.bf16.gmra.mrb[48].mxu0 %v3182_v50  ;;  %v3262_v50 = vcombine.low %v113_v38, %v121_v39  ;;  %v3280_v59 = vcombine.low %v130_v48, %v138_v49  ;;  %v60_v38 = vld [vmem:[%s5524_s0 + $0x168] sm:$0xff]  ;;  %v4337_v39 = vld [vmem:[%s5523_s1 + $0x3d0] sm:$0xff]  }
  0x84   :  { %2471 = vmatmul.mubr.bf16.gmra.mrb[48].mxu1 %v3184_v51  ;;  %2358 = vmatprep.mubr.bf16.mxu0 %v3199_v52  ;;  %v3264_v51 = vcombine.low %v114_v40, %v122_v41  ;;  %v3279_v52 = vcombine.high %v129_v46, %v137_v47 }
  0x85   :  { %2478 = vmatprep.mubr.bf16.mxu1 %v3201_v53  ;;  %3900 = vmatpush3.bf16.msra.mxu0 %v4300_v54  ;;  %v3281_v53 = vcombine.high %v130_v48, %v138_v49  ;;  %v145_v54 = vld [vmem:[%s5524_s0 + $0x410] sm:$0xff]  ;;  %v67_v48 = vld [vmem:[%s5524_s0 + $0x1a0] sm:$0xff] }
  0x86   :  { %3982 = vmatpush3.bf16.msra.mxu1 %v4302_v55  ;;  %3901 = vmatprep.subr.bf16.mxu0 %v4303_v56  ;;  %v153_v55 = vld [vmem:[%s5524_s0 + $0x450] sm:$0xff]  ;;  %v146_v56 = vld [vmem:[%s5524_s0 + $0x418] sm:$0xff]  ;;  %v75_v49 = vld [vmem:[%s5524_s0 + $0x1e0] sm:$0xff] }
  0x87   :  { %3983 = vmatprep.subr.bf16.mxu1 %v4305_v58  ;;  %v3278_v58 = vcombine.low %v129_v46, %v137_v47  ;;  %v3295_v60 = vcombine.high %v145_v54, %v153_v55  ;;  %v4339_v46 = vld [vmem:[%s5523_s1 + $0x358] sm:$0xff]  }
  0x88   :  { %v4341_v47 = vld [vmem:[%s5523_s1 + $0x3d8] sm:$0xff]  }
  0x89   :  { %3902 = vmatpush3.bf16.msra.mxu0 %v4304_v61  ;;  %v3297_v61 = vcombine.high %v146_v56, %v154_v57 }
  0x8a   :  { %3984 = vmatpush3.bf16.msra.mxu1 %v4306_v63  ;;  %3903 = vmatprep.subr.bf16.mxu0 %v4307_v0  ;;  %v169_v63 = vld [vmem:[%s5524_s0 + $0x4d0] sm:$0xff]  ;;  %v162_v0 = vld [vmem:[%s5524_s0 + $0x498] sm:$0xff] }
  0x8b   :  { %2359 = vmatmul.mubr.bf16.gmra.mrb[52].mxu0 %v3198_v1  ;;  %3985 = vmatprep.subr.bf16.mxu1 %v4309_v2  ;;  %v170_v1 = vld [vmem:[%s5524_s0 + $0x4d8] sm:$0xff]  ;;  %v3294_v2 = vcombine.low %v145_v54, %v153_v55  ;;  %v4343_v54 = vld [vmem:[%s5523_s1 + $0x360] sm:$0xff]  }
  0x8c   :  { %2479 = vmatmul.mubr.bf16.gmra.mrb[52].mxu1 %v3200_v3  ;;  %2366 = vmatprep.mubr.bf16.mxu0 %v3215_v4  ;;  %v3296_v3 = vcombine.low %v146_v56, %v154_v57  ;;  %v3311_v4 = vcombine.high %v161_v62, %v169_v63  ;;  %v3312_v9 = vcombine.low %v162_v0, %v170_v1  ;;  %v4345_v56 = vld [vmem:[%s5523_s1 + $0x3e0] sm:$0xff]  }
  0x8d   :  { %2486 = vmatprep.mubr.bf16.mxu1 %v3217_v6  ;;  %3904 = vmatpush3.bf16.msra.mxu0 %v4308_v5  ;;  %v3313_v5 = vcombine.high %v162_v0, %v170_v1  ;;  %v177_v6 = vld [vmem:[%s5524_s0 + $0x510] sm:$0x11]  ;;  %v83_v0 = vld [vmem:[%s5524_s0 + $0x220] sm:$0xff] }
  0x8e   :  { %3986 = vmatpush3.bf16.msra.mxu1 %v4310_v7  ;;  %3905 = vmatprep.subr.bf16.mxu0 %v4311_v8  ;;  %v178_v7 = vld [vmem:[%s5524_s0 + $0x518] sm:$0x11]  ;;  %v3310_v8 = vcombine.low %v161_v62, %v169_v63  ;;  %v4347_v62 = vld [vmem:[%s5523_s1 + $0x368] sm:$0xff]   ;;  %v91_v1 = vld [vmem:[%s5524_s0 + $0x260] sm:$0xff] }
  0x8f   :  { %3987 = vmatprep.subr.bf16.mxu1 %v4313_v10  ;;  %v3327_v10 = vcombine.high %v177_v6, %v177_v6  ;;  %v3329_v11 = vcombine.high %v178_v7, %v178_v7  ;;  %v4349_v63 = vld [vmem:[%s5523_s1 + $0x3e8] sm:$0xff]  }
  0x91   :  { %3906 = vmatpush3.bf16.msra.mxu0 %v4312_v14  ;;  %v20_v14 = vld [vmem:[%s5524_s0 + $0x28] sm:$0xff] }
  0x92   :  { %3988 = vmatpush3.bf16.msra.mxu1 %v4314_v15  ;;  %3907 = vmatprep.subr.bf16.mxu0 %v4315_v16  ;;  %v28_v15 = vld [vmem:[%s5524_s0 + $0x68] sm:$0xff]  ;;  %v3326_v16 = vcombine.low %v177_v6, %v177_v6  ;;  %v4351_v6 = vld [vmem:[%s5523_s1 + $0x370] sm:$0xff]  }
  0x93   :  { %2367 = vmatmul.mubr.bf16.gmra.mrb[56].mxu0 %v3214_v17  ;;  %3989 = vmatprep.subr.bf16.mxu1 %v4317_v18  ;;  %v3328_v17 = vcombine.low %v178_v7, %v178_v7  ;;  %v3171_v18 = vcombine.high %v19_v12, %v27_v13  ;;  %v3172_v25 = vcombine.low %v20_v14, %v28_v15 }
  0x94   :  { %2487 = vmatmul.mubr.bf16.gmra.mrb[56].mxu1 %v3216_v19  ;;  %2374 = vmatprep.mubr.bf16.mxu0 %v3231_v20  ;;  %v3173_v19 = vcombine.high %v20_v14, %v28_v15  ;;  %v35_v20 = vld [vmem:[%s5524_s0 + $0xa0] sm:$0xff]  ;;  %v3218_v7 = vcombine.low %v67_v48, %v75_v49  ;;  %v4355_v14 = vld [vmem:[%s5523_s1 + $0x378] sm:$0xff]  }
  0x95   :  { %2494 = vmatprep.mubr.bf16.mxu1 %v3233_v21  ;;  %3908 = vmatpush3.bf16.msra.mxu0 %v4316_v22  ;;  %v43_v21 = vld [vmem:[%s5524_s0 + $0xe0] sm:$0xff]  ;;  %v3170_v22 = vcombine.low %v19_v12, %v27_v13  ;;  %v4352_v12 = vld [vmem:[%s5523_s1 + $0x330] sm:$0xff]   ;;  %v4359_v15 = vld [vmem:[%s5523_s1 + $0x3f8] sm:$0xff]  }
  0x96   :  { %3990 = vmatpush3.bf16.msra.mxu1 %v4318_v23  ;;  %3909 = vmatprep.subr.bf16.mxu0 %v4319_v24  ;;  %v36_v23 = vld [vmem:[%s5524_s0 + $0xa8] sm:$0xff]  ;;  %v3187_v28 = vcombine.high %v35_v20, %v43_v21  ;;  %v3186_v40 = vcombine.low %v35_v20, %v43_v21  ;;  %v4354_v13 = vld [vmem:[%s5523_s1 + $0x3b0] sm:$0xff]   ;;  %v4362_v21 = vld [vmem:[%s5523_s1 + $0x3b8] sm:$0xff]  }
  0x97   :  { %3991 = vmatprep.subr.bf16.mxu1 %v4323_v27  ;;  %v44_v24 = vld [vmem:[%s5524_s0 + $0xe8] sm:$0xff]  ;;  %v4330_v27 = vld [vmem:[%s5523_s1 + $0x380] sm:$0xff]  }
  0x98   :  { %v3188_v41 = vcombine.low %v36_v23, %v44_v24  ;;  %v108_v20 = vld [vmem:[%s5524_s0 + $0x2e8] sm:$0xff] }
  0x99   :  { %3910 = vmatpush3.bf16.msra.mxu0 %v4320_v29  ;;  %v3189_v29 = vcombine.high %v36_v23, %v44_v24 }
  0x9a   :  { %3992 = vmatpush3.bf16.msra.mxu1 %v4326_v31  ;;  %4059 = vmatprep.subr.bf16.mxu0 %v4327_v32  ;;  %v4333_v31 = vld [vmem:[%s5523_s1 + $0x3c8] sm:$0xff]  }
  0x9b   :  { %2375 = vmatmul.mubr.bf16.gmra.mrb[60].mxu0 %v3230_v33  ;;  %4141 = vmatprep.subr.bf16.mxu1 %v4329_v34  ;;  %v4332_v32 = vld [vmem:[%s5523_s1 + $0x308] sm:$0xff]   ;;  %v51_v34 = vld [vmem:[%s5524_s0 + $0x120] sm:$0xff] }
  0x9c   :  { %2495 = vmatmul.mubr.bf16.gmra.mrb[60].mxu1 %v3232_v35  ;;  %2382 = vmatprep.mubr.bf16.mxu0 %v3247_v36  ;;  %v4334_v33 = vld [vmem:[%s5523_s1 + $0x388] sm:$0xff]   ;;  %v59_v35 = vld [vmem:[%s5524_s0 + $0x160] sm:$0xff]  ;;  %v4335_v36 = vld [vmem:[%s5523_s1 + $0x350] sm:$0xff]  }
  0x9d   :  { %2502 = vmatprep.mubr.bf16.mxu1 %v3249_v37  ;;  %v52_v37 = vld [vmem:[%s5524_s0 + $0x128] sm:$0xff]  ;;  %v3202_v55 = vcombine.low %v51_v34, %v59_v35 }
  0x9e   :  { %v3204_v57 = vcombine.low %v52_v37, %v60_v38 }
  0xa3   :  { %2383 = vmatmul.mubr.bf16.gmra.mrb[64].mxu0 %v3246_v42  ;;  %v3203_v42 = vcombine.high %v51_v34, %v59_v35 }
  0xa4   :  { %2503 = vmatmul.mubr.bf16.gmra.mrb[64].mxu1 %v3248_v43  ;;  %2390 = vmatprep.mubr.bf16.mxu0 %v3263_v44  ;;  %v3205_v43 = vcombine.high %v52_v37, %v60_v38  ;;  %v4336_v44 = vld [vmem:[%s5523_s1 + $0x310] sm:$0xff]  }
  0xa5   :  { %2510 = vmatprep.mubr.bf16.mxu1 %v3265_v45  ;;  %v4338_v45 = vld [vmem:[%s5523_s1 + $0x390] sm:$0xff]  }
  0xab   :  { %2391 = vmatmul.mubr.bf16.gmra.mrb[68].mxu0 %v3262_v50  ;;  %v68_v50 = vld [vmem:[%s5524_s0 + $0x1a8] sm:$0xff] }
  0xac   :  { %2511 = vmatmul.mubr.bf16.gmra.mrb[68].mxu1 %v3264_v51  ;;  %2398 = vmatprep.mubr.bf16.mxu0 %v3279_v52  ;;  %v4340_v51 = vld [vmem:[%s5523_s1 + $0x318] sm:$0xff]   ;;  %v76_v52 = vld [vmem:[%s5524_s0 + $0x1e8] sm:$0xff] }
  0xad   :  { %2518 = vmatprep.mubr.bf16.mxu1 %v3281_v53  ;;  %v4342_v53 = vld [vmem:[%s5523_s1 + $0x398] sm:$0xff]  }
  0xb3   :  { %2399 = vmatmul.mubr.bf16.gmra.mrb[72].mxu0 %v3278_v58  ;;  %v3219_v58 = vcombine.high %v67_v48, %v75_v49 }
  0xb4   :  { %2519 = vmatmul.mubr.bf16.gmra.mrb[72].mxu1 %v3280_v59  ;;  %2406 = vmatprep.mubr.bf16.mxu0 %v3295_v60  ;;  %v3221_v59 = vcombine.high %v68_v50, %v76_v52  ;;  %v4344_v60 = vld [vmem:[%s5523_s1 + $0x320] sm:$0xff]  }
  0xb5   :  { %2526 = vmatprep.mubr.bf16.mxu1 %v3297_v61  ;;  %v4346_v61 = vld [vmem:[%s5523_s1 + $0x3a0] sm:$0xff]  }
  0xbb   :  { %2407 = vmatmul.mubr.bf16.gmra.mrb[76].mxu0 %v3294_v2  ;;  %v84_v2 = vld [vmem:[%s5524_s0 + $0x228] sm:$0xff] }
  0xbc   :  { %2527 = vmatmul.mubr.bf16.gmra.mrb[76].mxu1 %v3296_v3  ;;  %2414 = vmatprep.mubr.bf16.mxu0 %v3311_v4  ;;  %v4348_v3 = vld [vmem:[%s5523_s1 + $0x328] sm:$0xff]  }
  0xbd   :  { %2534 = vmatprep.mubr.bf16.mxu1 %v3313_v5  ;;  %v92_v4 = vld [vmem:[%s5524_s0 + $0x268] sm:$0xff] }
  0xbe   :  { %v4350_v5 = vld [vmem:[%s5523_s1 + $0x3a8] sm:$0xff]   ;;  %v3236_v23 = vcombine.low %v84_v2, %v92_v4 }
  0xc3   :  { %2415 = vmatmul.mubr.bf16.gmra.mrb[80].mxu0 %v3310_v8  ;;  %v4353_v8 = vld [vmem:[%s5523_s1 + $0x3f0] sm:$0xff]  }
  0xc4   :  { %2535 = vmatmul.mubr.bf16.gmra.mrb[80].mxu1 %v3312_v9  ;;  %2422 = vmatprep.mubr.bf16.mxu0 %v3327_v10  ;;  %v3220_v9 = vcombine.low %v68_v50, %v76_v52  ;;  %v3235_v10 = vcombine.high %v83_v0, %v91_v1  ;;  %v131_v50 = vld [vmem:[%s5524_s0 + $0x3a0] sm:$0xff] }
  0xc5   :  { %2542 = vmatprep.mubr.bf16.mxu1 %v3329_v11  ;;  %v3237_v11 = vcombine.high %v84_v2, %v92_v4 }
  0xcb   :  { %2423 = vmatmul.mubr.bf16.gmra.mrb[84].mxu0 %v3326_v16  ;;  %v99_v16 = vld [vmem:[%s5524_s0 + $0x2a0] sm:$0xff] }
  0xcc   :  { %2543 = vmatmul.mubr.bf16.gmra.mrb[84].mxu1 %v3328_v17  ;;  %2582 = vmatprep.mubr.bf16.mxu0 %v3171_v18  ;;  %v107_v17 = vld [vmem:[%s5524_s0 + $0x2e0] sm:$0xff]  ;;  %v4356_v18 = vld [vmem:[%s5523_s1 + $0x338] sm:$0xff]  }
  0xcd   :  { %2702 = vmatprep.mubr.bf16.mxu1 %v3173_v19  ;;  %v100_v19 = vld [vmem:[%s5524_s0 + $0x2a8] sm:$0xff]  ;;  %v3251_v24 = vcombine.high %v99_v16, %v107_v17  ;;  %v3250_v34 = vcombine.low %v99_v16, %v107_v17 }
  0xce   :  { %v3252_v38 = vcombine.low %v100_v19, %v108_v20 }
  0xd3   :  { %2583 = vmatmul.mubr.bf16.vlgmr.msra.gmra.mrb[88].mxu0 %v3170_v22  ;;  %v3234_v22 = vcombine.low %v83_v0, %v91_v1 }
  0xd4   :  { %2703 = vmatmul.mubr.bf16.vlgmr.msra.gmra.mrb[88].mxu1 %v3172_v25  ;;  %4060 = vmatpush3.bf16.msra.mxu0 %v4328_v26  ;;  %v3253_v25 = vcombine.high %v100_v19, %v108_v20  ;;  %v115_v26 = vld [vmem:[%s5524_s0 + $0x320] sm:$0xff] }
  0xd5   :  { %4142 = vmatpush3.bf16.msra.mxu1 %v4330_v27  ;;  %2590 = vmatprep.mubr.bf16.mxu0 %v3187_v28  ;;  %v123_v27 = vld [vmem:[%s5524_s0 + $0x360] sm:$0xff] }
  0xd6   :  { %2710 = vmatprep.mubr.bf16.mxu1 %v3189_v29  ;;  %4061 = vmatprep.subr.bf16.mxu0 %v4331_v30  ;;  %v116_v29 = vld [vmem:[%s5524_s0 + $0x328] sm:$0xff] }
  0xd7   :  { %4143 = vmatprep.subr.bf16.mxu1 %v4333_v31  ;;  %v124_v30 = vld [vmem:[%s5524_s0 + $0x368] sm:$0xff] }
  0xd8   :  { %4062 = vmatpush3.bf16.msra.mxu0 %v4332_v32  ;;  %v5110_v32 = vld [vmem:[%s5525_s2] ss:$0 sm:$0xff] }
  0xd9   :  { %4144 = vmatpush3.bf16.msra.mxu1 %v4334_v33  ;;  %4063 = vmatprep.subr.bf16.mxu0 %v4335_v36 }
  0xda   :  { %4145 = vmatprep.subr.bf16.mxu1 %v4337_v39  ;;  %v3267_v39 = vcombine.high %v115_v26, %v123_v27 }
  0xdb   :  { %2591 = vmatmul.mubr.bf16.gmra.mrb[92].mxu0 %v3186_v40 }
  0xdc   :  { %2711 = vmatmul.mubr.bf16.gmra.mrb[92].mxu1 %v3188_v41  ;;  %2598 = vmatprep.mubr.bf16.mxu0 %v3203_v42 }
  0xdd   :  { %2718 = vmatprep.mubr.bf16.mxu1 %v3205_v43  ;;  %4064 = vmatpush3.bf16.msra.mxu0 %v4336_v44  ;;  %v3269_v43 = vcombine.high %v116_v29, %v124_v30 }
  0xde   :  { %4146 = vmatpush3.bf16.msra.mxu1 %v4338_v45  ;;  %4065 = vmatprep.subr.bf16.mxu0 %v4339_v46 }
  0xdf   :  { %4147 = vmatprep.subr.bf16.mxu1 %v4341_v47 }
  0xe1   :  { %4066 = vmatpush3.bf16.msra.mxu0 %v4340_v51  ;;  %v139_v51 = vld [vmem:[%s5524_s0 + $0x3e0] sm:$0xff] }
  0xe2   :  { %4148 = vmatpush3.bf16.msra.mxu1 %v4342_v53  ;;  %4067 = vmatprep.subr.bf16.mxu0 %v4343_v54  ;;  %v132_v54 = vld [vmem:[%s5524_s0 + $0x3a8] sm:$0xff] }
  0xe3   :  { %2599 = vmatmul.mubr.bf16.gmra.mrb[96].mxu0 %v3202_v55  ;;  %4149 = vmatprep.subr.bf16.mxu1 %v4345_v56  ;;  %v140_v55 = vld [vmem:[%s5524_s0 + $0x3e8] sm:$0xff] }
  0xe4   :  { %2719 = vmatmul.mubr.bf16.gmra.mrb[96].mxu1 %v3204_v57  ;;  %2606 = vmatprep.mubr.bf16.mxu0 %v3219_v58  ;;  %v3266_v58 = vcombine.low %v115_v26, %v123_v27 }
  0xe5   :  { %2726 = vmatprep.mubr.bf16.mxu1 %v3221_v59  ;;  %4068 = vmatpush3.bf16.msra.mxu0 %v4344_v60 }
  0xe6   :  { %4150 = vmatpush3.bf16.msra.mxu1 %v4346_v61  ;;  %4069 = vmatprep.subr.bf16.mxu0 %v4347_v62  ;;  %v3268_v62 = vcombine.low %v116_v29, %v124_v30 }
  0xe7   :  { %4151 = vmatprep.subr.bf16.mxu1 %v4349_v63  ;;  %v3283_v63 = vcombine.high %v131_v50, %v139_v51 }
  0xe9   :  { %4070 = vmatpush3.bf16.msra.mxu0 %v4348_v3  ;;  %v3285_v3 = vcombine.high %v132_v54, %v140_v55 }
  0xea   :  { %4152 = vmatpush3.bf16.msra.mxu1 %v4350_v5  ;;  %4071 = vmatprep.subr.bf16.mxu0 %v4351_v6 }
  0xeb   :  { %2607 = vmatmul.mubr.bf16.gmra.mrb[100].mxu0 %v3218_v7  ;;  %4153 = vmatprep.subr.bf16.mxu1 %v4353_v8 }
  0xec   :  { %2727 = vmatmul.mubr.bf16.gmra.mrb[100].mxu1 %v3220_v9  ;;  %2614 = vmatprep.mubr.bf16.mxu0 %v3235_v10  ;;  %v147_v10 = vld [vmem:[%s5524_s0 + $0x420] sm:$0xff] }
  0xed   :  { %2734 = vmatprep.mubr.bf16.mxu1 %v3237_v11  ;;  %4072 = vmatpush3.bf16.msra.mxu0 %v4352_v12  ;;  %v155_v11 = vld [vmem:[%s5524_s0 + $0x460] sm:$0xff] }
  0xee   :  { %4154 = vmatpush3.bf16.msra.mxu1 %v4354_v13  ;;  %4073 = vmatprep.subr.bf16.mxu0 %v4355_v14  ;;  %v148_v14 = vld [vmem:[%s5524_s0 + $0x428] sm:$0xff] }
  0xef   :  { %4155 = vmatprep.subr.bf16.mxu1 %v4359_v15  ;;  %v156_v15 = vld [vmem:[%s5524_s0 + $0x468] sm:$0xff] }
  0xf0   :  { %v3301_v27 = vcombine.high %v148_v14, %v156_v15 }
  0xf1   :  { %4074 = vmatpush3.bf16.msra.mxu0 %v4356_v18  ;;  %v3282_v18 = vcombine.low %v131_v50, %v139_v51 }
  0xf2   :  { %4156 = vmatpush3.bf16.msra.mxu1 %v4362_v21 }
  0xf3   :  { %2615 = vmatmul.mubr.bf16.gmra.mrb[104].mxu0 %v3234_v22  ;;  %v3284_v22 = vcombine.low %v132_v54, %v140_v55 }
  0xf4   :  { %2735 = vmatmul.mubr.bf16.gmra.mrb[104].mxu1 %v3236_v23  ;;  %2622 = vmatprep.mubr.bf16.mxu0 %v3251_v24  ;;  %v3299_v23 = vcombine.high %v147_v10, %v155_v11 }
  0xf5   :  { %2742 = vmatprep.mubr.bf16.mxu1 %v3253_v25 }
  0xf6   :  { %v3583_v28 = vpop.f32.mrb[0].mxu0 }
  0xf7   :  { %v3665_v31 = vpop.f32.mrb[0].mxu1  ;;  %v3584_v33 = vpop.f32.mrb[1].mxu0 }
  0xf8   :  { %v3585_v35 = vadd.f32 %v3584_v33, %v3583_v28  ;;  %v3666_v36 = vpop.f32.mrb[1].mxu1  ;;  %v3586_v37 = vpop.f32.mrb[2].mxu0 }
  0xf9   :  { %v3667_v40 = vadd.f32 %v3666_v36, %v3665_v31  ;;  %v3668_v41 = vpop.f32.mrb[2].mxu1  ;;  %v3587_v42 = vpop.f32.mrb[3].mxu0  ;;  %v171_v36 = vld [vmem:[%s5524_s0 + $0x4e0] sm:$0xff] }
  0xfa   :  { %v2105_v44 = vadd.f32 %v3585_v35, %v5110_v32  ;;  %v3588_v45 = vadd.f32 %v3587_v42, %v3586_v37  ;;  %v3669_v46 = vpop.f32.mrb[3].mxu1  ;;  %v163_v35 = vld [vmem:[%s5524_s0 + $0x4a0] sm:$0xff] }
  0xfb   :  { %v3670_v47 = vadd.f32 %v3669_v46, %v3668_v41  ;;  %2623 = vmatmul.mubr.bf16.gmra.mrb[108].mxu0 %v3250_v34 }
  0xfc   :  { %v5113_v48 = vadd.f32 %v3667_v40, %v2105_v44  ;;  %v2108_v49 = vadd.f32 %v3588_v45, %v5110_v32  ;;  %2743 = vmatmul.mubr.bf16.gmra.mrb[108].mxu1 %v3252_v38  ;;  %2630 = vmatprep.mubr.bf16.mxu0 %v3267_v39  ;;  %v164_v39 = vld [vmem:[%s5524_s0 + $0x4a8] sm:$0xff] }
  0xfd   :  { %2750 = vmatprep.mubr.bf16.mxu1 %v3269_v43  ;;  %v172_v40 = vld [vmem:[%s5524_s0 + $0x4e8] sm:$0xff]  ;;  %v3298_v43 = vcombine.low %v147_v10, %v155_v11 }
  0xfe   :  { %v5122_v52 = vadd.f32 %v3670_v47, %v2108_v49  ;;  %v3589_v53 = vpop.f32.mrb[4].mxu0  ;;  %v3300_v47 = vcombine.low %v148_v14, %v156_v15  ;;  %v3315_v49 = vcombine.high %v163_v35, %v171_v36  ;;  %v3317_v54 = vcombine.high %v164_v39, %v172_v40 }
  0xff   :  { %v3671_v56 = vpop.f32.mrb[4].mxu1  ;;  %v3590_v57 = vpop.f32.mrb[5].mxu0 }
 0x100   :  { %v3591_v59 = vadd.f32 %v3590_v57, %v3589_v53  ;;  %v3672_v60 = vpop.f32.mrb[5].mxu1  ;;  %v3592_v61 = vpop.f32.mrb[6].mxu0 }
 0x101   :  { %v3673_v0 = vadd.f32 %v3672_v60, %v3671_v56  ;;  %v3674_v1 = vpop.f32.mrb[6].mxu1  ;;  %v3593_v2 = vpop.f32.mrb[7].mxu0 }
 0x102   :  { %v2113_v4 = vadd.f32 %v3591_v59, %v5110_v32  ;;  %v3594_v5 = vadd.f32 %v3593_v2, %v3592_v61  ;;  %v3675_v6 = vpop.f32.mrb[7].mxu1  ;;  %v179_v61 = vld [vmem:[%s5524_s0 + $0x520] sm:$0x11] }
 0x103   :  { %v3676_v7 = vadd.f32 %v3675_v6, %v3674_v1  ;;  %2631 = vmatmul.mubr.bf16.gmra.mrb[112].mxu0 %v3266_v58 }
 0x104   :  { %v5131_v8 = vadd.f32 %v3673_v0, %v2113_v4  ;;  %v2116_v9 = vadd.f32 %v3594_v5, %v5110_v32  ;;  %2751 = vmatmul.mubr.bf16.gmra.mrb[112].mxu1 %v3268_v62  ;;  %2638 = vmatprep.mubr.bf16.mxu0 %v3283_v63  ;;  %v180_v0 = vld [vmem:[%s5524_s0 + $0x528] sm:$0x11] }
 0x105   :  { %2758 = vmatprep.mubr.bf16.mxu1 %v3285_v3  ;;  %v3314_v3 = vcombine.low %v163_v35, %v171_v36  ;;  %v3333_v14 = vcombine.high %v180_v0, %v180_v0  ;;  %v3332_v35 = vcombine.low %v180_v0, %v180_v0 }
 0x106   :  { %v5140_v12 = vadd.f32 %v3676_v7, %v2116_v9  ;;  %v3595_v13 = vpop.f32.mrb[8].mxu0  ;;  %v3316_v7 = vcombine.low %v164_v39, %v172_v40  ;;  %v3331_v9 = vcombine.high %v179_v61, %v179_v61 }
 0x107   :  { %v3677_v16 = vpop.f32.mrb[8].mxu1  ;;  %v3596_v17 = vpop.f32.mrb[9].mxu0 }
 0x108   :  { %v3597_v19 = vadd.f32 %v3596_v17, %v3595_v13  ;;  %v3678_v20 = vpop.f32.mrb[9].mxu1  ;;  %v3598_v21 = vpop.f32.mrb[10].mxu0 }
 0x109   :  { %v3679_v24 = vadd.f32 %v3678_v20, %v3677_v16  ;;  %v3680_v25 = vpop.f32.mrb[10].mxu1  ;;  %v3599_v26 = vpop.f32.mrb[11].mxu0 }
 0x10a   :  { %v2121_v28 = vadd.f32 %v3597_v19, %v5110_v32  ;;  %v3600_v29 = vadd.f32 %v3599_v26, %v3598_v21  ;;  %v3681_v30 = vpop.f32.mrb[11].mxu1  ;;  %v21_v21 = vld [vmem:[%s5524_s0 + $0x30] sm:$0xff]  ;;  %v30_v26 = vld [vmem:[%s5524_s0 + $0x78] sm:$0xff] }
 0x10b   :  { %v3682_v31 = vadd.f32 %v3681_v30, %v3680_v25  ;;  %2639 = vmatmul.mubr.bf16.gmra.mrb[116].mxu0 %v3282_v18  ;;  %v22_v25 = vld [vmem:[%s5524_s0 + $0x38] sm:$0xff] }
 0x10c   :  { %v5149_v33 = vadd.f32 %v3679_v24, %v2121_v28  ;;  %v2124_v34 = vadd.f32 %v3600_v29, %v5110_v32  ;;  %2759 = vmatmul.mubr.bf16.gmra.mrb[116].mxu1 %v3284_v22  ;;  %2646 = vmatprep.mubr.bf16.mxu0 %v3299_v23  ;;  %v29_v22 = vld [vmem:[%s5524_s0 + $0x70] sm:$0xff]  ;;  %v3330_v29 = vcombine.low %v179_v61, %v179_v61 }
 0x10d   :  { %2766 = vmatprep.mubr.bf16.mxu1 %v3301_v27  ;;  %v3175_v36 = vcombine.high %v21_v21, %v29_v22  ;;  %v3176_v0 = vcombine.low %v22_v25, %v30_v26 }
 0x10e   :  { %v5158_v37 = vadd.f32 %v3682_v31, %v2124_v34  ;;  %v3601_v38 = vpop.f32.mrb[12].mxu0 }
 0x10f   :  { %v3683_v41 = vpop.f32.mrb[12].mxu1  ;;  %v3602_v42 = vpop.f32.mrb[13].mxu0 }
 0x110   :  { %v3603_v44 = vadd.f32 %v3602_v42, %v3601_v38  ;;  %v3684_v45 = vpop.f32.mrb[13].mxu1  ;;  %v3604_v46 = vpop.f32.mrb[14].mxu0 }
 0x111   :  { %v3685_v50 = vadd.f32 %v3684_v45, %v3683_v41  ;;  %v3686_v51 = vpop.f32.mrb[14].mxu1  ;;  %v3605_v53 = vpop.f32.mrb[15].mxu0  ;;  %v3177_v41 = vcombine.high %v22_v25, %v30_v26 }
 0x112   :  { %v2129_v55 = vadd.f32 %v3603_v44, %v5110_v32  ;;  %v3606_v56 = vadd.f32 %v3605_v53, %v3604_v46  ;;  %v3687_v57 = vpop.f32.mrb[15].mxu1 }
 0x113   :  { %v3688_v58 = vadd.f32 %v3687_v57, %v3686_v51  ;;  %2647 = vmatmul.mubr.bf16.gmra.mrb[120].mxu0 %v3298_v43 }
 0x114   :  { %v5167_v59 = vadd.f32 %v3685_v50, %v2129_v55  ;;  %v2132_v60 = vadd.f32 %v3606_v56, %v5110_v32  ;;  %2767 = vmatmul.mubr.bf16.gmra.mrb[120].mxu1 %v3300_v47  ;;  %2654 = vmatprep.mubr.bf16.mxu0 %v3315_v49  ;;  %v37_v49 = vld [vmem:[%s5524_s0 + $0xb0] sm:$0xff]  ;;  %v46_v55 = vld [vmem:[%s5524_s0 + $0xf8] sm:$0xff] }
 0x115   :  { %2774 = vmatprep.mubr.bf16.mxu1 %v3317_v54  ;;  %v45_v50 = vld [vmem:[%s5524_s0 + $0xf0] sm:$0xff]  ;;  %v38_v54 = vld [vmem:[%s5524_s0 + $0xb8] sm:$0xff] }
 0x116   :  { %v5173_v62 = vadd.f32 %v3688_v58, %v2132_v60  ;;  %v3607_v63 = vpop.f32.mrb[16].mxu0  ;;  %v3174_v58 = vcombine.low %v21_v21, %v29_v22 }
 0x117   :  { %v3689_v1 = vpop.f32.mrb[16].mxu1  ;;  %v3608_v2 = vpop.f32.mrb[17].mxu0 }
 0x118   :  { %v3609_v4 = vadd.f32 %v3608_v2, %v3607_v63  ;;  %v3690_v5 = vpop.f32.mrb[17].mxu1  ;;  %v3610_v6 = vpop.f32.mrb[18].mxu0 }
 0x119   :  { %v3691_v10 = vadd.f32 %v3690_v5, %v3689_v1  ;;  %v3692_v11 = vpop.f32.mrb[18].mxu1  ;;  %v3611_v13 = vpop.f32.mrb[19].mxu0  ;;  %v3191_v1 = vcombine.high %v37_v49, %v45_v50  ;;  %v3193_v5 = vcombine.high %v38_v54, %v46_v55 }
 0x11a   :  { %v2137_v15 = vadd.f32 %v3609_v4, %v5110_v32  ;;  %v3612_v16 = vadd.f32 %v3611_v13, %v3610_v6  ;;  %v3693_v17 = vpop.f32.mrb[19].mxu1 }
 0x11b   :  { %v3694_v18 = vadd.f32 %v3693_v17, %v3692_v11  ;;  %2655 = vmatmul.mubr.bf16.gmra.mrb[124].mxu0 %v3314_v3 }
 0x11c   :  { %v5179_v19 = vadd.f32 %v3691_v10, %v2137_v15  ;;  %v2140_v20 = vadd.f32 %v3612_v16, %v5110_v32  ;;  %2775 = vmatmul.mubr.bf16.gmra.mrb[124].mxu1 %v3316_v7  ;;  %2662 = vmatprep.mubr.bf16.mxu0 %v3331_v9  ;;  %v61_v15 = vld [vmem:[%s5524_s0 + $0x170] sm:$0xff] }
 0x11d   :  { %2782 = vmatprep.mubr.bf16.mxu1 %v3333_v14  ;;  %v53_v14 = vld [vmem:[%s5524_s0 + $0x130] sm:$0xff] }
 0x11e   :  { %v5188_v23 = vadd.f32 %v3694_v18, %v2140_v20  ;;  %v3613_v24 = vpop.f32.mrb[20].mxu0  ;;  %v54_v18 = vld [vmem:[%s5524_s0 + $0x138] sm:$0xff] }
 0x11f   :  { %v3695_v27 = vpop.f32.mrb[20].mxu1  ;;  %v3614_v28 = vpop.f32.mrb[21].mxu0  ;;  %v62_v20 = vld [vmem:[%s5524_s0 + $0x178] sm:$0xff] }
 0x120   :  { %v3615_v30 = vadd.f32 %v3614_v28, %v3613_v24  ;;  %v3696_v31 = vpop.f32.mrb[21].mxu1  ;;  %v3616_v34 = vpop.f32.mrb[22].mxu0  ;;  %v3190_v24 = vcombine.low %v37_v49, %v45_v50  ;;  %v3192_v28 = vcombine.low %v38_v54, %v46_v55  ;;  %v70_v49 = vld [vmem:[%s5524_s0 + $0x1b8] sm:$0xff]  ;;  %v3206_v55 = vcombine.low %v53_v14, %v61_v15 }
 0x121   :  { %v3697_v38 = vadd.f32 %v3696_v31, %v3695_v27  ;;  %v3698_v39 = vpop.f32.mrb[22].mxu1  ;;  %v3617_v40 = vpop.f32.mrb[23].mxu0  ;;  %v78_v50 = vld [vmem:[%s5524_s0 + $0x1f8] sm:$0xff] }
 0x122   :  { %v2145_v42 = vadd.f32 %v3615_v30, %v5110_v32  ;;  %v3618_v43 = vadd.f32 %v3617_v40, %v3616_v34  ;;  %v3699_v44 = vpop.f32.mrb[23].mxu1 }
 0x123   :  { %v3700_v45 = vadd.f32 %v3699_v44, %v3698_v39  ;;  %2663 = vmatmul.mubr.bf16.gmra.mrb[128].mxu0 %v3330_v29  ;;  %v3207_v29 = vcombine.high %v53_v14, %v61_v15  ;;  %v77_v44 = vld [vmem:[%s5524_s0 + $0x1f0] sm:$0xff] }
 0x124   :  { %v5197_v46 = vadd.f32 %v3697_v38, %v2145_v42  ;;  %v2148_v47 = vadd.f32 %v3618_v43, %v5110_v32  ;;  %2783 = vmatmul.mubr.bf16.gmra.mrb[128].mxu1 %v3332_v35  ;;  %2822 = vmatprep.mubr.bf16.mxu0 %v3175_v36  ;;  %v3209_v35 = vcombine.high %v54_v18, %v62_v20  ;;  %v69_v43 = vld [vmem:[%s5524_s0 + $0x1b0] sm:$0xff] }
 0x125   :  { %2942 = vmatprep.mubr.bf16.mxu1 %v3177_v41 }
 0x126   :  { %v5206_v51 = vadd.f32 %v3700_v45, %v2148_v47  ;;  %v3619_v53 = vpop.f32.mrb[24].mxu0 }
 0x127   :  { %v3701_v56 = vpop.f32.mrb[24].mxu1  ;;  %v3620_v57 = vpop.f32.mrb[25].mxu0 }
 0x128   :  { %v3621_v60 = vadd.f32 %v3620_v57, %v3619_v53  ;;  %v3702_v61 = vpop.f32.mrb[25].mxu1  ;;  %v3622_v63 = vpop.f32.mrb[26].mxu0 }
 0x129   :  { %v3703_v2 = vadd.f32 %v3702_v61, %v3701_v56  ;;  %v3704_v3 = vpop.f32.mrb[26].mxu1  ;;  %v3623_v4 = vpop.f32.mrb[27].mxu0  ;;  %v3223_v61 = vcombine.high %v69_v43, %v77_v44 }
 0x12a   :  { %v2153_v6 = vadd.f32 %v3621_v60, %v5110_v32  ;;  %v3624_v7 = vadd.f32 %v3623_v4, %v3622_v63  ;;  %v3705_v9 = vpop.f32.mrb[27].mxu1  ;;  %v3208_v60 = vcombine.low %v54_v18, %v62_v20  ;;  %v94_v18 = vld [vmem:[%s5524_s0 + $0x278] sm:$0xff] }
 0x12b   :  { %v3706_v10 = vadd.f32 %v3705_v9, %v3704_v3  ;;  %2823 = vmatmul.mubr.bf16.vlgmr.msra.gmra.mrb[132].mxu0 %v3174_v58 }
 0x12c   :  { %v5215_v11 = vadd.f32 %v3703_v2, %v2153_v6  ;;  %v2156_v13 = vadd.f32 %v3624_v7, %v5110_v32  ;;  %2943 = vmatmul.mubr.bf16.vlgmr.msra.gmra.mrb[132].mxu1 %v3176_v0  ;;  %2830 = vmatprep.mubr.bf16.mxu0 %v3191_v1  ;;  %v3225_v2 = vcombine.high %v70_v49, %v78_v50 }
 0x12d   :  { %2950 = vmatprep.mubr.bf16.mxu1 %v3193_v5 }
 0x12e   :  { %v5224_v16 = vadd.f32 %v3706_v10, %v2156_v13  ;;  %v3625_v17 = vpop.f32.mrb[28].mxu0  ;;  %v85_v10 = vld [vmem:[%s5524_s0 + $0x230] sm:$0xff] }
 0x12f   :  { %v3707_v21 = vpop.f32.mrb[28].mxu1  ;;  %v3626_v22 = vpop.f32.mrb[29].mxu0  ;;  %v93_v13 = vld [vmem:[%s5524_s0 + $0x270] sm:$0xff] }
 0x130   :  { %v3627_v25 = vadd.f32 %v3626_v22, %v3625_v17  ;;  %v3708_v26 = vpop.f32.mrb[29].mxu1  ;;  %v3628_v27 = vpop.f32.mrb[30].mxu0  ;;  %v86_v17 = vld [vmem:[%s5524_s0 + $0x238] sm:$0xff]  ;;  %v3222_v22 = vcombine.low %v69_v43, %v77_v44  ;;  %v101_v43 = vld [vmem:[%s5524_s0 + $0x2b0] sm:$0xff] }
 0x131   :  { %v3709_v30 = vadd.f32 %v3708_v26, %v3707_v21  ;;  %v3710_v31 = vpop.f32.mrb[30].mxu1  ;;  %v3629_v34 = vpop.f32.mrb[31].mxu0  ;;  %v109_v44 = vld [vmem:[%s5524_s0 + $0x2f0] sm:$0xff] }
 0x132   :  { %v2161_v36 = vadd.f32 %v3627_v25, %v5110_v32  ;;  %v3630_v38 = vadd.f32 %v3629_v34, %v3628_v27  ;;  %v3711_v39 = vpop.f32.mrb[31].mxu1  ;;  %v3224_v27 = vcombine.low %v70_v49, %v78_v50  ;;  %v3241_v34 = vcombine.high %v86_v17, %v94_v18  ;;  %v102_v50 = vld [vmem:[%s5524_s0 + $0x2b8] sm:$0xff] }
 0x133   :  { %v3712_v40 = vadd.f32 %v3711_v39, %v3710_v31  ;;  %2831 = vmatmul.mubr.bf16.gmra.mrb[136].mxu0 %v3190_v24 }
 0x134   :  { %v5233_v41 = vadd.f32 %v3709_v30, %v2161_v36  ;;  %v2164_v42 = vadd.f32 %v3630_v38, %v5110_v32  ;;  %2951 = vmatmul.mubr.bf16.gmra.mrb[136].mxu1 %v3192_v28  ;;  %2838 = vmatprep.mubr.bf16.mxu0 %v3207_v29  ;;  %v3239_v28 = vcombine.high %v85_v10, %v93_v13 }
 0x135   :  { %2958 = vmatprep.mubr.bf16.mxu1 %v3209_v35 }
 0x136   :  { %v5242_v45 = vadd.f32 %v3712_v40, %v2164_v42  ;;  %v3631_v47 = vpop.f32.mrb[32].mxu0 }
 0x137   :  { %v3713_v53 = vpop.f32.mrb[32].mxu1  ;;  %v3632_v54 = vpop.f32.mrb[33].mxu0 }
 0x138   :  { %v3633_v56 = vadd.f32 %v3632_v54, %v3631_v47  ;;  %v3714_v57 = vpop.f32.mrb[33].mxu1  ;;  %v3634_v58 = vpop.f32.mrb[34].mxu0 }
 0x139   :  { %v3715_v63 = vadd.f32 %v3714_v57, %v3713_v53  ;;  %v3716_v0 = vpop.f32.mrb[34].mxu1  ;;  %v3635_v1 = vpop.f32.mrb[35].mxu0  ;;  %v110_v53 = vld [vmem:[%s5524_s0 + $0x2f8] sm:$0xff] }
 0x13a   :  { %v2169_v3 = vadd.f32 %v3633_v56, %v5110_v32  ;;  %v3636_v4 = vadd.f32 %v3635_v1, %v3634_v58  ;;  %v3717_v5 = vpop.f32.mrb[35].mxu1  ;;  %v3238_v56 = vcombine.low %v85_v10, %v93_v13  ;;  %v125_v10 = vld [vmem:[%s5524_s0 + $0x370] sm:$0xff] }
 0x13b   :  { %v3718_v6 = vadd.f32 %v3717_v5, %v3716_v0  ;;  %2839 = vmatmul.mubr.bf16.gmra.mrb[140].mxu0 %v3206_v55 }
 0x13c   :  { %v5251_v7 = vadd.f32 %v3715_v63, %v2169_v3  ;;  %v2172_v9 = vadd.f32 %v3636_v4, %v5110_v32  ;;  %2959 = vmatmul.mubr.bf16.gmra.mrb[140].mxu1 %v3208_v60  ;;  %2846 = vmatprep.mubr.bf16.mxu0 %v3223_v61  ;;  %v3240_v61 = vcombine.low %v86_v17, %v94_v18 }
 0x13d   :  { %2966 = vmatprep.mubr.bf16.mxu1 %v3225_v2  ;;  %v3255_v63 = vcombine.high %v101_v43, %v109_v44  ;;  %v3257_v3 = vcombine.high %v102_v50, %v110_v53 }
 0x13e   :  { %v5260_v14 = vadd.f32 %v3718_v6, %v2172_v9  ;;  %v3637_v15 = vpop.f32.mrb[36].mxu0  ;;  %v117_v9 = vld [vmem:[%s5524_s0 + $0x330] sm:$0xff] }
 0x13f   :  { %v3719_v20 = vpop.f32.mrb[36].mxu1  ;;  %v3638_v21 = vpop.f32.mrb[37].mxu0 }
 0x140   :  { %v3639_v24 = vadd.f32 %v3638_v21, %v3637_v15  ;;  %v3720_v25 = vpop.f32.mrb[37].mxu1  ;;  %v3640_v26 = vpop.f32.mrb[38].mxu0  ;;  %v126_v15 = vld [vmem:[%s5524_s0 + $0x378] sm:$0xff] }
 0x141   :  { %v3721_v29 = vadd.f32 %v3720_v25, %v3719_v20  ;;  %v3722_v30 = vpop.f32.mrb[38].mxu1  ;;  %v3641_v31 = vpop.f32.mrb[39].mxu0  ;;  %v3254_v20 = vcombine.low %v101_v43, %v109_v44  ;;  %v3256_v25 = vcombine.low %v102_v50, %v110_v53  ;;  %v141_v43 = vld [vmem:[%s5524_s0 + $0x3f0] sm:$0xff] }
 0x142   :  { %v2177_v35 = vadd.f32 %v3639_v24, %v5110_v32  ;;  %v3642_v36 = vadd.f32 %v3641_v31, %v3640_v26  ;;  %v3723_v38 = vpop.f32.mrb[39].mxu1  ;;  %v3271_v26 = vcombine.high %v117_v9, %v125_v10 }
 0x143   :  { %v3724_v39 = vadd.f32 %v3723_v38, %v3722_v30  ;;  %2847 = vmatmul.mubr.bf16.gmra.mrb[144].mxu0 %v3222_v22 }
 0x144   :  { %v5269_v40 = vadd.f32 %v3721_v29, %v2177_v35  ;;  %v2180_v42 = vadd.f32 %v3642_v36, %v5110_v32  ;;  %2967 = vmatmul.mubr.bf16.gmra.mrb[144].mxu1 %v3224_v27  ;;  %2854 = vmatprep.mubr.bf16.mxu0 %v3239_v28 }
 0x145   :  { %2974 = vmatprep.mubr.bf16.mxu1 %v3241_v34 }
 0x146   :  { %v5278_v47 = vadd.f32 %v3724_v39, %v2180_v42  ;;  %v3643_v49 = vpop.f32.mrb[40].mxu0  ;;  %v133_v42 = vld [vmem:[%s5524_s0 + $0x3b0] sm:$0xff] }
 0x147   :  { %v3725_v54 = vpop.f32.mrb[40].mxu1  ;;  %v3644_v55 = vpop.f32.mrb[41].mxu0 }
 0x148   :  { %v3645_v57 = vadd.f32 %v3644_v55, %v3643_v49  ;;  %v3726_v58 = vpop.f32.mrb[41].mxu1  ;;  %v3646_v60 = vpop.f32.mrb[42].mxu0  ;;  %v134_v49 = vld [vmem:[%s5524_s0 + $0x3b8] sm:$0xff] }
 0x149   :  { %v3727_v0 = vadd.f32 %v3726_v58, %v3725_v54  ;;  %v3728_v1 = vpop.f32.mrb[42].mxu1  ;;  %v3647_v2 = vpop.f32.mrb[43].mxu0  ;;  %v3270_v54 = vcombine.low %v117_v9, %v125_v10  ;;  %v3287_v60 = vcombine.high %v133_v42, %v141_v43  ;;  %v149_v9 = vld [vmem:[%s5524_s0 + $0x430] sm:$0xff] }
 0x14a   :  { %v2185_v4 = vadd.f32 %v3645_v57, %v5110_v32  ;;  %v3729_v5 = vpop.f32.mrb[43].mxu1  ;;  %v118_v32 = vld [vmem:[%s5524_s0 + $0x338] sm:$0xff]  ;;  %v157_v10 = vld [vmem:[%s5524_s0 + $0x470] sm:$0xff] }
 0x14b   :  { %2855 = vmatmul.mubr.bf16.gmra.mrb[148].mxu0 %v3238_v56  ;;  %v3273_v30 = vcombine.high %v118_v32, %v126_v15  ;;  %v3272_v58 = vcombine.low %v118_v32, %v126_v15  ;;  %v150_v15 = vld [vmem:[%s5524_s0 + $0x438] sm:$0xff] }
 0x14c   :  { %v5287_v6 = vadd.f32 %v3727_v0, %v2185_v4  ;;  %2975 = vmatmul.mubr.bf16.gmra.mrb[148].mxu1 %v3240_v61  ;;  %2862 = vmatprep.mubr.bf16.mxu0 %v3255_v63 }
 0x14d   :  { %2982 = vmatprep.mubr.bf16.mxu1 %v3257_v3 }
 0x14e   :  { %v3747_v13 = vpop.f32.mrb[44].mxu0 }
 0x14f   :  { %v3829_v17 = vpop.f32.mrb[44].mxu1  ;;  %v3748_v18 = vpop.f32.mrb[45].mxu0 }
 0x150   :  { %v3749_v21 = vadd.f32 %v3748_v18, %v3747_v13  ;;  %v3830_v22 = vpop.f32.mrb[45].mxu1  ;;  %v3750_v24 = vpop.f32.mrb[46].mxu0 }
 0x151   :  { %v3831_v27 = vadd.f32 %v3830_v22, %v3829_v17  ;;  %v3832_v28 = vpop.f32.mrb[46].mxu1  ;;  %v3751_v29 = vpop.f32.mrb[47].mxu0 }
 0x152   :  { %v2345_v31 = vadd.f32 %v3749_v21, %v5113_v48  ;;  %v3752_v34 = vadd.f32 %v3751_v29, %v3750_v24  ;;  %v3833_v35 = vpop.f32.mrb[47].mxu1  ;;  %v3286_v21 = vcombine.low %v133_v42, %v141_v43  ;;  %v165_v42 = vld [vmem:[%s5524_s0 + $0x4b0] sm:$0xff] }
 0x153   :  { %v3834_v36 = vadd.f32 %v3833_v35, %v3832_v28  ;;  %2863 = vmatmul.mubr.bf16.gmra.mrb[152].mxu0 %v3254_v20  ;;  %v173_v43 = vld [vmem:[%s5524_s0 + $0x4f0] sm:$0xff] }
 0x154   :  { %v5302_v38 = vadd.f32 %v3831_v27, %v2345_v31  ;;  %v2348_v39 = vadd.f32 %v3752_v34, %v5122_v52  ;;  %2983 = vmatmul.mubr.bf16.gmra.mrb[152].mxu1 %v3256_v25  ;;  %2870 = vmatprep.mubr.bf16.mxu0 %v3271_v26  ;;  %v142_v52 = vld [vmem:[%s5524_s0 + $0x3f8] sm:$0xff]  ;;  %v3303_v27 = vcombine.high %v149_v9, %v157_v10 }
 0x155   :  { %2990 = vmatprep.mubr.bf16.mxu1 %v3273_v30  ;;  %v3289_v1 = vcombine.high %v134_v49, %v142_v52  ;;  %v3288_v26 = vcombine.low %v134_v49, %v142_v52  ;;  %v166_v52 = vld [vmem:[%s5524_s0 + $0x4b8] sm:$0xff] }
 0x156   :  { %v5311_v48 = vadd.f32 %v3834_v36, %v2348_v39  ;;  %v3753_v44 = vpop.f32.mrb[48].mxu0 }
 0x157   :  { %v3835_v50 = vpop.f32.mrb[48].mxu1  ;;  %v3754_v53 = vpop.f32.mrb[49].mxu0 }
 0x158   :  { %v3755_v55 = vadd.f32 %v3754_v53, %v3753_v44  ;;  %v3836_v56 = vpop.f32.mrb[49].mxu1  ;;  %v3756_v57 = vpop.f32.mrb[50].mxu0 }
 0x159   :  { %v3837_v61 = vadd.f32 %v3836_v56, %v3835_v50  ;;  %v3838_v63 = vpop.f32.mrb[50].mxu1  ;;  %v3757_v0 = vpop.f32.mrb[51].mxu0 }
 0x15a   :  { %v2353_v2 = vadd.f32 %v3755_v55, %v5131_v8  ;;  %v3758_v3 = vadd.f32 %v3757_v0, %v3756_v57  ;;  %v3839_v4 = vpop.f32.mrb[51].mxu1  ;;  %v3302_v55 = vcombine.low %v149_v9, %v157_v10  ;;  %v181_v9 = vld [vmem:[%s5524_s0 + $0x530] sm:$0x11] }
 0x15b   :  { %v3840_v5 = vadd.f32 %v3839_v4, %v3838_v63  ;;  %2871 = vmatmul.mubr.bf16.gmra.mrb[156].mxu0 %v3270_v54 }
 0x15c   :  { %v5320_v13 = vadd.f32 %v3837_v61, %v2353_v2  ;;  %v2356_v17 = vadd.f32 %v3758_v3, %v5140_v12  ;;  %2991 = vmatmul.mubr.bf16.gmra.mrb[156].mxu1 %v3272_v58  ;;  %2878 = vmatprep.mubr.bf16.mxu0 %v3287_v60  ;;  %v158_v12 = vld [vmem:[%s5524_s0 + $0x478] sm:$0xff]  ;;  %v3319_v61 = vcombine.high %v165_v42, %v173_v43 }
 0x15d   :  { %2998 = vmatprep.mubr.bf16.mxu1 %v3289_v1  ;;  %v3305_v31 = vcombine.high %v150_v15, %v158_v12  ;;  %v3304_v60 = vcombine.low %v150_v15, %v158_v12 }
 0x15e   :  { %v5329_v8 = vadd.f32 %v3840_v5, %v2356_v17  ;;  %v3759_v32 = vpop.f32.mrb[52].mxu0 }
 0x15f   :  { %v3841_v18 = vpop.f32.mrb[52].mxu1  ;;  %v3760_v20 = vpop.f32.mrb[53].mxu0 }
 0x160   :  { %v3761_v22 = vadd.f32 %v3760_v20, %v3759_v32  ;;  %v3842_v24 = vpop.f32.mrb[53].mxu1  ;;  %v3762_v25 = vpop.f32.mrb[54].mxu0 }
 0x161   :  { %v3843_v28 = vadd.f32 %v3842_v24, %v3841_v18  ;;  %v3844_v29 = vpop.f32.mrb[54].mxu1  ;;  %v3763_v30 = vpop.f32.mrb[55].mxu0 }
 0x162   :  { %v2361_v34 = vadd.f32 %v3761_v22, %v5149_v33  ;;  %v3764_v35 = vadd.f32 %v3763_v30, %v3762_v25  ;;  %v3845_v36 = vpop.f32.mrb[55].mxu1 }
 0x163   :  { %v3846_v39 = vadd.f32 %v3845_v36, %v3844_v29  ;;  %2879 = vmatmul.mubr.bf16.gmra.mrb[160].mxu0 %v3286_v21  ;;  %v3318_v21 = vcombine.low %v165_v42, %v173_v43 }
 0x164   :  { %v5338_v44 = vadd.f32 %v3843_v28, %v2361_v34  ;;  %v2364_v50 = vadd.f32 %v3764_v35, %v5158_v37  ;;  %2999 = vmatmul.mubr.bf16.gmra.mrb[160].mxu1 %v3288_v26  ;;  %2886 = vmatprep.mubr.bf16.mxu0 %v3303_v27  ;;  %v174_v37 = vld [vmem:[%s5524_s0 + $0x4f8] sm:$0xff]  ;;  %v3335_v26 = vcombine.high %v181_v9, %v181_v9 }
 0x165   :  { %3006 = vmatprep.mubr.bf16.mxu1 %v3305_v31  ;;  %v3321_v2 = vcombine.high %v166_v52, %v174_v37  ;;  %v3320_v25 = vcombine.low %v166_v52, %v174_v37  ;;  %v3334_v37 = vcombine.low %v181_v9, %v181_v9 }
 0x166   :  { %v5347_v33 = vadd.f32 %v3846_v39, %v2364_v50  ;;  %v3765_v49 = vpop.f32.mrb[56].mxu0 }
 0x167   :  { %v3847_v53 = vpop.f32.mrb[56].mxu1  ;;  %v3766_v54 = vpop.f32.mrb[57].mxu0 }
 0x168   :  { %v3767_v56 = vadd.f32 %v3766_v54, %v3765_v49  ;;  %v3848_v57 = vpop.f32.mrb[57].mxu1  ;;  %v3768_v58 = vpop.f32.mrb[58].mxu0 }
 0x169   :  { %v3849_v63 = vadd.f32 %v3848_v57, %v3847_v53  ;;  %v3850_v0 = vpop.f32.mrb[58].mxu1  ;;  %v3769_v1 = vpop.f32.mrb[59].mxu0 }
 0x16a   :  { %v2369_v3 = vadd.f32 %v3767_v56, %v5167_v59  ;;  %v3770_v4 = vadd.f32 %v3769_v1, %v3768_v58  ;;  %v3851_v5 = vpop.f32.mrb[59].mxu1  ;;  %v182_v59 = vld [vmem:[%s5524_s0 + $0x538] sm:$0x11] }
 0x16b   :  { %v3852_v17 = vadd.f32 %v3851_v5, %v3850_v0  ;;  %2887 = vmatmul.mubr.bf16.gmra.mrb[164].mxu0 %v3302_v55  ;;  %v3337_v30 = vcombine.high %v182_v59, %v182_v59  ;;  %v3336_v55 = vcombine.low %v182_v59, %v182_v59 }
 0x16c   :  { %v5356_v32 = vadd.f32 %v3849_v63, %v2369_v3  ;;  %v2372_v18 = vadd.f32 %v3770_v4, %v5173_v62  ;;  %3007 = vmatmul.mubr.bf16.gmra.mrb[164].mxu1 %v3304_v60  ;;  %2894 = vmatprep.mubr.bf16.mxu0 %v3319_v61 }
 0x16d   :  { %3014 = vmatprep.mubr.bf16.mxu1 %v3321_v2 }
 0x16e   :  { %v5362_v10 = vadd.f32 %v3852_v17, %v2372_v18  ;;  %v3771_v15 = vpop.f32.mrb[60].mxu0 }
 0x16f   :  { %v3853_v12 = vpop.f32.mrb[60].mxu1  ;;  %v3772_v20 = vpop.f32.mrb[61].mxu0 }
 0x170   :  { %v3773_v22 = vadd.f32 %v3772_v20, %v3771_v15  ;;  %v3854_v24 = vpop.f32.mrb[61].mxu1  ;;  %v3774_v62 = vpop.f32.mrb[62].mxu0 }
 0x171   :  { %v3855_v27 = vadd.f32 %v3854_v24, %v3853_v12  ;;  %v3856_v28 = vpop.f32.mrb[62].mxu1  ;;  %v3775_v29 = vpop.f32.mrb[63].mxu0 }
 0x172   :  { %v2377_v31 = vadd.f32 %v3773_v22, %v5179_v19  ;;  %v3776_v34 = vadd.f32 %v3775_v29, %v3774_v62  ;;  %v3857_v35 = vpop.f32.mrb[63].mxu1 }
 0x173   :  { %v3858_v36 = vadd.f32 %v3857_v35, %v3856_v28  ;;  %2895 = vmatmul.mubr.bf16.gmra.mrb[168].mxu0 %v3318_v21 }
 0x174   :  { %v5368_v39 = vadd.f32 %v3855_v27, %v2377_v31  ;;  %v2380_v50 = vadd.f32 %v3776_v34, %v5188_v23  ;;  %3015 = vmatmul.mubr.bf16.gmra.mrb[168].mxu1 %v3320_v25  ;;  %2902 = vmatprep.mubr.bf16.mxu0 %v3335_v26 }
 0x175   :  { %3022 = vmatprep.mubr.bf16.mxu1 %v3337_v30 }
 0x176   :  { %v5371_v42 = vadd.f32 %v3858_v36, %v2380_v50  ;;  %v3777_v43 = vpop.f32.mrb[64].mxu0 }
 0x177   :  { %v3859_v49 = vpop.f32.mrb[64].mxu1  ;;  %v3778_v52 = vpop.f32.mrb[65].mxu0 }
 0x178   :  { %v3779_v53 = vadd.f32 %v3778_v52, %v3777_v43  ;;  %v3860_v54 = vpop.f32.mrb[65].mxu1  ;;  %v3780_v19 = vpop.f32.mrb[66].mxu0 }
 0x179   :  { %v3861_v56 = vadd.f32 %v3860_v54, %v3859_v49  ;;  %v3862_v57 = vpop.f32.mrb[66].mxu1  ;;  %v3781_v58 = vpop.f32.mrb[67].mxu0 }
 0x17a   :  { %v2385_v60 = vadd.f32 %v3779_v53, %v5197_v46  ;;  %v3782_v61 = vadd.f32 %v3781_v58, %v3780_v19  ;;  %v3863_v23 = vpop.f32.mrb[67].mxu1 }
 0x17b   :  { %v3864_v63 = vadd.f32 %v3863_v23, %v3862_v57  ;;  %2903 = vmatmul.mubr.bf16.gmra.mrb[172].mxu0 %v3334_v37 }
 0x17c   :  { %v5374_v0 = vadd.f32 %v3861_v56, %v2385_v60  ;;  %v2388_v1 = vadd.f32 %v3782_v61, %v5206_v51  ;;  %3023 = vmatmul.mubr.bf16.gmra.mrb[172].mxu1 %v3336_v55 }
 0x17e   :  { %v5377_v2 = vadd.f32 %v3864_v63, %v2388_v1  ;;  %v3783_v3 = vpop.f32.mrb[68].mxu0 }
 0x17f   :  { %v3865_v4 = vpop.f32.mrb[68].mxu1  ;;  %v3784_v5 = vpop.f32.mrb[69].mxu0 }
 0x180   :  { %v3785_v17 = vadd.f32 %v3784_v5, %v3783_v3  ;;  %v3866_v18 = vpop.f32.mrb[69].mxu1  ;;  %v3786_v9 = vpop.f32.mrb[70].mxu0 }
 0x181   :  { %v3867_v15 = vadd.f32 %v3866_v18, %v3865_v4  ;;  %v3868_v59 = vpop.f32.mrb[70].mxu1  ;;  %v3787_v46 = vpop.f32.mrb[71].mxu0 }
 0x182   :  { %v2393_v12 = vadd.f32 %v3785_v17, %v5215_v11  ;;  %v3788_v20 = vadd.f32 %v3787_v46, %v3786_v9  ;;  %v3869_v21 = vpop.f32.mrb[71].mxu1 }
 0x183   :  { %v3870_v22 = vadd.f32 %v3869_v21, %v3868_v59 }
 0x184   :  { %v5380_v24 = vadd.f32 %v3867_v15, %v2393_v12  ;;  %v2396_v51 = vadd.f32 %v3788_v20, %v5224_v16 }
 0x186   :  { %v5383_v62 = vadd.f32 %v3870_v22, %v2396_v51  ;;  %v3789_v25 = vpop.f32.mrb[72].mxu0 }
 0x187   :  { %v3871_v26 = vpop.f32.mrb[72].mxu1  ;;  %v3790_v27 = vpop.f32.mrb[73].mxu0 }
 0x188   :  { %v3791_v28 = vadd.f32 %v3790_v27, %v3789_v25  ;;  %v3872_v29 = vpop.f32.mrb[73].mxu1  ;;  %v3792_v30 = vpop.f32.mrb[74].mxu0 }
 0x189   :  { %v3873_v31 = vadd.f32 %v3872_v29, %v3871_v26  ;;  %v3874_v34 = vpop.f32.mrb[74].mxu1  ;;  %v3793_v35 = vpop.f32.mrb[75].mxu0 }
 0x18a   :  { %v2401_v11 = vadd.f32 %v3791_v28, %v5233_v41  ;;  %v3794_v36 = vadd.f32 %v3793_v35, %v3792_v30  ;;  %v3875_v50 = vpop.f32.mrb[75].mxu1 }
 0x18b   :  { %v3876_v43 = vadd.f32 %v3875_v50, %v3874_v34 }
 0x18c   :  { %v5386_v49 = vadd.f32 %v3873_v31, %v2401_v11  ;;  %v2404_v16 = vadd.f32 %v3794_v36, %v5242_v45 }
 0x18e   :  { %v5389_v52 = vadd.f32 %v3876_v43, %v2404_v16  ;;  %v3795_v37 = vpop.f32.mrb[76].mxu0 }
 0x18f   :  { %v3877_v53 = vpop.f32.mrb[76].mxu1  ;;  %v3796_v54 = vpop.f32.mrb[77].mxu0 }
 0x190   :  { %v3797_v19 = vadd.f32 %v3796_v54, %v3795_v37  ;;  %v3878_v55 = vpop.f32.mrb[77].mxu1  ;;  %v3798_v56 = vpop.f32.mrb[78].mxu0 }
 0x191   :  { %v3879_v57 = vadd.f32 %v3878_v55, %v3877_v53  ;;  %v3880_v58 = vpop.f32.mrb[78].mxu1  ;;  %v3799_v60 = vpop.f32.mrb[79].mxu0 }
 0x192   :  { %v2409_v41 = vadd.f32 %v3797_v19, %v5251_v7  ;;  %v3800_v61 = vadd.f32 %v3799_v60, %v3798_v56  ;;  %v3881_v23 = vpop.f32.mrb[79].mxu1 }
 0x193   :  { %v3882_v63 = vadd.f32 %v3881_v23, %v3880_v58 }
 0x194   :  { %v5392_v1 = vadd.f32 %v3879_v57, %v2409_v41  ;;  %v2412_v45 = vadd.f32 %v3800_v61, %v5260_v14 }
 0x196   :  { %v5395_v3 = vadd.f32 %v3882_v63, %v2412_v45  ;;  %v3801_v4 = vpop.f32.mrb[80].mxu0 }
 0x197   :  { %v3883_v5 = vpop.f32.mrb[80].mxu1  ;;  %v3802_v17 = vpop.f32.mrb[81].mxu0 }
 0x198   :  { %v3803_v18 = vadd.f32 %v3802_v17, %v3801_v4  ;;  %v3884_v9 = vpop.f32.mrb[81].mxu1  ;;  %v3804_v15 = vpop.f32.mrb[82].mxu0 }
 0x199   :  { %v3885_v59 = vadd.f32 %v3884_v9, %v3883_v5  ;;  %v3886_v46 = vpop.f32.mrb[82].mxu1  ;;  %v3805_v12 = vpop.f32.mrb[83].mxu0 }
 0x19a   :  { %v2417_v7 = vadd.f32 %v3803_v18, %v5269_v40  ;;  %v3806_v20 = vadd.f32 %v3805_v12, %v3804_v15  ;;  %v3887_v21 = vpop.f32.mrb[83].mxu1 }
 0x19b   :  { %v3888_v22 = vadd.f32 %v3887_v21, %v3886_v46 }
 0x19c   :  { %v5398_v51 = vadd.f32 %v3885_v59, %v2417_v7  ;;  %v2420_v14 = vadd.f32 %v3806_v20, %v5278_v47 }
 0x19e   :  { %v5401_v25 = vadd.f32 %v3888_v22, %v2420_v14  ;;  %v3807_v26 = vpop.f32.mrb[84].mxu0 }
 0x19f   :  { %v3889_v27 = vpop.f32.mrb[84].mxu1  ;;  %v3808_v28 = vpop.f32.mrb[85].mxu0 }
 0x1a0   :  { %v3809_v29 = vadd.f32 %v3808_v28, %v3807_v26  ;;  %v3890_v30 = vpop.f32.mrb[85].mxu1  ;;  %v3810_v31 = vpop.f32.mrb[86].mxu0 }
 0x1a1   :  { %v3891_v34 = vadd.f32 %v3890_v30, %v3889_v27  ;;  %v3892_v35 = vpop.f32.mrb[86].mxu1  ;;  %v3811_v11 = vpop.f32.mrb[87].mxu0 }
 0x1a2   :  { %v2425_v40 = vadd.f32 %v3809_v29, %v5287_v6  ;;  %v3893_v36 = vpop.f32.mrb[87].mxu1 }
 0x1a4   :  { %v5404_v50 = vadd.f32 %v3891_v34, %v2425_v40 }
 0x1a6   :  { %v3911_v43 = vpop.f32.mrb[88].mxu0 }
 0x1a7   :  { %v3993_v16 = vpop.f32.mrb[88].mxu1  ;;  %v3912_v37 = vpop.f32.mrb[89].mxu0 }
 0x1a8   :  { %v3913_v47 = vadd.f32 %v3912_v37, %v3911_v43  ;;  %v3994_v53 = vpop.f32.mrb[89].mxu1  ;;  %v3914_v54 = vpop.f32.mrb[90].mxu0 }
 0x1a9   :  { %v3995_v19 = vadd.f32 %v3994_v53, %v3993_v16  ;;  %v3996_v55 = vpop.f32.mrb[90].mxu1  ;;  %v3915_v56 = vpop.f32.mrb[91].mxu0 }
 0x1aa   :  { %v2585_v57 = vadd.f32 %v3913_v47, %v5302_v38  ;;  %v3916_v58 = vadd.f32 %v3915_v56, %v3914_v54  ;;  %v3997_v60 = vpop.f32.mrb[91].mxu1 }
 0x1ab   :  { %v3998_v41 = vadd.f32 %v3997_v60, %v3996_v55 }
 0x1ac   :  { %v5407_v61 = vadd.f32 %v3995_v19, %v2585_v57  ;;  %v2588_v6 = vadd.f32 %v3916_v58, %v5311_v48 }
 0x1ae   :  { %v5410_v23 = vadd.f32 %v3998_v41, %v2588_v6  ;;  %v3917_v63 = vpop.f32.mrb[92].mxu0 }
 0x1af   :  { %v3999_v45 = vpop.f32.mrb[92].mxu1  ;;  %v3918_v4 = vpop.f32.mrb[93].mxu0 }
 0x1b0   :  { %v3919_v5 = vadd.f32 %v3918_v4, %v3917_v63  ;;  %v4000_v17 = vpop.f32.mrb[93].mxu1  ;;  %v3920_v18 = vpop.f32.mrb[94].mxu0 }
 0x1b1   :  { %v4001_v9 = vadd.f32 %v4000_v17, %v3999_v45  ;;  %v4002_v15 = vpop.f32.mrb[94].mxu1  ;;  %v3921_v59 = vpop.f32.mrb[95].mxu0 }
 0x1b2   :  { %v2593_v38 = vadd.f32 %v3919_v5, %v5320_v13  ;;  %v3922_v46 = vadd.f32 %v3921_v59, %v3920_v18  ;;  %v4003_v12 = vpop.f32.mrb[95].mxu1 }
 0x1b3   :  { %v4004_v7 = vadd.f32 %v4003_v12, %v4002_v15 }
 0x1b4   :  { %v5413_v20 = vadd.f32 %v4001_v9, %v2593_v38  ;;  %v2596_v48 = vadd.f32 %v3922_v46, %v5329_v8 }
 0x1b6   :  { %v5416_v21 = vadd.f32 %v4004_v7, %v2596_v48  ;;  %v3923_v22 = vpop.f32.mrb[96].mxu0 }
 0x1b7   :  { %v4005_v14 = vpop.f32.mrb[96].mxu1  ;;  %v3924_v26 = vpop.f32.mrb[97].mxu0 }
 0x1b8   :  { %v3925_v27 = vadd.f32 %v3924_v26, %v3923_v22  ;;  %v4006_v28 = vpop.f32.mrb[97].mxu1  ;;  %v3926_v29 = vpop.f32.mrb[98].mxu0 }
 0x1b9   :  { %v4007_v30 = vadd.f32 %v4006_v28, %v4005_v14  ;;  %v4008_v31 = vpop.f32.mrb[98].mxu1  ;;  %v3927_v34 = vpop.f32.mrb[99].mxu0 }
 0x1ba   :  { %v2601_v13 = vadd.f32 %v3925_v27, %v5338_v44  ;;  %v3928_v35 = vadd.f32 %v3927_v34, %v3926_v29  ;;  %v4009_v11 = vpop.f32.mrb[99].mxu1 }
 0x1bb   :  { %v4010_v40 = vadd.f32 %v4009_v11, %v4008_v31 }
 0x1bc   :  { %v5419_v36 = vadd.f32 %v4007_v30, %v2601_v13  ;;  %v2604_v8 = vadd.f32 %v3928_v35, %v5347_v33 }
 0x1be   :  { %v5422_v43 = vadd.f32 %v4010_v40, %v2604_v8  ;;  %v3929_v16 = vpop.f32.mrb[100].mxu0 }
 0x1bf   :  { %v4011_v37 = vpop.f32.mrb[100].mxu1  ;;  %v3930_v47 = vpop.f32.mrb[101].mxu0 }
 0x1c0   :  { %v3931_v53 = vadd.f32 %v3930_v47, %v3929_v16  ;;  %v4012_v54 = vpop.f32.mrb[101].mxu1  ;;  %v3932_v19 = vpop.f32.mrb[102].mxu0 }
 0x1c1   :  { %v4013_v55 = vadd.f32 %v4012_v54, %v4011_v37  ;;  %v4014_v56 = vpop.f32.mrb[102].mxu1  ;;  %v3933_v57 = vpop.f32.mrb[103].mxu0 }
 0x1c2   :  { %v2609_v44 = vadd.f32 %v3931_v53, %v5356_v32  ;;  %v3934_v58 = vadd.f32 %v3933_v57, %v3932_v19  ;;  %v4015_v60 = vpop.f32.mrb[103].mxu1 }
 0x1c3   :  { %v4016_v41 = vadd.f32 %v4015_v60, %v4014_v56 }
 0x1c4   :  { %v5425_v6 = vadd.f32 %v4013_v55, %v2609_v44  ;;  %v2612_v33 = vadd.f32 %v3934_v58, %v5362_v10 }
 0x1c6   :  { %v5428_v63 = vadd.f32 %v4016_v41, %v2612_v33  ;;  %v3935_v45 = vpop.f32.mrb[104].mxu0 }
 0x1c7   :  { %v4017_v4 = vpop.f32.mrb[104].mxu1  ;;  %v3936_v5 = vpop.f32.mrb[105].mxu0 }
 0x1c8   :  { %v3937_v17 = vadd.f32 %v3936_v5, %v3935_v45  ;;  %v4018_v18 = vpop.f32.mrb[105].mxu1  ;;  %v3938_v9 = vpop.f32.mrb[106].mxu0 }
 0x1c9   :  { %v4019_v15 = vadd.f32 %v4018_v18, %v4017_v4  ;;  %v4020_v59 = vpop.f32.mrb[106].mxu1  ;;  %v3939_v38 = vpop.f32.mrb[107].mxu0 }
 0x1ca   :  { %v2617_v32 = vadd.f32 %v3937_v17, %v5368_v39  ;;  %v3940_v46 = vadd.f32 %v3939_v38, %v3938_v9  ;;  %v4021_v12 = vpop.f32.mrb[107].mxu1 }
 0x1cb   :  { %v4022_v7 = vadd.f32 %v4021_v12, %v4020_v59 }
 0x1cc   :  { %v5431_v48 = vadd.f32 %v4019_v15, %v2617_v32  ;;  %v2620_v10 = vadd.f32 %v3940_v46, %v5371_v42 }
 0x1ce   :  { %v5434_v22 = vadd.f32 %v4022_v7, %v2620_v10  ;;  %v3941_v14 = vpop.f32.mrb[108].mxu0 }
 0x1cf   :  { %v4023_v26 = vpop.f32.mrb[108].mxu1  ;;  %v3942_v27 = vpop.f32.mrb[109].mxu0 }
 0x1d0   :  { %v3943_v28 = vadd.f32 %v3942_v27, %v3941_v14  ;;  %v4024_v29 = vpop.f32.mrb[109].mxu1  ;;  %v3944_v30 = vpop.f32.mrb[110].mxu0 }
 0x1d1   :  { %v4025_v31 = vadd.f32 %v4024_v29, %v4023_v26  ;;  %v4026_v34 = vpop.f32.mrb[110].mxu1  ;;  %v3945_v13 = vpop.f32.mrb[111].mxu0 }
 0x1d2   :  { %v2625_v39 = vadd.f32 %v3943_v28, %v5374_v0  ;;  %v3946_v35 = vadd.f32 %v3945_v13, %v3944_v30  ;;  %v4027_v11 = vpop.f32.mrb[111].mxu1 }
 0x1d3   :  { %v4028_v40 = vadd.f32 %v4027_v11, %v4026_v34 }
 0x1d4   :  { %v5437_v8 = vadd.f32 %v4025_v31, %v2625_v39  ;;  %v2628_v42 = vadd.f32 %v3946_v35, %v5377_v2 }
 0x1d6   :  { %v5440_v16 = vadd.f32 %v4028_v40, %v2628_v42  ;;  %v3947_v37 = vpop.f32.mrb[112].mxu0 }
 0x1d7   :  { %v4029_v47 = vpop.f32.mrb[112].mxu1  ;;  %v3948_v53 = vpop.f32.mrb[113].mxu0 }
 0x1d8   :  { %v3949_v54 = vadd.f32 %v3948_v53, %v3947_v37  ;;  %v4030_v19 = vpop.f32.mrb[113].mxu1  ;;  %v3950_v55 = vpop.f32.mrb[114].mxu0 }
 0x1d9   :  { %v4031_v56 = vadd.f32 %v4030_v19, %v4029_v47  ;;  %v4032_v57 = vpop.f32.mrb[114].mxu1  ;;  %v3951_v44 = vpop.f32.mrb[115].mxu0 }
 0x1da   :  { %v2633_v0 = vadd.f32 %v3949_v54, %v5380_v24  ;;  %v3952_v58 = vadd.f32 %v3951_v44, %v3950_v55  ;;  %v4033_v60 = vpop.f32.mrb[115].mxu1 }
 0x1db   :  { %v4034_v41 = vadd.f32 %v4033_v60, %v4032_v57 }
 0x1dc   :  { %v5443_v33 = vadd.f32 %v4031_v56, %v2633_v0  ;;  %v2636_v2 = vadd.f32 %v3952_v58, %v5383_v62 }
 0x1de   :  { %v5446_v45 = vadd.f32 %v4034_v41, %v2636_v2  ;;  %v3953_v4 = vpop.f32.mrb[116].mxu0 }
 0x1df   :  { %v4035_v5 = vpop.f32.mrb[116].mxu1  ;;  %v3954_v17 = vpop.f32.mrb[117].mxu0 }
 0x1e0   :  { %v3955_v18 = vadd.f32 %v3954_v17, %v3953_v4  ;;  %v4036_v9 = vpop.f32.mrb[117].mxu1  ;;  %v3956_v15 = vpop.f32.mrb[118].mxu0 }
 0x1e1   :  { %v4037_v59 = vadd.f32 %v4036_v9, %v4035_v5  ;;  %v4038_v38 = vpop.f32.mrb[118].mxu1  ;;  %v3957_v32 = vpop.f32.mrb[119].mxu0 }
 0x1e2   :  { %v2641_v24 = vadd.f32 %v3955_v18, %v5386_v49  ;;  %v3958_v46 = vadd.f32 %v3957_v32, %v3956_v15  ;;  %v4039_v12 = vpop.f32.mrb[119].mxu1 }
 0x1e3   :  { %v4040_v7 = vadd.f32 %v4039_v12, %v4038_v38 }
 0x1e4   :  { %v5449_v10 = vadd.f32 %v4037_v59, %v2641_v24  ;;  %v2644_v62 = vadd.f32 %v3958_v46, %v5389_v52 }
 0x1e6   :  { %v5452_v14 = vadd.f32 %v4040_v7, %v2644_v62  ;;  %v3959_v26 = vpop.f32.mrb[120].mxu0 }
 0x1e7   :  { %v4041_v27 = vpop.f32.mrb[120].mxu1  ;;  %v3960_v28 = vpop.f32.mrb[121].mxu0 }
 0x1e8   :  { %v3961_v29 = vadd.f32 %v3960_v28, %v3959_v26  ;;  %v4042_v30 = vpop.f32.mrb[121].mxu1  ;;  %v3962_v31 = vpop.f32.mrb[122].mxu0 }
 0x1e9   :  { %v4043_v34 = vadd.f32 %v4042_v30, %v4041_v27  ;;  %v4044_v13 = vpop.f32.mrb[122].mxu1  ;;  %v3963_v39 = vpop.f32.mrb[123].mxu0 }
 0x1ea   :  { %v2649_v49 = vadd.f32 %v3961_v29, %v5392_v1  ;;  %v3964_v35 = vadd.f32 %v3963_v39, %v3962_v31  ;;  %v4045_v11 = vpop.f32.mrb[123].mxu1 }
 0x1eb   :  { %v4046_v40 = vadd.f32 %v4045_v11, %v4044_v13 }
 0x1ec   :  { %v5455_v42 = vadd.f32 %v4043_v34, %v2649_v49  ;;  %v2652_v52 = vadd.f32 %v3964_v35, %v5395_v3 }
 0x1ee   :  { %v5458_v37 = vadd.f32 %v4046_v40, %v2652_v52  ;;  %v3965_v47 = vpop.f32.mrb[124].mxu0 }
 0x1ef   :  { %v4047_v53 = vpop.f32.mrb[124].mxu1  ;;  %v3966_v54 = vpop.f32.mrb[125].mxu0 }
 0x1f0   :  { %v3967_v19 = vadd.f32 %v3966_v54, %v3965_v47  ;;  %v4048_v55 = vpop.f32.mrb[125].mxu1  ;;  %v3968_v56 = vpop.f32.mrb[126].mxu0 }
 0x1f1   :  { %v4049_v57 = vadd.f32 %v4048_v55, %v4047_v53  ;;  %v4050_v44 = vpop.f32.mrb[126].mxu1  ;;  %v3969_v0 = vpop.f32.mrb[127].mxu0 }
 0x1f2   :  { %v2657_v1 = vadd.f32 %v3967_v19, %v5398_v51  ;;  %v3970_v58 = vadd.f32 %v3969_v0, %v3968_v56  ;;  %v4051_v60 = vpop.f32.mrb[127].mxu1 }
 0x1f3   :  { %v4052_v41 = vadd.f32 %v4051_v60, %v4050_v44 }
 0x1f4   :  { %v5461_v2 = vadd.f32 %v4049_v57, %v2657_v1  ;;  %v2660_v3 = vadd.f32 %v3970_v58, %v5401_v25 }
 0x1f6   :  { %v5464_v4 = vadd.f32 %v4052_v41, %v2660_v3  ;;  %v3971_v5 = vpop.f32.mrb[128].mxu0 }
 0x1f7   :  { %v4053_v17 = vpop.f32.mrb[128].mxu1  ;;  %v3972_v18 = vpop.f32.mrb[129].mxu0 }
 0x1f8   :  { %v3973_v9 = vadd.f32 %v3972_v18, %v3971_v5  ;;  %v4054_v15 = vpop.f32.mrb[129].mxu1  ;;  %v3974_v59 = vpop.f32.mrb[130].mxu0 }
 0x1f9   :  { %v4055_v38 = vadd.f32 %v4054_v15, %v4053_v17  ;;  %v4056_v32 = vpop.f32.mrb[130].mxu1  ;;  %v3975_v24 = vpop.f32.mrb[131].mxu0 }
 0x1fa   :  { %v2665_v51 = vadd.f32 %v3973_v9, %v5404_v50  ;;  %v4057_v46 = vpop.f32.mrb[131].mxu1 }
 0x1fc   :  { %v5467_v12 = vadd.f32 %v4055_v38, %v2665_v51 }
 0x1fe   :  { %v4075_v7 = vpop.f32.mrb[132].mxu0 }
 0x1ff   :  { %v4157_v62 = vpop.f32.mrb[132].mxu1  ;;  %v4076_v26 = vpop.f32.mrb[133].mxu0 }
 0x200   :  { %v4077_v25 = vadd.f32 %v4076_v26, %v4075_v7  ;;  %v4158_v27 = vpop.f32.mrb[133].mxu1  ;;  %v4078_v28 = vpop.f32.mrb[134].mxu0 }
 0x201   :  { %v4159_v29 = vadd.f32 %v4158_v27, %v4157_v62  ;;  %v4160_v30 = vpop.f32.mrb[134].mxu1  ;;  %v4079_v31 = vpop.f32.mrb[135].mxu0 }
 0x202   :  { %v2825_v34 = vadd.f32 %v4077_v25, %v5407_v61  ;;  %v4080_v13 = vadd.f32 %v4079_v31, %v4078_v28  ;;  %v4161_v39 = vpop.f32.mrb[135].mxu1 }
 0x203   :  { %v4162_v49 = vadd.f32 %v4161_v39, %v4160_v30 }
 0x204   :  { %v2945_v35 = vadd.f32 %v4159_v29, %v2825_v34  ;;  %v2828_v50 = vadd.f32 %v4080_v13, %v5410_v23 }
 0x206   :  { %v2948_v11 = vadd.f32 %v4162_v49, %v2828_v50  ;;  %v4081_v40 = vpop.f32.mrb[136].mxu0  ;;  %v3030_v53 = vmax.f32 %v2945_v35, 0.0 }
 0x207   :  { %v4163_v52 = vpop.f32.mrb[136].mxu1  ;;  %v4082_v47 = vpop.f32.mrb[137].mxu0 }
 0x208   :  { %v3031_v54 = vmax.f32 %v2948_v11, 0.0  ;;  %v4083_v19 = vadd.f32 %v4082_v47, %v4081_v40  ;;  %v4164_v55 = vpop.f32.mrb[137].mxu1  ;;  %v4084_v56 = vpop.f32.mrb[138].mxu0 }
 0x209   :  { %v4165_v57 = vadd.f32 %v4164_v55, %v4163_v52  ;;  %v4166_v44 = vpop.f32.mrb[138].mxu1  ;;  %v4085_v0 = vpop.f32.mrb[139].mxu0 }
 0x20a   :  { %v3511_v1 = vpack.c.bf16 %v3031_v54, %v3030_v53  ;;  %v2833_v61 = vadd.f32 %v4083_v19, %v5413_v20  ;;  %v4086_v58 = vadd.f32 %v4085_v0, %v4084_v56  ;;  %v4167_v60 = vpop.f32.mrb[139].mxu1 }
 0x20b   :  { %v4168_v41 = vadd.f32 %v4167_v60, %v4166_v44 }
 0x20c   :  { %3512 = vst [vmem:[%s5526_s3] sm:$0xff] %v3511_v1   ;;  %v2953_v23 = vadd.f32 %v4165_v57, %v2833_v61  ;;  %v2836_v3 = vadd.f32 %v4086_v58, %v5416_v21 }
 0x20e   :  { %v2956_v5 = vadd.f32 %v4168_v41, %v2836_v3  ;;  %v4087_v17 = vpop.f32.mrb[140].mxu0  ;;  %v3032_v15 = vmax.f32 %v2953_v23, 0.0 }
 0x20f   :  { %v4169_v18 = vpop.f32.mrb[140].mxu1  ;;  %v4088_v9 = vpop.f32.mrb[141].mxu0 }
 0x210   :  { %v3033_v59 = vmax.f32 %v2956_v5, 0.0  ;;  %v4089_v38 = vadd.f32 %v4088_v9, %v4087_v17  ;;  %v4170_v32 = vpop.f32.mrb[141].mxu1  ;;  %v4090_v24 = vpop.f32.mrb[142].mxu0 }
 0x211   :  { %v4171_v20 = vadd.f32 %v4170_v32, %v4169_v18  ;;  %v4172_v51 = vpop.f32.mrb[142].mxu1  ;;  %v4091_v46 = vpop.f32.mrb[143].mxu0 }
 0x212   :  { %v3516_v7 = vpack.c.bf16 %v3033_v59, %v3032_v15  ;;  %v2841_v62 = vadd.f32 %v4089_v38, %v5419_v36  ;;  %v4092_v26 = vadd.f32 %v4091_v46, %v4090_v24  ;;  %v4173_v25 = vpop.f32.mrb[143].mxu1 }
 0x213   :  { %v4174_v27 = vadd.f32 %v4173_v25, %v4172_v51 }
 0x214   :  { %3558 = vst [vmem:[%s5526_s3 + $0x8] sm:$0xff] %v3516_v7   ;;  %v2961_v21 = vadd.f32 %v4171_v20, %v2841_v62  ;;  %v2844_v28 = vadd.f32 %v4092_v26, %v5422_v43 }
 0x216   :  { %v2964_v29 = vadd.f32 %v4174_v27, %v2844_v28  ;;  %v4093_v30 = vpop.f32.mrb[144].mxu0  ;;  %v3034_v13 = vmax.f32 %v2961_v21, 0.0 }
 0x217   :  { %v4175_v31 = vpop.f32.mrb[144].mxu1  ;;  %v4094_v34 = vpop.f32.mrb[145].mxu0 }
 0x218   :  { %v3035_v39 = vmax.f32 %v2964_v29, 0.0  ;;  %v4095_v49 = vadd.f32 %v4094_v34, %v4093_v30  ;;  %v4176_v35 = vpop.f32.mrb[145].mxu1  ;;  %v4096_v50 = vpop.f32.mrb[146].mxu0 }
 0x219   :  { %v4177_v36 = vadd.f32 %v4176_v35, %v4175_v31  ;;  %v4178_v11 = vpop.f32.mrb[146].mxu1  ;;  %v4097_v40 = vpop.f32.mrb[147].mxu0 }
 0x21a   :  { %v3521_v52 = vpack.c.bf16 %v3035_v39, %v3034_v13  ;;  %v2849_v47 = vadd.f32 %v4095_v49, %v5425_v6  ;;  %v4098_v53 = vadd.f32 %v4097_v40, %v4096_v50  ;;  %v4179_v54 = vpop.f32.mrb[147].mxu1 }
 0x21b   :  { %v4180_v19 = vadd.f32 %v4179_v54, %v4178_v11 }
 0x21c   :  { %3559 = vst [vmem:[%s5526_s3 + $0x10] sm:$0xff] %v3521_v52   ;;  %v2969_v43 = vadd.f32 %v4177_v36, %v2849_v47  ;;  %v2852_v55 = vadd.f32 %v4098_v53, %v5428_v63 }
 0x21e   :  { %v2972_v56 = vadd.f32 %v4180_v19, %v2852_v55  ;;  %v4099_v57 = vpop.f32.mrb[148].mxu0  ;;  %v3036_v1 = vmax.f32 %v2969_v43, 0.0 }
 0x21f   :  { %v4181_v44 = vpop.f32.mrb[148].mxu1  ;;  %v4100_v0 = vpop.f32.mrb[149].mxu0 }
 0x220   :  { %v3037_v61 = vmax.f32 %v2972_v56, 0.0  ;;  %v4101_v58 = vadd.f32 %v4100_v0, %v4099_v57  ;;  %v4182_v60 = vpop.f32.mrb[149].mxu1  ;;  %v4102_v41 = vpop.f32.mrb[150].mxu0 }
 0x221   :  { %v4183_v6 = vadd.f32 %v4182_v60, %v4181_v44  ;;  %v4184_v23 = vpop.f32.mrb[150].mxu1  ;;  %v4103_v3 = vpop.f32.mrb[151].mxu0 }
 0x222   :  { %v3526_v5 = vpack.c.bf16 %v3037_v61, %v3036_v1  ;;  %v2857_v17 = vadd.f32 %v4101_v58, %v5431_v48  ;;  %v4104_v18 = vadd.f32 %v4103_v3, %v4102_v41  ;;  %v4185_v9 = vpop.f32.mrb[151].mxu1 }
 0x223   :  { %v4186_v15 = vadd.f32 %v4185_v9, %v4184_v23 }
 0x224   :  { %3560 = vst [vmem:[%s5526_s3 + $0x18] sm:$0xff] %v3526_v5   ;;  %v2977_v63 = vadd.f32 %v4183_v6, %v2857_v17  ;;  %v2860_v59 = vadd.f32 %v4104_v18, %v5434_v22 }
 0x226   :  { %v2980_v38 = vadd.f32 %v4186_v15, %v2860_v59  ;;  %v4105_v32 = vpop.f32.mrb[152].mxu0  ;;  %v3038_v51 = vmax.f32 %v2977_v63, 0.0 }
 0x227   :  { %v4187_v24 = vpop.f32.mrb[152].mxu1  ;;  %v4106_v20 = vpop.f32.mrb[153].mxu0 }
 0x228   :  { %v3039_v46 = vmax.f32 %v2980_v38, 0.0  ;;  %v4107_v7 = vadd.f32 %v4106_v20, %v4105_v32  ;;  %v4188_v62 = vpop.f32.mrb[153].mxu1  ;;  %v4108_v26 = vpop.f32.mrb[154].mxu0 }
 0x229   :  { %v4189_v48 = vadd.f32 %v4188_v62, %v4187_v24  ;;  %v4190_v25 = vpop.f32.mrb[154].mxu1  ;;  %v4109_v27 = vpop.f32.mrb[155].mxu0 }
 0x22a   :  { %v3531_v21 = vpack.c.bf16 %v3039_v46, %v3038_v51  ;;  %v2865_v28 = vadd.f32 %v4107_v7, %v5437_v8  ;;  %v4110_v29 = vadd.f32 %v4109_v27, %v4108_v26  ;;  %v4191_v30 = vpop.f32.mrb[155].mxu1 }
 0x22b   :  { %v4192_v31 = vadd.f32 %v4191_v30, %v4190_v25 }
 0x22c   :  { %3561 = vst [vmem:[%s5526_s3 + $0x20] sm:$0xff] %v3531_v21   ;;  %v2985_v22 = vadd.f32 %v4189_v48, %v2865_v28  ;;  %v2868_v34 = vadd.f32 %v4110_v29, %v5440_v16 }
 0x22e   :  { %v2988_v13 = vadd.f32 %v4192_v31, %v2868_v34  ;;  %v4111_v39 = vpop.f32.mrb[156].mxu0  ;;  %v3040_v50 = vmax.f32 %v2985_v22, 0.0 }
 0x22f   :  { %v4193_v49 = vpop.f32.mrb[156].mxu1  ;;  %v4112_v35 = vpop.f32.mrb[157].mxu0 }
 0x230   :  { %v3041_v36 = vmax.f32 %v2988_v13, 0.0  ;;  %v4113_v11 = vadd.f32 %v4112_v35, %v4111_v39  ;;  %v4194_v40 = vpop.f32.mrb[157].mxu1  ;;  %v4114_v52 = vpop.f32.mrb[158].mxu0 }
 0x231   :  { %v4195_v8 = vadd.f32 %v4194_v40, %v4193_v49  ;;  %v4196_v47 = vpop.f32.mrb[158].mxu1  ;;  %v4115_v53 = vpop.f32.mrb[159].mxu0 }
 0x232   :  { %v3536_v54 = vpack.c.bf16 %v3041_v36, %v3040_v50  ;;  %v2873_v19 = vadd.f32 %v4113_v11, %v5443_v33  ;;  %v4116_v43 = vadd.f32 %v4115_v53, %v4114_v52  ;;  %v4197_v55 = vpop.f32.mrb[159].mxu1 }
 0x233   :  { %v4198_v56 = vadd.f32 %v4197_v55, %v4196_v47 }
 0x234   :  { %3562 = vst [vmem:[%s5526_s3 + $0x28] sm:$0xff] %v3536_v54   ;;  %v2993_v16 = vadd.f32 %v4195_v8, %v2873_v19  ;;  %v2876_v57 = vadd.f32 %v4116_v43, %v5446_v45 }
 0x236   :  { %v2996_v44 = vadd.f32 %v4198_v56, %v2876_v57  ;;  %v4117_v0 = vpop.f32.mrb[160].mxu0  ;;  %v3042_v58 = vmax.f32 %v2993_v16, 0.0 }
 0x237   :  { %v4199_v1 = vpop.f32.mrb[160].mxu1  ;;  %v4118_v61 = vpop.f32.mrb[161].mxu0 }
 0x238   :  { %v3043_v60 = vmax.f32 %v2996_v44, 0.0  ;;  %v4119_v41 = vadd.f32 %v4118_v61, %v4117_v0  ;;  %v4200_v6 = vpop.f32.mrb[161].mxu1  ;;  %v4120_v23 = vpop.f32.mrb[162].mxu0 }
 0x239   :  { %v4201_v33 = vadd.f32 %v4200_v6, %v4199_v1  ;;  %v4202_v3 = vpop.f32.mrb[162].mxu1  ;;  %v4121_v5 = vpop.f32.mrb[163].mxu0 }
 0x23a   :  { %v3541_v17 = vpack.c.bf16 %v3043_v60, %v3042_v58  ;;  %v2881_v18 = vadd.f32 %v4119_v41, %v5449_v10  ;;  %v4122_v9 = vadd.f32 %v4121_v5, %v4120_v23  ;;  %v4203_v15 = vpop.f32.mrb[163].mxu1 }
 0x23b   :  { %v4204_v63 = vadd.f32 %v4203_v15, %v4202_v3 }
 0x23c   :  { %3563 = vst [vmem:[%s5526_s3 + $0x30] sm:$0xff] %v3541_v17   ;;  %v3001_v45 = vadd.f32 %v4201_v33, %v2881_v18  ;;  %v2884_v59 = vadd.f32 %v4122_v9, %v5452_v14 }
 0x23e   :  { %v3004_v38 = vadd.f32 %v4204_v63, %v2884_v59  ;;  %v4123_v32 = vpop.f32.mrb[164].mxu0  ;;  %v3044_v51 = vmax.f32 %v3001_v45, 0.0 }
 0x23f   :  { %v4205_v24 = vpop.f32.mrb[164].mxu1  ;;  %v4124_v20 = vpop.f32.mrb[165].mxu0 }
 0x240   :  { %v3045_v46 = vmax.f32 %v3004_v38, 0.0  ;;  %v4125_v7 = vadd.f32 %v4124_v20, %v4123_v32  ;;  %v4206_v62 = vpop.f32.mrb[165].mxu1  ;;  %v4126_v26 = vpop.f32.mrb[166].mxu0 }
 0x241   :  { %v4207_v10 = vadd.f32 %v4206_v62, %v4205_v24  ;;  %v4208_v48 = vpop.f32.mrb[166].mxu1  ;;  %v4127_v25 = vpop.f32.mrb[167].mxu0 }
 0x242   :  { %v3546_v27 = vpack.c.bf16 %v3045_v46, %v3044_v51  ;;  %v2889_v21 = vadd.f32 %v4125_v7, %v5455_v42  ;;  %v4128_v28 = vadd.f32 %v4127_v25, %v4126_v26  ;;  %v4209_v29 = vpop.f32.mrb[167].mxu1 }
 0x243   :  { %v4210_v30 = vadd.f32 %v4209_v29, %v4208_v48 }
 0x244   :  { %3564 = vst [vmem:[%s5526_s3 + $0x38] sm:$0xff] %v3546_v27   ;;  %v3009_v14 = vadd.f32 %v4207_v10, %v2889_v21  ;;  %v2892_v31 = vadd.f32 %v4128_v28, %v5458_v37 }
 0x246   :  { %v3012_v22 = vadd.f32 %v4210_v30, %v2892_v31  ;;  %v4129_v34 = vpop.f32.mrb[168].mxu0  ;;  %v3046_v49 = vmax.f32 %v3009_v14, 0.0 }
 0x247   :  { %v4211_v13 = vpop.f32.mrb[168].mxu1  ;;  %v4130_v39 = vpop.f32.mrb[169].mxu0 }
 0x248   :  { %v3047_v35 = vmax.f32 %v3012_v22, 0.0  ;;  %v4131_v50 = vadd.f32 %v4130_v39, %v4129_v34  ;;  %v4212_v36 = vpop.f32.mrb[169].mxu1  ;;  %v4132_v11 = vpop.f32.mrb[170].mxu0 }
 0x249   :  { %v4213_v42 = vadd.f32 %v4212_v36, %v4211_v13  ;;  %v4214_v40 = vpop.f32.mrb[170].mxu1  ;;  %v4133_v52 = vpop.f32.mrb[171].mxu0 }
 0x24a   :  { %v3551_v8 = vpack.c.bf16 %v3047_v35, %v3046_v49  ;;  %v2897_v47 = vadd.f32 %v4131_v50, %v5461_v2  ;;  %v4134_v53 = vadd.f32 %v4133_v52, %v4132_v11  ;;  %v4215_v54 = vpop.f32.mrb[171].mxu1 }
 0x24b   :  { %v4216_v19 = vadd.f32 %v4215_v54, %v4214_v40 }
 0x24c   :  { %3565 = vst [vmem:[%s5526_s3 + $0x40] sm:$0xff] %v3551_v8   ;;  %v3017_v37 = vadd.f32 %v4213_v42, %v2897_v47  ;;  %v2900_v43 = vadd.f32 %v4134_v53, %v5464_v4 }
 0x24e   :  { %v3020_v55 = vadd.f32 %v4216_v19, %v2900_v43  ;;  %v4135_v56 = vpop.f32.mrb[172].mxu0  ;;  %v3048_v44 = vmax.f32 %v3017_v37, 0.0 }
 0x24f   :  { %v4217_v16 = vpop.f32.mrb[172].mxu1  ;;  %v4136_v57 = vpop.f32.mrb[173].mxu0 }
 0x250   :  { %v3049_v0 = vmax.f32 %v3020_v55, 0.0  ;;  %v4137_v1 = vadd.f32 %v4136_v57, %v4135_v56  ;;  %v4218_v61 = vpop.f32.mrb[173].mxu1  ;;  %v4138_v58 = vpop.f32.mrb[174].mxu0 }
 0x251   :  { %v4219_v2 = vadd.f32 %v4218_v61, %v4217_v16  ;;  %v4220_v60 = vpop.f32.mrb[174].mxu1  ;;  %v4139_v41 = vpop.f32.mrb[175].mxu0 }
 0x252   :  { %v3556_v6 = vpack.c.bf16 %v3049_v0, %v3048_v44  ;;  %v2905_v23 = vadd.f32 %v4137_v1, %v5467_v12  ;;  %v4221_v33 = vpop.f32.mrb[175].mxu1 }
 0x254   :  { %3566 = vst [vmem:[%s5526_s3 + $0x48] sm:$0xff] %v3556_v6   ;;  %v3025_v4 = vadd.f32 %v4219_v2, %v2905_v23 }
 0x256   :  { %v3050_v3 = vmax.f32 %v3025_v4, 0.0 }
 0x258   :  { %v3507_v5 = vpack.c.bf16 %v3050_v3, %v3050_v3 }
 0x25a   :  { %3156 = vst [vmem:[%s5526_s3 + $0x50] sm:$0x1] %v3507_v5 }

// kernel: convq_forward.6
= control target key start
LH: loop header
LB: loop body
LE: loop exit
PB: predicated region body
PF: predicated region fallthrough
CT: control target
= control target key end

     0   :  { %vm2160_vm0 = vmmov 0   ;;  %s2695_s1 = inlined_call_operand.vmem [shape: bf16[1152,128], index: 1, kind: input, shape index: {}]   ;;  %s2696_s0 = inlined_call_operand.vmem [shape: bf16[98,1152], index: 0, kind: input, shape index: {}]   ;;  %s2697_s2 = inlined_call_operand.vmem [shape: f32[1,128], index: 2, kind: input, shape index: {}]   ;;  %s2698_s3 = inlined_call_operand.vmem [shape: bf16[98,128], index: 3, kind: output, shape index: {}]  }
   0x1   :  { %v2000_v0 = vld [vmem:[%s2695_s1 + $0x40] sm:$0xff]   ;;  %v2002_v2 = vld [vmem:[%s2695_s1 + $0x48] sm:$0xff]   ;;  %v2004_v4 = vld [vmem:[%s2695_s1 + $0x50] sm:$0xff]  }
   0x2   :  { %v2001_v1 = vld [vmem:[%s2695_s1] sm:$0xff]   ;;  %1982 = vmatprep.subr.bf16.mxu1 %v2000_v0  ;;  %1691 = vmatprep.subr.bf16.mxu0 %v2000_v0  ;;  %v2003_v3 = vld [vmem:[%s2695_s1 + $0x8] sm:$0xff]   ;;  %v2005_v5 = vld [vmem:[%s2695_s1 + $0x10] sm:$0xff]  }
   0x3   :  { %1990 = vmatpush3.bf16.msra.mxu1 %v2001_v1  ;;  %1692 = vmatpush3.bf16.msra.mxu0 %v2001_v1  ;;  %v2006_v6 = vld [vmem:[%s2695_s1 + $0x58] sm:$0xff]   ;;  %v2008_v8 = vld [vmem:[%s2695_s1 + $0x60] sm:$0xff]   ;;  %v2010_v10 = vld [vmem:[%s2695_s1 + $0x68] sm:$0xff]  }
   0x4   :  { %1983 = vmatprep.subr.bf16.mxu1 %v2002_v2  ;;  %1693 = vmatprep.subr.bf16.mxu0 %v2002_v2  ;;  %v2007_v7 = vld [vmem:[%s2695_s1 + $0x18] sm:$0xff]   ;;  %v2009_v9 = vld [vmem:[%s2695_s1 + $0x20] sm:$0xff]   ;;  %v2011_v12 = vld [vmem:[%s2695_s1 + $0x28] sm:$0xff]  }
   0x5   :  { %v2018_v11 = vld [vmem:[%s2696_s0 + $0x124] ss:$36 sps:$4 sm:$0xff]   ;;  %v2012_v14 = vld [vmem:[%s2695_s1 + $0x70] sm:$0xff]   ;;  %v2014_v16 = vld [vmem:[%s2695_s1 + $0x78] sm:$0xff]  }
   0x6   :  { %v2022_v13 = vld [vmem:[%s2696_s0 + $0x4] ss:$36 sps:$4 sm:$0xff]   ;;  %1035 = vmatprep.mubr.bf16.mxu1 %v2018_v11  ;;  %v2013_v15 = vld [vmem:[%s2695_s1 + $0x30] sm:$0xff]   ;;  %v2015_v17 = vld [vmem:[%s2695_s1 + $0x38] sm:$0xff]  }
   0x7   :  { %1991 = vmatpush3.bf16.msra.mxu1 %v2003_v3  ;;  %1694 = vmatpush3.bf16.msra.mxu0 %v2003_v3  ;;  %v2019_v18 = vld [vmem:[%s2695_s1 + $0xc0] sm:$0xff]   ;;  %v2026_v24 = vld [vmem:[%s2695_s1 + $0xc8] sm:$0xff]   ;;  %v2030_v30 = vld [vmem:[%s2695_s1 + $0xd0] sm:$0xff]  }
   0x8   :  { %1984 = vmatprep.subr.bf16.mxu1 %v2004_v4  ;;  %1695 = vmatprep.subr.bf16.mxu0 %v2004_v4  ;;  %v2016_v19 = vld [vmem:[%s2696_s0 + $0x120] ss:$36 sps:$4 sm:$0xff]   ;;  %v2028_v25 = vld [vmem:[%s2695_s1 + $0x148] sm:$0xff]   ;;  %v2035_v31 = vld [vmem:[%s2695_s1 + $0x150] sm:$0xff]  }
   0x9   :  { %1003 = vmatprep.mubr.bf16.mxu0 %v2022_v13  ;;  %v2020_v20 = vld [vmem:[%s2696_s0] ss:$36 sps:$4 sm:$0xff]   ;;  %v2031_v26 = vld [vmem:[%s2696_s0 + $0x4c] ss:$36 sps:$4 sm:$0xff]   ;;  %v2037_v36 = vld [vmem:[%s2695_s1 + $0xd8] sm:$0xff]  }
   0xa   :  { %v2024_v21 = vld [vmem:[%s2695_s1 + $0x140] sm:$0xff]   ;;  %v2027_v27 = vld [vmem:[%s2695_s1 + $0x88] sm:$0xff]   ;;  %v2033_v32 = vld [vmem:[%s2695_s1 + $0x90] sm:$0xff]  }
   0xb   :  { %1992 = vmatpush3.bf16.msra.mxu1 %v2005_v5  ;;  %1696 = vmatpush3.bf16.msra.mxu0 %v2005_v5  ;;  %v2023_v22 = vld [vmem:[%s2695_s1 + $0x80] sm:$0xff]   ;;  %v2038_v28 = vld [vmem:[%s2696_s0 + $0x16c] ss:$36 sps:$4 sm:$0xff]   ;;  %v2042_v37 = vld [vmem:[%s2695_s1 + $0x158] sm:$0xff]  }
   0xc   :  { %1985 = vmatprep.subr.bf16.mxu1 %v2006_v6  ;;  %1697 = vmatprep.subr.bf16.mxu0 %v2006_v6  ;;  %v2025_v23 = vld [vmem:[%s2695_s1 + $0x100] sm:$0xff]   ;;  %v2029_v29 = vld [vmem:[%s2695_s1 + $0x108] sm:$0xff]   ;;  %v2036_v35 = vld [vmem:[%s2695_s1 + $0x110] sm:$0xff]  }
   0xd   :  { %v2034_v33 = vld [vmem:[%s2696_s0 + $0x48] ss:$36 sps:$4 sm:$0xff]   ;;  %v2040_v38 = vld [vmem:[%s2695_s1 + $0x98] sm:$0xff]   ;;  %v2044_v41 = vld [vmem:[%s2695_s1 + $0xe0] sm:$0xff]  }
   0xe   :  { %v2041_v34 = vld [vmem:[%s2696_s0 + $0x168] ss:$36 sps:$4 sm:$0xff]   ;;  %v2045_v39 = vld [vmem:[%s2696_s0 + $0x94] ss:$36 sps:$4 sm:$0xff]   ;;  %v2049_v43 = vld [vmem:[%s2695_s1 + $0x160] sm:$0xff]  }
   0xf   :  { %1993 = vmatpush3.bf16.msra.mxu1 %v2007_v7  ;;  %1698 = vmatpush3.bf16.msra.mxu0 %v2007_v7  ;;  %v2043_v40 = vld [vmem:[%s2695_s1 + $0x118] sm:$0xff]   ;;  %v75_v42 = vld [vmem:[%s2696_s0 + $0x1b0] sm:$0x11]  ;;  %v2047_v45 = vld [vmem:[%s2695_s1 + $0xa0] sm:$0xff]   ;;  %v2159_v7 = vmov 0.0  }
  0x10   :  { %1986 = vmatprep.subr.bf16.mxu1 %v2008_v8  ;;  %1699 = vmatprep.subr.bf16.mxu0 %v2008_v8  ;;  %v1550_v44 = vcombine.high %v75_v42, %v75_v42  ;;  %v2048_v46 = vld [vmem:[%s2696_s0 + $0x90] ss:$36 sps:$4 sm:$0xff]   ;;  %v2050_v47 = vld [vmem:[%s2695_s1 + $0x120] sm:$0xff]   ;;  %v1549_v48 = vcombine.low %v75_v42, %v75_v42  ;;  %v2051_v49 = vld [vmem:[%s2695_s1 + $0xe8] sm:$0xff]  }
  0x11   :  { %v2055_v50 = vld [vmem:[%s2695_s1 + $0x168] sm:$0xff]   ;;  %v2058_v52 = vld [vmem:[%s2696_s0 + $0xdc] ss:$36 sps:$4 sm:$0xff]   ;;  %v2057_v54 = vld [vmem:[%s2695_s1 + $0xf0] sm:$0xff]  }
  0x12   :  { %v2053_v51 = vld [vmem:[%s2695_s1 + $0xa8] sm:$0xff]   ;;  %v2062_v55 = vld [vmem:[%s2695_s1 + $0x170] sm:$0xff]   ;;  %v2061_v57 = vld [vmem:[%s2696_s0 + $0xd8] ss:$36 sps:$4 sm:$0xff]  }
  0x13   :  { %1994 = vmatpush3.bf16.msra.mxu1 %v2009_v9  ;;  %1700 = vmatpush3.bf16.msra.mxu0 %v2009_v9  ;;  %v2056_v53 = vld [vmem:[%s2695_s1 + $0x128] sm:$0xff]   ;;  %v2060_v56 = vld [vmem:[%s2695_s1 + $0xb0] sm:$0xff]   ;;  %v2064_v59 = vld [vmem:[%s2695_s1 + $0xf8] sm:$0xff]  }
  0x14   :  { %1987 = vmatprep.subr.bf16.mxu1 %v2010_v10  ;;  %1701 = vmatprep.subr.bf16.mxu0 %v2010_v10  ;;  %v2063_v58 = vld [vmem:[%s2695_s1 + $0x130] sm:$0xff]   ;;  %v2066_v60 = vld [vmem:[%s2695_s1 + $0x178] sm:$0xff]   ;;  %v2071_v0 = vld [vmem:[%s2695_s1 + $0x1c0] sm:$0xff]  }
  0x15   :  { %v2069_v61 = vld [vmem:[%s2696_s0 + $0xc] ss:$36 sps:$4 sm:$0xff]   ;;  %v2065_v62 = vld [vmem:[%s2695_s1 + $0xb8] sm:$0xff]   ;;  %v2075_v4 = vld [vmem:[%s2695_s1 + $0x180] sm:$0xff]  }
  0x16   :  { %v2070_v63 = vld [vmem:[%s2695_s1 + $0x138] sm:$0xff]   ;;  %v2067_v2 = vld [vmem:[%s2696_s0 + $0x8] ss:$36 sps:$4 sm:$0xff]   ;;  %v2072_v3 = vld [vmem:[%s2696_s0 + $0x10] ss:$36 sps:$4 sm:$0xff]  }
  0x17   :  { %1995 = vmatpush3.bf16.msra.mxu1 %v2011_v12  ;;  %1702 = vmatpush3.bf16.msra.mxu0 %v2011_v12  ;;  %v2074_v1 = vld [vmem:[%s2696_s0 + $0x14] ss:$36 sps:$4 sm:$0xff]   ;;  %v2076_v5 = vld [vmem:[%s2695_s1 + $0x200] sm:$0xff]   ;;  %v2079_v8 = vld [vmem:[%s2695_s1 + $0x1c8] sm:$0xff]  }
  0x18   :  { %1988 = vmatprep.subr.bf16.mxu1 %v2012_v14  ;;  %1703 = vmatprep.subr.bf16.mxu0 %v2012_v14  ;;  %v2077_v6 = vld [vmem:[%s2696_s0 + $0x54] ss:$36 sps:$4 sm:$0xff]   ;;  %v2081_v9 = vld [vmem:[%s2695_s1 + $0x188] sm:$0xff]   ;;  %v2082_v10 = vld [vmem:[%s2696_s0 + $0x5c] ss:$36 sps:$4 sm:$0xff]  }
  0x19   :  { %v2085_v11 = vld [vmem:[%s2695_s1 + $0x208] sm:$0xff]   ;;  %v2086_v12 = vld [vmem:[%s2695_s1 + $0x1d0] sm:$0xff]   ;;  %v2084_v14 = vld [vmem:[%s2696_s0 + $0x58] ss:$36 sps:$4 sm:$0xff]  }
  0x1a   :  { %v2080_v13 = vld [vmem:[%s2696_s0 + $0x50] ss:$36 sps:$4 sm:$0xff]   ;;  %v2128_v42 = vld [vmem:[%s2695_s1 + $0x1f8] sm:$0xff]  }
  0x1b   :  { %1996 = vmatpush3.bf16.msra.mxu1 %v2013_v15  ;;  %1704 = vmatpush3.bf16.msra.mxu0 %v2013_v15  ;;  %v2087_v15 = vld [vmem:[%s2696_s0 + $0x9c] ss:$36 sps:$4 sm:$0xff]  }
  0x1c   :  { %1989 = vmatprep.subr.bf16.mxu1 %v2014_v16  ;;  %1705 = vmatprep.subr.bf16.mxu0 %v2014_v16  ;;  %v2089_v16 = vld [vmem:[%s2695_s1 + $0x190] sm:$0xff]  }
  0x1f   :  { %1997 = vmatpush3.bf16.msra.mxu1 %v2015_v17  ;;  %1706 = vmatpush3.bf16.msra.mxu0 %v2015_v17  ;;  %v2091_v17 = vld [vmem:[%s2696_s0 + $0xa4] ss:$36 sps:$4 sm:$0xff]  }
  0x20   :  { %1749 = vmatprep.subr.bf16.mxu1 %v2019_v18  ;;  %1807 = vmatprep.subr.bf16.mxu0 %v2024_v21  ;;  %v2094_v18 = vld [vmem:[%s2695_s1 + $0x210] sm:$0xff]   ;;  %v2090_v21 = vld [vmem:[%s2696_s0 + $0x98] ss:$36 sps:$4 sm:$0xff]  }
  0x22   :  { %1036 = vmatmul.mubr.bf16.vlgmr.msra.gmra.mrb[0].mxu1 %v2016_v19  ;;  %1004 = vmatmul.mubr.bf16.vlgmr.msra.gmra.mrb[0].mxu0 %v2020_v20  ;;  %v2095_v19 = vld [vmem:[%s2695_s1 + $0x1d8] sm:$0xff]  }
  0x23   :  { %1750 = vmatpush3.bf16.msra.mxu1 %v2023_v22  ;;  %1808 = vmatpush3.bf16.msra.mxu0 %v2025_v23  ;;  %v2096_v20 = vld [vmem:[%s2695_s1 + $0x198] sm:$0xff]   ;;  %v2093_v22 = vld [vmem:[%s2696_s0 + $0xa0] ss:$36 sps:$4 sm:$0xff]  }
  0x24   :  { %1751 = vmatprep.subr.bf16.mxu1 %v2026_v24  ;;  %1809 = vmatprep.subr.bf16.mxu0 %v2028_v25  ;;  %v2097_v23 = vld [vmem:[%s2696_s0 + $0xe4] ss:$36 sps:$4 sm:$0xff]   ;;  %v2100_v24 = vld [vmem:[%s2696_s0 + $0xec] ss:$36 sps:$4 sm:$0xff]   ;;  %v2103_v25 = vld [vmem:[%s2695_s1 + $0x218] sm:$0xff]  }
  0x25   :  { %1011 = vmatprep.mubr.bf16.mxu0 %v2031_v26  ;;  %1043 = vmatprep.mubr.bf16.mxu1 %v2038_v28  ;;  %v2104_v26 = vld [vmem:[%s2695_s1 + $0x1e0] sm:$0xff]  }
  0x26   :  { %v2099_v28 = vld [vmem:[%s2696_s0 + $0xe0] ss:$36 sps:$4 sm:$0xff]  }
  0x27   :  { %1752 = vmatpush3.bf16.msra.mxu1 %v2027_v27  ;;  %1810 = vmatpush3.bf16.msra.mxu0 %v2029_v29  ;;  %v2105_v27 = vld [vmem:[%s2695_s1 + $0x1a0] sm:$0xff]   ;;  %v2102_v29 = vld [vmem:[%s2696_s0 + $0xe8] ss:$36 sps:$4 sm:$0xff]  }
  0x28   :  { %1753 = vmatprep.subr.bf16.mxu1 %v2030_v30  ;;  %1811 = vmatprep.subr.bf16.mxu0 %v2035_v31  ;;  %v2112_v30 = vld [vmem:[%s2695_s1 + $0x220] sm:$0xff]   ;;  %v2113_v31 = vld [vmem:[%s2695_s1 + $0x1e8] sm:$0xff]  }
  0x2a   :  { %1012 = vmatmul.mubr.bf16.gmra.mrb[4].mxu0 %v2034_v33  ;;  %1044 = vmatmul.mubr.bf16.gmra.mrb[4].mxu1 %v2041_v34  ;;  %v2106_v33 = vld [vmem:[%s2696_s0 + $0x12c] ss:$36 sps:$4 sm:$0xff]   ;;  %v2109_v34 = vld [vmem:[%s2696_s0 + $0x134] ss:$36 sps:$4 sm:$0xff]  }
  0x2b   :  { %1754 = vmatpush3.bf16.msra.mxu1 %v2033_v32  ;;  %1812 = vmatpush3.bf16.msra.mxu0 %v2036_v35  ;;  %v2114_v32 = vld [vmem:[%s2695_s1 + $0x1a8] sm:$0xff]  }
  0x2c   :  { %1755 = vmatprep.subr.bf16.mxu1 %v2037_v36  ;;  %1813 = vmatprep.subr.bf16.mxu0 %v2042_v37  ;;  %v2120_v35 = vld [vmem:[%s2695_s1 + $0x228] sm:$0xff]   ;;  %v2122_v36 = vld [vmem:[%s2695_s1 + $0x1f0] sm:$0xff]  }
  0x2d   :  { %1019 = vmatprep.mubr.bf16.mxu0 %v2045_v39  ;;  %1051 = vmatprep.mubr.bf16.mxu1 %v1550_v44  ;;  %v2108_v37 = vld [vmem:[%s2696_s0 + $0x128] ss:$36 sps:$4 sm:$0xff]   ;;  %v2123_v39 = vld [vmem:[%s2695_s1 + $0x1b0] sm:$0xff]   ;;  %v2130_v44 = vld [vmem:[%s2695_s1 + $0x1b8] sm:$0xff]  }
  0x2f   :  { %1756 = vmatpush3.bf16.msra.mxu1 %v2040_v38  ;;  %1814 = vmatpush3.bf16.msra.mxu0 %v2043_v40  ;;  %v2111_v38 = vld [vmem:[%s2696_s0 + $0x130] ss:$36 sps:$4 sm:$0xff]  }
  0x30   :  { %1757 = vmatprep.subr.bf16.mxu1 %v2044_v41  ;;  %1815 = vmatprep.subr.bf16.mxu0 %v2049_v43  ;;  %v2115_v40 = vld [vmem:[%s2696_s0 + $0x174] ss:$36 sps:$4 sm:$0xff]   ;;  %v2118_v43 = vld [vmem:[%s2696_s0 + $0x17c] ss:$36 sps:$4 sm:$0xff]  }
  0x31   :  { %v2126_v41 = vld [vmem:[%s2695_s1 + $0x230] sm:$0xff]  }
  0x32   :  { %1020 = vmatmul.mubr.bf16.gmra.mrb[8].mxu0 %v2048_v46  ;;  %1052 = vmatmul.mubr.bf16.gmra.mrb[8].mxu1 %v1549_v48  ;;  %v76_v46 = vld [vmem:[%s2696_s0 + $0x1b8] sm:$0x11]  ;;  %v2117_v48 = vld [vmem:[%s2696_s0 + $0x170] ss:$36 sps:$4 sm:$0xff]  }
  0x33   :  { %1758 = vmatpush3.bf16.msra.mxu1 %v2047_v45  ;;  %1816 = vmatpush3.bf16.msra.mxu0 %v2050_v47  ;;  %v2134_v45 = vld [vmem:[%s2695_s1 + $0x238] sm:$0xff]   ;;  %v77_v47 = vld [vmem:[%s2696_s0 + $0x1c0] sm:$0x11] }
  0x34   :  { %1759 = vmatprep.subr.bf16.mxu1 %v2051_v49  ;;  %1817 = vmatprep.subr.bf16.mxu0 %v2055_v50  ;;  %v2121_v49 = vld [vmem:[%s2696_s0 + $0x178] ss:$36 sps:$4 sm:$0xff]   ;;  %v1552_v50 = vcombine.high %v76_v46, %v76_v46 }
  0x35   :  { %1027 = vmatprep.mubr.bf16.mxu0 %v2058_v52  ;;  %1091 = vmatprep.mubr.bf16.mxu1 %v2069_v61  ;;  %v1551_v52 = vcombine.low %v76_v46, %v76_v46  ;;  %v2142_v61 = vld [vmem:[%s2696_s0 + $0xa8] ss:$36 sps:$4 sm:$0xff]  }
  0x37   :  { %1760 = vmatpush3.bf16.msra.mxu1 %v2053_v51  ;;  %1818 = vmatpush3.bf16.msra.mxu0 %v2056_v53  ;;  %v1554_v51 = vcombine.high %v77_v47, %v77_v47  ;;  %v1553_v53 = vcombine.low %v77_v47, %v77_v47 }
  0x38   :  { %1761 = vmatprep.subr.bf16.mxu1 %v2057_v54  ;;  %1819 = vmatprep.subr.bf16.mxu0 %v2062_v55  ;;  %v2133_v54 = vld [vmem:[%s2696_s0 + $0x1c] ss:$36 sps:$4 sm:$0xff]  }
  0x39   :  { %v2131_v55 = vld [vmem:[%s2696_s0 + $0x18] ss:$36 sps:$4 sm:$0xff]  }
  0x3a   :  { %1028 = vmatmul.mubr.bf16.gmra.mrb[12].mxu0 %v2061_v57  ;;  %v2136_v57 = vld [vmem:[%s2696_s0 + $0x64] ss:$36 sps:$4 sm:$0xff]  }
  0x3b   :  { %1762 = vmatpush3.bf16.msra.mxu1 %v2060_v56  ;;  %1820 = vmatpush3.bf16.msra.mxu0 %v2063_v58  ;;  %v2135_v56 = vld [vmem:[%s2696_s0 + $0x20] ss:$36 sps:$4 sm:$0xff]  }
  0x3c   :  { %1763 = vmatprep.subr.bf16.mxu1 %v2064_v59  ;;  %1821 = vmatprep.subr.bf16.mxu0 %v2066_v60  ;;  %v2138_v58 = vld [vmem:[%s2696_s0 + $0x60] ss:$36 sps:$4 sm:$0xff]   ;;  %v2139_v59 = vld [vmem:[%s2696_s0 + $0x68] ss:$36 sps:$4 sm:$0xff]  }
  0x3d   :  { %1179 = vmatprep.mubr.bf16.mxu0 %v2074_v1  ;;  %v2140_v60 = vld [vmem:[%s2696_s0 + $0xac] ss:$36 sps:$4 sm:$0xff]   ;;  %v2147_v1 = vld [vmem:[%s2696_s0 + $0xf8] ss:$36 sps:$4 sm:$0xff]  }
  0x3f   :  { %1764 = vmatpush3.bf16.msra.mxu1 %v2065_v62  ;;  %1822 = vmatpush3.bf16.msra.mxu0 %v2070_v63  ;;  %v2143_v62 = vld [vmem:[%s2696_s0 + $0xb0] ss:$36 sps:$4 sm:$0xff]  }
  0x40   :  { %1865 = vmatprep.subr.bf16.mxu1 %v2071_v0  ;;  %1938 = vmatprep.subr.bf16.mxu0 %v2159_v7  ;;  %v2144_v63 = vld [vmem:[%s2696_s0 + $0xf4] ss:$36 sps:$4 sm:$0xff]  }
  0x41   :  { %v2146_v0 = vld [vmem:[%s2696_s0 + $0xf0] ss:$36 sps:$4 sm:$0xff]  }
  0x42   :  { %1092 = vmatmul.mubr.bf16.vlgmr.msra.gmra.mrb[12].mxu1 %v2067_v2  ;;  %1180 = vmatmul.mubr.bf16.vlgmr.msra.gmra.mrb[16].mxu0 %v2072_v3  ;;  %v2148_v2 = vld [vmem:[%s2696_s0 + $0x13c] ss:$36 sps:$4 sm:$0xff]  }
  0x43   :  { %1866 = vmatpush3.bf16.msra.mxu1 %v2075_v4  ;;  %1939 = vmatpush3.bf16.msra.mxu0 %v2076_v5  ;;  %v2150_v3 = vld [vmem:[%s2696_s0 + $0x138] ss:$36 sps:$4 sm:$0xff]   ;;  %v2151_v4 = vld [vmem:[%s2696_s0 + $0x140] ss:$36 sps:$4 sm:$0xff]  }
  0x44   :  { %1099 = vmatprep.mubr.bf16.mxu1 %v2077_v6  ;;  %1867 = vmatprep.subr.bf16.mxu1 %v2079_v8  ;;  %v2152_v5 = vld [vmem:[%s2696_s0 + $0x184] ss:$36 sps:$4 sm:$0xff]  }
  0x45   :  { %1187 = vmatprep.mubr.bf16.mxu0 %v2082_v10  ;;  %1940 = vmatprep.subr.bf16.mxu0 %v2159_v7  ;;  %v78_v6 = vld [vmem:[%s2696_s0 + $0x1c8] sm:$0x11]  ;;  %v2154_v8 = vld [vmem:[%s2696_s0 + $0x180] ss:$36 sps:$4 sm:$0xff]  }
  0x46   :  { %v1556_v10 = vcombine.high %v78_v6, %v78_v6 }
  0x47   :  { %1868 = vmatpush3.bf16.msra.mxu1 %v2081_v9  ;;  %1941 = vmatpush3.bf16.msra.mxu0 %v2085_v11  ;;  %v2155_v9 = vld [vmem:[%s2696_s0 + $0x188] ss:$36 sps:$4 sm:$0xff]   ;;  %v1555_v11 = vcombine.low %v78_v6, %v78_v6 }
  0x48   :  { %1869 = vmatprep.subr.bf16.mxu1 %v2086_v12  ;;  %1942 = vmatprep.subr.bf16.mxu0 %v2159_v7  ;;  %v2158_v12 = vld [vmem:[%s2696_s0 + $0x1d0] ss:$0 sps:$4 sm:$0x11]  }
  0x4a   :  { %1100 = vmatmul.mubr.bf16.gmra.mrb[16].mxu1 %v2080_v13  ;;  %1188 = vmatmul.mubr.bf16.gmra.mrb[20].mxu0 %v2084_v14 }
  0x4b   :  { %1107 = vmatprep.mubr.bf16.mxu1 %v2087_v15  ;;  %1870 = vmatpush3.bf16.msra.mxu1 %v2089_v16 }
  0x4c   :  { %1195 = vmatprep.mubr.bf16.mxu0 %v2091_v17  ;;  %1943 = vmatpush3.bf16.msra.mxu0 %v2094_v18 }
  0x4d   :  { %1871 = vmatprep.subr.bf16.mxu1 %v2095_v19  ;;  %1944 = vmatprep.subr.bf16.mxu0 %v2159_v7 }
  0x4f   :  { %1872 = vmatpush3.bf16.msra.mxu1 %v2096_v20 }
  0x50   :  { %1945 = vmatpush3.bf16.msra.mxu0 %v2103_v25  ;;  %1873 = vmatprep.subr.bf16.mxu1 %v2104_v26 }
  0x51   :  { %1946 = vmatprep.subr.bf16.mxu0 %v2159_v7 }
  0x52   :  { %1108 = vmatmul.mubr.bf16.gmra.mrb[20].mxu1 %v2090_v21  ;;  %1196 = vmatmul.mubr.bf16.gmra.mrb[24].mxu0 %v2093_v22 }
  0x53   :  { %1115 = vmatprep.mubr.bf16.mxu1 %v2097_v23  ;;  %1203 = vmatprep.mubr.bf16.mxu0 %v2100_v24 }
  0x54   :  { %1874 = vmatpush3.bf16.msra.mxu1 %v2105_v27  ;;  %1947 = vmatpush3.bf16.msra.mxu0 %v2112_v30 }
  0x55   :  { %1875 = vmatprep.subr.bf16.mxu1 %v2113_v31  ;;  %1948 = vmatprep.subr.bf16.mxu0 %v2159_v7 }
  0x58   :  { %1876 = vmatpush3.bf16.msra.mxu1 %v2114_v32  ;;  %1949 = vmatpush3.bf16.msra.mxu0 %v2120_v35 }
  0x59   :  { %1877 = vmatprep.subr.bf16.mxu1 %v2122_v36  ;;  %1950 = vmatprep.subr.bf16.mxu0 %v2159_v7 }
  0x5a   :  { %1116 = vmatmul.mubr.bf16.gmra.mrb[24].mxu1 %v2099_v28  ;;  %1204 = vmatmul.mubr.bf16.gmra.mrb[28].mxu0 %v2102_v29 }
  0x5b   :  { %1123 = vmatprep.mubr.bf16.mxu1 %v2106_v33  ;;  %1211 = vmatprep.mubr.bf16.mxu0 %v2109_v34 }
  0x5c   :  { %1878 = vmatpush3.bf16.msra.mxu1 %v2123_v39  ;;  %1951 = vmatpush3.bf16.msra.mxu0 %v2126_v41 }
  0x5d   :  { %1879 = vmatprep.subr.bf16.mxu1 %v2128_v42  ;;  %1952 = vmatprep.subr.bf16.mxu0 %v2159_v7 }
  0x60   :  { %1880 = vmatpush3.bf16.msra.mxu1 %v2130_v44  ;;  %1953 = vmatpush3.bf16.msra.mxu0 %v2134_v45 }
  0x62   :  { %1124 = vmatmul.mubr.bf16.gmra.mrb[28].mxu1 %v2108_v37  ;;  %1212 = vmatmul.mubr.bf16.gmra.mrb[32].mxu0 %v2111_v38 }
  0x63   :  { %1131 = vmatprep.mubr.bf16.mxu1 %v2115_v40  ;;  %1219 = vmatprep.mubr.bf16.mxu0 %v2118_v43 }
  0x6a   :  { %1132 = vmatmul.mubr.bf16.gmra.mrb[32].mxu1 %v2117_v48  ;;  %1220 = vmatmul.mubr.bf16.gmra.mrb[36].mxu0 %v2121_v49 }
  0x6b   :  { %1139 = vmatprep.mubr.bf16.mxu1 %v1552_v50  ;;  %1227 = vmatprep.mubr.bf16.mxu0 %v1554_v51 }
  0x72   :  { %1140 = vmatmul.mubr.bf16.gmra.mrb[36].mxu1 %v1551_v52  ;;  %1228 = vmatmul.mubr.bf16.gmra.mrb[40].mxu0 %v1553_v53 }
  0x73   :  { %1267 = vmatprep.mubr.bf16.mxu1 %v2133_v54  ;;  %1954 = vmatprep.mubr.msk.bf16.mxu0 %vm2160_vm0, %v2159_v7 }
  0x7a   :  { %1268 = vmatmul.mubr.bf16.vlgmr.msra.gmra.mrb[40].mxu1 %v2131_v55  ;;  %1955 = vmatmul.mubr.bf16.vlgmr.msra.gmra.mrb[44].mxu0 %v2135_v56  ;;  %v2613_v55 = vld [vmem:[%s2697_s2] ss:$0 sm:$0xff] }
  0x7b   :  { %1275 = vmatprep.mubr.bf16.mxu1 %v2136_v57  ;;  %1958 = vmatprep.mubr.msk.bf16.mxu0 %vm2160_vm0, %v2159_v7 }
  0x82   :  { %1276 = vmatmul.mubr.bf16.gmra.mrb[44].mxu1 %v2138_v58  ;;  %1959 = vmatmul.mubr.bf16.gmra.mrb[48].mxu0 %v2139_v59 }
  0x83   :  { %1283 = vmatprep.mubr.bf16.mxu1 %v2140_v60  ;;  %1962 = vmatprep.mubr.msk.bf16.mxu0 %vm2160_vm0, %v2159_v7 }
  0x8a   :  { %1284 = vmatmul.mubr.bf16.gmra.mrb[48].mxu1 %v2142_v61  ;;  %1963 = vmatmul.mubr.bf16.gmra.mrb[52].mxu0 %v2143_v62 }
  0x8b   :  { %1291 = vmatprep.mubr.bf16.mxu1 %v2144_v63  ;;  %1966 = vmatprep.mubr.msk.bf16.mxu0 %vm2160_vm0, %v2159_v7 }
  0x92   :  { %1292 = vmatmul.mubr.bf16.gmra.mrb[52].mxu1 %v2146_v0  ;;  %1967 = vmatmul.mubr.bf16.gmra.mrb[56].mxu0 %v2147_v1 }
  0x93   :  { %1299 = vmatprep.mubr.bf16.mxu1 %v2148_v2  ;;  %1970 = vmatprep.mubr.msk.bf16.mxu0 %vm2160_vm0, %v2159_v7 }
  0x9a   :  { %1300 = vmatmul.mubr.bf16.gmra.mrb[56].mxu1 %v2150_v3  ;;  %1971 = vmatmul.mubr.bf16.gmra.mrb[60].mxu0 %v2151_v4 }
  0x9b   :  { %1307 = vmatprep.mubr.bf16.mxu1 %v2152_v5  ;;  %1974 = vmatprep.mubr.msk.bf16.mxu0 %vm2160_vm0, %v2159_v7 }
  0xa2   :  { %1308 = vmatmul.mubr.bf16.gmra.mrb[60].mxu1 %v2154_v8  ;;  %1975 = vmatmul.mubr.bf16.gmra.mrb[64].mxu0 %v2155_v9 }
  0xa3   :  { %1315 = vmatprep.mubr.bf16.mxu1 %v1556_v10  ;;  %1978 = vmatprep.mubr.msk.bf16.mxu0 %vm2160_vm0, %v2159_v7 }
  0xaa   :  { %1316 = vmatmul.mubr.bf16.gmra.mrb[64].mxu1 %v1555_v11  ;;  %1979 = vmatmul.mubr.bf16.gmra.mrb[68].mxu0 %v2158_v12 }
  0xf5   :  { %v1731_v13 = vpop.f32.mrb[0].mxu1  ;;  %v1707_v14 = vpop.f32.mrb[0].mxu0 }
  0xf6   :  { %v1732_v15 = vpop.f32.mrb[1].mxu1  ;;  %v1708_v16 = vpop.f32.mrb[1].mxu0 }
  0xf7   :  { %v2596_v17 = vadd.f32 %v1732_v15, %v1731_v13  ;;  %v1734_v18 = vpop.f32.mrb[2].mxu1  ;;  %v1709_v19 = vadd.f32 %v1708_v16, %v1707_v14  ;;  %v1710_v20 = vpop.f32.mrb[2].mxu0 }
  0xf8   :  { %v1735_v21 = vpop.f32.mrb[3].mxu1  ;;  %v1711_v22 = vpop.f32.mrb[3].mxu0 }
  0xf9   :  { %v2598_v23 = vadd.f32 %v1735_v21, %v1734_v18  ;;  %v1712_v7 = vadd.f32 %v1711_v22, %v1710_v20  ;;  %v1006_v58 = vadd.f32 %v1709_v19, %v2613_v55 }
  0xfb   :  { %v1009_v1 = vadd.f32 %v1712_v7, %v2613_v55 }
  0xfd   :  { %v1713_v24 = vpop.f32.mrb[4].mxu0  ;;  %v1737_v25 = vpop.f32.mrb[4].mxu1 }
  0xfe   :  { %v1714_v26 = vpop.f32.mrb[5].mxu0  ;;  %v1738_v27 = vpop.f32.mrb[5].mxu1 }
  0xff   :  { %v1715_v28 = vadd.f32 %v1714_v26, %v1713_v24  ;;  %v1716_v29 = vpop.f32.mrb[6].mxu0  ;;  %v2600_v30 = vadd.f32 %v1738_v27, %v1737_v25  ;;  %v1740_v31 = vpop.f32.mrb[6].mxu1 }
 0x100   :  { %v1717_v32 = vpop.f32.mrb[7].mxu0  ;;  %v1741_v33 = vpop.f32.mrb[7].mxu1 }
 0x101   :  { %v1718_v34 = vadd.f32 %v1717_v32, %v1716_v29  ;;  %v2602_v35 = vadd.f32 %v1741_v33, %v1740_v31  ;;  %v1014_v13 = vadd.f32 %v1715_v28, %v2613_v55 }
 0x103   :  { %v1017_v21 = vadd.f32 %v1718_v34, %v2613_v55 }
 0x105   :  { %v1719_v36 = vpop.f32.mrb[8].mxu0  ;;  %v1743_v37 = vpop.f32.mrb[8].mxu1 }
 0x106   :  { %v1720_v38 = vpop.f32.mrb[9].mxu0  ;;  %v1744_v39 = vpop.f32.mrb[9].mxu1 }
 0x107   :  { %v1721_v40 = vadd.f32 %v1720_v38, %v1719_v36  ;;  %v1722_v41 = vpop.f32.mrb[10].mxu0  ;;  %v2604_v42 = vadd.f32 %v1744_v39, %v1743_v37  ;;  %v1746_v43 = vpop.f32.mrb[10].mxu1 }
 0x108   :  { %v1723_v44 = vpop.f32.mrb[11].mxu0  ;;  %v1747_v45 = vpop.f32.mrb[11].mxu1 }
 0x109   :  { %v1724_v46 = vadd.f32 %v1723_v44, %v1722_v41  ;;  %v1022_v33 = vadd.f32 %v1721_v40, %v2613_v55 }
 0x10b   :  { %v1025_v43 = vadd.f32 %v1724_v46, %v2613_v55 }
 0x10d   :  { %v1725_v47 = vpop.f32.mrb[12].mxu0 }
 0x10e   :  { %v1726_v48 = vpop.f32.mrb[13].mxu0 }
 0x10f   :  { %v2606_v49 = vadd.f32 %v1726_v48, %v1725_v47  ;;  %v1728_v50 = vpop.f32.mrb[14].mxu0 }
 0x110   :  { %v1729_v51 = vpop.f32.mrb[15].mxu0 }
 0x111   :  { %v2608_v52 = vadd.f32 %v1729_v51, %v1728_v50 }
 0x115   :  { %v1765_v53 = vpop.f32.mrb[12].mxu1  ;;  %v1823_v54 = vpop.f32.mrb[16].mxu0 }
 0x116   :  { %v1766_v56 = vpop.f32.mrb[13].mxu1  ;;  %v1824_v57 = vpop.f32.mrb[17].mxu0 }
 0x117   :  { %v1767_v59 = vadd.f32 %v1766_v56, %v1765_v53  ;;  %v1768_v60 = vpop.f32.mrb[14].mxu1  ;;  %v1825_v61 = vadd.f32 %v1824_v57, %v1823_v54  ;;  %v1826_v62 = vpop.f32.mrb[18].mxu0  ;;  %v1030_v57 = vadd.f32 %v2606_v49, %v2613_v55 }
 0x118   :  { %v1769_v63 = vpop.f32.mrb[15].mxu1  ;;  %v1827_v0 = vpop.f32.mrb[19].mxu0 }
 0x119   :  { %v1094_v2 = vadd.f32 %v1767_v59, %v1006_v58  ;;  %v1770_v3 = vadd.f32 %v1769_v63, %v1768_v60  ;;  %v1828_v4 = vadd.f32 %v1827_v0, %v1826_v62  ;;  %v1033_v63 = vadd.f32 %v2608_v52, %v2613_v55 }
 0x11b   :  { %v1097_v5 = vadd.f32 %v1770_v3, %v1009_v1  ;;  %v2617_v6 = vadd.f32 %v1825_v61, %v1094_v2 }
 0x11d   :  { %v2619_v8 = vadd.f32 %v1828_v4, %v1097_v5  ;;  %v1771_v9 = vpop.f32.mrb[16].mxu1  ;;  %v1829_v10 = vpop.f32.mrb[20].mxu0 }
 0x11e   :  { %v1772_v11 = vpop.f32.mrb[17].mxu1  ;;  %v1830_v12 = vpop.f32.mrb[21].mxu0 }
 0x11f   :  { %v1773_v14 = vadd.f32 %v1772_v11, %v1771_v9  ;;  %v1774_v15 = vpop.f32.mrb[18].mxu1  ;;  %v1831_v16 = vadd.f32 %v1830_v12, %v1829_v10  ;;  %v1832_v18 = vpop.f32.mrb[22].mxu0  ;;  %v1038_v12 = vadd.f32 %v2596_v17, %v2613_v55 }
 0x120   :  { %v1775_v19 = vpop.f32.mrb[19].mxu1  ;;  %v1833_v20 = vpop.f32.mrb[23].mxu0 }
 0x121   :  { %v1102_v22 = vadd.f32 %v1773_v14, %v1014_v13  ;;  %v1776_v7 = vadd.f32 %v1775_v19, %v1774_v15  ;;  %v1834_v24 = vadd.f32 %v1833_v20, %v1832_v18  ;;  %v1041_v19 = vadd.f32 %v2598_v23, %v2613_v55 }
 0x123   :  { %v1105_v25 = vadd.f32 %v1776_v7, %v1017_v21  ;;  %v2623_v26 = vadd.f32 %v1831_v16, %v1102_v22 }
 0x125   :  { %v2625_v27 = vadd.f32 %v1834_v24, %v1105_v25  ;;  %v1777_v29 = vpop.f32.mrb[20].mxu1  ;;  %v1835_v31 = vpop.f32.mrb[24].mxu0 }
 0x126   :  { %v1778_v32 = vpop.f32.mrb[21].mxu1  ;;  %v1836_v28 = vpop.f32.mrb[25].mxu0 }
 0x127   :  { %v1779_v36 = vadd.f32 %v1778_v32, %v1777_v29  ;;  %v1780_v37 = vpop.f32.mrb[22].mxu1  ;;  %v1837_v38 = vadd.f32 %v1836_v28, %v1835_v31  ;;  %v1838_v39 = vpop.f32.mrb[26].mxu0  ;;  %v1046_v28 = vadd.f32 %v2600_v30, %v2613_v55 }
 0x128   :  { %v1781_v41 = vpop.f32.mrb[23].mxu1  ;;  %v1839_v34 = vpop.f32.mrb[27].mxu0 }
 0x129   :  { %v1110_v44 = vadd.f32 %v1779_v36, %v1022_v33  ;;  %v1782_v45 = vadd.f32 %v1781_v41, %v1780_v37  ;;  %v1840_v47 = vadd.f32 %v1839_v34, %v1838_v39  ;;  %v1049_v41 = vadd.f32 %v2602_v35, %v2613_v55 }
 0x12b   :  { %v1113_v48 = vadd.f32 %v1782_v45, %v1025_v43  ;;  %v2629_v50 = vadd.f32 %v1837_v38, %v1110_v44 }
 0x12d   :  { %v2631_v51 = vadd.f32 %v1840_v47, %v1113_v48  ;;  %v1783_v53 = vpop.f32.mrb[24].mxu1  ;;  %v1841_v54 = vpop.f32.mrb[28].mxu0 }
 0x12e   :  { %v1784_v56 = vpop.f32.mrb[25].mxu1  ;;  %v1842_v40 = vpop.f32.mrb[29].mxu0 }
 0x12f   :  { %v1785_v58 = vadd.f32 %v1784_v56, %v1783_v53  ;;  %v1786_v59 = vpop.f32.mrb[26].mxu1  ;;  %v1843_v60 = vadd.f32 %v1842_v40, %v1841_v54  ;;  %v1844_v61 = vpop.f32.mrb[30].mxu0  ;;  %v1054_v40 = vadd.f32 %v2604_v42, %v2613_v55 }
 0x130   :  { %v1787_v46 = vpop.f32.mrb[27].mxu1  ;;  %v1845_v62 = vpop.f32.mrb[31].mxu0 }
 0x131   :  { %v1118_v0 = vadd.f32 %v1785_v58, %v1030_v57  ;;  %v1788_v1 = vadd.f32 %v1787_v46, %v1786_v59  ;;  %v1846_v2 = vadd.f32 %v1845_v62, %v1844_v61 }
 0x133   :  { %v1121_v3 = vadd.f32 %v1788_v1, %v1033_v63  ;;  %v2637_v4 = vadd.f32 %v1843_v60, %v1118_v0 }
 0x135   :  { %v2639_v5 = vadd.f32 %v1846_v2, %v1121_v3  ;;  %v1789_v9 = vpop.f32.mrb[28].mxu1  ;;  %v1847_v10 = vpop.f32.mrb[32].mxu0 }
 0x136   :  { %v1790_v49 = vpop.f32.mrb[29].mxu1  ;;  %v1848_v11 = vpop.f32.mrb[33].mxu0 }
 0x137   :  { %v1791_v13 = vadd.f32 %v1790_v49, %v1789_v9  ;;  %v1792_v14 = vpop.f32.mrb[30].mxu1  ;;  %v1849_v15 = vadd.f32 %v1848_v11, %v1847_v10  ;;  %v1850_v16 = vpop.f32.mrb[34].mxu0 }
 0x138   :  { %v1793_v52 = vpop.f32.mrb[31].mxu1  ;;  %v1851_v18 = vpop.f32.mrb[35].mxu0 }
 0x139   :  { %v1126_v20 = vadd.f32 %v1791_v13, %v1038_v12  ;;  %v1794_v21 = vadd.f32 %v1793_v52, %v1792_v14  ;;  %v1852_v22 = vadd.f32 %v1851_v18, %v1850_v16 }
 0x13b   :  { %v1129_v7 = vadd.f32 %v1794_v21, %v1041_v19  ;;  %v2645_v24 = vadd.f32 %v1849_v15, %v1126_v20 }
 0x13d   :  { %v2647_v25 = vadd.f32 %v1852_v22, %v1129_v7  ;;  %v1795_v29 = vpop.f32.mrb[32].mxu1  ;;  %v1853_v31 = vpop.f32.mrb[36].mxu0 }
 0x13e   :  { %v1796_v17 = vpop.f32.mrb[33].mxu1  ;;  %v1854_v32 = vpop.f32.mrb[37].mxu0 }
 0x13f   :  { %v1797_v33 = vadd.f32 %v1796_v17, %v1795_v29  ;;  %v1798_v36 = vpop.f32.mrb[34].mxu1  ;;  %v1855_v37 = vadd.f32 %v1854_v32, %v1853_v31  ;;  %v1856_v38 = vpop.f32.mrb[38].mxu0 }
 0x140   :  { %v1799_v23 = vpop.f32.mrb[35].mxu1  ;;  %v1857_v39 = vpop.f32.mrb[39].mxu0 }
 0x141   :  { %v1134_v34 = vadd.f32 %v1797_v33, %v1046_v28  ;;  %v1800_v43 = vadd.f32 %v1799_v23, %v1798_v36  ;;  %v1858_v44 = vadd.f32 %v1857_v39, %v1856_v38 }
 0x143   :  { %v1137_v45 = vadd.f32 %v1800_v43, %v1049_v41  ;;  %v2653_v47 = vadd.f32 %v1855_v37, %v1134_v34 }
 0x145   :  { %v2655_v48 = vadd.f32 %v1858_v44, %v1137_v45  ;;  %v1801_v53 = vpop.f32.mrb[36].mxu1  ;;  %v1859_v54 = vpop.f32.mrb[40].mxu0 }
 0x146   :  { %v1802_v30 = vpop.f32.mrb[37].mxu1  ;;  %v1860_v56 = vpop.f32.mrb[41].mxu0 }
 0x147   :  { %v1803_v57 = vadd.f32 %v1802_v30, %v1801_v53  ;;  %v1804_v58 = vpop.f32.mrb[38].mxu1  ;;  %v1861_v59 = vadd.f32 %v1860_v56, %v1859_v54  ;;  %v1862_v60 = vpop.f32.mrb[42].mxu0 }
 0x148   :  { %v1805_v35 = vpop.f32.mrb[39].mxu1  ;;  %v1863_v61 = vpop.f32.mrb[43].mxu0 }
 0x149   :  { %v1142_v46 = vadd.f32 %v1803_v57, %v1054_v40 }
 0x14b   :  { %v2659_v62 = vadd.f32 %v1861_v59, %v1142_v46 }
 0x14d   :  { %v1881_v63 = vpop.f32.mrb[40].mxu1  ;;  %v1357_v0 = vpop.f32.mrb[44].mxu0 }
 0x14e   :  { %v1882_v1 = vpop.f32.mrb[41].mxu1  ;;  %v1956_v2 = vpop.f32.mrb[45].mxu0 }
 0x14f   :  { %v1883_v3 = vadd.f32 %v1882_v1, %v1881_v63  ;;  %v1884_v9 = vpop.f32.mrb[42].mxu1  ;;  %v1360_v10 = vpop.f32.mrb[46].mxu0 }
 0x150   :  { %v1885_v49 = vpop.f32.mrb[43].mxu1  ;;  %v1957_v11 = vpop.f32.mrb[47].mxu0 }
 0x151   :  { %v1886_v12 = vadd.f32 %v1885_v49, %v1884_v9  ;;  %v1270_v42 = vadd.f32 %v1883_v3, %v2617_v6 }
 0x153   :  { %v1358_v55 = vadd.f32 %v1357_v0, %v1270_v42  ;;  %v1273_v13 = vadd.f32 %v1886_v12, %v2619_v8 }
 0x155   :  { %v1361_v14 = vadd.f32 %v1360_v10, %v1273_v13  ;;  %v1887_v15 = vpop.f32.mrb[44].mxu1  ;;  %v1365_v16 = vpop.f32.mrb[48].mxu0  ;;  %v1411_v19 = vmax.f32 %v1358_v55, 0.0 }
 0x156   :  { %v1888_v52 = vpop.f32.mrb[45].mxu1  ;;  %v1960_v18 = vpop.f32.mrb[49].mxu0 }
 0x157   :  { %v1412_v20 = vmax.f32 %v1361_v14, 0.0  ;;  %v1889_v21 = vadd.f32 %v1888_v52, %v1887_v15  ;;  %v1890_v22 = vpop.f32.mrb[46].mxu1  ;;  %v1368_v7 = vpop.f32.mrb[50].mxu0 }
 0x158   :  { %v1891_v29 = vpop.f32.mrb[47].mxu1  ;;  %v1961_v31 = vpop.f32.mrb[51].mxu0 }
 0x159   :  { %v1659_v17 = vpack.c.bf16 %v1412_v20, %v1411_v19  ;;  %v1892_v32 = vadd.f32 %v1891_v29, %v1890_v22  ;;  %v1278_v28 = vadd.f32 %v1889_v21, %v2623_v26 }
 0x15b   :  { %1660 = vst [vmem:[%s2698_s3] sm:$0xff] %v1659_v17   ;;  %v1366_v6 = vadd.f32 %v1365_v16, %v1278_v28  ;;  %v1281_v8 = vadd.f32 %v1892_v32, %v2625_v27 }
 0x15d   :  { %v1369_v33 = vadd.f32 %v1368_v7, %v1281_v8  ;;  %v1893_v36 = vpop.f32.mrb[48].mxu1  ;;  %v1373_v37 = vpop.f32.mrb[52].mxu0  ;;  %v1413_v39 = vmax.f32 %v1366_v6, 0.0 }
 0x15e   :  { %v1894_v38 = vpop.f32.mrb[49].mxu1  ;;  %v1964_v23 = vpop.f32.mrb[53].mxu0 }
 0x15f   :  { %v1414_v41 = vmax.f32 %v1369_v33, 0.0  ;;  %v1895_v34 = vadd.f32 %v1894_v38, %v1893_v36  ;;  %v1896_v43 = vpop.f32.mrb[50].mxu1  ;;  %v1376_v44 = vpop.f32.mrb[54].mxu0 }
 0x160   :  { %v1897_v45 = vpop.f32.mrb[51].mxu1  ;;  %v1965_v53 = vpop.f32.mrb[55].mxu0 }
 0x161   :  { %v1664_v26 = vpack.c.bf16 %v1414_v41, %v1413_v39  ;;  %v1898_v54 = vadd.f32 %v1897_v45, %v1896_v43  ;;  %v1286_v30 = vadd.f32 %v1895_v34, %v2629_v50 }
 0x163   :  { %1686 = vst [vmem:[%s2698_s3 + $0x8] sm:$0xff] %v1664_v26   ;;  %v1374_v27 = vadd.f32 %v1373_v37, %v1286_v30  ;;  %v1289_v56 = vadd.f32 %v1898_v54, %v2631_v51 }
 0x165   :  { %v1377_v40 = vadd.f32 %v1376_v44, %v1289_v56  ;;  %v1899_v57 = vpop.f32.mrb[52].mxu1  ;;  %v1381_v58 = vpop.f32.mrb[56].mxu0  ;;  %v1415_v35 = vmax.f32 %v1374_v27, 0.0 }
 0x166   :  { %v1900_v59 = vpop.f32.mrb[53].mxu1  ;;  %v1968_v60 = vpop.f32.mrb[57].mxu0 }
 0x167   :  { %v1416_v61 = vmax.f32 %v1377_v40, 0.0  ;;  %v1901_v46 = vadd.f32 %v1900_v59, %v1899_v57  ;;  %v1902_v63 = vpop.f32.mrb[54].mxu1  ;;  %v1384_v0 = vpop.f32.mrb[58].mxu0 }
 0x168   :  { %v1903_v1 = vpop.f32.mrb[55].mxu1  ;;  %v1969_v2 = vpop.f32.mrb[59].mxu0 }
 0x169   :  { %v1669_v50 = vpack.c.bf16 %v1416_v61, %v1415_v35  ;;  %v1904_v3 = vadd.f32 %v1903_v1, %v1902_v63  ;;  %v1294_v9 = vadd.f32 %v1901_v46, %v2637_v4 }
 0x16b   :  { %1687 = vst [vmem:[%s2698_s3 + $0x10] sm:$0xff] %v1669_v50   ;;  %v1382_v51 = vadd.f32 %v1381_v58, %v1294_v9  ;;  %v1297_v10 = vadd.f32 %v1904_v3, %v2639_v5 }
 0x16d   :  { %v1385_v49 = vadd.f32 %v1384_v0, %v1297_v10  ;;  %v1905_v11 = vpop.f32.mrb[56].mxu1  ;;  %v1389_v12 = vpop.f32.mrb[60].mxu0  ;;  %v1417_v13 = vmax.f32 %v1382_v51, 0.0 }
 0x16e   :  { %v1906_v42 = vpop.f32.mrb[57].mxu1  ;;  %v1972_v55 = vpop.f32.mrb[61].mxu0 }
 0x16f   :  { %v1418_v14 = vmax.f32 %v1385_v49, 0.0  ;;  %v1907_v15 = vadd.f32 %v1906_v42, %v1905_v11  ;;  %v1908_v16 = vpop.f32.mrb[58].mxu1  ;;  %v1392_v52 = vpop.f32.mrb[62].mxu0 }
 0x170   :  { %v1909_v18 = vpop.f32.mrb[59].mxu1  ;;  %v1973_v19 = vpop.f32.mrb[63].mxu0 }
 0x171   :  { %v1674_v4 = vpack.c.bf16 %v1418_v14, %v1417_v13  ;;  %v1910_v20 = vadd.f32 %v1909_v18, %v1908_v16  ;;  %v1302_v21 = vadd.f32 %v1907_v15, %v2645_v24 }
 0x173   :  { %1688 = vst [vmem:[%s2698_s3 + $0x18] sm:$0xff] %v1674_v4   ;;  %v1390_v5 = vadd.f32 %v1389_v12, %v1302_v21  ;;  %v1305_v22 = vadd.f32 %v1910_v20, %v2647_v25 }
 0x175   :  { %v1393_v7 = vadd.f32 %v1392_v52, %v1305_v22  ;;  %v1911_v29 = vpop.f32.mrb[60].mxu1  ;;  %v1397_v31 = vpop.f32.mrb[64].mxu0  ;;  %v1419_v28 = vmax.f32 %v1390_v5, 0.0 }
 0x176   :  { %v1912_v17 = vpop.f32.mrb[61].mxu1  ;;  %v1976_v32 = vpop.f32.mrb[65].mxu0 }
 0x177   :  { %v1420_v6 = vmax.f32 %v1393_v7, 0.0  ;;  %v1913_v8 = vadd.f32 %v1912_v17, %v1911_v29  ;;  %v1914_v33 = vpop.f32.mrb[62].mxu1  ;;  %v1400_v36 = vpop.f32.mrb[66].mxu0 }
 0x178   :  { %v1915_v37 = vpop.f32.mrb[63].mxu1  ;;  %v1977_v38 = vpop.f32.mrb[67].mxu0 }
 0x179   :  { %v1679_v24 = vpack.c.bf16 %v1420_v6, %v1419_v28  ;;  %v1916_v23 = vadd.f32 %v1915_v37, %v1914_v33  ;;  %v1310_v39 = vadd.f32 %v1913_v8, %v2653_v47 }
 0x17b   :  { %1689 = vst [vmem:[%s2698_s3 + $0x20] sm:$0xff] %v1679_v24   ;;  %v1398_v25 = vadd.f32 %v1397_v31, %v1310_v39  ;;  %v1313_v41 = vadd.f32 %v1916_v23, %v2655_v48 }
 0x17d   :  { %v1401_v34 = vadd.f32 %v1400_v36, %v1313_v41  ;;  %v1917_v43 = vpop.f32.mrb[64].mxu1  ;;  %v1405_v44 = vpop.f32.mrb[68].mxu0  ;;  %v1421_v26 = vmax.f32 %v1398_v25, 0.0 }
 0x17e   :  { %v1918_v45 = vpop.f32.mrb[65].mxu1  ;;  %v1980_v53 = vpop.f32.mrb[69].mxu0 }
 0x17f   :  { %v1422_v54 = vmax.f32 %v1401_v34, 0.0  ;;  %v1919_v30 = vadd.f32 %v1918_v45, %v1917_v43  ;;  %v1920_v27 = vpop.f32.mrb[66].mxu1  ;;  %v1408_v56 = vpop.f32.mrb[70].mxu0 }
 0x180   :  { %v1921_v40 = vpop.f32.mrb[67].mxu1  ;;  %v1981_v57 = vpop.f32.mrb[71].mxu0 }
 0x181   :  { %v1684_v47 = vpack.c.bf16 %v1422_v54, %v1421_v26  ;;  %v1318_v58 = vadd.f32 %v1919_v30, %v2659_v62 }
 0x183   :  { %1690 = vst [vmem:[%s2698_s3 + $0x28] sm:$0xff] %v1684_v47   ;;  %v1406_v48 = vadd.f32 %v1405_v44, %v1318_v58 }
 0x185   :  { %v1423_v59 = vmax.f32 %v1406_v48, 0.0 }
 0x187   :  { %v1655_v60 = vpack.c.bf16 %v1423_v59, %v1423_v59 }
 0x189   :  { %1489 = vst [vmem:[%s2698_s3 + $0x30] sm:$0x1] %v1655_v60 }

// kernel: convq_forward.7
= control target key start
LH: loop header
LB: loop body
LE: loop exit
PB: predicated region body
PF: predicated region fallthrough
CT: control target
= control target key end

     0   :  { %v812_v36 = vlaneseq  ;;  %v8581_v37 = vmov 1966171168   ;;  %s11223_s0 = inlined_call_operand.vmem [shape: bf16[2,3136], index: 0, kind: input, shape index: {}]   ;;  %s11224_s1 = inlined_call_operand.vmem [shape: bf16[3136,512], index: 1, kind: input, shape index: {}]   ;;  %s11225_s2 = inlined_call_operand.vmem [shape: f32[1,512], index: 2, kind: input, shape index: {}]   ;;  %s11226_s3 = inlined_call_operand.vmem [shape: bf16[512,128], index: 3, kind: input, shape index: {}]   ;;  %s11227_s4 = inlined_call_operand.vmem [shape: f32[1,128], index: 4, kind: input, shape index: {}]   ;;  %s11228_s5 = inlined_call_operand.hbm [shape: f32[2,128], index: 5, kind: output, shape index: {}]  }
   0x1   :  { %v7344_v0 = vld [vmem:[%s11224_s1 + $0x4] ss:$16 sps:$4 sm:$0xff]   ;;  %v7346_v1 = vld [vmem:[%s11224_s1 + $0xc] ss:$16 sps:$4 sm:$0xff]   ;;  %v7348_v2 = vld [vmem:[%s11224_s1] ss:$16 sps:$4 sm:$0xff]   ;;  %v838_v38 = vunpack.c.l.s4 %v8581_v37 }
   0x2   :  { %4945 = vmatprep.subr.bf16.mxu0 %v7344_v0  ;;  %v7349_v3 = vld [vmem:[%s11224_s1 + $0x8] ss:$16 sps:$4 sm:$0xff]   ;;  %5478 = vmatprep.subr.bf16.mxu1 %v7346_v1  ;;  %v7350_v4 = vld [vmem:[%s11224_s1 + $0x24] ss:$16 sps:$4 sm:$0xff]   ;;  %v7352_v5 = vld [vmem:[%s11224_s1 + $0x2c] ss:$16 sps:$4 sm:$0xff]  }
   0x3   :  { %4946 = vmatpush1.bf16.msra.mxu0 %v7348_v2  ;;  %5479 = vmatpush1.bf16.msra.mxu1 %v7349_v3  ;;  %v7354_v6 = vld [vmem:[%s11224_s1 + $0x20] ss:$16 sps:$4 sm:$0xff]   ;;  %v7355_v7 = vld [vmem:[%s11224_s1 + $0x28] ss:$16 sps:$4 sm:$0xff]   ;;  %v7356_v8 = vld [vmem:[%s11224_s1 + $0x44] ss:$16 sps:$4 sm:$0xff]   ;;  %v839_v43 = vunpack.c.0.s8 %v838_v38 }
   0x4   :  { %4947 = vmatprep.subr.bf16.mxu0 %v7350_v4  ;;  %5480 = vmatprep.subr.bf16.mxu1 %v7352_v5  ;;  %v7358_v9 = vld [vmem:[%s11224_s1 + $0x4c] ss:$16 sps:$4 sm:$0xff]   ;;  %v7360_v10 = vld [vmem:[%s11224_s1 + $0x40] ss:$16 sps:$4 sm:$0xff]   ;;  %v7361_v11 = vld [vmem:[%s11224_s1 + $0x48] ss:$16 sps:$4 sm:$0xff]  }
   0x5   :  { %v7362_v12 = vld [vmem:[%s11224_s1 + $0x64] ss:$16 sps:$4 sm:$0xff]   ;;  %v7364_v13 = vld [vmem:[%s11224_s1 + $0x6c] ss:$16 sps:$4 sm:$0xff]   ;;  %v7366_v14 = vld [vmem:[%s11224_s1 + $0x60] ss:$16 sps:$4 sm:$0xff]  }
   0x6   :  { %v7367_v15 = vld [vmem:[%s11224_s1 + $0x68] ss:$16 sps:$4 sm:$0xff]   ;;  %v7368_v16 = vld [vmem:[%s11224_s1 + $0x84] ss:$16 sps:$4 sm:$0xff]   ;;  %v7370_v17 = vld [vmem:[%s11224_s1 + $0x8c] ss:$16 sps:$4 sm:$0xff]  }
   0x7   :  { %4948 = vmatpush1.bf16.msra.mxu0 %v7354_v6  ;;  %5481 = vmatpush1.bf16.msra.mxu1 %v7355_v7  ;;  %v7372_v18 = vld [vmem:[%s11224_s1 + $0x80] ss:$16 sps:$4 sm:$0xff]   ;;  %v7373_v19 = vld [vmem:[%s11224_s1 + $0x88] ss:$16 sps:$4 sm:$0xff]   ;;  %v7374_v20 = vld [vmem:[%s11224_s1 + $0xa4] ss:$16 sps:$4 sm:$0xff]  }
   0x8   :  { %4949 = vmatprep.subr.bf16.mxu0 %v7356_v8  ;;  %5482 = vmatprep.subr.bf16.mxu1 %v7358_v9  ;;  %v7376_v21 = vld [vmem:[%s11224_s1 + $0xac] ss:$16 sps:$4 sm:$0xff]   ;;  %v7378_v22 = vld [vmem:[%s11224_s1 + $0xa0] ss:$16 sps:$4 sm:$0xff]   ;;  %v7379_v23 = vld [vmem:[%s11224_s1 + $0xa8] ss:$16 sps:$4 sm:$0xff]  }
   0x9   :  { %v7380_v24 = vld [vmem:[%s11224_s1 + $0xc4] ss:$16 sps:$4 sm:$0xff]   ;;  %v7382_v25 = vld [vmem:[%s11224_s1 + $0xcc] ss:$16 sps:$4 sm:$0xff]   ;;  %v7384_v26 = vld [vmem:[%s11224_s1 + $0xc0] ss:$16 sps:$4 sm:$0xff]  }
   0xa   :  { %v7385_v27 = vld [vmem:[%s11224_s1 + $0xc8] ss:$16 sps:$4 sm:$0xff]   ;;  %v7386_v28 = vld [vmem:[%s11224_s1 + $0xe4] ss:$16 sps:$4 sm:$0xff]   ;;  %v7388_v29 = vld [vmem:[%s11224_s1 + $0xec] ss:$16 sps:$4 sm:$0xff]  }
   0xb   :  { %4950 = vmatpush1.bf16.msra.mxu0 %v7360_v10  ;;  %5483 = vmatpush1.bf16.msra.mxu1 %v7361_v11  ;;  %v7390_v30 = vld [vmem:[%s11224_s1 + $0xe0] ss:$16 sps:$4 sm:$0xff]   ;;  %v7391_v31 = vld [vmem:[%s11224_s1 + $0xe8] ss:$16 sps:$4 sm:$0xff]   ;;  %v7392_v32 = vld [vmem:[%s11224_s1 + $0x104] ss:$16 sps:$4 sm:$0xff]  }
   0xc   :  { %4951 = vmatprep.subr.bf16.mxu0 %v7362_v12  ;;  %5484 = vmatprep.subr.bf16.mxu1 %v7364_v13  ;;  %v7394_v33 = vld [vmem:[%s11224_s1 + $0x10c] ss:$16 sps:$4 sm:$0xff]   ;;  %v7396_v34 = vld [vmem:[%s11224_s1 + $0x100] ss:$16 sps:$4 sm:$0xff]   ;;  %v7397_v35 = vld [vmem:[%s11224_s1 + $0x108] ss:$16 sps:$4 sm:$0xff]  }
   0xd   :  { %v7398_v39 = vld [vmem:[%s11224_s1 + $0x124] ss:$16 sps:$4 sm:$0xff]   ;;  %v7400_v40 = vld [vmem:[%s11224_s1 + $0x12c] ss:$16 sps:$4 sm:$0xff]   ;;  %v7402_v41 = vld [vmem:[%s11224_s1 + $0x120] ss:$16 sps:$4 sm:$0xff]  }
   0xe   :  { %v8731_v42 = vshrl.u32 %v812_v36, 7  ;;  %v7403_v44 = vld [vmem:[%s11224_s1 + $0x128] ss:$16 sps:$4 sm:$0xff]   ;;  %v7404_v45 = vld [vmem:[%s11224_s1 + $0x144] ss:$16 sps:$4 sm:$0xff]  }
   0xf   :  { %4952 = vmatpush1.bf16.msra.mxu0 %v7366_v14  ;;  %5485 = vmatpush1.bf16.msra.mxu1 %v7367_v15  ;;  %v7406_v46 = vld [vmem:[%s11224_s1 + $0x14c] ss:$16 sps:$4 sm:$0xff]   ;;  %v7408_v47 = vld [vmem:[%s11224_s1 + $0x140] ss:$16 sps:$4 sm:$0xff]   ;;  %v7409_v48 = vld [vmem:[%s11224_s1 + $0x148] ss:$16 sps:$4 sm:$0xff]  }
  0x10   :  { %4953 = vmatprep.subr.bf16.mxu0 %v7368_v16  ;;  %5486 = vmatprep.subr.bf16.mxu1 %v7370_v17  ;;  %v8749_v49 = vsub.s32 %v839_v43, %v8731_v42  ;;  %v7410_v50 = vld [vmem:[%s11224_s1 + $0x164] ss:$16 sps:$4 sm:$0xff]   ;;  %v7412_v51 = vld [vmem:[%s11224_s1 + $0x16c] ss:$16 sps:$4 sm:$0xff]   ;;  %v7414_v53 = vld [vmem:[%s11224_s1 + $0x160] ss:$16 sps:$4 sm:$0xff]  }
  0x11   :  { %v8760_v52 = vld [vmem:[%s11223_s0] sm:$0xff]  ;;  %v7415_v55 = vld [vmem:[%s11224_s1 + $0x168] ss:$16 sps:$4 sm:$0xff]   ;;  %v7418_v57 = vld [vmem:[%s11224_s1 + $0x18c] ss:$16 sps:$4 sm:$0xff]  }
  0x12   :  { %v843_v54 = vrot.slane %v8760_v52, %v8749_v49  ;;  %v7416_v56 = vld [vmem:[%s11224_s1 + $0x184] ss:$16 sps:$4 sm:$0xff]   ;;  %v7420_v59 = vld [vmem:[%s11224_s1 + $0x180] ss:$16 sps:$4 sm:$0xff]   ;;  %v7421_v61 = vld [vmem:[%s11224_s1 + $0x188] ss:$16 sps:$4 sm:$0xff]  }
  0x13   :  { %4954 = vmatpush1.bf16.msra.mxu0 %v7372_v18  ;;  %5487 = vmatpush1.bf16.msra.mxu1 %v7373_v19  ;;  %v7422_v62 = vld [vmem:[%s11224_s1 + $0x1a4] ss:$16 sps:$4 sm:$0xff]   ;;  %v7424_v63 = vld [vmem:[%s11224_s1 + $0x1ac] ss:$16 sps:$4 sm:$0xff]   ;;  %v7426_v0 = vld [vmem:[%s11224_s1 + $0x1a0] ss:$16 sps:$4 sm:$0xff]  }
  0x14   :  { %4955 = vmatprep.subr.bf16.mxu0 %v7374_v20  ;;  %5488 = vmatprep.subr.bf16.mxu1 %v7376_v21  ;;  %v851_v58 = vcombine.high %v843_v54, %v843_v54  ;;  %v7427_v1 = vld [vmem:[%s11224_s1 + $0x1a8] ss:$16 sps:$4 sm:$0xff]   ;;  %v7428_v2 = vld [vmem:[%s11224_s1 + $0x1c4] ss:$16 sps:$4 sm:$0xff]   ;;  %v7430_v3 = vld [vmem:[%s11224_s1 + $0x1cc] ss:$16 sps:$4 sm:$0xff]   ;;  %v8829_v13 = vrot.slane %v843_v54, %v8749_v49 }
  0x15   :  { %v7432_v4 = vld [vmem:[%s11224_s1 + $0x1c0] ss:$16 sps:$4 sm:$0xff]   ;;  %v7433_v5 = vld [vmem:[%s11224_s1 + $0x1c8] ss:$16 sps:$4 sm:$0xff]   ;;  %v7434_v6 = vld [vmem:[%s11224_s1 + $0x1e4] ss:$16 sps:$4 sm:$0xff]  }
  0x16   :  { %v873_v60 = vrot.slane %v851_v58, %v8749_v49  ;;  %v7436_v7 = vld [vmem:[%s11224_s1 + $0x1ec] ss:$16 sps:$4 sm:$0xff]   ;;  %v7438_v8 = vld [vmem:[%s11224_s1 + $0x1e0] ss:$16 sps:$4 sm:$0xff]   ;;  %v7439_v9 = vld [vmem:[%s11224_s1 + $0x1e8] ss:$16 sps:$4 sm:$0xff]  }
  0x17   :  { %4956 = vmatpush1.bf16.msra.mxu0 %v7378_v22  ;;  %5489 = vmatpush1.bf16.msra.mxu1 %v7379_v23  ;;  %v7442_v10 = vld [vmem:[%s11224_s1 + $0x204] ss:$16 sps:$4 sm:$0xff]   ;;  %v7445_v11 = vld [vmem:[%s11224_s1 + $0x20c] ss:$16 sps:$4 sm:$0xff]   ;;  %v7440_v12 = vld [vmem:[%s11224_s1 + $0x200] ss:$16 sps:$4 sm:$0xff]  }
  0x18   :  { %4957 = vmatprep.subr.bf16.mxu0 %v7380_v24  ;;  %5490 = vmatprep.subr.bf16.mxu1 %v7382_v25  ;;  %v7443_v14 = vld [vmem:[%s11224_s1 + $0x208] ss:$16 sps:$4 sm:$0xff]   ;;  %v7448_v15 = vld [vmem:[%s11224_s1 + $0x224] ss:$16 sps:$4 sm:$0xff]   ;;  %v7451_v16 = vld [vmem:[%s11224_s1 + $0x22c] ss:$16 sps:$4 sm:$0xff]   ;;  %v883_v17 = vcombine.high %v873_v60, %v873_v60 }
  0x19   :  { %4977 = vmatprep.mubr.bf16.mxu0 %v873_v60  ;;  %5510 = vmatprep.mubr.bf16.mxu1 %v873_v60  ;;  %v7446_v18 = vld [vmem:[%s11224_s1 + $0x220] ss:$16 sps:$4 sm:$0xff]   ;;  %v7449_v19 = vld [vmem:[%s11224_s1 + $0x228] ss:$16 sps:$4 sm:$0xff]   ;;  %v7454_v20 = vld [vmem:[%s11224_s1 + $0x244] ss:$16 sps:$4 sm:$0xff]  }
  0x1a   :  { %v7457_v21 = vld [vmem:[%s11224_s1 + $0x24c] ss:$16 sps:$4 sm:$0xff]   ;;  %v7452_v22 = vld [vmem:[%s11224_s1 + $0x240] ss:$16 sps:$4 sm:$0xff]   ;;  %v7455_v23 = vld [vmem:[%s11224_s1 + $0x248] ss:$16 sps:$4 sm:$0xff]  }
  0x1b   :  { %4958 = vmatpush1.bf16.msra.mxu0 %v7384_v26  ;;  %5491 = vmatpush1.bf16.msra.mxu1 %v7385_v27  ;;  %v7460_v24 = vld [vmem:[%s11224_s1 + $0x264] ss:$16 sps:$4 sm:$0xff]   ;;  %v7463_v25 = vld [vmem:[%s11224_s1 + $0x26c] ss:$16 sps:$4 sm:$0xff]   ;;  %v7458_v26 = vld [vmem:[%s11224_s1 + $0x260] ss:$16 sps:$4 sm:$0xff]  }
  0x1c   :  { %4959 = vmatprep.subr.bf16.mxu0 %v7386_v28  ;;  %5492 = vmatprep.subr.bf16.mxu1 %v7388_v29  ;;  %v7461_v27 = vld [vmem:[%s11224_s1 + $0x268] ss:$16 sps:$4 sm:$0xff]   ;;  %v7466_v28 = vld [vmem:[%s11224_s1 + $0x284] ss:$16 sps:$4 sm:$0xff]   ;;  %v7469_v29 = vld [vmem:[%s11224_s1 + $0x28c] ss:$16 sps:$4 sm:$0xff]  }
  0x1d   :  { %v7478_v36 = vld [vmem:[%s11224_s1 + $0x2c4] ss:$16 sps:$4 sm:$0xff]   ;;  %v7481_v37 = vld [vmem:[%s11224_s1 + $0x2cc] ss:$16 sps:$4 sm:$0xff]   ;;  %v7476_v38 = vld [vmem:[%s11224_s1 + $0x2c0] ss:$16 sps:$4 sm:$0xff]  }
  0x1e   :  { %v7482_v43 = vld [vmem:[%s11224_s1 + $0x2e0] ss:$16 sps:$4 sm:$0xff]   ;;  %v7497_v54 = vld [vmem:[%s11224_s1 + $0x328] ss:$16 sps:$4 sm:$0xff]   ;;  %v7511_v60 = vld [vmem:[%s11224_s1 + $0x36c] ss:$16 sps:$4 sm:$0xff]  }
  0x1f   :  { %4960 = vmatpush1.bf16.msra.mxu0 %v7390_v30  ;;  %5493 = vmatpush1.bf16.msra.mxu1 %v7391_v31  ;;  %v7464_v30 = vld [vmem:[%s11224_s1 + $0x280] ss:$16 sps:$4 sm:$0xff]   ;;  %v7467_v31 = vld [vmem:[%s11224_s1 + $0x288] ss:$16 sps:$4 sm:$0xff]  }
  0x20   :  { %4961 = vmatprep.subr.bf16.mxu0 %v7392_v32  ;;  %5494 = vmatprep.subr.bf16.mxu1 %v7394_v33  ;;  %v7472_v32 = vld [vmem:[%s11224_s1 + $0x2a4] ss:$16 sps:$4 sm:$0xff]   ;;  %v7475_v33 = vld [vmem:[%s11224_s1 + $0x2ac] ss:$16 sps:$4 sm:$0xff]   ;;  %v7503_v58 = vld [vmem:[%s11224_s1 + $0x348] ss:$16 sps:$4 sm:$0xff]  }
  0x23   :  { %4962 = vmatpush1.bf16.msra.mxu0 %v7396_v34  ;;  %5495 = vmatpush1.bf16.msra.mxu1 %v7397_v35  ;;  %v7470_v34 = vld [vmem:[%s11224_s1 + $0x2a0] ss:$16 sps:$4 sm:$0xff]   ;;  %v7473_v35 = vld [vmem:[%s11224_s1 + $0x2a8] ss:$16 sps:$4 sm:$0xff]  }
  0x24   :  { %4963 = vmatprep.subr.bf16.mxu0 %v7398_v39  ;;  %5496 = vmatprep.subr.bf16.mxu1 %v7400_v40  ;;  %v7479_v39 = vld [vmem:[%s11224_s1 + $0x2c8] ss:$16 sps:$4 sm:$0xff]   ;;  %v7484_v40 = vld [vmem:[%s11224_s1 + $0x2e4] ss:$16 sps:$4 sm:$0xff]  }
  0x27   :  { %4964 = vmatpush1.bf16.msra.mxu0 %v7402_v41  ;;  %5497 = vmatpush1.bf16.msra.mxu1 %v7403_v44  ;;  %v7487_v41 = vld [vmem:[%s11224_s1 + $0x2ec] ss:$16 sps:$4 sm:$0xff]   ;;  %v7485_v44 = vld [vmem:[%s11224_s1 + $0x2e8] ss:$16 sps:$4 sm:$0xff]  }
  0x28   :  { %4965 = vmatprep.subr.bf16.mxu0 %v7404_v45  ;;  %5498 = vmatprep.subr.bf16.mxu1 %v7406_v46  ;;  %v7490_v45 = vld [vmem:[%s11224_s1 + $0x304] ss:$16 sps:$4 sm:$0xff]   ;;  %v7493_v46 = vld [vmem:[%s11224_s1 + $0x30c] ss:$16 sps:$4 sm:$0xff]  }
  0x2b   :  { %4966 = vmatpush1.bf16.msra.mxu0 %v7408_v47  ;;  %5499 = vmatpush1.bf16.msra.mxu1 %v7409_v48  ;;  %v7488_v47 = vld [vmem:[%s11224_s1 + $0x300] ss:$16 sps:$4 sm:$0xff]   ;;  %v7491_v48 = vld [vmem:[%s11224_s1 + $0x308] ss:$16 sps:$4 sm:$0xff]  }
  0x2c   :  { %4967 = vmatprep.subr.bf16.mxu0 %v7410_v50  ;;  %5500 = vmatprep.subr.bf16.mxu1 %v7412_v51  ;;  %v7496_v50 = vld [vmem:[%s11224_s1 + $0x324] ss:$16 sps:$4 sm:$0xff]   ;;  %v7499_v51 = vld [vmem:[%s11224_s1 + $0x32c] ss:$16 sps:$4 sm:$0xff]  }
  0x2f   :  { %4968 = vmatpush1.bf16.msra.mxu0 %v7414_v53  ;;  %5501 = vmatpush1.bf16.msra.mxu1 %v7415_v55  ;;  %v7494_v53 = vld [vmem:[%s11224_s1 + $0x320] ss:$16 sps:$4 sm:$0xff]   ;;  %v7502_v55 = vld [vmem:[%s11224_s1 + $0x344] ss:$16 sps:$4 sm:$0xff]  }
  0x30   :  { %4969 = vmatprep.subr.bf16.mxu0 %v7416_v56  ;;  %5502 = vmatprep.subr.bf16.mxu1 %v7418_v57  ;;  %v7505_v56 = vld [vmem:[%s11224_s1 + $0x34c] ss:$16 sps:$4 sm:$0xff]   ;;  %v7500_v57 = vld [vmem:[%s11224_s1 + $0x340] ss:$16 sps:$4 sm:$0xff]  }
  0x33   :  { %4970 = vmatpush1.bf16.msra.mxu0 %v7420_v59  ;;  %5503 = vmatpush1.bf16.msra.mxu1 %v7421_v61  ;;  %v7508_v59 = vld [vmem:[%s11224_s1 + $0x364] ss:$16 sps:$4 sm:$0xff]   ;;  %v7506_v61 = vld [vmem:[%s11224_s1 + $0x360] ss:$16 sps:$4 sm:$0xff]  }
  0x34   :  { %4971 = vmatprep.subr.bf16.mxu0 %v7422_v62  ;;  %5504 = vmatprep.subr.bf16.mxu1 %v7424_v63  ;;  %v7509_v62 = vld [vmem:[%s11224_s1 + $0x368] ss:$16 sps:$4 sm:$0xff]   ;;  %v7514_v63 = vld [vmem:[%s11224_s1 + $0x384] ss:$16 sps:$4 sm:$0xff]  }
  0x37   :  { %4972 = vmatpush1.bf16.msra.mxu0 %v7426_v0  ;;  %5505 = vmatpush1.bf16.msra.mxu1 %v7427_v1  ;;  %v7517_v0 = vld [vmem:[%s11224_s1 + $0x38c] ss:$16 sps:$4 sm:$0xff]   ;;  %v7512_v1 = vld [vmem:[%s11224_s1 + $0x380] ss:$16 sps:$4 sm:$0xff]  }
  0x38   :  { %4973 = vmatprep.subr.bf16.mxu0 %v7428_v2  ;;  %5506 = vmatprep.subr.bf16.mxu1 %v7430_v3  ;;  %v7515_v2 = vld [vmem:[%s11224_s1 + $0x388] ss:$16 sps:$4 sm:$0xff]   ;;  %v7520_v3 = vld [vmem:[%s11224_s1 + $0x3a4] ss:$16 sps:$4 sm:$0xff]  }
  0x3b   :  { %4974 = vmatpush1.bf16.msra.mxu0 %v7432_v4  ;;  %5507 = vmatpush1.bf16.msra.mxu1 %v7433_v5  ;;  %v7523_v4 = vld [vmem:[%s11224_s1 + $0x3ac] ss:$16 sps:$4 sm:$0xff]   ;;  %v7518_v5 = vld [vmem:[%s11224_s1 + $0x3a0] ss:$16 sps:$4 sm:$0xff]  }
  0x3c   :  { %4975 = vmatprep.subr.bf16.mxu0 %v7434_v6  ;;  %5508 = vmatprep.subr.bf16.mxu1 %v7436_v7  ;;  %v7521_v6 = vld [vmem:[%s11224_s1 + $0x3a8] ss:$16 sps:$4 sm:$0xff]   ;;  %v7526_v7 = vld [vmem:[%s11224_s1 + $0x3c4] ss:$16 sps:$4 sm:$0xff]  }
  0x3f   :  { %4976 = vmatpush1.bf16.msra.mxu0 %v7438_v8  ;;  %5509 = vmatpush1.bf16.msra.mxu1 %v7439_v9  ;;  %v7529_v8 = vld [vmem:[%s11224_s1 + $0x3cc] ss:$16 sps:$4 sm:$0xff]   ;;  %v836_v9 = vcombine.high %v8760_v52, %v8760_v52 }
  0x40   :  { %4986 = vmatprep.subr.bf16.mxu0 %v7442_v10  ;;  %5519 = vmatprep.subr.bf16.mxu1 %v7445_v11  ;;  %v7524_v10 = vld [vmem:[%s11224_s1 + $0x3c0] ss:$16 sps:$4 sm:$0xff]   ;;  %v7527_v11 = vld [vmem:[%s11224_s1 + $0x3c8] ss:$16 sps:$4 sm:$0xff]   ;;  %v7535_v52 = vld [vmem:[%s11224_s1 + $0x3ec] ss:$16 sps:$4 sm:$0xff]  }
  0x42   :  { %4978 = vmatmul.mubr.bf16.vlgmr.msra.gmra.mrb[0].mxu0 %v8829_v13  ;;  %5511 = vmatmul.mubr.bf16.vlgmr.msra.gmra.mrb[0].mxu1 %v8829_v13 }
  0x43   :  { %4987 = vmatpush1.bf16.msra.mxu0 %v7440_v12  ;;  %5520 = vmatpush1.bf16.msra.mxu1 %v7443_v14  ;;  %v7532_v12 = vld [vmem:[%s11224_s1 + $0x3e4] ss:$16 sps:$4 sm:$0xff]   ;;  %v9013_v14 = vrot.slane %v836_v9, %v8749_v49  ;;  %v7611_v9 = vld [vmem:[%s11224_s1 + $0x588] ss:$16 sps:$4 sm:$0xff]  }
  0x44   :  { %4988 = vmatprep.subr.bf16.mxu0 %v7448_v15  ;;  %5521 = vmatprep.subr.bf16.mxu1 %v7451_v16  ;;  %v7530_v15 = vld [vmem:[%s11224_s1 + $0x3e0] ss:$16 sps:$4 sm:$0xff]   ;;  %v7533_v16 = vld [vmem:[%s11224_s1 + $0x3e8] ss:$16 sps:$4 sm:$0xff]  }
  0x45   :  { %5018 = vmatprep.mubr.bf16.mxu0 %v883_v17  ;;  %5551 = vmatprep.mubr.bf16.mxu1 %v883_v17  ;;  %v7538_v17 = vld [vmem:[%s11224_s1 + $0x404] ss:$16 sps:$4 sm:$0xff]  }
  0x47   :  { %4989 = vmatpush1.bf16.msra.mxu0 %v7446_v18  ;;  %5522 = vmatpush1.bf16.msra.mxu1 %v7449_v19  ;;  %v7541_v18 = vld [vmem:[%s11224_s1 + $0x40c] ss:$16 sps:$4 sm:$0xff]   ;;  %v852_v19 = vcombine.high %v9013_v14, %v9013_v14 }
  0x48   :  { %4990 = vmatprep.subr.bf16.mxu0 %v7454_v20  ;;  %5523 = vmatprep.subr.bf16.mxu1 %v7457_v21  ;;  %v7536_v20 = vld [vmem:[%s11224_s1 + $0x400] ss:$16 sps:$4 sm:$0xff]   ;;  %v881_v21 = vcombine.high %v8829_v13, %v8829_v13 }
  0x49   :  { %v7542_v13 = vld [vmem:[%s11224_s1 + $0x420] ss:$16 sps:$4 sm:$0xff]  }
  0x4b   :  { %4991 = vmatpush1.bf16.msra.mxu0 %v7452_v22  ;;  %5524 = vmatpush1.bf16.msra.mxu1 %v7455_v23  ;;  %v7539_v22 = vld [vmem:[%s11224_s1 + $0x408] ss:$16 sps:$4 sm:$0xff]   ;;  %v7544_v23 = vld [vmem:[%s11224_s1 + $0x424] ss:$16 sps:$4 sm:$0xff]  }
  0x4c   :  { %4992 = vmatprep.subr.bf16.mxu0 %v7460_v24  ;;  %5525 = vmatprep.subr.bf16.mxu1 %v7463_v25  ;;  %v7547_v24 = vld [vmem:[%s11224_s1 + $0x42c] ss:$16 sps:$4 sm:$0xff]   ;;  %v9044_v25 = vrot.slane %v852_v19, %v8749_v49  ;;  %v7628_v19 = vld [vmem:[%s11224_s1 + $0x5e4] ss:$16 sps:$4 sm:$0xff]  }
  0x4f   :  { %4993 = vmatpush1.bf16.msra.mxu0 %v7458_v26  ;;  %5526 = vmatpush1.bf16.msra.mxu1 %v7461_v27  ;;  %v7545_v26 = vld [vmem:[%s11224_s1 + $0x428] ss:$16 sps:$4 sm:$0xff]   ;;  %v7550_v27 = vld [vmem:[%s11224_s1 + $0x444] ss:$16 sps:$4 sm:$0xff]  }
  0x50   :  { %4994 = vmatprep.subr.bf16.mxu0 %v7466_v28  ;;  %5527 = vmatprep.subr.bf16.mxu1 %v7469_v29  ;;  %v7553_v28 = vld [vmem:[%s11224_s1 + $0x44c] ss:$16 sps:$4 sm:$0xff]   ;;  %v7548_v29 = vld [vmem:[%s11224_s1 + $0x440] ss:$16 sps:$4 sm:$0xff]  }
  0x53   :  { %4995 = vmatpush1.bf16.msra.mxu0 %v7464_v30  ;;  %5528 = vmatpush1.bf16.msra.mxu1 %v7467_v31  ;;  %v7551_v30 = vld [vmem:[%s11224_s1 + $0x448] ss:$16 sps:$4 sm:$0xff]   ;;  %v7556_v31 = vld [vmem:[%s11224_s1 + $0x464] ss:$16 sps:$4 sm:$0xff]  }
  0x54   :  { %4996 = vmatprep.subr.bf16.mxu0 %v7472_v32  ;;  %5529 = vmatprep.subr.bf16.mxu1 %v7475_v33  ;;  %v7559_v32 = vld [vmem:[%s11224_s1 + $0x46c] ss:$16 sps:$4 sm:$0xff]   ;;  %v7554_v33 = vld [vmem:[%s11224_s1 + $0x460] ss:$16 sps:$4 sm:$0xff]  }
  0x57   :  { %4997 = vmatpush1.bf16.msra.mxu0 %v7470_v34  ;;  %5530 = vmatpush1.bf16.msra.mxu1 %v7473_v35  ;;  %v7557_v34 = vld [vmem:[%s11224_s1 + $0x468] ss:$16 sps:$4 sm:$0xff]   ;;  %v7562_v35 = vld [vmem:[%s11224_s1 + $0x484] ss:$16 sps:$4 sm:$0xff]  }
  0x58   :  { %4998 = vmatprep.subr.bf16.mxu0 %v7478_v36  ;;  %5531 = vmatprep.subr.bf16.mxu1 %v7481_v37  ;;  %v7565_v36 = vld [vmem:[%s11224_s1 + $0x48c] ss:$16 sps:$4 sm:$0xff]   ;;  %v7560_v37 = vld [vmem:[%s11224_s1 + $0x480] ss:$16 sps:$4 sm:$0xff]  }
  0x5b   :  { %4999 = vmatpush1.bf16.msra.mxu0 %v7476_v38  ;;  %5532 = vmatpush1.bf16.msra.mxu1 %v7479_v39  ;;  %v7563_v38 = vld [vmem:[%s11224_s1 + $0x488] ss:$16 sps:$4 sm:$0xff]   ;;  %v7568_v39 = vld [vmem:[%s11224_s1 + $0x4a4] ss:$16 sps:$4 sm:$0xff]  }
  0x5c   :  { %5000 = vmatprep.subr.bf16.mxu0 %v7484_v40  ;;  %5533 = vmatprep.subr.bf16.mxu1 %v7487_v41  ;;  %v7571_v40 = vld [vmem:[%s11224_s1 + $0x4ac] ss:$16 sps:$4 sm:$0xff]   ;;  %v7566_v41 = vld [vmem:[%s11224_s1 + $0x4a0] ss:$16 sps:$4 sm:$0xff]  }
  0x5f   :  { %5001 = vmatpush1.bf16.msra.mxu0 %v7482_v43  ;;  %5534 = vmatpush1.bf16.msra.mxu1 %v7485_v44  ;;  %v7569_v43 = vld [vmem:[%s11224_s1 + $0x4a8] ss:$16 sps:$4 sm:$0xff]   ;;  %v7574_v44 = vld [vmem:[%s11224_s1 + $0x4c4] ss:$16 sps:$4 sm:$0xff]  }
  0x60   :  { %5002 = vmatprep.subr.bf16.mxu0 %v7490_v45  ;;  %5535 = vmatprep.subr.bf16.mxu1 %v7493_v46  ;;  %v7577_v45 = vld [vmem:[%s11224_s1 + $0x4cc] ss:$16 sps:$4 sm:$0xff]   ;;  %v7572_v46 = vld [vmem:[%s11224_s1 + $0x4c0] ss:$16 sps:$4 sm:$0xff]  }
  0x63   :  { %5003 = vmatpush1.bf16.msra.mxu0 %v7488_v47  ;;  %5536 = vmatpush1.bf16.msra.mxu1 %v7491_v48  ;;  %v7575_v47 = vld [vmem:[%s11224_s1 + $0x4c8] ss:$16 sps:$4 sm:$0xff]   ;;  %v7580_v48 = vld [vmem:[%s11224_s1 + $0x4e4] ss:$16 sps:$4 sm:$0xff]  }
  0x64   :  { %5004 = vmatprep.subr.bf16.mxu0 %v7496_v50  ;;  %5537 = vmatprep.subr.bf16.mxu1 %v7499_v51  ;;  %v7583_v50 = vld [vmem:[%s11224_s1 + $0x4ec] ss:$16 sps:$4 sm:$0xff]   ;;  %v7578_v51 = vld [vmem:[%s11224_s1 + $0x4e0] ss:$16 sps:$4 sm:$0xff]  }
  0x67   :  { %5005 = vmatpush1.bf16.msra.mxu0 %v7494_v53  ;;  %5538 = vmatpush1.bf16.msra.mxu1 %v7497_v54  ;;  %v7581_v53 = vld [vmem:[%s11224_s1 + $0x4e8] ss:$16 sps:$4 sm:$0xff]   ;;  %v7586_v54 = vld [vmem:[%s11224_s1 + $0x504] ss:$16 sps:$4 sm:$0xff]  }
  0x68   :  { %5006 = vmatprep.subr.bf16.mxu0 %v7502_v55  ;;  %5539 = vmatprep.subr.bf16.mxu1 %v7505_v56  ;;  %v7589_v55 = vld [vmem:[%s11224_s1 + $0x50c] ss:$16 sps:$4 sm:$0xff]   ;;  %v7584_v56 = vld [vmem:[%s11224_s1 + $0x500] ss:$16 sps:$4 sm:$0xff]  }
  0x6b   :  { %5007 = vmatpush1.bf16.msra.mxu0 %v7500_v57  ;;  %5540 = vmatpush1.bf16.msra.mxu1 %v7503_v58  ;;  %v7587_v57 = vld [vmem:[%s11224_s1 + $0x508] ss:$16 sps:$4 sm:$0xff]   ;;  %v7592_v58 = vld [vmem:[%s11224_s1 + $0x524] ss:$16 sps:$4 sm:$0xff]  }
  0x6c   :  { %5008 = vmatprep.subr.bf16.mxu0 %v7508_v59  ;;  %5541 = vmatprep.subr.bf16.mxu1 %v7511_v60  ;;  %v7595_v59 = vld [vmem:[%s11224_s1 + $0x52c] ss:$16 sps:$4 sm:$0xff]   ;;  %v7590_v60 = vld [vmem:[%s11224_s1 + $0x520] ss:$16 sps:$4 sm:$0xff]  }
  0x6f   :  { %5009 = vmatpush1.bf16.msra.mxu0 %v7506_v61  ;;  %5542 = vmatpush1.bf16.msra.mxu1 %v7509_v62  ;;  %v7593_v61 = vld [vmem:[%s11224_s1 + $0x528] ss:$16 sps:$4 sm:$0xff]   ;;  %v7598_v62 = vld [vmem:[%s11224_s1 + $0x544] ss:$16 sps:$4 sm:$0xff]  }
  0x70   :  { %5010 = vmatprep.subr.bf16.mxu0 %v7514_v63  ;;  %5543 = vmatprep.subr.bf16.mxu1 %v7517_v0  ;;  %v7601_v63 = vld [vmem:[%s11224_s1 + $0x54c] ss:$16 sps:$4 sm:$0xff]   ;;  %v7596_v0 = vld [vmem:[%s11224_s1 + $0x540] ss:$16 sps:$4 sm:$0xff]  }
  0x73   :  { %5011 = vmatpush1.bf16.msra.mxu0 %v7512_v1  ;;  %5544 = vmatpush1.bf16.msra.mxu1 %v7515_v2  ;;  %v7599_v1 = vld [vmem:[%s11224_s1 + $0x548] ss:$16 sps:$4 sm:$0xff]   ;;  %v7604_v2 = vld [vmem:[%s11224_s1 + $0x564] ss:$16 sps:$4 sm:$0xff]  }
  0x74   :  { %5012 = vmatprep.subr.bf16.mxu0 %v7520_v3  ;;  %5545 = vmatprep.subr.bf16.mxu1 %v7523_v4  ;;  %v7607_v3 = vld [vmem:[%s11224_s1 + $0x56c] ss:$16 sps:$4 sm:$0xff]   ;;  %v7602_v4 = vld [vmem:[%s11224_s1 + $0x560] ss:$16 sps:$4 sm:$0xff]  }
  0x77   :  { %5013 = vmatpush1.bf16.msra.mxu0 %v7518_v5  ;;  %5546 = vmatpush1.bf16.msra.mxu1 %v7521_v6  ;;  %v7605_v5 = vld [vmem:[%s11224_s1 + $0x568] ss:$16 sps:$4 sm:$0xff]   ;;  %v7610_v6 = vld [vmem:[%s11224_s1 + $0x584] ss:$16 sps:$4 sm:$0xff]  }
  0x78   :  { %5014 = vmatprep.subr.bf16.mxu0 %v7526_v7  ;;  %5547 = vmatprep.subr.bf16.mxu1 %v7529_v8  ;;  %v7613_v7 = vld [vmem:[%s11224_s1 + $0x58c] ss:$16 sps:$4 sm:$0xff]   ;;  %v7608_v8 = vld [vmem:[%s11224_s1 + $0x580] ss:$16 sps:$4 sm:$0xff]  }
  0x7b   :  { %5015 = vmatpush1.bf16.msra.mxu0 %v7524_v10  ;;  %5548 = vmatpush1.bf16.msra.mxu1 %v7527_v11  ;;  %v7616_v10 = vld [vmem:[%s11224_s1 + $0x5a4] ss:$16 sps:$4 sm:$0xff]   ;;  %v7619_v11 = vld [vmem:[%s11224_s1 + $0x5ac] ss:$16 sps:$4 sm:$0xff]  }
  0x7c   :  { %5016 = vmatprep.subr.bf16.mxu0 %v7532_v12  ;;  %5549 = vmatprep.subr.bf16.mxu1 %v7535_v52  ;;  %v7614_v12 = vld [vmem:[%s11224_s1 + $0x5a0] ss:$16 sps:$4 sm:$0xff]   ;;  %v7617_v52 = vld [vmem:[%s11224_s1 + $0x5a8] ss:$16 sps:$4 sm:$0xff]  }
  0x7f   :  { %5017 = vmatpush1.bf16.msra.mxu0 %v7530_v15  ;;  %5550 = vmatpush1.bf16.msra.mxu1 %v7533_v16  ;;  %v7622_v15 = vld [vmem:[%s11224_s1 + $0x5c4] ss:$16 sps:$4 sm:$0xff]   ;;  %v7625_v16 = vld [vmem:[%s11224_s1 + $0x5cc] ss:$16 sps:$4 sm:$0xff]  }
  0x80   :  { %5027 = vmatprep.subr.bf16.mxu0 %v7538_v17  ;;  %5560 = vmatprep.subr.bf16.mxu1 %v7541_v18  ;;  %v7620_v17 = vld [vmem:[%s11224_s1 + $0x5c0] ss:$16 sps:$4 sm:$0xff]   ;;  %v7623_v18 = vld [vmem:[%s11224_s1 + $0x5c8] ss:$16 sps:$4 sm:$0xff]  }
  0x82   :  { %5019 = vmatmul.mubr.bf16.vlgmr.msra.gmra.mrb[0].mxu0 %v881_v21  ;;  %5552 = vmatmul.mubr.bf16.vlgmr.msra.gmra.mrb[0].mxu1 %v881_v21  ;;  %v7626_v21 = vld [vmem:[%s11224_s1 + $0x5e0] ss:$16 sps:$4 sm:$0xff]  }
  0x83   :  { %5028 = vmatpush1.bf16.msra.mxu0 %v7536_v20  ;;  %5561 = vmatpush1.bf16.msra.mxu1 %v7539_v22  ;;  %v7631_v20 = vld [vmem:[%s11224_s1 + $0x5ec] ss:$16 sps:$4 sm:$0xff]   ;;  %v7629_v22 = vld [vmem:[%s11224_s1 + $0x5e8] ss:$16 sps:$4 sm:$0xff]  }
  0x84   :  { %5029 = vmatprep.subr.bf16.mxu0 %v7544_v23  ;;  %5562 = vmatprep.subr.bf16.mxu1 %v7547_v24  ;;  %v7635_v23 = vld [vmem:[%s11224_s1 + $0x604] ss:$16 sps:$4 sm:$0xff]   ;;  %v7638_v24 = vld [vmem:[%s11224_s1 + $0x60c] ss:$16 sps:$4 sm:$0xff]  }
  0x85   :  { %5059 = vmatprep.mubr.bf16.mxu0 %v9044_v25  ;;  %5592 = vmatprep.mubr.bf16.mxu1 %v9044_v25 }
  0x87   :  { %5030 = vmatpush1.bf16.msra.mxu0 %v7542_v13  ;;  %5563 = vmatpush1.bf16.msra.mxu1 %v7545_v26  ;;  %v7633_v13 = vld [vmem:[%s11224_s1 + $0x600] ss:$16 sps:$4 sm:$0xff]   ;;  %v9233_v26 = vrot.slane %v9013_v14, %v8749_v49  ;;  %v884_v14 = vcombine.high %v9044_v25, %v9044_v25  ;;  %v7647_v25 = vld [vmem:[%s11224_s1 + $0x644] ss:$16 sps:$4 sm:$0xff]  }
  0x88   :  { %5031 = vmatprep.subr.bf16.mxu0 %v7550_v27  ;;  %5564 = vmatprep.subr.bf16.mxu1 %v7553_v28  ;;  %v7636_v27 = vld [vmem:[%s11224_s1 + $0x608] ss:$16 sps:$4 sm:$0xff]   ;;  %v7641_v28 = vld [vmem:[%s11224_s1 + $0x624] ss:$16 sps:$4 sm:$0xff]  }
  0x8b   :  { %5032 = vmatpush1.bf16.msra.mxu0 %v7548_v29  ;;  %5565 = vmatpush1.bf16.msra.mxu1 %v7551_v30  ;;  %v7644_v29 = vld [vmem:[%s11224_s1 + $0x62c] ss:$16 sps:$4 sm:$0xff]   ;;  %v7639_v30 = vld [vmem:[%s11224_s1 + $0x620] ss:$16 sps:$4 sm:$0xff]  }
  0x8c   :  { %5033 = vmatprep.subr.bf16.mxu0 %v7556_v31  ;;  %5566 = vmatprep.subr.bf16.mxu1 %v7559_v32  ;;  %v7642_v31 = vld [vmem:[%s11224_s1 + $0x628] ss:$16 sps:$4 sm:$0xff]   ;;  %v7650_v32 = vld [vmem:[%s11224_s1 + $0x64c] ss:$16 sps:$4 sm:$0xff]  }
  0x8f   :  { %5034 = vmatpush1.bf16.msra.mxu0 %v7554_v33  ;;  %5567 = vmatpush1.bf16.msra.mxu1 %v7557_v34  ;;  %v7645_v33 = vld [vmem:[%s11224_s1 + $0x640] ss:$16 sps:$4 sm:$0xff]   ;;  %v7648_v34 = vld [vmem:[%s11224_s1 + $0x648] ss:$16 sps:$4 sm:$0xff]  }
  0x90   :  { %5035 = vmatprep.subr.bf16.mxu0 %v7562_v35  ;;  %5568 = vmatprep.subr.bf16.mxu1 %v7565_v36  ;;  %v7653_v35 = vld [vmem:[%s11224_s1 + $0x664] ss:$16 sps:$4 sm:$0xff]   ;;  %v7656_v36 = vld [vmem:[%s11224_s1 + $0x66c] ss:$16 sps:$4 sm:$0xff]  }
  0x93   :  { %5036 = vmatpush1.bf16.msra.mxu0 %v7560_v37  ;;  %5569 = vmatpush1.bf16.msra.mxu1 %v7563_v38  ;;  %v7651_v37 = vld [vmem:[%s11224_s1 + $0x660] ss:$16 sps:$4 sm:$0xff]   ;;  %v7654_v38 = vld [vmem:[%s11224_s1 + $0x668] ss:$16 sps:$4 sm:$0xff]  }
  0x94   :  { %5037 = vmatprep.subr.bf16.mxu0 %v7568_v39  ;;  %5570 = vmatprep.subr.bf16.mxu1 %v7571_v40  ;;  %v7659_v39 = vld [vmem:[%s11224_s1 + $0x684] ss:$16 sps:$4 sm:$0xff]   ;;  %v7662_v40 = vld [vmem:[%s11224_s1 + $0x68c] ss:$16 sps:$4 sm:$0xff]  }
  0x97   :  { %5038 = vmatpush1.bf16.msra.mxu0 %v7566_v41  ;;  %5571 = vmatpush1.bf16.msra.mxu1 %v7569_v43  ;;  %v7657_v41 = vld [vmem:[%s11224_s1 + $0x680] ss:$16 sps:$4 sm:$0xff]   ;;  %v7660_v43 = vld [vmem:[%s11224_s1 + $0x688] ss:$16 sps:$4 sm:$0xff]  }
  0x98   :  { %5039 = vmatprep.subr.bf16.mxu0 %v7574_v44  ;;  %5572 = vmatprep.subr.bf16.mxu1 %v7577_v45  ;;  %v7665_v44 = vld [vmem:[%s11224_s1 + $0x6a4] ss:$16 sps:$4 sm:$0xff]   ;;  %v7668_v45 = vld [vmem:[%s11224_s1 + $0x6ac] ss:$16 sps:$4 sm:$0xff]  }
  0x9b   :  { %5040 = vmatpush1.bf16.msra.mxu0 %v7572_v46  ;;  %5573 = vmatpush1.bf16.msra.mxu1 %v7575_v47  ;;  %v7663_v46 = vld [vmem:[%s11224_s1 + $0x6a0] ss:$16 sps:$4 sm:$0xff]   ;;  %v7666_v47 = vld [vmem:[%s11224_s1 + $0x6a8] ss:$16 sps:$4 sm:$0xff]  }
  0x9c   :  { %5041 = vmatprep.subr.bf16.mxu0 %v7580_v48  ;;  %5574 = vmatprep.subr.bf16.mxu1 %v7583_v50  ;;  %v7671_v48 = vld [vmem:[%s11224_s1 + $0x6c4] ss:$16 sps:$4 sm:$0xff]   ;;  %v7674_v50 = vld [vmem:[%s11224_s1 + $0x6cc] ss:$16 sps:$4 sm:$0xff]  }
  0x9f   :  { %5042 = vmatpush1.bf16.msra.mxu0 %v7578_v51  ;;  %5575 = vmatpush1.bf16.msra.mxu1 %v7581_v53  ;;  %v7669_v51 = vld [vmem:[%s11224_s1 + $0x6c0] ss:$16 sps:$4 sm:$0xff]   ;;  %v7672_v53 = vld [vmem:[%s11224_s1 + $0x6c8] ss:$16 sps:$4 sm:$0xff]  }
  0xa0   :  { %5043 = vmatprep.subr.bf16.mxu0 %v7586_v54  ;;  %5576 = vmatprep.subr.bf16.mxu1 %v7589_v55  ;;  %v7677_v54 = vld [vmem:[%s11224_s1 + $0x6e4] ss:$16 sps:$4 sm:$0xff]   ;;  %v7680_v55 = vld [vmem:[%s11224_s1 + $0x6ec] ss:$16 sps:$4 sm:$0xff]  }
  0xa3   :  { %5044 = vmatpush1.bf16.msra.mxu0 %v7584_v56  ;;  %5577 = vmatpush1.bf16.msra.mxu1 %v7587_v57  ;;  %v7675_v56 = vld [vmem:[%s11224_s1 + $0x6e0] ss:$16 sps:$4 sm:$0xff]   ;;  %v7678_v57 = vld [vmem:[%s11224_s1 + $0x6e8] ss:$16 sps:$4 sm:$0xff]  }
  0xa4   :  { %5045 = vmatprep.subr.bf16.mxu0 %v7592_v58  ;;  %5578 = vmatprep.subr.bf16.mxu1 %v7595_v59  ;;  %v7683_v58 = vld [vmem:[%s11224_s1 + $0x704] ss:$16 sps:$4 sm:$0xff]   ;;  %v7686_v59 = vld [vmem:[%s11224_s1 + $0x70c] ss:$16 sps:$4 sm:$0xff]  }
  0xa7   :  { %5046 = vmatpush1.bf16.msra.mxu0 %v7590_v60  ;;  %5579 = vmatpush1.bf16.msra.mxu1 %v7593_v61  ;;  %v7681_v60 = vld [vmem:[%s11224_s1 + $0x700] ss:$16 sps:$4 sm:$0xff]   ;;  %v7684_v61 = vld [vmem:[%s11224_s1 + $0x708] ss:$16 sps:$4 sm:$0xff]  }
  0xa8   :  { %5047 = vmatprep.subr.bf16.mxu0 %v7598_v62  ;;  %5580 = vmatprep.subr.bf16.mxu1 %v7601_v63  ;;  %v7689_v62 = vld [vmem:[%s11224_s1 + $0x724] ss:$16 sps:$4 sm:$0xff]   ;;  %v7692_v63 = vld [vmem:[%s11224_s1 + $0x72c] ss:$16 sps:$4 sm:$0xff]  }
  0xab   :  { %5048 = vmatpush1.bf16.msra.mxu0 %v7596_v0  ;;  %5581 = vmatpush1.bf16.msra.mxu1 %v7599_v1  ;;  %v7687_v0 = vld [vmem:[%s11224_s1 + $0x720] ss:$16 sps:$4 sm:$0xff]   ;;  %v7690_v1 = vld [vmem:[%s11224_s1 + $0x728] ss:$16 sps:$4 sm:$0xff]  }
  0xac   :  { %5049 = vmatprep.subr.bf16.mxu0 %v7604_v2  ;;  %5582 = vmatprep.subr.bf16.mxu1 %v7607_v3  ;;  %v7695_v2 = vld [vmem:[%s11224_s1 + $0x744] ss:$16 sps:$4 sm:$0xff]   ;;  %v7698_v3 = vld [vmem:[%s11224_s1 + $0x74c] ss:$16 sps:$4 sm:$0xff]  }
  0xaf   :  { %5050 = vmatpush1.bf16.msra.mxu0 %v7602_v4  ;;  %5583 = vmatpush1.bf16.msra.mxu1 %v7605_v5  ;;  %v7693_v4 = vld [vmem:[%s11224_s1 + $0x740] ss:$16 sps:$4 sm:$0xff]   ;;  %v7696_v5 = vld [vmem:[%s11224_s1 + $0x748] ss:$16 sps:$4 sm:$0xff]  }
  0xb0   :  { %5051 = vmatprep.subr.bf16.mxu0 %v7610_v6  ;;  %5584 = vmatprep.subr.bf16.mxu1 %v7613_v7  ;;  %v7701_v6 = vld [vmem:[%s11224_s1 + $0x764] ss:$16 sps:$4 sm:$0xff]   ;;  %v7704_v7 = vld [vmem:[%s11224_s1 + $0x76c] ss:$16 sps:$4 sm:$0xff]  }
  0xb3   :  { %5052 = vmatpush1.bf16.msra.mxu0 %v7608_v8  ;;  %5585 = vmatpush1.bf16.msra.mxu1 %v7611_v9  ;;  %v7699_v8 = vld [vmem:[%s11224_s1 + $0x760] ss:$16 sps:$4 sm:$0xff]   ;;  %v7702_v9 = vld [vmem:[%s11224_s1 + $0x768] ss:$16 sps:$4 sm:$0xff]  }
  0xb4   :  { %5053 = vmatprep.subr.bf16.mxu0 %v7616_v10  ;;  %5586 = vmatprep.subr.bf16.mxu1 %v7619_v11  ;;  %v7707_v10 = vld [vmem:[%s11224_s1 + $0x784] ss:$16 sps:$4 sm:$0xff]   ;;  %v7710_v11 = vld [vmem:[%s11224_s1 + $0x78c] ss:$16 sps:$4 sm:$0xff]  }
  0xb7   :  { %5054 = vmatpush1.bf16.msra.mxu0 %v7614_v12  ;;  %5587 = vmatpush1.bf16.msra.mxu1 %v7617_v52  ;;  %v7705_v12 = vld [vmem:[%s11224_s1 + $0x780] ss:$16 sps:$4 sm:$0xff]   ;;  %v7708_v52 = vld [vmem:[%s11224_s1 + $0x788] ss:$16 sps:$4 sm:$0xff]  }
  0xb8   :  { %5055 = vmatprep.subr.bf16.mxu0 %v7622_v15  ;;  %5588 = vmatprep.subr.bf16.mxu1 %v7625_v16  ;;  %v7713_v15 = vld [vmem:[%s11224_s1 + $0x7a4] ss:$16 sps:$4 sm:$0xff]   ;;  %v7716_v16 = vld [vmem:[%s11224_s1 + $0x7ac] ss:$16 sps:$4 sm:$0xff]  }
  0xbb   :  { %5056 = vmatpush1.bf16.msra.mxu0 %v7620_v17  ;;  %5589 = vmatpush1.bf16.msra.mxu1 %v7623_v18  ;;  %v7711_v17 = vld [vmem:[%s11224_s1 + $0x7a0] ss:$16 sps:$4 sm:$0xff]   ;;  %v7714_v18 = vld [vmem:[%s11224_s1 + $0x7a8] ss:$16 sps:$4 sm:$0xff]  }
  0xbc   :  { %5057 = vmatprep.subr.bf16.mxu0 %v7628_v19  ;;  %5590 = vmatprep.subr.bf16.mxu1 %v7631_v20  ;;  %v7719_v19 = vld [vmem:[%s11224_s1 + $0x7c4] ss:$16 sps:$4 sm:$0xff]   ;;  %v7722_v20 = vld [vmem:[%s11224_s1 + $0x7cc] ss:$16 sps:$4 sm:$0xff]  }
  0xbf   :  { %5058 = vmatpush1.bf16.msra.mxu0 %v7626_v21  ;;  %5591 = vmatpush1.bf16.msra.mxu1 %v7629_v22  ;;  %v9407_v21 = vld.sshfl [vmem:[%s11223_s0 + $0x8] sm:$0xff pattern:$0x75316420]  ;;  %v7717_v22 = vld [vmem:[%s11224_s1 + $0x7c0] ss:$16 sps:$4 sm:$0xff]  }
  0xc0   :  { %5068 = vmatprep.subr.bf16.mxu0 %v7635_v23  ;;  %5601 = vmatprep.subr.bf16.mxu1 %v7638_v24  ;;  %v7720_v23 = vld [vmem:[%s11224_s1 + $0x7c8] ss:$16 sps:$4 sm:$0xff]   ;;  %v7725_v24 = vld [vmem:[%s11224_s1 + $0x7e4] ss:$16 sps:$4 sm:$0xff]  }
  0xc2   :  { %5060 = vmatmul.mubr.bf16.vlgmr.msra.gmra.mrb[0].mxu0 %v9233_v26  ;;  %5593 = vmatmul.mubr.bf16.vlgmr.msra.gmra.mrb[0].mxu1 %v9233_v26 }
  0xc3   :  { %5069 = vmatpush1.bf16.msra.mxu0 %v7633_v13  ;;  %5602 = vmatpush1.bf16.msra.mxu1 %v7636_v27  ;;  %v7728_v13 = vld [vmem:[%s11224_s1 + $0x7ec] ss:$16 sps:$4 sm:$0xff]   ;;  %v7723_v27 = vld [vmem:[%s11224_s1 + $0x7e0] ss:$16 sps:$4 sm:$0xff]  }
  0xc4   :  { %5070 = vmatprep.subr.bf16.mxu0 %v7641_v28  ;;  %5603 = vmatprep.subr.bf16.mxu1 %v7644_v29  ;;  %v7726_v28 = vld [vmem:[%s11224_s1 + $0x7e8] ss:$16 sps:$4 sm:$0xff]   ;;  %v7731_v29 = vld [vmem:[%s11224_s1 + $0x804] ss:$16 sps:$4 sm:$0xff]  }
  0xc5   :  { %5100 = vmatprep.mubr.bf16.mxu0 %v884_v14  ;;  %5633 = vmatprep.mubr.bf16.mxu1 %v884_v14  ;;  %v7734_v14 = vld [vmem:[%s11224_s1 + $0x80c] ss:$16 sps:$4 sm:$0xff]  }
  0xc7   :  { %5071 = vmatpush1.bf16.msra.mxu0 %v7639_v30  ;;  %5604 = vmatpush1.bf16.msra.mxu1 %v7642_v31  ;;  %v900_v30 = vcombine.high %v9407_v21, %v9407_v21  ;;  %v882_v31 = vcombine.high %v9233_v26, %v9233_v26  ;;  %v7740_v26 = vld [vmem:[%s11224_s1 + $0x82c] ss:$16 sps:$4 sm:$0xff]  }
  0xc8   :  { %5072 = vmatprep.subr.bf16.mxu0 %v7647_v25  ;;  %5605 = vmatprep.subr.bf16.mxu1 %v7650_v32  ;;  %v7729_v25 = vld [vmem:[%s11224_s1 + $0x800] ss:$16 sps:$4 sm:$0xff]   ;;  %v7732_v32 = vld [vmem:[%s11224_s1 + $0x808] ss:$16 sps:$4 sm:$0xff]  }
  0xcb   :  { %5073 = vmatpush1.bf16.msra.mxu0 %v7645_v33  ;;  %5606 = vmatpush1.bf16.msra.mxu1 %v7648_v34  ;;  %v7737_v33 = vld [vmem:[%s11224_s1 + $0x824] ss:$16 sps:$4 sm:$0xff]   ;;  %v9450_v34 = vrot.slane %v900_v30, %v8749_v49 }
  0xcc   :  { %5074 = vmatprep.subr.bf16.mxu0 %v7653_v35  ;;  %5607 = vmatprep.subr.bf16.mxu1 %v7656_v36  ;;  %v7735_v35 = vld [vmem:[%s11224_s1 + $0x820] ss:$16 sps:$4 sm:$0xff]   ;;  %v7738_v36 = vld [vmem:[%s11224_s1 + $0x828] ss:$16 sps:$4 sm:$0xff]   ;;  %v7821_v30 = vld [vmem:[%s11224_s1 + $0x9e4] ss:$16 sps:$4 sm:$0xff]  }
  0xcf   :  { %5075 = vmatpush1.bf16.msra.mxu0 %v7651_v37  ;;  %5608 = vmatpush1.bf16.msra.mxu1 %v7654_v38  ;;  %v7743_v37 = vld [vmem:[%s11224_s1 + $0x844] ss:$16 sps:$4 sm:$0xff]   ;;  %v7746_v38 = vld [vmem:[%s11224_s1 + $0x84c] ss:$16 sps:$4 sm:$0xff]  }
  0xd0   :  { %5076 = vmatprep.subr.bf16.mxu0 %v7659_v39  ;;  %5609 = vmatprep.subr.bf16.mxu1 %v7662_v40  ;;  %v7741_v39 = vld [vmem:[%s11224_s1 + $0x840] ss:$16 sps:$4 sm:$0xff]   ;;  %v7744_v40 = vld [vmem:[%s11224_s1 + $0x848] ss:$16 sps:$4 sm:$0xff]  }
  0xd3   :  { %5077 = vmatpush1.bf16.msra.mxu0 %v7657_v41  ;;  %5610 = vmatpush1.bf16.msra.mxu1 %v7660_v43  ;;  %v7749_v41 = vld [vmem:[%s11224_s1 + $0x864] ss:$16 sps:$4 sm:$0xff]   ;;  %v7752_v43 = vld [vmem:[%s11224_s1 + $0x86c] ss:$16 sps:$4 sm:$0xff]  }
  0xd4   :  { %5078 = vmatprep.subr.bf16.mxu0 %v7665_v44  ;;  %5611 = vmatprep.subr.bf16.mxu1 %v7668_v45  ;;  %v7747_v44 = vld [vmem:[%s11224_s1 + $0x860] ss:$16 sps:$4 sm:$0xff]   ;;  %v7750_v45 = vld [vmem:[%s11224_s1 + $0x868] ss:$16 sps:$4 sm:$0xff]  }
  0xd7   :  { %5079 = vmatpush1.bf16.msra.mxu0 %v7663_v46  ;;  %5612 = vmatpush1.bf16.msra.mxu1 %v7666_v47  ;;  %v7755_v46 = vld [vmem:[%s11224_s1 + $0x884] ss:$16 sps:$4 sm:$0xff]   ;;  %v7758_v47 = vld [vmem:[%s11224_s1 + $0x88c] ss:$16 sps:$4 sm:$0xff]  }
  0xd8   :  { %5080 = vmatprep.subr.bf16.mxu0 %v7671_v48  ;;  %5613 = vmatprep.subr.bf16.mxu1 %v7674_v50  ;;  %v7753_v48 = vld [vmem:[%s11224_s1 + $0x880] ss:$16 sps:$4 sm:$0xff]   ;;  %v7756_v50 = vld [vmem:[%s11224_s1 + $0x888] ss:$16 sps:$4 sm:$0xff]  }
  0xdb   :  { %5081 = vmatpush1.bf16.msra.mxu0 %v7669_v51  ;;  %5614 = vmatpush1.bf16.msra.mxu1 %v7672_v53  ;;  %v7761_v51 = vld [vmem:[%s11224_s1 + $0x8a4] ss:$16 sps:$4 sm:$0xff]   ;;  %v7764_v53 = vld [vmem:[%s11224_s1 + $0x8ac] ss:$16 sps:$4 sm:$0xff]  }
  0xdc   :  { %5082 = vmatprep.subr.bf16.mxu0 %v7677_v54  ;;  %5615 = vmatprep.subr.bf16.mxu1 %v7680_v55  ;;  %v7759_v54 = vld [vmem:[%s11224_s1 + $0x8a0] ss:$16 sps:$4 sm:$0xff]   ;;  %v7762_v55 = vld [vmem:[%s11224_s1 + $0x8a8] ss:$16 sps:$4 sm:$0xff]  }
  0xdf   :  { %5083 = vmatpush1.bf16.msra.mxu0 %v7675_v56  ;;  %5616 = vmatpush1.bf16.msra.mxu1 %v7678_v57  ;;  %v7767_v56 = vld [vmem:[%s11224_s1 + $0x8c4] ss:$16 sps:$4 sm:$0xff]   ;;  %v7770_v57 = vld [vmem:[%s11224_s1 + $0x8cc] ss:$16 sps:$4 sm:$0xff]  }
  0xe0   :  { %5084 = vmatprep.subr.bf16.mxu0 %v7683_v58  ;;  %5617 = vmatprep.subr.bf16.mxu1 %v7686_v59  ;;  %v7765_v58 = vld [vmem:[%s11224_s1 + $0x8c0] ss:$16 sps:$4 sm:$0xff]   ;;  %v7768_v59 = vld [vmem:[%s11224_s1 + $0x8c8] ss:$16 sps:$4 sm:$0xff]  }
  0xe3   :  { %5085 = vmatpush1.bf16.msra.mxu0 %v7681_v60  ;;  %5618 = vmatpush1.bf16.msra.mxu1 %v7684_v61  ;;  %v7773_v60 = vld [vmem:[%s11224_s1 + $0x8e4] ss:$16 sps:$4 sm:$0xff]   ;;  %v7776_v61 = vld [vmem:[%s11224_s1 + $0x8ec] ss:$16 sps:$4 sm:$0xff]  }
  0xe4   :  { %5086 = vmatprep.subr.bf16.mxu0 %v7689_v62  ;;  %5619 = vmatprep.subr.bf16.mxu1 %v7692_v63  ;;  %v7771_v62 = vld [vmem:[%s11224_s1 + $0x8e0] ss:$16 sps:$4 sm:$0xff]   ;;  %v7774_v63 = vld [vmem:[%s11224_s1 + $0x8e8] ss:$16 sps:$4 sm:$0xff]  }
  0xe7   :  { %5087 = vmatpush1.bf16.msra.mxu0 %v7687_v0  ;;  %5620 = vmatpush1.bf16.msra.mxu1 %v7690_v1  ;;  %v7779_v0 = vld [vmem:[%s11224_s1 + $0x904] ss:$16 sps:$4 sm:$0xff]   ;;  %v7782_v1 = vld [vmem:[%s11224_s1 + $0x90c] ss:$16 sps:$4 sm:$0xff]  }
  0xe8   :  { %5088 = vmatprep.subr.bf16.mxu0 %v7695_v2  ;;  %5621 = vmatprep.subr.bf16.mxu1 %v7698_v3  ;;  %v7777_v2 = vld [vmem:[%s11224_s1 + $0x900] ss:$16 sps:$4 sm:$0xff]   ;;  %v7780_v3 = vld [vmem:[%s11224_s1 + $0x908] ss:$16 sps:$4 sm:$0xff]  }
  0xeb   :  { %5089 = vmatpush1.bf16.msra.mxu0 %v7693_v4  ;;  %5622 = vmatpush1.bf16.msra.mxu1 %v7696_v5  ;;  %v7785_v4 = vld [vmem:[%s11224_s1 + $0x924] ss:$16 sps:$4 sm:$0xff]   ;;  %v7788_v5 = vld [vmem:[%s11224_s1 + $0x92c] ss:$16 sps:$4 sm:$0xff]  }
  0xec   :  { %5090 = vmatprep.subr.bf16.mxu0 %v7701_v6  ;;  %5623 = vmatprep.subr.bf16.mxu1 %v7704_v7  ;;  %v7783_v6 = vld [vmem:[%s11224_s1 + $0x920] ss:$16 sps:$4 sm:$0xff]   ;;  %v7786_v7 = vld [vmem:[%s11224_s1 + $0x928] ss:$16 sps:$4 sm:$0xff]  }
  0xef   :  { %5091 = vmatpush1.bf16.msra.mxu0 %v7699_v8  ;;  %5624 = vmatpush1.bf16.msra.mxu1 %v7702_v9  ;;  %v7791_v8 = vld [vmem:[%s11224_s1 + $0x944] ss:$16 sps:$4 sm:$0xff]   ;;  %v7794_v9 = vld [vmem:[%s11224_s1 + $0x94c] ss:$16 sps:$4 sm:$0xff]  }
  0xf0   :  { %5092 = vmatprep.subr.bf16.mxu0 %v7707_v10  ;;  %5625 = vmatprep.subr.bf16.mxu1 %v7710_v11  ;;  %v7789_v10 = vld [vmem:[%s11224_s1 + $0x940] ss:$16 sps:$4 sm:$0xff]   ;;  %v7792_v11 = vld [vmem:[%s11224_s1 + $0x948] ss:$16 sps:$4 sm:$0xff]  }
  0xf3   :  { %5093 = vmatpush1.bf16.msra.mxu0 %v7705_v12  ;;  %5626 = vmatpush1.bf16.msra.mxu1 %v7708_v52  ;;  %v7797_v12 = vld [vmem:[%s11224_s1 + $0x964] ss:$16 sps:$4 sm:$0xff]   ;;  %v7800_v52 = vld [vmem:[%s11224_s1 + $0x96c] ss:$16 sps:$4 sm:$0xff]  }
  0xf4   :  { %5094 = vmatprep.subr.bf16.mxu0 %v7713_v15  ;;  %5627 = vmatprep.subr.bf16.mxu1 %v7716_v16  ;;  %v7795_v15 = vld [vmem:[%s11224_s1 + $0x960] ss:$16 sps:$4 sm:$0xff]   ;;  %v7798_v16 = vld [vmem:[%s11224_s1 + $0x968] ss:$16 sps:$4 sm:$0xff]  }
  0xf7   :  { %5095 = vmatpush1.bf16.msra.mxu0 %v7711_v17  ;;  %5628 = vmatpush1.bf16.msra.mxu1 %v7714_v18  ;;  %v7803_v17 = vld [vmem:[%s11224_s1 + $0x984] ss:$16 sps:$4 sm:$0xff]   ;;  %v7806_v18 = vld [vmem:[%s11224_s1 + $0x98c] ss:$16 sps:$4 sm:$0xff]  }
  0xf8   :  { %5096 = vmatprep.subr.bf16.mxu0 %v7719_v19  ;;  %5629 = vmatprep.subr.bf16.mxu1 %v7722_v20  ;;  %v7801_v19 = vld [vmem:[%s11224_s1 + $0x980] ss:$16 sps:$4 sm:$0xff]   ;;  %v7804_v20 = vld [vmem:[%s11224_s1 + $0x988] ss:$16 sps:$4 sm:$0xff]  }
  0xfb   :  { %5097 = vmatpush1.bf16.msra.mxu0 %v7717_v22  ;;  %5630 = vmatpush1.bf16.msra.mxu1 %v7720_v23  ;;  %v7809_v22 = vld [vmem:[%s11224_s1 + $0x9a4] ss:$16 sps:$4 sm:$0xff]   ;;  %v7812_v23 = vld [vmem:[%s11224_s1 + $0x9ac] ss:$16 sps:$4 sm:$0xff]  }
  0xfc   :  { %5098 = vmatprep.subr.bf16.mxu0 %v7725_v24  ;;  %5631 = vmatprep.subr.bf16.mxu1 %v7728_v13  ;;  %v7807_v24 = vld [vmem:[%s11224_s1 + $0x9a0] ss:$16 sps:$4 sm:$0xff]   ;;  %v7810_v13 = vld [vmem:[%s11224_s1 + $0x9a8] ss:$16 sps:$4 sm:$0xff]  }
  0xff   :  { %5099 = vmatpush1.bf16.msra.mxu0 %v7723_v27  ;;  %5632 = vmatpush1.bf16.msra.mxu1 %v7726_v28  ;;  %v7815_v27 = vld [vmem:[%s11224_s1 + $0x9c4] ss:$16 sps:$4 sm:$0xff]   ;;  %v7818_v28 = vld [vmem:[%s11224_s1 + $0x9cc] ss:$16 sps:$4 sm:$0xff]  }
 0x100   :  { %5109 = vmatprep.subr.bf16.mxu0 %v7731_v29  ;;  %5642 = vmatprep.subr.bf16.mxu1 %v7734_v14  ;;  %v7813_v29 = vld [vmem:[%s11224_s1 + $0x9c0] ss:$16 sps:$4 sm:$0xff]   ;;  %v7816_v14 = vld [vmem:[%s11224_s1 + $0x9c8] ss:$16 sps:$4 sm:$0xff]  }
 0x102   :  { %5101 = vmatmul.mubr.bf16.vlgmr.msra.gmra.mrb[0].mxu0 %v882_v31  ;;  %5634 = vmatmul.mubr.bf16.vlgmr.msra.gmra.mrb[0].mxu1 %v882_v31  ;;  %v7824_v31 = vld [vmem:[%s11224_s1 + $0x9ec] ss:$16 sps:$4 sm:$0xff]  }
 0x103   :  { %5110 = vmatpush1.bf16.msra.mxu0 %v7729_v25  ;;  %5643 = vmatpush1.bf16.msra.mxu1 %v7732_v32  ;;  %v7819_v25 = vld [vmem:[%s11224_s1 + $0x9e0] ss:$16 sps:$4 sm:$0xff]   ;;  %v7822_v32 = vld [vmem:[%s11224_s1 + $0x9e8] ss:$16 sps:$4 sm:$0xff]  }
 0x104   :  { %5111 = vmatprep.subr.bf16.mxu0 %v7737_v33  ;;  %5644 = vmatprep.subr.bf16.mxu1 %v7740_v26  ;;  %v7827_v33 = vld [vmem:[%s11224_s1 + $0xa04] ss:$16 sps:$4 sm:$0xff]   ;;  %v7830_v26 = vld [vmem:[%s11224_s1 + $0xa0c] ss:$16 sps:$4 sm:$0xff]  }
 0x105   :  { %5141 = vmatprep.mubr.bf16.mxu0 %v9450_v34  ;;  %5674 = vmatprep.mubr.bf16.mxu1 %v9450_v34 }
 0x107   :  { %5112 = vmatpush1.bf16.msra.mxu0 %v7735_v35  ;;  %5645 = vmatpush1.bf16.msra.mxu1 %v7738_v36  ;;  %v9636_v35 = vrot.slane %v9407_v21, %v8749_v49  ;;  %v7825_v36 = vld [vmem:[%s11224_s1 + $0xa00] ss:$16 sps:$4 sm:$0xff]   ;;  %v7836_v21 = vld [vmem:[%s11224_s1 + $0xa2c] ss:$16 sps:$4 sm:$0xff]  }
 0x108   :  { %5113 = vmatprep.subr.bf16.mxu0 %v7743_v37  ;;  %5646 = vmatprep.subr.bf16.mxu1 %v7746_v38  ;;  %v7828_v37 = vld [vmem:[%s11224_s1 + $0xa08] ss:$16 sps:$4 sm:$0xff]   ;;  %v7833_v38 = vld [vmem:[%s11224_s1 + $0xa24] ss:$16 sps:$4 sm:$0xff]  }
 0x10b   :  { %5114 = vmatpush1.bf16.msra.mxu0 %v7741_v39  ;;  %5647 = vmatpush1.bf16.msra.mxu1 %v7744_v40  ;;  %v932_v39 = vcombine.high %v9450_v34, %v9450_v34  ;;  %v7831_v40 = vld [vmem:[%s11224_s1 + $0xa20] ss:$16 sps:$4 sm:$0xff]   ;;  %v7839_v34 = vld [vmem:[%s11224_s1 + $0xa44] ss:$16 sps:$4 sm:$0xff]  }
 0x10c   :  { %5115 = vmatprep.subr.bf16.mxu0 %v7749_v41  ;;  %5648 = vmatprep.subr.bf16.mxu1 %v7752_v43  ;;  %v7834_v41 = vld [vmem:[%s11224_s1 + $0xa28] ss:$16 sps:$4 sm:$0xff]   ;;  %v7842_v43 = vld [vmem:[%s11224_s1 + $0xa4c] ss:$16 sps:$4 sm:$0xff]  }
 0x10f   :  { %5116 = vmatpush1.bf16.msra.mxu0 %v7747_v44  ;;  %5649 = vmatpush1.bf16.msra.mxu1 %v7750_v45  ;;  %v7837_v44 = vld [vmem:[%s11224_s1 + $0xa40] ss:$16 sps:$4 sm:$0xff]   ;;  %v7840_v45 = vld [vmem:[%s11224_s1 + $0xa48] ss:$16 sps:$4 sm:$0xff]  }
 0x110   :  { %5117 = vmatprep.subr.bf16.mxu0 %v7755_v46  ;;  %5650 = vmatprep.subr.bf16.mxu1 %v7758_v47  ;;  %v7845_v46 = vld [vmem:[%s11224_s1 + $0xa64] ss:$16 sps:$4 sm:$0xff]   ;;  %v7848_v47 = vld [vmem:[%s11224_s1 + $0xa6c] ss:$16 sps:$4 sm:$0xff]  }
 0x113   :  { %5118 = vmatpush1.bf16.msra.mxu0 %v7753_v48  ;;  %5651 = vmatpush1.bf16.msra.mxu1 %v7756_v50  ;;  %v7843_v48 = vld [vmem:[%s11224_s1 + $0xa60] ss:$16 sps:$4 sm:$0xff]   ;;  %v7846_v50 = vld [vmem:[%s11224_s1 + $0xa68] ss:$16 sps:$4 sm:$0xff]  }
 0x114   :  { %5119 = vmatprep.subr.bf16.mxu0 %v7761_v51  ;;  %5652 = vmatprep.subr.bf16.mxu1 %v7764_v53  ;;  %v7851_v51 = vld [vmem:[%s11224_s1 + $0xa84] ss:$16 sps:$4 sm:$0xff]   ;;  %v7854_v53 = vld [vmem:[%s11224_s1 + $0xa8c] ss:$16 sps:$4 sm:$0xff]  }
 0x117   :  { %5120 = vmatpush1.bf16.msra.mxu0 %v7759_v54  ;;  %5653 = vmatpush1.bf16.msra.mxu1 %v7762_v55  ;;  %v7849_v54 = vld [vmem:[%s11224_s1 + $0xa80] ss:$16 sps:$4 sm:$0xff]   ;;  %v7852_v55 = vld [vmem:[%s11224_s1 + $0xa88] ss:$16 sps:$4 sm:$0xff]  }
 0x118   :  { %5121 = vmatprep.subr.bf16.mxu0 %v7767_v56  ;;  %5654 = vmatprep.subr.bf16.mxu1 %v7770_v57  ;;  %v7857_v56 = vld [vmem:[%s11224_s1 + $0xaa4] ss:$16 sps:$4 sm:$0xff]   ;;  %v7860_v57 = vld [vmem:[%s11224_s1 + $0xaac] ss:$16 sps:$4 sm:$0xff]  }
 0x11b   :  { %5122 = vmatpush1.bf16.msra.mxu0 %v7765_v58  ;;  %5655 = vmatpush1.bf16.msra.mxu1 %v7768_v59  ;;  %v7855_v58 = vld [vmem:[%s11224_s1 + $0xaa0] ss:$16 sps:$4 sm:$0xff]   ;;  %v7858_v59 = vld [vmem:[%s11224_s1 + $0xaa8] ss:$16 sps:$4 sm:$0xff]  }
 0x11c   :  { %5123 = vmatprep.subr.bf16.mxu0 %v7773_v60  ;;  %5656 = vmatprep.subr.bf16.mxu1 %v7776_v61  ;;  %v7863_v60 = vld [vmem:[%s11224_s1 + $0xac4] ss:$16 sps:$4 sm:$0xff]   ;;  %v7866_v61 = vld [vmem:[%s11224_s1 + $0xacc] ss:$16 sps:$4 sm:$0xff]  }
 0x11f   :  { %5124 = vmatpush1.bf16.msra.mxu0 %v7771_v62  ;;  %5657 = vmatpush1.bf16.msra.mxu1 %v7774_v63  ;;  %v7861_v62 = vld [vmem:[%s11224_s1 + $0xac0] ss:$16 sps:$4 sm:$0xff]   ;;  %v7864_v63 = vld [vmem:[%s11224_s1 + $0xac8] ss:$16 sps:$4 sm:$0xff]  }
 0x120   :  { %5125 = vmatprep.subr.bf16.mxu0 %v7779_v0  ;;  %5658 = vmatprep.subr.bf16.mxu1 %v7782_v1  ;;  %v7869_v0 = vld [vmem:[%s11224_s1 + $0xae4] ss:$16 sps:$4 sm:$0xff]   ;;  %v7872_v1 = vld [vmem:[%s11224_s1 + $0xaec] ss:$16 sps:$4 sm:$0xff]  }
 0x123   :  { %5126 = vmatpush1.bf16.msra.mxu0 %v7777_v2  ;;  %5659 = vmatpush1.bf16.msra.mxu1 %v7780_v3  ;;  %v7867_v2 = vld [vmem:[%s11224_s1 + $0xae0] ss:$16 sps:$4 sm:$0xff]   ;;  %v7870_v3 = vld [vmem:[%s11224_s1 + $0xae8] ss:$16 sps:$4 sm:$0xff]  }
 0x124   :  { %5127 = vmatprep.subr.bf16.mxu0 %v7785_v4  ;;  %5660 = vmatprep.subr.bf16.mxu1 %v7788_v5  ;;  %v7875_v4 = vld [vmem:[%s11224_s1 + $0xb04] ss:$16 sps:$4 sm:$0xff]   ;;  %v7878_v5 = vld [vmem:[%s11224_s1 + $0xb0c] ss:$16 sps:$4 sm:$0xff]  }
 0x127   :  { %5128 = vmatpush1.bf16.msra.mxu0 %v7783_v6  ;;  %5661 = vmatpush1.bf16.msra.mxu1 %v7786_v7  ;;  %v7873_v6 = vld [vmem:[%s11224_s1 + $0xb00] ss:$16 sps:$4 sm:$0xff]   ;;  %v7876_v7 = vld [vmem:[%s11224_s1 + $0xb08] ss:$16 sps:$4 sm:$0xff]  }
 0x128   :  { %5129 = vmatprep.subr.bf16.mxu0 %v7791_v8  ;;  %5662 = vmatprep.subr.bf16.mxu1 %v7794_v9  ;;  %v7881_v8 = vld [vmem:[%s11224_s1 + $0xb24] ss:$16 sps:$4 sm:$0xff]   ;;  %v7884_v9 = vld [vmem:[%s11224_s1 + $0xb2c] ss:$16 sps:$4 sm:$0xff]  }
 0x12b   :  { %5130 = vmatpush1.bf16.msra.mxu0 %v7789_v10  ;;  %5663 = vmatpush1.bf16.msra.mxu1 %v7792_v11  ;;  %v7879_v10 = vld [vmem:[%s11224_s1 + $0xb20] ss:$16 sps:$4 sm:$0xff]   ;;  %v7882_v11 = vld [vmem:[%s11224_s1 + $0xb28] ss:$16 sps:$4 sm:$0xff]  }
 0x12c   :  { %5131 = vmatprep.subr.bf16.mxu0 %v7797_v12  ;;  %5664 = vmatprep.subr.bf16.mxu1 %v7800_v52  ;;  %v7887_v12 = vld [vmem:[%s11224_s1 + $0xb44] ss:$16 sps:$4 sm:$0xff]   ;;  %v7890_v52 = vld [vmem:[%s11224_s1 + $0xb4c] ss:$16 sps:$4 sm:$0xff]  }
 0x12f   :  { %5132 = vmatpush1.bf16.msra.mxu0 %v7795_v15  ;;  %5665 = vmatpush1.bf16.msra.mxu1 %v7798_v16  ;;  %v7885_v15 = vld [vmem:[%s11224_s1 + $0xb40] ss:$16 sps:$4 sm:$0xff]   ;;  %v7888_v16 = vld [vmem:[%s11224_s1 + $0xb48] ss:$16 sps:$4 sm:$0xff]  }
 0x130   :  { %5133 = vmatprep.subr.bf16.mxu0 %v7803_v17  ;;  %5666 = vmatprep.subr.bf16.mxu1 %v7806_v18  ;;  %v7893_v17 = vld [vmem:[%s11224_s1 + $0xb64] ss:$16 sps:$4 sm:$0xff]   ;;  %v7896_v18 = vld [vmem:[%s11224_s1 + $0xb6c] ss:$16 sps:$4 sm:$0xff]  }
 0x133   :  { %5134 = vmatpush1.bf16.msra.mxu0 %v7801_v19  ;;  %5667 = vmatpush1.bf16.msra.mxu1 %v7804_v20  ;;  %v7891_v19 = vld [vmem:[%s11224_s1 + $0xb60] ss:$16 sps:$4 sm:$0xff]   ;;  %v7894_v20 = vld [vmem:[%s11224_s1 + $0xb68] ss:$16 sps:$4 sm:$0xff]  }
 0x134   :  { %5135 = vmatprep.subr.bf16.mxu0 %v7809_v22  ;;  %5668 = vmatprep.subr.bf16.mxu1 %v7812_v23  ;;  %v7899_v22 = vld [vmem:[%s11224_s1 + $0xb84] ss:$16 sps:$4 sm:$0xff]   ;;  %v7902_v23 = vld [vmem:[%s11224_s1 + $0xb8c] ss:$16 sps:$4 sm:$0xff]  }
 0x137   :  { %5136 = vmatpush1.bf16.msra.mxu0 %v7807_v24  ;;  %5669 = vmatpush1.bf16.msra.mxu1 %v7810_v13  ;;  %v7897_v24 = vld [vmem:[%s11224_s1 + $0xb80] ss:$16 sps:$4 sm:$0xff]   ;;  %v7900_v13 = vld [vmem:[%s11224_s1 + $0xb88] ss:$16 sps:$4 sm:$0xff]  }
 0x138   :  { %5137 = vmatprep.subr.bf16.mxu0 %v7815_v27  ;;  %5670 = vmatprep.subr.bf16.mxu1 %v7818_v28  ;;  %v7905_v27 = vld [vmem:[%s11224_s1 + $0xba4] ss:$16 sps:$4 sm:$0xff]   ;;  %v7908_v28 = vld [vmem:[%s11224_s1 + $0xbac] ss:$16 sps:$4 sm:$0xff]  }
 0x13b   :  { %5138 = vmatpush1.bf16.msra.mxu0 %v7813_v29  ;;  %5671 = vmatpush1.bf16.msra.mxu1 %v7816_v14  ;;  %v7903_v29 = vld [vmem:[%s11224_s1 + $0xba0] ss:$16 sps:$4 sm:$0xff]   ;;  %v7906_v14 = vld [vmem:[%s11224_s1 + $0xba8] ss:$16 sps:$4 sm:$0xff]  }
 0x13c   :  { %5139 = vmatprep.subr.bf16.mxu0 %v7821_v30  ;;  %5672 = vmatprep.subr.bf16.mxu1 %v7824_v31  ;;  %v7911_v30 = vld [vmem:[%s11224_s1 + $0xbc4] ss:$16 sps:$4 sm:$0xff]   ;;  %v7914_v31 = vld [vmem:[%s11224_s1 + $0xbcc] ss:$16 sps:$4 sm:$0xff]  }
 0x13f   :  { %5140 = vmatpush1.bf16.msra.mxu0 %v7819_v25  ;;  %5673 = vmatpush1.bf16.msra.mxu1 %v7822_v32  ;;  %v8555_v25 = vld [vmem:[%s11223_s0 + $0x8] sm:$0xff] }
 0x140   :  { %5150 = vmatprep.subr.bf16.mxu0 %v7827_v33  ;;  %5683 = vmatprep.subr.bf16.mxu1 %v7830_v26  ;;  %v885_v32 = vcombine.high %v8555_v25, %v8555_v25  ;;  %v7909_v33 = vld [vmem:[%s11224_s1 + $0xbc0] ss:$16 sps:$4 sm:$0xff]   ;;  %v7912_v26 = vld [vmem:[%s11224_s1 + $0xbc8] ss:$16 sps:$4 sm:$0xff]  }
 0x141   :  { %v7993_v25 = vld [vmem:[%s11224_s1 + $0xd80] ss:$16 sps:$4 sm:$0xff]  }
 0x142   :  { %5142 = vmatmul.mubr.bf16.vlgmr.msra.gmra.mrb[0].mxu0 %v9636_v35  ;;  %5675 = vmatmul.mubr.bf16.vlgmr.msra.gmra.mrb[0].mxu1 %v9636_v35 }
 0x143   :  { %5151 = vmatpush1.bf16.msra.mxu0 %v7825_v36  ;;  %5684 = vmatpush1.bf16.msra.mxu1 %v7828_v37  ;;  %v7917_v36 = vld [vmem:[%s11224_s1 + $0xbe4] ss:$16 sps:$4 sm:$0xff]   ;;  %v7920_v37 = vld [vmem:[%s11224_s1 + $0xbec] ss:$16 sps:$4 sm:$0xff]  }
 0x144   :  { %5152 = vmatprep.subr.bf16.mxu0 %v7833_v38  ;;  %5685 = vmatprep.subr.bf16.mxu1 %v7836_v21  ;;  %v9826_v38 = vrot.slane %v885_v32, %v8749_v49  ;;  %v7915_v21 = vld [vmem:[%s11224_s1 + $0xbe0] ss:$16 sps:$4 sm:$0xff]   ;;  %v7996_v32 = vld [vmem:[%s11224_s1 + $0xd88] ss:$16 sps:$4 sm:$0xff]  }
 0x145   :  { %5182 = vmatprep.mubr.bf16.mxu0 %v932_v39  ;;  %5715 = vmatprep.mubr.bf16.mxu1 %v932_v39  ;;  %v7918_v39 = vld [vmem:[%s11224_s1 + $0xbe8] ss:$16 sps:$4 sm:$0xff]  }
 0x147   :  { %5153 = vmatpush1.bf16.msra.mxu0 %v7831_v40  ;;  %5686 = vmatpush1.bf16.msra.mxu1 %v7834_v41  ;;  %v7923_v40 = vld [vmem:[%s11224_s1 + $0xc04] ss:$16 sps:$4 sm:$0xff]   ;;  %v7926_v41 = vld [vmem:[%s11224_s1 + $0xc0c] ss:$16 sps:$4 sm:$0xff]  }
 0x148   :  { %5154 = vmatprep.subr.bf16.mxu0 %v7839_v34  ;;  %5687 = vmatprep.subr.bf16.mxu1 %v7842_v43  ;;  %v901_v34 = vcombine.high %v9826_v38, %v9826_v38  ;;  %v930_v43 = vcombine.high %v9636_v35, %v9636_v35  ;;  %v7932_v35 = vld [vmem:[%s11224_s1 + $0xc2c] ss:$16 sps:$4 sm:$0xff]  }
 0x14b   :  { %5155 = vmatpush1.bf16.msra.mxu0 %v7837_v44  ;;  %5688 = vmatpush1.bf16.msra.mxu1 %v7840_v45  ;;  %v7921_v44 = vld [vmem:[%s11224_s1 + $0xc00] ss:$16 sps:$4 sm:$0xff]   ;;  %v7924_v45 = vld [vmem:[%s11224_s1 + $0xc08] ss:$16 sps:$4 sm:$0xff]  }
 0x14c   :  { %5156 = vmatprep.subr.bf16.mxu0 %v7845_v46  ;;  %5689 = vmatprep.subr.bf16.mxu1 %v7848_v47  ;;  %v7929_v46 = vld [vmem:[%s11224_s1 + $0xc24] ss:$16 sps:$4 sm:$0xff]   ;;  %v9857_v47 = vrot.slane %v901_v34, %v8749_v49 }
 0x14d   :  { %v8013_v34 = vld [vmem:[%s11224_s1 + $0xde4] ss:$16 sps:$4 sm:$0xff]  }
 0x14f   :  { %5157 = vmatpush1.bf16.msra.mxu0 %v7843_v48  ;;  %5690 = vmatpush1.bf16.msra.mxu1 %v7846_v50  ;;  %v7927_v48 = vld [vmem:[%s11224_s1 + $0xc20] ss:$16 sps:$4 sm:$0xff]   ;;  %v7930_v50 = vld [vmem:[%s11224_s1 + $0xc28] ss:$16 sps:$4 sm:$0xff]  }
 0x150   :  { %5158 = vmatprep.subr.bf16.mxu0 %v7851_v51  ;;  %5691 = vmatprep.subr.bf16.mxu1 %v7854_v53  ;;  %v7935_v51 = vld [vmem:[%s11224_s1 + $0xc44] ss:$16 sps:$4 sm:$0xff]   ;;  %v7938_v53 = vld [vmem:[%s11224_s1 + $0xc4c] ss:$16 sps:$4 sm:$0xff]  }
 0x153   :  { %5159 = vmatpush1.bf16.msra.mxu0 %v7849_v54  ;;  %5692 = vmatpush1.bf16.msra.mxu1 %v7852_v55  ;;  %v7933_v54 = vld [vmem:[%s11224_s1 + $0xc40] ss:$16 sps:$4 sm:$0xff]   ;;  %v7936_v55 = vld [vmem:[%s11224_s1 + $0xc48] ss:$16 sps:$4 sm:$0xff]  }
 0x154   :  { %5160 = vmatprep.subr.bf16.mxu0 %v7857_v56  ;;  %5693 = vmatprep.subr.bf16.mxu1 %v7860_v57  ;;  %v7941_v56 = vld [vmem:[%s11224_s1 + $0xc64] ss:$16 sps:$4 sm:$0xff]   ;;  %v7944_v57 = vld [vmem:[%s11224_s1 + $0xc6c] ss:$16 sps:$4 sm:$0xff]  }
 0x157   :  { %5161 = vmatpush1.bf16.msra.mxu0 %v7855_v58  ;;  %5694 = vmatpush1.bf16.msra.mxu1 %v7858_v59  ;;  %v7939_v58 = vld [vmem:[%s11224_s1 + $0xc60] ss:$16 sps:$4 sm:$0xff]   ;;  %v7942_v59 = vld [vmem:[%s11224_s1 + $0xc68] ss:$16 sps:$4 sm:$0xff]  }
 0x158   :  { %5162 = vmatprep.subr.bf16.mxu0 %v7863_v60  ;;  %5695 = vmatprep.subr.bf16.mxu1 %v7866_v61  ;;  %v7947_v60 = vld [vmem:[%s11224_s1 + $0xc84] ss:$16 sps:$4 sm:$0xff]   ;;  %v7950_v61 = vld [vmem:[%s11224_s1 + $0xc8c] ss:$16 sps:$4 sm:$0xff]  }
 0x15b   :  { %5163 = vmatpush1.bf16.msra.mxu0 %v7861_v62  ;;  %5696 = vmatpush1.bf16.msra.mxu1 %v7864_v63  ;;  %v7945_v62 = vld [vmem:[%s11224_s1 + $0xc80] ss:$16 sps:$4 sm:$0xff]   ;;  %v7948_v63 = vld [vmem:[%s11224_s1 + $0xc88] ss:$16 sps:$4 sm:$0xff]  }
 0x15c   :  { %5164 = vmatprep.subr.bf16.mxu0 %v7869_v0  ;;  %5697 = vmatprep.subr.bf16.mxu1 %v7872_v1  ;;  %v7953_v0 = vld [vmem:[%s11224_s1 + $0xca4] ss:$16 sps:$4 sm:$0xff]   ;;  %v7956_v1 = vld [vmem:[%s11224_s1 + $0xcac] ss:$16 sps:$4 sm:$0xff]  }
 0x15f   :  { %5165 = vmatpush1.bf16.msra.mxu0 %v7867_v2  ;;  %5698 = vmatpush1.bf16.msra.mxu1 %v7870_v3  ;;  %v7951_v2 = vld [vmem:[%s11224_s1 + $0xca0] ss:$16 sps:$4 sm:$0xff]   ;;  %v7954_v3 = vld [vmem:[%s11224_s1 + $0xca8] ss:$16 sps:$4 sm:$0xff]  }
 0x160   :  { %5166 = vmatprep.subr.bf16.mxu0 %v7875_v4  ;;  %5699 = vmatprep.subr.bf16.mxu1 %v7878_v5  ;;  %v7959_v4 = vld [vmem:[%s11224_s1 + $0xcc4] ss:$16 sps:$4 sm:$0xff]   ;;  %v7962_v5 = vld [vmem:[%s11224_s1 + $0xccc] ss:$16 sps:$4 sm:$0xff]  }
 0x163   :  { %5167 = vmatpush1.bf16.msra.mxu0 %v7873_v6  ;;  %5700 = vmatpush1.bf16.msra.mxu1 %v7876_v7  ;;  %v7957_v6 = vld [vmem:[%s11224_s1 + $0xcc0] ss:$16 sps:$4 sm:$0xff]   ;;  %v7960_v7 = vld [vmem:[%s11224_s1 + $0xcc8] ss:$16 sps:$4 sm:$0xff]  }
 0x164   :  { %5168 = vmatprep.subr.bf16.mxu0 %v7881_v8  ;;  %5701 = vmatprep.subr.bf16.mxu1 %v7884_v9  ;;  %v7965_v8 = vld [vmem:[%s11224_s1 + $0xce4] ss:$16 sps:$4 sm:$0xff]   ;;  %v7968_v9 = vld [vmem:[%s11224_s1 + $0xcec] ss:$16 sps:$4 sm:$0xff]  }
 0x167   :  { %5169 = vmatpush1.bf16.msra.mxu0 %v7879_v10  ;;  %5702 = vmatpush1.bf16.msra.mxu1 %v7882_v11  ;;  %v7963_v10 = vld [vmem:[%s11224_s1 + $0xce0] ss:$16 sps:$4 sm:$0xff]   ;;  %v7966_v11 = vld [vmem:[%s11224_s1 + $0xce8] ss:$16 sps:$4 sm:$0xff]  }
 0x168   :  { %5170 = vmatprep.subr.bf16.mxu0 %v7887_v12  ;;  %5703 = vmatprep.subr.bf16.mxu1 %v7890_v52  ;;  %v7971_v12 = vld [vmem:[%s11224_s1 + $0xd04] ss:$16 sps:$4 sm:$0xff]   ;;  %v7974_v52 = vld [vmem:[%s11224_s1 + $0xd0c] ss:$16 sps:$4 sm:$0xff]  }
 0x16b   :  { %5171 = vmatpush1.bf16.msra.mxu0 %v7885_v15  ;;  %5704 = vmatpush1.bf16.msra.mxu1 %v7888_v16  ;;  %v7969_v15 = vld [vmem:[%s11224_s1 + $0xd00] ss:$16 sps:$4 sm:$0xff]   ;;  %v7972_v16 = vld [vmem:[%s11224_s1 + $0xd08] ss:$16 sps:$4 sm:$0xff]  }
 0x16c   :  { %5172 = vmatprep.subr.bf16.mxu0 %v7893_v17  ;;  %5705 = vmatprep.subr.bf16.mxu1 %v7896_v18  ;;  %v7977_v17 = vld [vmem:[%s11224_s1 + $0xd24] ss:$16 sps:$4 sm:$0xff]   ;;  %v7980_v18 = vld [vmem:[%s11224_s1 + $0xd2c] ss:$16 sps:$4 sm:$0xff]  }
 0x16f   :  { %5173 = vmatpush1.bf16.msra.mxu0 %v7891_v19  ;;  %5706 = vmatpush1.bf16.msra.mxu1 %v7894_v20  ;;  %v7975_v19 = vld [vmem:[%s11224_s1 + $0xd20] ss:$16 sps:$4 sm:$0xff]   ;;  %v7978_v20 = vld [vmem:[%s11224_s1 + $0xd28] ss:$16 sps:$4 sm:$0xff]  }
 0x170   :  { %5174 = vmatprep.subr.bf16.mxu0 %v7899_v22  ;;  %5707 = vmatprep.subr.bf16.mxu1 %v7902_v23  ;;  %v7983_v22 = vld [vmem:[%s11224_s1 + $0xd44] ss:$16 sps:$4 sm:$0xff]   ;;  %v7986_v23 = vld [vmem:[%s11224_s1 + $0xd4c] ss:$16 sps:$4 sm:$0xff]  }
 0x173   :  { %5175 = vmatpush1.bf16.msra.mxu0 %v7897_v24  ;;  %5708 = vmatpush1.bf16.msra.mxu1 %v7900_v13  ;;  %v7981_v24 = vld [vmem:[%s11224_s1 + $0xd40] ss:$16 sps:$4 sm:$0xff]   ;;  %v7984_v13 = vld [vmem:[%s11224_s1 + $0xd48] ss:$16 sps:$4 sm:$0xff]  }
 0x174   :  { %5176 = vmatprep.subr.bf16.mxu0 %v7905_v27  ;;  %5709 = vmatprep.subr.bf16.mxu1 %v7908_v28  ;;  %v7989_v27 = vld [vmem:[%s11224_s1 + $0xd64] ss:$16 sps:$4 sm:$0xff]   ;;  %v7992_v28 = vld [vmem:[%s11224_s1 + $0xd6c] ss:$16 sps:$4 sm:$0xff]  }
 0x177   :  { %5177 = vmatpush1.bf16.msra.mxu0 %v7903_v29  ;;  %5710 = vmatpush1.bf16.msra.mxu1 %v7906_v14  ;;  %v7987_v29 = vld [vmem:[%s11224_s1 + $0xd60] ss:$16 sps:$4 sm:$0xff]   ;;  %v7990_v14 = vld [vmem:[%s11224_s1 + $0xd68] ss:$16 sps:$4 sm:$0xff]  }
 0x178   :  { %5178 = vmatprep.subr.bf16.mxu0 %v7911_v30  ;;  %5711 = vmatprep.subr.bf16.mxu1 %v7914_v31  ;;  %v7995_v30 = vld [vmem:[%s11224_s1 + $0xd84] ss:$16 sps:$4 sm:$0xff]   ;;  %v7998_v31 = vld [vmem:[%s11224_s1 + $0xd8c] ss:$16 sps:$4 sm:$0xff]  }
 0x17b   :  { %5179 = vmatpush1.bf16.msra.mxu0 %v7909_v33  ;;  %5712 = vmatpush1.bf16.msra.mxu1 %v7912_v26  ;;  %v8001_v33 = vld [vmem:[%s11224_s1 + $0xda4] ss:$16 sps:$4 sm:$0xff]   ;;  %v8004_v26 = vld [vmem:[%s11224_s1 + $0xdac] ss:$16 sps:$4 sm:$0xff]  }
 0x17c   :  { %5180 = vmatprep.subr.bf16.mxu0 %v7917_v36  ;;  %5713 = vmatprep.subr.bf16.mxu1 %v7920_v37  ;;  %v7999_v36 = vld [vmem:[%s11224_s1 + $0xda0] ss:$16 sps:$4 sm:$0xff]   ;;  %v8002_v37 = vld [vmem:[%s11224_s1 + $0xda8] ss:$16 sps:$4 sm:$0xff]  }
 0x17f   :  { %5181 = vmatpush1.bf16.msra.mxu0 %v7915_v21  ;;  %5714 = vmatpush1.bf16.msra.mxu1 %v7918_v39  ;;  %v8007_v21 = vld [vmem:[%s11224_s1 + $0xdc4] ss:$16 sps:$4 sm:$0xff]   ;;  %v8010_v39 = vld [vmem:[%s11224_s1 + $0xdcc] ss:$16 sps:$4 sm:$0xff]  }
 0x180   :  { %5191 = vmatprep.subr.bf16.mxu0 %v7923_v40  ;;  %5724 = vmatprep.subr.bf16.mxu1 %v7926_v41  ;;  %v8005_v40 = vld [vmem:[%s11224_s1 + $0xdc0] ss:$16 sps:$4 sm:$0xff]   ;;  %v8008_v41 = vld [vmem:[%s11224_s1 + $0xdc8] ss:$16 sps:$4 sm:$0xff]  }
 0x182   :  { %5183 = vmatmul.mubr.bf16.vlgmr.msra.gmra.mrb[0].mxu0 %v930_v43  ;;  %5716 = vmatmul.mubr.bf16.vlgmr.msra.gmra.mrb[0].mxu1 %v930_v43  ;;  %v8016_v43 = vld [vmem:[%s11224_s1 + $0xdec] ss:$16 sps:$4 sm:$0xff]  }
 0x183   :  { %5192 = vmatpush1.bf16.msra.mxu0 %v7921_v44  ;;  %5725 = vmatpush1.bf16.msra.mxu1 %v7924_v45  ;;  %v8011_v44 = vld [vmem:[%s11224_s1 + $0xde0] ss:$16 sps:$4 sm:$0xff]   ;;  %v8014_v45 = vld [vmem:[%s11224_s1 + $0xde8] ss:$16 sps:$4 sm:$0xff]  }
 0x184   :  { %5193 = vmatprep.subr.bf16.mxu0 %v7929_v46  ;;  %5726 = vmatprep.subr.bf16.mxu1 %v7932_v35  ;;  %v8020_v46 = vld [vmem:[%s11224_s1 + $0xe04] ss:$16 sps:$4 sm:$0xff]   ;;  %v8023_v35 = vld [vmem:[%s11224_s1 + $0xe0c] ss:$16 sps:$4 sm:$0xff]  }
 0x185   :  { %5223 = vmatprep.mubr.bf16.mxu0 %v9857_v47  ;;  %5756 = vmatprep.mubr.bf16.mxu1 %v9857_v47 }
 0x187   :  { %5194 = vmatpush1.bf16.msra.mxu0 %v7927_v48  ;;  %5727 = vmatpush1.bf16.msra.mxu1 %v7930_v50  ;;  %v10043_v48 = vrot.slane %v9826_v38, %v8749_v49  ;;  %v8018_v50 = vld [vmem:[%s11224_s1 + $0xe00] ss:$16 sps:$4 sm:$0xff]   ;;  %v8029_v38 = vld [vmem:[%s11224_s1 + $0xe2c] ss:$16 sps:$4 sm:$0xff]  }
 0x188   :  { %5195 = vmatprep.subr.bf16.mxu0 %v7935_v51  ;;  %5728 = vmatprep.subr.bf16.mxu1 %v7938_v53  ;;  %v8021_v51 = vld [vmem:[%s11224_s1 + $0xe08] ss:$16 sps:$4 sm:$0xff]   ;;  %v8026_v53 = vld [vmem:[%s11224_s1 + $0xe24] ss:$16 sps:$4 sm:$0xff]  }
 0x18b   :  { %5196 = vmatpush1.bf16.msra.mxu0 %v7933_v54  ;;  %5729 = vmatpush1.bf16.msra.mxu1 %v7936_v55  ;;  %v933_v54 = vcombine.high %v9857_v47, %v9857_v47  ;;  %v8024_v55 = vld [vmem:[%s11224_s1 + $0xe20] ss:$16 sps:$4 sm:$0xff]   ;;  %v8032_v47 = vld [vmem:[%s11224_s1 + $0xe44] ss:$16 sps:$4 sm:$0xff]  }
 0x18c   :  { %5197 = vmatprep.subr.bf16.mxu0 %v7941_v56  ;;  %5730 = vmatprep.subr.bf16.mxu1 %v7944_v57  ;;  %v8027_v56 = vld [vmem:[%s11224_s1 + $0xe28] ss:$16 sps:$4 sm:$0xff]   ;;  %v8035_v57 = vld [vmem:[%s11224_s1 + $0xe4c] ss:$16 sps:$4 sm:$0xff]  }
 0x18f   :  { %5198 = vmatpush1.bf16.msra.mxu0 %v7939_v58  ;;  %5731 = vmatpush1.bf16.msra.mxu1 %v7942_v59  ;;  %v8030_v58 = vld [vmem:[%s11224_s1 + $0xe40] ss:$16 sps:$4 sm:$0xff]   ;;  %v8033_v59 = vld [vmem:[%s11224_s1 + $0xe48] ss:$16 sps:$4 sm:$0xff]  }
 0x190   :  { %5199 = vmatprep.subr.bf16.mxu0 %v7947_v60  ;;  %5732 = vmatprep.subr.bf16.mxu1 %v7950_v61  ;;  %v8038_v60 = vld [vmem:[%s11224_s1 + $0xe64] ss:$16 sps:$4 sm:$0xff]   ;;  %v8041_v61 = vld [vmem:[%s11224_s1 + $0xe6c] ss:$16 sps:$4 sm:$0xff]  }
 0x193   :  { %5200 = vmatpush1.bf16.msra.mxu0 %v7945_v62  ;;  %5733 = vmatpush1.bf16.msra.mxu1 %v7948_v63  ;;  %v8036_v62 = vld [vmem:[%s11224_s1 + $0xe60] ss:$16 sps:$4 sm:$0xff]   ;;  %v8039_v63 = vld [vmem:[%s11224_s1 + $0xe68] ss:$16 sps:$4 sm:$0xff]  }
 0x194   :  { %5201 = vmatprep.subr.bf16.mxu0 %v7953_v0  ;;  %5734 = vmatprep.subr.bf16.mxu1 %v7956_v1  ;;  %v8044_v0 = vld [vmem:[%s11224_s1 + $0xe84] ss:$16 sps:$4 sm:$0xff]   ;;  %v8047_v1 = vld [vmem:[%s11224_s1 + $0xe8c] ss:$16 sps:$4 sm:$0xff]  }
 0x197   :  { %5202 = vmatpush1.bf16.msra.mxu0 %v7951_v2  ;;  %5735 = vmatpush1.bf16.msra.mxu1 %v7954_v3  ;;  %v8042_v2 = vld [vmem:[%s11224_s1 + $0xe80] ss:$16 sps:$4 sm:$0xff]   ;;  %v8045_v3 = vld [vmem:[%s11224_s1 + $0xe88] ss:$16 sps:$4 sm:$0xff]  }
 0x198   :  { %5203 = vmatprep.subr.bf16.mxu0 %v7959_v4  ;;  %5736 = vmatprep.subr.bf16.mxu1 %v7962_v5  ;;  %v8050_v4 = vld [vmem:[%s11224_s1 + $0xea4] ss:$16 sps:$4 sm:$0xff]   ;;  %v8053_v5 = vld [vmem:[%s11224_s1 + $0xeac] ss:$16 sps:$4 sm:$0xff]  }
 0x19b   :  { %5204 = vmatpush1.bf16.msra.mxu0 %v7957_v6  ;;  %5737 = vmatpush1.bf16.msra.mxu1 %v7960_v7  ;;  %v8048_v6 = vld [vmem:[%s11224_s1 + $0xea0] ss:$16 sps:$4 sm:$0xff]   ;;  %v8051_v7 = vld [vmem:[%s11224_s1 + $0xea8] ss:$16 sps:$4 sm:$0xff]  }
 0x19c   :  { %5205 = vmatprep.subr.bf16.mxu0 %v7965_v8  ;;  %5738 = vmatprep.subr.bf16.mxu1 %v7968_v9  ;;  %v8056_v8 = vld [vmem:[%s11224_s1 + $0xec4] ss:$16 sps:$4 sm:$0xff]   ;;  %v8059_v9 = vld [vmem:[%s11224_s1 + $0xecc] ss:$16 sps:$4 sm:$0xff]  }
 0x19f   :  { %5206 = vmatpush1.bf16.msra.mxu0 %v7963_v10  ;;  %5739 = vmatpush1.bf16.msra.mxu1 %v7966_v11  ;;  %v8054_v10 = vld [vmem:[%s11224_s1 + $0xec0] ss:$16 sps:$4 sm:$0xff]   ;;  %v8057_v11 = vld [vmem:[%s11224_s1 + $0xec8] ss:$16 sps:$4 sm:$0xff]  }
 0x1a0   :  { %5207 = vmatprep.subr.bf16.mxu0 %v7971_v12  ;;  %5740 = vmatprep.subr.bf16.mxu1 %v7974_v52  ;;  %v8062_v12 = vld [vmem:[%s11224_s1 + $0xee4] ss:$16 sps:$4 sm:$0xff]   ;;  %v8065_v52 = vld [vmem:[%s11224_s1 + $0xeec] ss:$16 sps:$4 sm:$0xff]  }
 0x1a3   :  { %5208 = vmatpush1.bf16.msra.mxu0 %v7969_v15  ;;  %5741 = vmatpush1.bf16.msra.mxu1 %v7972_v16  ;;  %v8060_v15 = vld [vmem:[%s11224_s1 + $0xee0] ss:$16 sps:$4 sm:$0xff]   ;;  %v8063_v16 = vld [vmem:[%s11224_s1 + $0xee8] ss:$16 sps:$4 sm:$0xff]  }
 0x1a4   :  { %5209 = vmatprep.subr.bf16.mxu0 %v7977_v17  ;;  %5742 = vmatprep.subr.bf16.mxu1 %v7980_v18  ;;  %v8068_v17 = vld [vmem:[%s11224_s1 + $0xf04] ss:$16 sps:$4 sm:$0xff]   ;;  %v8071_v18 = vld [vmem:[%s11224_s1 + $0xf0c] ss:$16 sps:$4 sm:$0xff]  }
 0x1a7   :  { %5210 = vmatpush1.bf16.msra.mxu0 %v7975_v19  ;;  %5743 = vmatpush1.bf16.msra.mxu1 %v7978_v20  ;;  %v8066_v19 = vld [vmem:[%s11224_s1 + $0xf00] ss:$16 sps:$4 sm:$0xff]   ;;  %v8069_v20 = vld [vmem:[%s11224_s1 + $0xf08] ss:$16 sps:$4 sm:$0xff]  }
 0x1a8   :  { %5211 = vmatprep.subr.bf16.mxu0 %v7983_v22  ;;  %5744 = vmatprep.subr.bf16.mxu1 %v7986_v23  ;;  %v8074_v22 = vld [vmem:[%s11224_s1 + $0xf24] ss:$16 sps:$4 sm:$0xff]   ;;  %v8077_v23 = vld [vmem:[%s11224_s1 + $0xf2c] ss:$16 sps:$4 sm:$0xff]  }
 0x1ab   :  { %5212 = vmatpush1.bf16.msra.mxu0 %v7981_v24  ;;  %5745 = vmatpush1.bf16.msra.mxu1 %v7984_v13  ;;  %v8072_v24 = vld [vmem:[%s11224_s1 + $0xf20] ss:$16 sps:$4 sm:$0xff]   ;;  %v8075_v13 = vld [vmem:[%s11224_s1 + $0xf28] ss:$16 sps:$4 sm:$0xff]  }
 0x1ac   :  { %5213 = vmatprep.subr.bf16.mxu0 %v7989_v27  ;;  %5746 = vmatprep.subr.bf16.mxu1 %v7992_v28  ;;  %v8080_v27 = vld [vmem:[%s11224_s1 + $0xf44] ss:$16 sps:$4 sm:$0xff]   ;;  %v8083_v28 = vld [vmem:[%s11224_s1 + $0xf4c] ss:$16 sps:$4 sm:$0xff]  }
 0x1af   :  { %5214 = vmatpush1.bf16.msra.mxu0 %v7987_v29  ;;  %5747 = vmatpush1.bf16.msra.mxu1 %v7990_v14  ;;  %v8078_v29 = vld [vmem:[%s11224_s1 + $0xf40] ss:$16 sps:$4 sm:$0xff]   ;;  %v8081_v14 = vld [vmem:[%s11224_s1 + $0xf48] ss:$16 sps:$4 sm:$0xff]  }
 0x1b0   :  { %5215 = vmatprep.subr.bf16.mxu0 %v7995_v30  ;;  %5748 = vmatprep.subr.bf16.mxu1 %v7998_v31  ;;  %v8086_v30 = vld [vmem:[%s11224_s1 + $0xf64] ss:$16 sps:$4 sm:$0xff]   ;;  %v8089_v31 = vld [vmem:[%s11224_s1 + $0xf6c] ss:$16 sps:$4 sm:$0xff]  }
 0x1b3   :  { %5216 = vmatpush1.bf16.msra.mxu0 %v7993_v25  ;;  %5749 = vmatpush1.bf16.msra.mxu1 %v7996_v32 }
 0x1b4   :  { %5217 = vmatprep.subr.bf16.mxu0 %v8001_v33  ;;  %5750 = vmatprep.subr.bf16.mxu1 %v8004_v26 }
 0x1b7   :  { %5218 = vmatpush1.bf16.msra.mxu0 %v7999_v36  ;;  %5751 = vmatpush1.bf16.msra.mxu1 %v8002_v37 }
 0x1b8   :  { %5219 = vmatprep.subr.bf16.mxu0 %v8007_v21  ;;  %5752 = vmatprep.subr.bf16.mxu1 %v8010_v39 }
 0x1bb   :  { %5220 = vmatpush1.bf16.msra.mxu0 %v8005_v40  ;;  %5753 = vmatpush1.bf16.msra.mxu1 %v8008_v41 }
 0x1bc   :  { %5221 = vmatprep.subr.bf16.mxu0 %v8013_v34  ;;  %5754 = vmatprep.subr.bf16.mxu1 %v8016_v43 }
 0x1bf   :  { %5222 = vmatpush1.bf16.msra.mxu0 %v8011_v44  ;;  %5755 = vmatpush1.bf16.msra.mxu1 %v8014_v45 }
 0x1c0   :  { %5232 = vmatprep.subr.bf16.mxu0 %v8020_v46  ;;  %5765 = vmatprep.subr.bf16.mxu1 %v8023_v35 }
 0x1c2   :  { %5224 = vmatmul.mubr.bf16.vlgmr.msra.gmra.mrb[0].mxu0 %v10043_v48  ;;  %5757 = vmatmul.mubr.bf16.vlgmr.msra.gmra.mrb[0].mxu1 %v10043_v48 }
 0x1c3   :  { %5233 = vmatpush1.bf16.msra.mxu0 %v8018_v50  ;;  %5766 = vmatpush1.bf16.msra.mxu1 %v8021_v51 }
 0x1c4   :  { %5234 = vmatprep.subr.bf16.mxu0 %v8026_v53  ;;  %5767 = vmatprep.subr.bf16.mxu1 %v8029_v38 }
 0x1c5   :  { %5264 = vmatprep.mubr.bf16.mxu0 %v933_v54  ;;  %5797 = vmatprep.mubr.bf16.mxu1 %v933_v54 }
 0x1c7   :  { %5235 = vmatpush1.bf16.msra.mxu0 %v8024_v55  ;;  %5768 = vmatpush1.bf16.msra.mxu1 %v8027_v56 }
 0x1c8   :  { %5236 = vmatprep.subr.bf16.mxu0 %v8032_v47  ;;  %5769 = vmatprep.subr.bf16.mxu1 %v8035_v57 }
 0x1cb   :  { %5237 = vmatpush1.bf16.msra.mxu0 %v8030_v58  ;;  %5770 = vmatpush1.bf16.msra.mxu1 %v8033_v59 }
 0x1cc   :  { %5238 = vmatprep.subr.bf16.mxu0 %v8038_v60  ;;  %5771 = vmatprep.subr.bf16.mxu1 %v8041_v61 }
 0x1cf   :  { %5239 = vmatpush1.bf16.msra.mxu0 %v8036_v62  ;;  %5772 = vmatpush1.bf16.msra.mxu1 %v8039_v63 }
 0x1d0   :  { %5240 = vmatprep.subr.bf16.mxu0 %v8044_v0  ;;  %5773 = vmatprep.subr.bf16.mxu1 %v8047_v1 }
 0x1d3   :  { %5241 = vmatpush1.bf16.msra.mxu0 %v8042_v2  ;;  %5774 = vmatpush1.bf16.msra.mxu1 %v8045_v3 }
 0x1d4   :  { %5242 = vmatprep.subr.bf16.mxu0 %v8050_v4  ;;  %5775 = vmatprep.subr.bf16.mxu1 %v8053_v5 }
 0x1d7   :  { %5243 = vmatpush1.bf16.msra.mxu0 %v8048_v6  ;;  %5776 = vmatpush1.bf16.msra.mxu1 %v8051_v7 }
 0x1d8   :  { %5244 = vmatprep.subr.bf16.mxu0 %v8056_v8  ;;  %5777 = vmatprep.subr.bf16.mxu1 %v8059_v9 }
 0x1db   :  { %5245 = vmatpush1.bf16.msra.mxu0 %v8054_v10  ;;  %5778 = vmatpush1.bf16.msra.mxu1 %v8057_v11 }
 0x1dc   :  { %5246 = vmatprep.subr.bf16.mxu0 %v8062_v12  ;;  %5779 = vmatprep.subr.bf16.mxu1 %v8065_v52 }
 0x1df   :  { %5247 = vmatpush1.bf16.msra.mxu0 %v8060_v15  ;;  %5780 = vmatpush1.bf16.msra.mxu1 %v8063_v16 }
 0x1e0   :  { %5248 = vmatprep.subr.bf16.mxu0 %v8068_v17  ;;  %5781 = vmatprep.subr.bf16.mxu1 %v8071_v18 }
 0x1e3   :  { %5249 = vmatpush1.bf16.msra.mxu0 %v8066_v19  ;;  %5782 = vmatpush1.bf16.msra.mxu1 %v8069_v20 }
 0x1e4   :  { %5250 = vmatprep.subr.bf16.mxu0 %v8074_v22  ;;  %5783 = vmatprep.subr.bf16.mxu1 %v8077_v23 }
 0x1e7   :  { %5251 = vmatpush1.bf16.msra.mxu0 %v8072_v24  ;;  %5784 = vmatpush1.bf16.msra.mxu1 %v8075_v13 }
 0x1e8   :  { %5252 = vmatprep.subr.bf16.mxu0 %v8080_v27  ;;  %5785 = vmatprep.subr.bf16.mxu1 %v8083_v28 }
 0x1e9   :  { %10 = vsyncpa [#allocation3], 0  ;;  %v8084_v25 = vld [vmem:[%s11224_s1 + $0xf60] ss:$16 sps:$4 sm:$0xff]   ;;  %v8087_v32 = vld [vmem:[%s11224_s1 + $0xf68] ss:$16 sps:$4 sm:$0xff]   ;;  %v931_v47 = vcombine.high %v10043_v48, %v10043_v48 }
 0x1ea   :  { %v8092_v33 = vld [vmem:[%s11224_s1 + $0xf84] ss:$16 sps:$4 sm:$0xff]   ;;  %v8095_v26 = vld [vmem:[%s11224_s1 + $0xf8c] ss:$16 sps:$4 sm:$0xff]   ;;  %v8090_v36 = vld [vmem:[%s11224_s1 + $0xf80] ss:$16 sps:$4 sm:$0xff]  }
 0x1eb   :  { %5253 = vmatpush1.bf16.msra.mxu0 %v8078_v29  ;;  %5786 = vmatpush1.bf16.msra.mxu1 %v8081_v14  ;;  %v8093_v37 = vld [vmem:[%s11224_s1 + $0xf88] ss:$16 sps:$4 sm:$0xff]   ;;  %v8098_v21 = vld [vmem:[%s11224_s1 + $0xfa4] ss:$16 sps:$4 sm:$0xff]   ;;  %v8101_v39 = vld [vmem:[%s11224_s1 + $0xfac] ss:$16 sps:$4 sm:$0xff]  }
 0x1ec   :  { %5254 = vmatprep.subr.bf16.mxu0 %v8086_v30  ;;  %5787 = vmatprep.subr.bf16.mxu1 %v8089_v31  ;;  %v8096_v40 = vld [vmem:[%s11224_s1 + $0xfa0] ss:$16 sps:$4 sm:$0xff]   ;;  %v8099_v41 = vld [vmem:[%s11224_s1 + $0xfa8] ss:$16 sps:$4 sm:$0xff]   ;;  %v8104_v34 = vld [vmem:[%s11224_s1 + $0xfc4] ss:$16 sps:$4 sm:$0xff]  }
 0x1ed   :  { %v8107_v43 = vld [vmem:[%s11224_s1 + $0xfcc] ss:$16 sps:$4 sm:$0xff]   ;;  %v10220_v44 = vld [vmem:[%s11223_s0 + $0x10] sm:$0xff]  ;;  %v8105_v46 = vld [vmem:[%s11224_s1 + $0xfc8] ss:$16 sps:$4 sm:$0xff]   ;;  %vm4941_vm0 = vcmask 523264  }
 0x1ee   :  { %v8102_v45 = vld [vmem:[%s11224_s1 + $0xfc0] ss:$16 sps:$4 sm:$0xff]   ;;  %v8110_v35 = vld [vmem:[%s11224_s1 + $0xfe4] ss:$16 sps:$4 sm:$0xff]   ;;  %v8113_v50 = vld [vmem:[%s11224_s1 + $0xfec] ss:$16 sps:$4 sm:$0xff]   ;;  %v10236_v51 = vrot.slane %v10220_v44, %v8749_v49 }
 0x1ef   :  { %5255 = vmatpush1.bf16.msra.mxu0 %v8084_v25  ;;  %5788 = vmatpush1.bf16.msra.mxu1 %v8087_v32  ;;  %v8108_v53 = vld [vmem:[%s11224_s1 + $0xfe0] ss:$16 sps:$4 sm:$0xff]   ;;  %v8111_v38 = vld [vmem:[%s11224_s1 + $0xfe8] ss:$16 sps:$4 sm:$0xff]   ;;  %v8116_v54 = vld [vmem:[%s11224_s1 + $0x1004] ss:$16 sps:$4 sm:$0xff]  }
 0x1f0   :  { %5256 = vmatprep.subr.bf16.mxu0 %v8092_v33  ;;  %5789 = vmatprep.subr.bf16.mxu1 %v8095_v26  ;;  %v8119_v55 = vld [vmem:[%s11224_s1 + $0x100c] ss:$16 sps:$4 sm:$0xff]   ;;  %v949_v56 = vcombine.high %v10236_v51, %v10236_v51  ;;  %v8114_v57 = vld [vmem:[%s11224_s1 + $0x1000] ss:$16 sps:$4 sm:$0xff]   ;;  %v8117_v58 = vld [vmem:[%s11224_s1 + $0x1008] ss:$16 sps:$4 sm:$0xff]  }
 0x1f1   :  { %v8122_v59 = vld [vmem:[%s11224_s1 + $0x1024] ss:$16 sps:$4 sm:$0xff]   ;;  %v8125_v48 = vld [vmem:[%s11224_s1 + $0x102c] ss:$16 sps:$4 sm:$0xff]   ;;  %v8120_v61 = vld [vmem:[%s11224_s1 + $0x1020] ss:$16 sps:$4 sm:$0xff]  }
 0x1f2   :  { %v10267_v60 = vrot.slane %v949_v56, %v8749_v49  ;;  %v8123_v62 = vld [vmem:[%s11224_s1 + $0x1028] ss:$16 sps:$4 sm:$0xff]   ;;  %v8128_v63 = vld [vmem:[%s11224_s1 + $0x1044] ss:$16 sps:$4 sm:$0xff]   ;;  %v8131_v0 = vld [vmem:[%s11224_s1 + $0x104c] ss:$16 sps:$4 sm:$0xff]  }
 0x1f3   :  { %5257 = vmatpush1.bf16.msra.mxu0 %v8090_v36  ;;  %5790 = vmatpush1.bf16.msra.mxu1 %v8093_v37  ;;  %v8126_v1 = vld [vmem:[%s11224_s1 + $0x1040] ss:$16 sps:$4 sm:$0xff]   ;;  %v8129_v2 = vld [vmem:[%s11224_s1 + $0x1048] ss:$16 sps:$4 sm:$0xff]   ;;  %v8134_v3 = vld [vmem:[%s11224_s1 + $0x1064] ss:$16 sps:$4 sm:$0xff]  }
 0x1f4   :  { %5258 = vmatprep.subr.bf16.mxu0 %v8098_v21  ;;  %5791 = vmatprep.subr.bf16.mxu1 %v8101_v39  ;;  %v8137_v4 = vld [vmem:[%s11224_s1 + $0x106c] ss:$16 sps:$4 sm:$0xff]   ;;  %v8132_v5 = vld [vmem:[%s11224_s1 + $0x1060] ss:$16 sps:$4 sm:$0xff]   ;;  %v8135_v6 = vld [vmem:[%s11224_s1 + $0x1068] ss:$16 sps:$4 sm:$0xff]  }
 0x1f5   :  { %v8140_v7 = vld [vmem:[%s11224_s1 + $0x1084] ss:$16 sps:$4 sm:$0xff]   ;;  %v8143_v8 = vld [vmem:[%s11224_s1 + $0x108c] ss:$16 sps:$4 sm:$0xff]   ;;  %v8138_v9 = vld [vmem:[%s11224_s1 + $0x1080] ss:$16 sps:$4 sm:$0xff]  }
 0x1f6   :  { %v8141_v10 = vld [vmem:[%s11224_s1 + $0x1088] ss:$16 sps:$4 sm:$0xff]   ;;  %v8146_v11 = vld [vmem:[%s11224_s1 + $0x10a4] ss:$16 sps:$4 sm:$0xff]   ;;  %v8149_v12 = vld [vmem:[%s11224_s1 + $0x10ac] ss:$16 sps:$4 sm:$0xff]  }
 0x1f7   :  { %5259 = vmatpush1.bf16.msra.mxu0 %v8096_v40  ;;  %5792 = vmatpush1.bf16.msra.mxu1 %v8099_v41  ;;  %v8144_v52 = vld [vmem:[%s11224_s1 + $0x10a0] ss:$16 sps:$4 sm:$0xff]   ;;  %v8147_v15 = vld [vmem:[%s11224_s1 + $0x10a8] ss:$16 sps:$4 sm:$0xff]   ;;  %v8152_v16 = vld [vmem:[%s11224_s1 + $0x10c4] ss:$16 sps:$4 sm:$0xff]  }
 0x1f8   :  { %5260 = vmatprep.subr.bf16.mxu0 %v8104_v34  ;;  %5793 = vmatprep.subr.bf16.mxu1 %v8107_v43  ;;  %v8155_v17 = vld [vmem:[%s11224_s1 + $0x10cc] ss:$16 sps:$4 sm:$0xff]   ;;  %v8150_v18 = vld [vmem:[%s11224_s1 + $0x10c0] ss:$16 sps:$4 sm:$0xff]   ;;  %v8153_v19 = vld [vmem:[%s11224_s1 + $0x10c8] ss:$16 sps:$4 sm:$0xff]  }
 0x1f9   :  { %v8158_v20 = vld [vmem:[%s11224_s1 + $0x10e4] ss:$16 sps:$4 sm:$0xff]   ;;  %v8161_v22 = vld [vmem:[%s11224_s1 + $0x10ec] ss:$16 sps:$4 sm:$0xff]   ;;  %v8156_v23 = vld [vmem:[%s11224_s1 + $0x10e0] ss:$16 sps:$4 sm:$0xff]  }
 0x1fa   :  { %v8159_v24 = vld [vmem:[%s11224_s1 + $0x10e8] ss:$16 sps:$4 sm:$0xff]   ;;  %v8164_v13 = vld [vmem:[%s11224_s1 + $0x1104] ss:$16 sps:$4 sm:$0xff]   ;;  %v8167_v27 = vld [vmem:[%s11224_s1 + $0x110c] ss:$16 sps:$4 sm:$0xff]  }
 0x1fb   :  { %5261 = vmatpush1.bf16.msra.mxu0 %v8102_v45  ;;  %5794 = vmatpush1.bf16.msra.mxu1 %v8105_v46  ;;  %v8162_v28 = vld [vmem:[%s11224_s1 + $0x1100] ss:$16 sps:$4 sm:$0xff]   ;;  %v8165_v29 = vld [vmem:[%s11224_s1 + $0x1108] ss:$16 sps:$4 sm:$0xff]   ;;  %v8170_v14 = vld [vmem:[%s11224_s1 + $0x1124] ss:$16 sps:$4 sm:$0xff]  }
 0x1fc   :  { %5262 = vmatprep.subr.bf16.mxu0 %v8110_v35  ;;  %5795 = vmatprep.subr.bf16.mxu1 %v8113_v50  ;;  %v8173_v30 = vld [vmem:[%s11224_s1 + $0x112c] ss:$16 sps:$4 sm:$0xff]   ;;  %v8168_v31 = vld [vmem:[%s11224_s1 + $0x1120] ss:$16 sps:$4 sm:$0xff]   ;;  %v8171_v25 = vld [vmem:[%s11224_s1 + $0x1128] ss:$16 sps:$4 sm:$0xff]  }
 0x1fd   :  { %v8176_v32 = vld [vmem:[%s11224_s1 + $0x1144] ss:$16 sps:$4 sm:$0xff]   ;;  %v8179_v33 = vld [vmem:[%s11224_s1 + $0x114c] ss:$16 sps:$4 sm:$0xff]   ;;  %v8174_v26 = vld [vmem:[%s11224_s1 + $0x1140] ss:$16 sps:$4 sm:$0xff]  }
 0x1fe   :  { %v8177_v36 = vld [vmem:[%s11224_s1 + $0x1148] ss:$16 sps:$4 sm:$0xff]   ;;  %v8182_v37 = vld [vmem:[%s11224_s1 + $0x1164] ss:$16 sps:$4 sm:$0xff]   ;;  %v8185_v21 = vld [vmem:[%s11224_s1 + $0x116c] ss:$16 sps:$4 sm:$0xff]  }
 0x1ff   :  { %5263 = vmatpush1.bf16.msra.mxu0 %v8108_v53  ;;  %5796 = vmatpush1.bf16.msra.mxu1 %v8111_v38  ;;  %v8180_v39 = vld [vmem:[%s11224_s1 + $0x1160] ss:$16 sps:$4 sm:$0xff]   ;;  %v8183_v40 = vld [vmem:[%s11224_s1 + $0x1168] ss:$16 sps:$4 sm:$0xff]   ;;  %v8188_v41 = vld [vmem:[%s11224_s1 + $0x1184] ss:$16 sps:$4 sm:$0xff]  }
 0x200   :  { %5273 = vmatprep.subr.bf16.mxu0 %v8116_v54  ;;  %5806 = vmatprep.subr.bf16.mxu1 %v8119_v55  ;;  %v8191_v34 = vld [vmem:[%s11224_s1 + $0x118c] ss:$16 sps:$4 sm:$0xff]   ;;  %v8186_v43 = vld [vmem:[%s11224_s1 + $0x1180] ss:$16 sps:$4 sm:$0xff]   ;;  %v8189_v45 = vld [vmem:[%s11224_s1 + $0x1188] ss:$16 sps:$4 sm:$0xff]  }
 0x201   :  { %v8194_v46 = vld [vmem:[%s11224_s1 + $0x11a4] ss:$16 sps:$4 sm:$0xff]   ;;  %v8197_v35 = vld [vmem:[%s11224_s1 + $0x11ac] ss:$16 sps:$4 sm:$0xff]   ;;  %v8192_v50 = vld [vmem:[%s11224_s1 + $0x11a0] ss:$16 sps:$4 sm:$0xff]  }
 0x202   :  { %5265 = vmatmul.mubr.bf16.vlgmr.msra.gmra.mrb[0].mxu0 %v931_v47  ;;  %5798 = vmatmul.mubr.bf16.vlgmr.msra.gmra.mrb[0].mxu1 %v931_v47  ;;  %v8195_v53 = vld [vmem:[%s11224_s1 + $0x11a8] ss:$16 sps:$4 sm:$0xff]   ;;  %v8200_v38 = vld [vmem:[%s11224_s1 + $0x11c4] ss:$16 sps:$4 sm:$0xff]   ;;  %v8203_v54 = vld [vmem:[%s11224_s1 + $0x11cc] ss:$16 sps:$4 sm:$0xff]  }
 0x203   :  { %5274 = vmatpush1.bf16.msra.mxu0 %v8114_v57  ;;  %5807 = vmatpush1.bf16.msra.mxu1 %v8117_v58  ;;  %v8198_v55 = vld [vmem:[%s11224_s1 + $0x11c0] ss:$16 sps:$4 sm:$0xff]   ;;  %v8201_v56 = vld [vmem:[%s11224_s1 + $0x11c8] ss:$16 sps:$4 sm:$0xff]   ;;  %v8206_v47 = vld [vmem:[%s11224_s1 + $0x11e4] ss:$16 sps:$4 sm:$0xff]  }
 0x204   :  { %5275 = vmatprep.subr.bf16.mxu0 %v8122_v59  ;;  %5808 = vmatprep.subr.bf16.mxu1 %v8125_v48  ;;  %v8209_v57 = vld [vmem:[%s11224_s1 + $0x11ec] ss:$16 sps:$4 sm:$0xff]   ;;  %v8204_v58 = vld [vmem:[%s11224_s1 + $0x11e0] ss:$16 sps:$4 sm:$0xff]   ;;  %v8207_v59 = vld [vmem:[%s11224_s1 + $0x11e8] ss:$16 sps:$4 sm:$0xff]  }
 0x205   :  { %5305 = vmatprep.mubr.bf16.mxu0 %v10267_v60  ;;  %5838 = vmatprep.mubr.bf16.mxu1 %v10267_v60  ;;  %v8212_v48 = vld [vmem:[%s11224_s1 + $0x1204] ss:$16 sps:$4 sm:$0xff]   ;;  %s8583_s6 = smov [#allocation2]  }
 0x206   :  { %s6369_s7 = sshll.u32 %s8583_s6, 4  ;;  %s6370_s7 = int_to_ptr.vmem [resolvable:$true] %s6369_s7 }
 0x207   :  { %5276 = vmatpush1.bf16.msra.mxu0 %v8120_v61  ;;  %5809 = vmatpush1.bf16.msra.mxu1 %v8123_v62  ;;  %v8215_v61 = vld [vmem:[%s11224_s1 + $0x120c] ss:$16 sps:$4 sm:$0xff]   ;;  %v10453_v62 = vrot.slane %v10236_v51, %v8749_v49  ;;  %s8557_s8 = scalar_lea.vmem %s6370_s7, 32  ;;  %p8562_p1 = scmp.lt.s32.totalorder %s6370_s7, %s6370_s7 }
 0x208   :  { %5277 = vmatprep.subr.bf16.mxu0 %v8128_v63  ;;  %5810 = vmatprep.subr.bf16.mxu1 %v8131_v0  ;;  %v8210_v63 = vld [vmem:[%s11224_s1 + $0x1200] ss:$16 sps:$4 sm:$0xff]   ;;  %v8213_v0 = vld [vmem:[%s11224_s1 + $0x1208] ss:$16 sps:$4 sm:$0xff]   ;;  %v8221_v51 = vld [vmem:[%s11224_s1 + $0x122c] ss:$16 sps:$4 sm:$0xff]   ;;  %p8558_p0 = scmp.ne.s32.totalorder %s6370_s7, %s8557_s8  ;;  %p8563_p2 = scmp.lt.s32.totalorder %s8557_s8, %s8557_s8 }
 0x20a   :  { %p8564_p3 = por %p8563_p2, %p8562_p1 }
 0x20b   :  { %5278 = vmatpush1.bf16.msra.mxu0 %v8126_v1  ;;  %5811 = vmatpush1.bf16.msra.mxu1 %v8129_v2  ;;  %v8218_v1 = vld [vmem:[%s11224_s1 + $0x1224] ss:$16 sps:$4 sm:$0xff]   ;;  %v981_v2 = vcombine.high %v10267_v60, %v10267_v60 }
 0x20c   :  { %5279 = vmatprep.subr.bf16.mxu0 %v8134_v3  ;;  %5812 = vmatprep.subr.bf16.mxu1 %v8137_v4  ;;  %v8216_v3 = vld [vmem:[%s11224_s1 + $0x1220] ss:$16 sps:$4 sm:$0xff]   ;;  %v8219_v4 = vld [vmem:[%s11224_s1 + $0x1228] ss:$16 sps:$4 sm:$0xff]   ;;  %v8224_v60 = vld [vmem:[%s11224_s1 + $0x1244] ss:$16 sps:$4 sm:$0xff]   ;;  %p8565_p4 = pnand %p8564_p3, %p8558_p0 }
 0x20f   :  { %5280 = vmatpush1.bf16.msra.mxu0 %v8132_v5  ;;  %5813 = vmatpush1.bf16.msra.mxu1 %v8135_v6  ;;  %v8227_v5 = vld [vmem:[%s11224_s1 + $0x124c] ss:$16 sps:$4 sm:$0xff]   ;;  %v8222_v6 = vld [vmem:[%s11224_s1 + $0x1240] ss:$16 sps:$4 sm:$0xff]  }
 0x210   :  { %5281 = vmatprep.subr.bf16.mxu0 %v8140_v7  ;;  %5814 = vmatprep.subr.bf16.mxu1 %v8143_v8  ;;  %v8225_v7 = vld [vmem:[%s11224_s1 + $0x1248] ss:$16 sps:$4 sm:$0xff]   ;;  %v8230_v8 = vld [vmem:[%s11224_s1 + $0x1264] ss:$16 sps:$4 sm:$0xff]  }
 0x213   :  { %5282 = vmatpush1.bf16.msra.mxu0 %v8138_v9  ;;  %5815 = vmatpush1.bf16.msra.mxu1 %v8141_v10  ;;  %v8233_v9 = vld [vmem:[%s11224_s1 + $0x126c] ss:$16 sps:$4 sm:$0xff]   ;;  %v8228_v10 = vld [vmem:[%s11224_s1 + $0x1260] ss:$16 sps:$4 sm:$0xff]  }
 0x214   :  { %5283 = vmatprep.subr.bf16.mxu0 %v8146_v11  ;;  %5816 = vmatprep.subr.bf16.mxu1 %v8149_v12  ;;  %v8231_v11 = vld [vmem:[%s11224_s1 + $0x1268] ss:$16 sps:$4 sm:$0xff]   ;;  %v8236_v12 = vld [vmem:[%s11224_s1 + $0x1284] ss:$16 sps:$4 sm:$0xff]  }
 0x217   :  { %5284 = vmatpush1.bf16.msra.mxu0 %v8144_v52  ;;  %5817 = vmatpush1.bf16.msra.mxu1 %v8147_v15  ;;  %v8239_v52 = vld [vmem:[%s11224_s1 + $0x128c] ss:$16 sps:$4 sm:$0xff]   ;;  %v8234_v15 = vld [vmem:[%s11224_s1 + $0x1280] ss:$16 sps:$4 sm:$0xff]  }
 0x218   :  { %5285 = vmatprep.subr.bf16.mxu0 %v8152_v16  ;;  %5818 = vmatprep.subr.bf16.mxu1 %v8155_v17  ;;  %v8237_v16 = vld [vmem:[%s11224_s1 + $0x1288] ss:$16 sps:$4 sm:$0xff]   ;;  %v8242_v17 = vld [vmem:[%s11224_s1 + $0x12a4] ss:$16 sps:$4 sm:$0xff]  }
 0x21b   :  { %5286 = vmatpush1.bf16.msra.mxu0 %v8150_v18  ;;  %5819 = vmatpush1.bf16.msra.mxu1 %v8153_v19  ;;  %v8245_v18 = vld [vmem:[%s11224_s1 + $0x12ac] ss:$16 sps:$4 sm:$0xff]   ;;  %v8240_v19 = vld [vmem:[%s11224_s1 + $0x12a0] ss:$16 sps:$4 sm:$0xff]  }
 0x21c   :  { %5287 = vmatprep.subr.bf16.mxu0 %v8158_v20  ;;  %5820 = vmatprep.subr.bf16.mxu1 %v8161_v22  ;;  %v8243_v20 = vld [vmem:[%s11224_s1 + $0x12a8] ss:$16 sps:$4 sm:$0xff]   ;;  %v8248_v22 = vld [vmem:[%s11224_s1 + $0x12c4] ss:$16 sps:$4 sm:$0xff]  }
 0x21f   :  { %5288 = vmatpush1.bf16.msra.mxu0 %v8156_v23  ;;  %5821 = vmatpush1.bf16.msra.mxu1 %v8159_v24  ;;  %v8251_v23 = vld [vmem:[%s11224_s1 + $0x12cc] ss:$16 sps:$4 sm:$0xff]   ;;  %v8246_v24 = vld [vmem:[%s11224_s1 + $0x12c0] ss:$16 sps:$4 sm:$0xff]  }
 0x220   :  { %5289 = vmatprep.subr.bf16.mxu0 %v8164_v13  ;;  %5822 = vmatprep.subr.bf16.mxu1 %v8167_v27  ;;  %v8249_v13 = vld [vmem:[%s11224_s1 + $0x12c8] ss:$16 sps:$4 sm:$0xff]   ;;  %v8254_v27 = vld [vmem:[%s11224_s1 + $0x12e4] ss:$16 sps:$4 sm:$0xff]  }
 0x223   :  { %5290 = vmatpush1.bf16.msra.mxu0 %v8162_v28  ;;  %5823 = vmatpush1.bf16.msra.mxu1 %v8165_v29  ;;  %v8257_v28 = vld [vmem:[%s11224_s1 + $0x12ec] ss:$16 sps:$4 sm:$0xff]   ;;  %v8252_v29 = vld [vmem:[%s11224_s1 + $0x12e0] ss:$16 sps:$4 sm:$0xff]  }
 0x224   :  { %5291 = vmatprep.subr.bf16.mxu0 %v8170_v14  ;;  %5824 = vmatprep.subr.bf16.mxu1 %v8173_v30  ;;  %v8255_v14 = vld [vmem:[%s11224_s1 + $0x12e8] ss:$16 sps:$4 sm:$0xff]   ;;  %v8260_v30 = vld [vmem:[%s11224_s1 + $0x1304] ss:$16 sps:$4 sm:$0xff]  }
 0x227   :  { %5292 = vmatpush1.bf16.msra.mxu0 %v8168_v31  ;;  %5825 = vmatpush1.bf16.msra.mxu1 %v8171_v25  ;;  %v8263_v31 = vld [vmem:[%s11224_s1 + $0x130c] ss:$16 sps:$4 sm:$0xff]   ;;  %v8258_v25 = vld [vmem:[%s11224_s1 + $0x1300] ss:$16 sps:$4 sm:$0xff]  }
 0x228   :  { %5293 = vmatprep.subr.bf16.mxu0 %v8176_v32  ;;  %5826 = vmatprep.subr.bf16.mxu1 %v8179_v33  ;;  %v8261_v32 = vld [vmem:[%s11224_s1 + $0x1308] ss:$16 sps:$4 sm:$0xff]   ;;  %v8266_v33 = vld [vmem:[%s11224_s1 + $0x1324] ss:$16 sps:$4 sm:$0xff]  }
 0x22b   :  { %5294 = vmatpush1.bf16.msra.mxu0 %v8174_v26  ;;  %5827 = vmatpush1.bf16.msra.mxu1 %v8177_v36  ;;  %v8269_v26 = vld [vmem:[%s11224_s1 + $0x132c] ss:$16 sps:$4 sm:$0xff]   ;;  %v8264_v36 = vld [vmem:[%s11224_s1 + $0x1320] ss:$16 sps:$4 sm:$0xff]  }
 0x22c   :  { %5295 = vmatprep.subr.bf16.mxu0 %v8182_v37  ;;  %5828 = vmatprep.subr.bf16.mxu1 %v8185_v21  ;;  %v8267_v37 = vld [vmem:[%s11224_s1 + $0x1328] ss:$16 sps:$4 sm:$0xff]   ;;  %v8272_v21 = vld [vmem:[%s11224_s1 + $0x1344] ss:$16 sps:$4 sm:$0xff]  }
 0x22f   :  { %5296 = vmatpush1.bf16.msra.mxu0 %v8180_v39  ;;  %5829 = vmatpush1.bf16.msra.mxu1 %v8183_v40  ;;  %v8275_v39 = vld [vmem:[%s11224_s1 + $0x134c] ss:$16 sps:$4 sm:$0xff]   ;;  %v8270_v40 = vld [vmem:[%s11224_s1 + $0x1340] ss:$16 sps:$4 sm:$0xff]  }
 0x230   :  { %5297 = vmatprep.subr.bf16.mxu0 %v8188_v41  ;;  %5830 = vmatprep.subr.bf16.mxu1 %v8191_v34  ;;  %v8273_v41 = vld [vmem:[%s11224_s1 + $0x1348] ss:$16 sps:$4 sm:$0xff]   ;;  %v8278_v34 = vld [vmem:[%s11224_s1 + $0x1364] ss:$16 sps:$4 sm:$0xff]  }
 0x233   :  { %5298 = vmatpush1.bf16.msra.mxu0 %v8186_v43  ;;  %5831 = vmatpush1.bf16.msra.mxu1 %v8189_v45  ;;  %v8281_v43 = vld [vmem:[%s11224_s1 + $0x136c] ss:$16 sps:$4 sm:$0xff]   ;;  %v8276_v45 = vld [vmem:[%s11224_s1 + $0x1360] ss:$16 sps:$4 sm:$0xff]  }
 0x234   :  { %5299 = vmatprep.subr.bf16.mxu0 %v8194_v46  ;;  %5832 = vmatprep.subr.bf16.mxu1 %v8197_v35  ;;  %v8279_v46 = vld [vmem:[%s11224_s1 + $0x1368] ss:$16 sps:$4 sm:$0xff]   ;;  %v8284_v35 = vld [vmem:[%s11224_s1 + $0x1384] ss:$16 sps:$4 sm:$0xff]  }
 0x237   :  { %5300 = vmatpush1.bf16.msra.mxu0 %v8192_v50  ;;  %5833 = vmatpush1.bf16.msra.mxu1 %v8195_v53  ;;  %v8287_v50 = vld [vmem:[%s11224_s1 + $0x138c] ss:$16 sps:$4 sm:$0xff]   ;;  %v8282_v53 = vld [vmem:[%s11224_s1 + $0x1380] ss:$16 sps:$4 sm:$0xff]  }
 0x238   :  { %5301 = vmatprep.subr.bf16.mxu0 %v8200_v38  ;;  %5834 = vmatprep.subr.bf16.mxu1 %v8203_v54  ;;  %v8285_v38 = vld [vmem:[%s11224_s1 + $0x1388] ss:$16 sps:$4 sm:$0xff]   ;;  %v8290_v54 = vld [vmem:[%s11224_s1 + $0x13a4] ss:$16 sps:$4 sm:$0xff]  }
 0x23b   :  { %5302 = vmatpush1.bf16.msra.mxu0 %v8198_v55  ;;  %5835 = vmatpush1.bf16.msra.mxu1 %v8201_v56  ;;  %v8293_v55 = vld [vmem:[%s11224_s1 + $0x13ac] ss:$16 sps:$4 sm:$0xff]   ;;  %v8288_v56 = vld [vmem:[%s11224_s1 + $0x13a0] ss:$16 sps:$4 sm:$0xff]  }
 0x23c   :  { %5303 = vmatprep.subr.bf16.mxu0 %v8206_v47  ;;  %5836 = vmatprep.subr.bf16.mxu1 %v8209_v57  ;;  %v8291_v47 = vld [vmem:[%s11224_s1 + $0x13a8] ss:$16 sps:$4 sm:$0xff]   ;;  %v8296_v57 = vld [vmem:[%s11224_s1 + $0x13c4] ss:$16 sps:$4 sm:$0xff]  }
 0x23f   :  { %5304 = vmatpush1.bf16.msra.mxu0 %v8204_v58  ;;  %5837 = vmatpush1.bf16.msra.mxu1 %v8207_v59  ;;  %v8299_v58 = vld [vmem:[%s11224_s1 + $0x13cc] ss:$16 sps:$4 sm:$0xff]   ;;  %v934_v59 = vcombine.high %v10220_v44, %v10220_v44 }
 0x240   :  { %5314 = vmatprep.subr.bf16.mxu0 %v8212_v48  ;;  %5847 = vmatprep.subr.bf16.mxu1 %v8215_v61  ;;  %v8294_v48 = vld [vmem:[%s11224_s1 + $0x13c0] ss:$16 sps:$4 sm:$0xff]   ;;  %v8297_v61 = vld [vmem:[%s11224_s1 + $0x13c8] ss:$16 sps:$4 sm:$0xff]   ;;  %v8305_v44 = vld [vmem:[%s11224_s1 + $0x13ec] ss:$16 sps:$4 sm:$0xff]  }
 0x242   :  { %5306 = vmatmul.mubr.bf16.vlgmr.msra.gmra.mrb[0].mxu0 %v10453_v62  ;;  %5839 = vmatmul.mubr.bf16.vlgmr.msra.gmra.mrb[0].mxu1 %v10453_v62 }
 0x243   :  { %5315 = vmatpush1.bf16.msra.mxu0 %v8210_v63  ;;  %5848 = vmatpush1.bf16.msra.mxu1 %v8213_v0  ;;  %v8302_v63 = vld [vmem:[%s11224_s1 + $0x13e4] ss:$16 sps:$4 sm:$0xff]   ;;  %v10642_v0 = vrot.slane %v934_v59, %v8749_v49  ;;  %v8381_v59 = vld [vmem:[%s11224_s1 + $0x1588] ss:$16 sps:$4 sm:$0xff]  }
 0x244   :  { %5316 = vmatprep.subr.bf16.mxu0 %v8218_v1  ;;  %5849 = vmatprep.subr.bf16.mxu1 %v8221_v51  ;;  %v8300_v1 = vld [vmem:[%s11224_s1 + $0x13e0] ss:$16 sps:$4 sm:$0xff]   ;;  %v8303_v51 = vld [vmem:[%s11224_s1 + $0x13e8] ss:$16 sps:$4 sm:$0xff]  }
 0x245   :  { %5346 = vmatprep.mubr.bf16.mxu0 %v981_v2  ;;  %5879 = vmatprep.mubr.bf16.mxu1 %v981_v2  ;;  %v8308_v2 = vld [vmem:[%s11224_s1 + $0x1404] ss:$16 sps:$4 sm:$0xff]  }
 0x247   :  { %5317 = vmatpush1.bf16.msra.mxu0 %v8216_v3  ;;  %5850 = vmatpush1.bf16.msra.mxu1 %v8219_v4  ;;  %v8311_v3 = vld [vmem:[%s11224_s1 + $0x140c] ss:$16 sps:$4 sm:$0xff]   ;;  %v950_v4 = vcombine.high %v10642_v0, %v10642_v0 }
 0x248   :  { %5318 = vmatprep.subr.bf16.mxu0 %v8224_v60  ;;  %5851 = vmatprep.subr.bf16.mxu1 %v8227_v5  ;;  %v979_v60 = vcombine.high %v10453_v62, %v10453_v62  ;;  %v8306_v5 = vld [vmem:[%s11224_s1 + $0x1400] ss:$16 sps:$4 sm:$0xff]   ;;  %v8317_v62 = vld [vmem:[%s11224_s1 + $0x142c] ss:$16 sps:$4 sm:$0xff]  }
 0x24b   :  { %5319 = vmatpush1.bf16.msra.mxu0 %v8222_v6  ;;  %5852 = vmatpush1.bf16.msra.mxu1 %v8225_v7  ;;  %v8309_v6 = vld [vmem:[%s11224_s1 + $0x1408] ss:$16 sps:$4 sm:$0xff]   ;;  %v8314_v7 = vld [vmem:[%s11224_s1 + $0x1424] ss:$16 sps:$4 sm:$0xff]  }
 0x24c   :  { %5320 = vmatprep.subr.bf16.mxu0 %v8230_v8  ;;  %5853 = vmatprep.subr.bf16.mxu1 %v8233_v9  ;;  %v10673_v8 = vrot.slane %v950_v4, %v8749_v49  ;;  %v8312_v9 = vld [vmem:[%s11224_s1 + $0x1420] ss:$16 sps:$4 sm:$0xff]   ;;  %v8398_v4 = vld [vmem:[%s11224_s1 + $0x15e4] ss:$16 sps:$4 sm:$0xff]  }
 0x24f   :  { %5321 = vmatpush1.bf16.msra.mxu0 %v8228_v10  ;;  %5854 = vmatpush1.bf16.msra.mxu1 %v8231_v11  ;;  %v8315_v10 = vld [vmem:[%s11224_s1 + $0x1428] ss:$16 sps:$4 sm:$0xff]   ;;  %v8320_v11 = vld [vmem:[%s11224_s1 + $0x1444] ss:$16 sps:$4 sm:$0xff]  }
 0x250   :  { %5322 = vmatprep.subr.bf16.mxu0 %v8236_v12  ;;  %5855 = vmatprep.subr.bf16.mxu1 %v8239_v52  ;;  %v8323_v12 = vld [vmem:[%s11224_s1 + $0x144c] ss:$16 sps:$4 sm:$0xff]   ;;  %v8318_v52 = vld [vmem:[%s11224_s1 + $0x1440] ss:$16 sps:$4 sm:$0xff]  }
 0x253   :  { %5323 = vmatpush1.bf16.msra.mxu0 %v8234_v15  ;;  %5856 = vmatpush1.bf16.msra.mxu1 %v8237_v16  ;;  %v8321_v15 = vld [vmem:[%s11224_s1 + $0x1448] ss:$16 sps:$4 sm:$0xff]   ;;  %v8326_v16 = vld [vmem:[%s11224_s1 + $0x1464] ss:$16 sps:$4 sm:$0xff]  }
 0x254   :  { %5324 = vmatprep.subr.bf16.mxu0 %v8242_v17  ;;  %5857 = vmatprep.subr.bf16.mxu1 %v8245_v18  ;;  %v8329_v17 = vld [vmem:[%s11224_s1 + $0x146c] ss:$16 sps:$4 sm:$0xff]   ;;  %v8324_v18 = vld [vmem:[%s11224_s1 + $0x1460] ss:$16 sps:$4 sm:$0xff]  }
 0x257   :  { %5325 = vmatpush1.bf16.msra.mxu0 %v8240_v19  ;;  %5858 = vmatpush1.bf16.msra.mxu1 %v8243_v20  ;;  %v8327_v19 = vld [vmem:[%s11224_s1 + $0x1468] ss:$16 sps:$4 sm:$0xff]   ;;  %v8332_v20 = vld [vmem:[%s11224_s1 + $0x1484] ss:$16 sps:$4 sm:$0xff]  }
 0x258   :  { %5326 = vmatprep.subr.bf16.mxu0 %v8248_v22  ;;  %5859 = vmatprep.subr.bf16.mxu1 %v8251_v23  ;;  %v8335_v22 = vld [vmem:[%s11224_s1 + $0x148c] ss:$16 sps:$4 sm:$0xff]   ;;  %v8330_v23 = vld [vmem:[%s11224_s1 + $0x1480] ss:$16 sps:$4 sm:$0xff]  }
 0x25b   :  { %5327 = vmatpush1.bf16.msra.mxu0 %v8246_v24  ;;  %5860 = vmatpush1.bf16.msra.mxu1 %v8249_v13  ;;  %v8333_v24 = vld [vmem:[%s11224_s1 + $0x1488] ss:$16 sps:$4 sm:$0xff]   ;;  %v8338_v13 = vld [vmem:[%s11224_s1 + $0x14a4] ss:$16 sps:$4 sm:$0xff]  }
 0x25c   :  { %5328 = vmatprep.subr.bf16.mxu0 %v8254_v27  ;;  %5861 = vmatprep.subr.bf16.mxu1 %v8257_v28  ;;  %v8341_v27 = vld [vmem:[%s11224_s1 + $0x14ac] ss:$16 sps:$4 sm:$0xff]   ;;  %v8336_v28 = vld [vmem:[%s11224_s1 + $0x14a0] ss:$16 sps:$4 sm:$0xff]  }
 0x25f   :  { %5329 = vmatpush1.bf16.msra.mxu0 %v8252_v29  ;;  %5862 = vmatpush1.bf16.msra.mxu1 %v8255_v14  ;;  %v8339_v29 = vld [vmem:[%s11224_s1 + $0x14a8] ss:$16 sps:$4 sm:$0xff]   ;;  %v8344_v14 = vld [vmem:[%s11224_s1 + $0x14c4] ss:$16 sps:$4 sm:$0xff]  }
 0x260   :  { %5330 = vmatprep.subr.bf16.mxu0 %v8260_v30  ;;  %5863 = vmatprep.subr.bf16.mxu1 %v8263_v31  ;;  %v8347_v30 = vld [vmem:[%s11224_s1 + $0x14cc] ss:$16 sps:$4 sm:$0xff]   ;;  %v8342_v31 = vld [vmem:[%s11224_s1 + $0x14c0] ss:$16 sps:$4 sm:$0xff]  }
 0x263   :  { %5331 = vmatpush1.bf16.msra.mxu0 %v8258_v25  ;;  %5864 = vmatpush1.bf16.msra.mxu1 %v8261_v32  ;;  %v8345_v25 = vld [vmem:[%s11224_s1 + $0x14c8] ss:$16 sps:$4 sm:$0xff]   ;;  %v8350_v32 = vld [vmem:[%s11224_s1 + $0x14e4] ss:$16 sps:$4 sm:$0xff]  }
 0x264   :  { %5332 = vmatprep.subr.bf16.mxu0 %v8266_v33  ;;  %5865 = vmatprep.subr.bf16.mxu1 %v8269_v26  ;;  %v8353_v33 = vld [vmem:[%s11224_s1 + $0x14ec] ss:$16 sps:$4 sm:$0xff]   ;;  %v8348_v26 = vld [vmem:[%s11224_s1 + $0x14e0] ss:$16 sps:$4 sm:$0xff]  }
 0x267   :  { %5333 = vmatpush1.bf16.msra.mxu0 %v8264_v36  ;;  %5866 = vmatpush1.bf16.msra.mxu1 %v8267_v37  ;;  %v8351_v36 = vld [vmem:[%s11224_s1 + $0x14e8] ss:$16 sps:$4 sm:$0xff]   ;;  %v8356_v37 = vld [vmem:[%s11224_s1 + $0x1504] ss:$16 sps:$4 sm:$0xff]  }
 0x268   :  { %5334 = vmatprep.subr.bf16.mxu0 %v8272_v21  ;;  %5867 = vmatprep.subr.bf16.mxu1 %v8275_v39  ;;  %v8359_v21 = vld [vmem:[%s11224_s1 + $0x150c] ss:$16 sps:$4 sm:$0xff]   ;;  %v8354_v39 = vld [vmem:[%s11224_s1 + $0x1500] ss:$16 sps:$4 sm:$0xff]  }
 0x26b   :  { %5335 = vmatpush1.bf16.msra.mxu0 %v8270_v40  ;;  %5868 = vmatpush1.bf16.msra.mxu1 %v8273_v41  ;;  %v8357_v40 = vld [vmem:[%s11224_s1 + $0x1508] ss:$16 sps:$4 sm:$0xff]   ;;  %v8362_v41 = vld [vmem:[%s11224_s1 + $0x1524] ss:$16 sps:$4 sm:$0xff]  }
 0x26c   :  { %5336 = vmatprep.subr.bf16.mxu0 %v8278_v34  ;;  %5869 = vmatprep.subr.bf16.mxu1 %v8281_v43  ;;  %v8365_v34 = vld [vmem:[%s11224_s1 + $0x152c] ss:$16 sps:$4 sm:$0xff]   ;;  %v8360_v43 = vld [vmem:[%s11224_s1 + $0x1520] ss:$16 sps:$4 sm:$0xff]  }
 0x26f   :  { %5337 = vmatpush1.bf16.msra.mxu0 %v8276_v45  ;;  %5870 = vmatpush1.bf16.msra.mxu1 %v8279_v46  ;;  %v8363_v45 = vld [vmem:[%s11224_s1 + $0x1528] ss:$16 sps:$4 sm:$0xff]   ;;  %v8368_v46 = vld [vmem:[%s11224_s1 + $0x1544] ss:$16 sps:$4 sm:$0xff]  }
 0x270   :  { %5338 = vmatprep.subr.bf16.mxu0 %v8284_v35  ;;  %5871 = vmatprep.subr.bf16.mxu1 %v8287_v50  ;;  %v8371_v35 = vld [vmem:[%s11224_s1 + $0x154c] ss:$16 sps:$4 sm:$0xff]   ;;  %v8366_v50 = vld [vmem:[%s11224_s1 + $0x1540] ss:$16 sps:$4 sm:$0xff]  }
 0x273   :  { %5339 = vmatpush1.bf16.msra.mxu0 %v8282_v53  ;;  %5872 = vmatpush1.bf16.msra.mxu1 %v8285_v38  ;;  %v8369_v53 = vld [vmem:[%s11224_s1 + $0x1548] ss:$16 sps:$4 sm:$0xff]   ;;  %v8374_v38 = vld [vmem:[%s11224_s1 + $0x1564] ss:$16 sps:$4 sm:$0xff]  }
 0x274   :  { %5340 = vmatprep.subr.bf16.mxu0 %v8290_v54  ;;  %5873 = vmatprep.subr.bf16.mxu1 %v8293_v55  ;;  %v8377_v54 = vld [vmem:[%s11224_s1 + $0x156c] ss:$16 sps:$4 sm:$0xff]   ;;  %v8372_v55 = vld [vmem:[%s11224_s1 + $0x1560] ss:$16 sps:$4 sm:$0xff]  }
 0x277   :  { %5341 = vmatpush1.bf16.msra.mxu0 %v8288_v56  ;;  %5874 = vmatpush1.bf16.msra.mxu1 %v8291_v47  ;;  %v8375_v56 = vld [vmem:[%s11224_s1 + $0x1568] ss:$16 sps:$4 sm:$0xff]   ;;  %v8380_v47 = vld [vmem:[%s11224_s1 + $0x1584] ss:$16 sps:$4 sm:$0xff]  }
 0x278   :  { %5342 = vmatprep.subr.bf16.mxu0 %v8296_v57  ;;  %5875 = vmatprep.subr.bf16.mxu1 %v8299_v58  ;;  %v8383_v57 = vld [vmem:[%s11224_s1 + $0x158c] ss:$16 sps:$4 sm:$0xff]   ;;  %v8378_v58 = vld [vmem:[%s11224_s1 + $0x1580] ss:$16 sps:$4 sm:$0xff]  }
 0x27b   :  { %5343 = vmatpush1.bf16.msra.mxu0 %v8294_v48  ;;  %5876 = vmatpush1.bf16.msra.mxu1 %v8297_v61  ;;  %v8386_v48 = vld [vmem:[%s11224_s1 + $0x15a4] ss:$16 sps:$4 sm:$0xff]   ;;  %v8389_v61 = vld [vmem:[%s11224_s1 + $0x15ac] ss:$16 sps:$4 sm:$0xff]  }
 0x27c   :  { %5344 = vmatprep.subr.bf16.mxu0 %v8302_v63  ;;  %5877 = vmatprep.subr.bf16.mxu1 %v8305_v44  ;;  %v8384_v63 = vld [vmem:[%s11224_s1 + $0x15a0] ss:$16 sps:$4 sm:$0xff]   ;;  %v8387_v44 = vld [vmem:[%s11224_s1 + $0x15a8] ss:$16 sps:$4 sm:$0xff]  }
 0x27f   :  { %5345 = vmatpush1.bf16.msra.mxu0 %v8300_v1  ;;  %5878 = vmatpush1.bf16.msra.mxu1 %v8303_v51  ;;  %v8392_v1 = vld [vmem:[%s11224_s1 + $0x15c4] ss:$16 sps:$4 sm:$0xff]   ;;  %v8395_v51 = vld [vmem:[%s11224_s1 + $0x15cc] ss:$16 sps:$4 sm:$0xff]  }
 0x280   :  { %5355 = vmatprep.subr.bf16.mxu0 %v8308_v2  ;;  %5888 = vmatprep.subr.bf16.mxu1 %v8311_v3  ;;  %v8390_v2 = vld [vmem:[%s11224_s1 + $0x15c0] ss:$16 sps:$4 sm:$0xff]   ;;  %v8393_v3 = vld [vmem:[%s11224_s1 + $0x15c8] ss:$16 sps:$4 sm:$0xff]  }
 0x282   :  { %5347 = vmatmul.mubr.bf16.vlgmr.msra.gmra.mrb[0].mxu0 %v979_v60  ;;  %5880 = vmatmul.mubr.bf16.vlgmr.msra.gmra.mrb[0].mxu1 %v979_v60  ;;  %v8401_v60 = vld [vmem:[%s11224_s1 + $0x15ec] ss:$16 sps:$4 sm:$0xff]  }
 0x283   :  { %5356 = vmatpush1.bf16.msra.mxu0 %v8306_v5  ;;  %5889 = vmatpush1.bf16.msra.mxu1 %v8309_v6  ;;  %v8396_v5 = vld [vmem:[%s11224_s1 + $0x15e0] ss:$16 sps:$4 sm:$0xff]   ;;  %v8399_v6 = vld [vmem:[%s11224_s1 + $0x15e8] ss:$16 sps:$4 sm:$0xff]  }
 0x284   :  { %5357 = vmatprep.subr.bf16.mxu0 %v8314_v7  ;;  %5890 = vmatprep.subr.bf16.mxu1 %v8317_v62  ;;  %v8405_v7 = vld [vmem:[%s11224_s1 + $0x1604] ss:$16 sps:$4 sm:$0xff]   ;;  %v8408_v62 = vld [vmem:[%s11224_s1 + $0x160c] ss:$16 sps:$4 sm:$0xff]  }
 0x285   :  { %5387 = vmatprep.mubr.bf16.mxu0 %v10673_v8  ;;  %5920 = vmatprep.mubr.bf16.mxu1 %v10673_v8 }
 0x287   :  { %5358 = vmatpush1.bf16.msra.mxu0 %v8312_v9  ;;  %5891 = vmatpush1.bf16.msra.mxu1 %v8315_v10  ;;  %v10859_v9 = vrot.slane %v10642_v0, %v8749_v49  ;;  %v8403_v10 = vld [vmem:[%s11224_s1 + $0x1600] ss:$16 sps:$4 sm:$0xff]   ;;  %v8414_v0 = vld [vmem:[%s11224_s1 + $0x162c] ss:$16 sps:$4 sm:$0xff]  }
 0x288   :  { %5359 = vmatprep.subr.bf16.mxu0 %v8320_v11  ;;  %5892 = vmatprep.subr.bf16.mxu1 %v8323_v12  ;;  %v8406_v11 = vld [vmem:[%s11224_s1 + $0x1608] ss:$16 sps:$4 sm:$0xff]   ;;  %v8411_v12 = vld [vmem:[%s11224_s1 + $0x1624] ss:$16 sps:$4 sm:$0xff]  }
 0x28b   :  { %5360 = vmatpush1.bf16.msra.mxu0 %v8318_v52  ;;  %5893 = vmatpush1.bf16.msra.mxu1 %v8321_v15  ;;  %v982_v52 = vcombine.high %v10673_v8, %v10673_v8  ;;  %v8409_v15 = vld [vmem:[%s11224_s1 + $0x1620] ss:$16 sps:$4 sm:$0xff]   ;;  %v8417_v8 = vld [vmem:[%s11224_s1 + $0x1644] ss:$16 sps:$4 sm:$0xff]  }
 0x28c   :  { %5361 = vmatprep.subr.bf16.mxu0 %v8326_v16  ;;  %5894 = vmatprep.subr.bf16.mxu1 %v8329_v17  ;;  %v8412_v16 = vld [vmem:[%s11224_s1 + $0x1628] ss:$16 sps:$4 sm:$0xff]   ;;  %v8420_v17 = vld [vmem:[%s11224_s1 + $0x164c] ss:$16 sps:$4 sm:$0xff]  }
 0x28f   :  { %5362 = vmatpush1.bf16.msra.mxu0 %v8324_v18  ;;  %5895 = vmatpush1.bf16.msra.mxu1 %v8327_v19  ;;  %v8415_v18 = vld [vmem:[%s11224_s1 + $0x1640] ss:$16 sps:$4 sm:$0xff]   ;;  %v8418_v19 = vld [vmem:[%s11224_s1 + $0x1648] ss:$16 sps:$4 sm:$0xff]  }
 0x290   :  { %5363 = vmatprep.subr.bf16.mxu0 %v8332_v20  ;;  %5896 = vmatprep.subr.bf16.mxu1 %v8335_v22  ;;  %v8423_v20 = vld [vmem:[%s11224_s1 + $0x1664] ss:$16 sps:$4 sm:$0xff]   ;;  %v8426_v22 = vld [vmem:[%s11224_s1 + $0x166c] ss:$16 sps:$4 sm:$0xff]  }
 0x293   :  { %5364 = vmatpush1.bf16.msra.mxu0 %v8330_v23  ;;  %5897 = vmatpush1.bf16.msra.mxu1 %v8333_v24  ;;  %v8421_v23 = vld [vmem:[%s11224_s1 + $0x1660] ss:$16 sps:$4 sm:$0xff]   ;;  %v8424_v24 = vld [vmem:[%s11224_s1 + $0x1668] ss:$16 sps:$4 sm:$0xff]  }
 0x294   :  { %5365 = vmatprep.subr.bf16.mxu0 %v8338_v13  ;;  %5898 = vmatprep.subr.bf16.mxu1 %v8341_v27  ;;  %v8429_v13 = vld [vmem:[%s11224_s1 + $0x1684] ss:$16 sps:$4 sm:$0xff]   ;;  %v8432_v27 = vld [vmem:[%s11224_s1 + $0x168c] ss:$16 sps:$4 sm:$0xff]  }
 0x297   :  { %5366 = vmatpush1.bf16.msra.mxu0 %v8336_v28  ;;  %5899 = vmatpush1.bf16.msra.mxu1 %v8339_v29  ;;  %v8427_v28 = vld [vmem:[%s11224_s1 + $0x1680] ss:$16 sps:$4 sm:$0xff]   ;;  %v8430_v29 = vld [vmem:[%s11224_s1 + $0x1688] ss:$16 sps:$4 sm:$0xff]  }
 0x298   :  { %5367 = vmatprep.subr.bf16.mxu0 %v8344_v14  ;;  %5900 = vmatprep.subr.bf16.mxu1 %v8347_v30  ;;  %v8435_v14 = vld [vmem:[%s11224_s1 + $0x16a4] ss:$16 sps:$4 sm:$0xff]   ;;  %v8438_v30 = vld [vmem:[%s11224_s1 + $0x16ac] ss:$16 sps:$4 sm:$0xff]  }
 0x29b   :  { %5368 = vmatpush1.bf16.msra.mxu0 %v8342_v31  ;;  %5901 = vmatpush1.bf16.msra.mxu1 %v8345_v25  ;;  %v8433_v31 = vld [vmem:[%s11224_s1 + $0x16a0] ss:$16 sps:$4 sm:$0xff]   ;;  %v8436_v25 = vld [vmem:[%s11224_s1 + $0x16a8] ss:$16 sps:$4 sm:$0xff]  }
 0x29c   :  { %5369 = vmatprep.subr.bf16.mxu0 %v8350_v32  ;;  %5902 = vmatprep.subr.bf16.mxu1 %v8353_v33  ;;  %v8441_v32 = vld [vmem:[%s11224_s1 + $0x16c4] ss:$16 sps:$4 sm:$0xff]   ;;  %v8444_v33 = vld [vmem:[%s11224_s1 + $0x16cc] ss:$16 sps:$4 sm:$0xff]  }
 0x29f   :  { %5370 = vmatpush1.bf16.msra.mxu0 %v8348_v26  ;;  %5903 = vmatpush1.bf16.msra.mxu1 %v8351_v36  ;;  %v8439_v26 = vld [vmem:[%s11224_s1 + $0x16c0] ss:$16 sps:$4 sm:$0xff]   ;;  %v8442_v36 = vld [vmem:[%s11224_s1 + $0x16c8] ss:$16 sps:$4 sm:$0xff]  }
 0x2a0   :  { %5371 = vmatprep.subr.bf16.mxu0 %v8356_v37  ;;  %5904 = vmatprep.subr.bf16.mxu1 %v8359_v21  ;;  %v8447_v37 = vld [vmem:[%s11224_s1 + $0x16e4] ss:$16 sps:$4 sm:$0xff]   ;;  %v8450_v21 = vld [vmem:[%s11224_s1 + $0x16ec] ss:$16 sps:$4 sm:$0xff]  }
 0x2a3   :  { %5372 = vmatpush1.bf16.msra.mxu0 %v8354_v39  ;;  %5905 = vmatpush1.bf16.msra.mxu1 %v8357_v40  ;;  %v8445_v39 = vld [vmem:[%s11224_s1 + $0x16e0] ss:$16 sps:$4 sm:$0xff]   ;;  %v8448_v40 = vld [vmem:[%s11224_s1 + $0x16e8] ss:$16 sps:$4 sm:$0xff]  }
 0x2a4   :  { %5373 = vmatprep.subr.bf16.mxu0 %v8362_v41  ;;  %5906 = vmatprep.subr.bf16.mxu1 %v8365_v34  ;;  %v8453_v41 = vld [vmem:[%s11224_s1 + $0x1704] ss:$16 sps:$4 sm:$0xff]   ;;  %v8456_v34 = vld [vmem:[%s11224_s1 + $0x170c] ss:$16 sps:$4 sm:$0xff]  }
 0x2a7   :  { %5374 = vmatpush1.bf16.msra.mxu0 %v8360_v43  ;;  %5907 = vmatpush1.bf16.msra.mxu1 %v8363_v45  ;;  %v8451_v43 = vld [vmem:[%s11224_s1 + $0x1700] ss:$16 sps:$4 sm:$0xff]   ;;  %v8454_v45 = vld [vmem:[%s11224_s1 + $0x1708] ss:$16 sps:$4 sm:$0xff]  }
 0x2a8   :  { %5375 = vmatprep.subr.bf16.mxu0 %v8368_v46  ;;  %5908 = vmatprep.subr.bf16.mxu1 %v8371_v35  ;;  %v8459_v46 = vld [vmem:[%s11224_s1 + $0x1724] ss:$16 sps:$4 sm:$0xff]   ;;  %v8462_v35 = vld [vmem:[%s11224_s1 + $0x172c] ss:$16 sps:$4 sm:$0xff]  }
 0x2ab   :  { %5376 = vmatpush1.bf16.msra.mxu0 %v8366_v50  ;;  %5909 = vmatpush1.bf16.msra.mxu1 %v8369_v53  ;;  %v8457_v50 = vld [vmem:[%s11224_s1 + $0x1720] ss:$16 sps:$4 sm:$0xff]   ;;  %v8460_v53 = vld [vmem:[%s11224_s1 + $0x1728] ss:$16 sps:$4 sm:$0xff]  }
 0x2ac   :  { %5377 = vmatprep.subr.bf16.mxu0 %v8374_v38  ;;  %5910 = vmatprep.subr.bf16.mxu1 %v8377_v54  ;;  %v8465_v38 = vld [vmem:[%s11224_s1 + $0x1744] ss:$16 sps:$4 sm:$0xff]   ;;  %v8468_v54 = vld [vmem:[%s11224_s1 + $0x174c] ss:$16 sps:$4 sm:$0xff]  }
 0x2af   :  { %5378 = vmatpush1.bf16.msra.mxu0 %v8372_v55  ;;  %5911 = vmatpush1.bf16.msra.mxu1 %v8375_v56  ;;  %v8463_v55 = vld [vmem:[%s11224_s1 + $0x1740] ss:$16 sps:$4 sm:$0xff]   ;;  %v8466_v56 = vld [vmem:[%s11224_s1 + $0x1748] ss:$16 sps:$4 sm:$0xff]  }
 0x2b0   :  { %5379 = vmatprep.subr.bf16.mxu0 %v8380_v47  ;;  %5912 = vmatprep.subr.bf16.mxu1 %v8383_v57  ;;  %v8471_v47 = vld [vmem:[%s11224_s1 + $0x1764] ss:$16 sps:$4 sm:$0xff]   ;;  %v8474_v57 = vld [vmem:[%s11224_s1 + $0x176c] ss:$16 sps:$4 sm:$0xff]  }
 0x2b3   :  { %5380 = vmatpush1.bf16.msra.mxu0 %v8378_v58  ;;  %5913 = vmatpush1.bf16.msra.mxu1 %v8381_v59  ;;  %v8469_v58 = vld [vmem:[%s11224_s1 + $0x1760] ss:$16 sps:$4 sm:$0xff]   ;;  %v8472_v59 = vld [vmem:[%s11224_s1 + $0x1768] ss:$16 sps:$4 sm:$0xff]  }
 0x2b4   :  { %5381 = vmatprep.subr.bf16.mxu0 %v8386_v48  ;;  %5914 = vmatprep.subr.bf16.mxu1 %v8389_v61  ;;  %v8477_v48 = vld [vmem:[%s11224_s1 + $0x1784] ss:$16 sps:$4 sm:$0xff]   ;;  %v8480_v61 = vld [vmem:[%s11224_s1 + $0x178c] ss:$16 sps:$4 sm:$0xff]  }
 0x2b7   :  { %5382 = vmatpush1.bf16.msra.mxu0 %v8384_v63  ;;  %5915 = vmatpush1.bf16.msra.mxu1 %v8387_v44  ;;  %v8475_v63 = vld [vmem:[%s11224_s1 + $0x1780] ss:$16 sps:$4 sm:$0xff]   ;;  %v8478_v44 = vld [vmem:[%s11224_s1 + $0x1788] ss:$16 sps:$4 sm:$0xff]  }
 0x2b8   :  { %5383 = vmatprep.subr.bf16.mxu0 %v8392_v1  ;;  %5916 = vmatprep.subr.bf16.mxu1 %v8395_v51  ;;  %v8483_v1 = vld [vmem:[%s11224_s1 + $0x17a4] ss:$16 sps:$4 sm:$0xff]   ;;  %v8486_v51 = vld [vmem:[%s11224_s1 + $0x17ac] ss:$16 sps:$4 sm:$0xff]  }
 0x2bb   :  { %5384 = vmatpush1.bf16.msra.mxu0 %v8390_v2  ;;  %5917 = vmatpush1.bf16.msra.mxu1 %v8393_v3  ;;  %v8481_v2 = vld [vmem:[%s11224_s1 + $0x17a0] ss:$16 sps:$4 sm:$0xff]   ;;  %v8484_v3 = vld [vmem:[%s11224_s1 + $0x17a8] ss:$16 sps:$4 sm:$0xff]  }
 0x2bc   :  { %5385 = vmatprep.subr.bf16.mxu0 %v8398_v4  ;;  %5918 = vmatprep.subr.bf16.mxu1 %v8401_v60  ;;  %v8489_v4 = vld [vmem:[%s11224_s1 + $0x17c4] ss:$16 sps:$4 sm:$0xff]   ;;  %v8492_v60 = vld [vmem:[%s11224_s1 + $0x17cc] ss:$16 sps:$4 sm:$0xff]  }
 0x2bf   :  { %5386 = vmatpush1.bf16.msra.mxu0 %v8396_v5  ;;  %5919 = vmatpush1.bf16.msra.mxu1 %v8399_v6  ;;  %v8487_v5 = vld [vmem:[%s11224_s1 + $0x17c0] ss:$16 sps:$4 sm:$0xff]   ;;  %v8490_v6 = vld [vmem:[%s11224_s1 + $0x17c8] ss:$16 sps:$4 sm:$0xff]  }
 0x2c0   :  { %5396 = vmatprep.subr.bf16.mxu0 %v8405_v7  ;;  %5929 = vmatprep.subr.bf16.mxu1 %v8408_v62  ;;  %v8495_v7 = vld [vmem:[%s11224_s1 + $0x17e4] ss:$16 sps:$4 sm:$0xff]   ;;  %v8498_v62 = vld [vmem:[%s11224_s1 + $0x17ec] ss:$16 sps:$4 sm:$0xff]  }
 0x2c2   :  { %5388 = vmatmul.mubr.bf16.vlgmr.msra.gmra.mrb[0].mxu0 %v10859_v9  ;;  %5921 = vmatmul.mubr.bf16.vlgmr.msra.gmra.mrb[0].mxu1 %v10859_v9 }
 0x2c3   :  { %5397 = vmatpush1.bf16.msra.mxu0 %v8403_v10  ;;  %5930 = vmatpush1.bf16.msra.mxu1 %v8406_v11  ;;  %v8493_v10 = vld [vmem:[%s11224_s1 + $0x17e0] ss:$16 sps:$4 sm:$0xff]   ;;  %v8496_v11 = vld [vmem:[%s11224_s1 + $0x17e8] ss:$16 sps:$4 sm:$0xff]  }
 0x2c4   :  { %5398 = vmatprep.subr.bf16.mxu0 %v8411_v12  ;;  %5931 = vmatprep.subr.bf16.mxu1 %v8414_v0  ;;  %v8501_v12 = vld [vmem:[%s11224_s1 + $0x1804] ss:$16 sps:$4 sm:$0xff]   ;;  %v8504_v0 = vld [vmem:[%s11224_s1 + $0x180c] ss:$16 sps:$4 sm:$0xff]  }
 0x2c5   :  { %5428 = vmatprep.mubr.bf16.mxu0 %v982_v52  ;;  %5961 = vmatprep.mubr.bf16.mxu1 %v982_v52  ;;  %v980_v52 = vcombine.high %v10859_v9, %v10859_v9  ;;  %v8510_v9 = vld [vmem:[%s11224_s1 + $0x182c] ss:$16 sps:$4 sm:$0xff]  }
 0x2c7   :  { %5399 = vmatpush1.bf16.msra.mxu0 %v8409_v15  ;;  %5932 = vmatpush1.bf16.msra.mxu1 %v8412_v16  ;;  %v8499_v15 = vld [vmem:[%s11224_s1 + $0x1800] ss:$16 sps:$4 sm:$0xff]   ;;  %v8502_v16 = vld [vmem:[%s11224_s1 + $0x1808] ss:$16 sps:$4 sm:$0xff]  }
 0x2c8   :  { %5400 = vmatprep.subr.bf16.mxu0 %v8417_v8  ;;  %5933 = vmatprep.subr.bf16.mxu1 %v8420_v17  ;;  %v8507_v8 = vld [vmem:[%s11224_s1 + $0x1824] ss:$16 sps:$4 sm:$0xff]   ;;  %v8505_v17 = vld [vmem:[%s11224_s1 + $0x1820] ss:$16 sps:$4 sm:$0xff]  }
 0x2cb   :  { %5401 = vmatpush1.bf16.msra.mxu0 %v8415_v18  ;;  %5934 = vmatpush1.bf16.msra.mxu1 %v8418_v19  ;;  %v8508_v18 = vld [vmem:[%s11224_s1 + $0x1828] ss:$16 sps:$4 sm:$0xff]   ;;  %v8513_v19 = vld [vmem:[%s11224_s1 + $0x1844] ss:$16 sps:$4 sm:$0xff]  }
 0x2cc   :  { %5402 = vmatprep.subr.bf16.mxu0 %v8423_v20  ;;  %5935 = vmatprep.subr.bf16.mxu1 %v8426_v22  ;;  %v8516_v20 = vld [vmem:[%s11224_s1 + $0x184c] ss:$16 sps:$4 sm:$0xff]   ;;  %v8582_v22 = vmov 0  }
 0x2cf   :  { %5403 = vmatpush1.bf16.msra.mxu0 %v8421_v23  ;;  %5936 = vmatpush1.bf16.msra.mxu1 %v8424_v24  ;;  %v8511_v23 = vld [vmem:[%s11224_s1 + $0x1840] ss:$16 sps:$4 sm:$0xff]   ;;  %v8514_v24 = vld [vmem:[%s11224_s1 + $0x1848] ss:$16 sps:$4 sm:$0xff]  }
 0x2d0   :  { %5404 = vmatprep.subr.bf16.mxu0 %v8429_v13  ;;  %5937 = vmatprep.subr.bf16.mxu1 %v8432_v27  ;;  %v8519_v13 = vld [vmem:[%s11224_s1 + $0x1864] ss:$16 sps:$4 sm:$0xff]   ;;  %v8522_v27 = vld [vmem:[%s11224_s1 + $0x186c] ss:$16 sps:$4 sm:$0xff]  }
 0x2d3   :  { %5405 = vmatpush1.bf16.msra.mxu0 %v8427_v28  ;;  %5938 = vmatpush1.bf16.msra.mxu1 %v8430_v29  ;;  %v8517_v28 = vld [vmem:[%s11224_s1 + $0x1860] ss:$16 sps:$4 sm:$0xff]   ;;  %v8520_v29 = vld [vmem:[%s11224_s1 + $0x1868] ss:$16 sps:$4 sm:$0xff]  }
 0x2d4   :  { %5406 = vmatprep.subr.bf16.mxu0 %v8435_v14  ;;  %5939 = vmatprep.subr.bf16.mxu1 %v8438_v30  ;;  %v6377_v14 = vld.sshfl [vmem:[%s11223_s0 + $0x18] sm:$0x1 pattern:$0x75316420]  ;;  %v8523_v30 = vld [vmem:[%s11226_s3 + $0x40] sm:$0xff]  }
 0x2d7   :  { %5407 = vmatpush1.bf16.msra.mxu0 %v8433_v31  ;;  %5940 = vmatpush1.bf16.msra.mxu1 %v8436_v25  ;;  %v8524_v31 = vld [vmem:[%s11226_s3 + $0xc0] sm:$0xff]   ;;  %v996_v25 = vrot.slane %v6377_v14, %v8749_v49  ;;  %v8528_v49 = vld [vmem:[%s11226_s3 + $0xc8] sm:$0xff]  }
 0x2d8   :  { %5408 = vmatprep.subr.bf16.mxu0 %v8441_v32  ;;  %5941 = vmatprep.subr.bf16.mxu1 %v8444_v33  ;;  %v8525_v32 = vld [vmem:[%s11226_s3] sm:$0xff]  }
 0x2d9   :  { %v8526_v33 = vld [vmem:[%s11226_s3 + $0x80] sm:$0xff]  }
 0x2db   :  { %5409 = vmatpush1.bf16.msra.mxu0 %v8439_v26  ;;  %5942 = vmatpush1.bf16.msra.mxu1 %v8442_v36  ;;  %v8527_v26 = vld [vmem:[%s11226_s3 + $0x48] sm:$0xff]  }
 0x2dc   :  { %5410 = vmatprep.subr.bf16.mxu0 %v8447_v37  ;;  %5943 = vmatprep.subr.bf16.mxu1 %v8450_v21  ;;  %v8529_v36 = vld [vmem:[%s11226_s3 + $0x8] sm:$0xff]   ;;  %v8531_v21 = vld [vmem:[%s11226_s3 + $0x50] sm:$0xff]  }
 0x2dd   :  { %v8530_v37 = vld [vmem:[%s11226_s3 + $0x88] sm:$0xff]  }
 0x2df   :  { %5411 = vmatpush1.bf16.msra.mxu0 %v8445_v39  ;;  %5944 = vmatpush1.bf16.msra.mxu1 %v8448_v40  ;;  %v8532_v39 = vld [vmem:[%s11226_s3 + $0xd0] sm:$0xff]  }
 0x2e0   :  { %5412 = vmatprep.subr.bf16.mxu0 %v8453_v41  ;;  %5945 = vmatprep.subr.bf16.mxu1 %v8456_v34  ;;  %v8533_v40 = vld [vmem:[%s11226_s3 + $0x10] sm:$0xff]   ;;  %v8535_v34 = vld [vmem:[%s11226_s3 + $0x58] sm:$0xff]  }
 0x2e1   :  { %v8534_v41 = vld [vmem:[%s11226_s3 + $0x90] sm:$0xff]  }
 0x2e3   :  { %5413 = vmatpush1.bf16.msra.mxu0 %v8451_v43  ;;  %5946 = vmatpush1.bf16.msra.mxu1 %v8454_v45  ;;  %v8536_v43 = vld [vmem:[%s11226_s3 + $0xd8] sm:$0xff]  }
 0x2e4   :  { %5414 = vmatprep.subr.bf16.mxu0 %v8459_v46  ;;  %5947 = vmatprep.subr.bf16.mxu1 %v8462_v35  ;;  %v8537_v45 = vld [vmem:[%s11226_s3 + $0x18] sm:$0xff]   ;;  %v8539_v35 = vld [vmem:[%s11226_s3 + $0x60] sm:$0xff]  }
 0x2e5   :  { %v8538_v46 = vld [vmem:[%s11226_s3 + $0x98] sm:$0xff]  }
 0x2e7   :  { %5415 = vmatpush1.bf16.msra.mxu0 %v8457_v50  ;;  %5948 = vmatpush1.bf16.msra.mxu1 %v8460_v53  ;;  %v8540_v50 = vld [vmem:[%s11226_s3 + $0xe0] sm:$0xff]  }
 0x2e8   :  { %5416 = vmatprep.subr.bf16.mxu0 %v8465_v38  ;;  %5949 = vmatprep.subr.bf16.mxu1 %v8468_v54  ;;  %v8541_v53 = vld [vmem:[%s11226_s3 + $0x20] sm:$0xff]   ;;  %v8543_v54 = vld [vmem:[%s11226_s3 + $0x68] sm:$0xff]  }
 0x2e9   :  { %v8542_v38 = vld [vmem:[%s11226_s3 + $0xa0] sm:$0xff]  }
 0x2eb   :  { %5417 = vmatpush1.bf16.msra.mxu0 %v8463_v55  ;;  %5950 = vmatpush1.bf16.msra.mxu1 %v8466_v56  ;;  %v8544_v55 = vld [vmem:[%s11226_s3 + $0xe8] sm:$0xff]  }
 0x2ec   :  { %5418 = vmatprep.subr.bf16.mxu0 %v8471_v47  ;;  %5951 = vmatprep.subr.bf16.mxu1 %v8474_v57  ;;  %v8545_v56 = vld [vmem:[%s11226_s3 + $0x28] sm:$0xff]   ;;  %v8547_v57 = vld [vmem:[%s11226_s3 + $0x70] sm:$0xff]  }
 0x2ed   :  { %v8546_v47 = vld [vmem:[%s11226_s3 + $0xa8] sm:$0xff]  }
 0x2ef   :  { %5419 = vmatpush1.bf16.msra.mxu0 %v8469_v58  ;;  %5952 = vmatpush1.bf16.msra.mxu1 %v8472_v59  ;;  %v8548_v58 = vld [vmem:[%s11226_s3 + $0xf0] sm:$0xff]  }
 0x2f0   :  { %5420 = vmatprep.subr.bf16.mxu0 %v8477_v48  ;;  %5953 = vmatprep.subr.bf16.mxu1 %v8480_v61  ;;  %v8549_v59 = vld [vmem:[%s11226_s3 + $0x30] sm:$0xff]   ;;  %v8551_v61 = vld [vmem:[%s11226_s3 + $0x78] sm:$0xff]  }
 0x2f1   :  { %v8550_v48 = vld [vmem:[%s11226_s3 + $0xb0] sm:$0xff]  }
 0x2f3   :  { %5421 = vmatpush1.bf16.msra.mxu0 %v8475_v63  ;;  %5954 = vmatpush1.bf16.msra.mxu1 %v8478_v44  ;;  %v8552_v63 = vld [vmem:[%s11226_s3 + $0xf8] sm:$0xff]  }
 0x2f4   :  { %5422 = vmatprep.subr.bf16.mxu0 %v8483_v1  ;;  %5955 = vmatprep.subr.bf16.mxu1 %v8486_v51  ;;  %v8553_v44 = vld [vmem:[%s11226_s3 + $0x38] sm:$0xff]   ;;  %v814_v51 = vsub.s32 0, %v8731_v42 }
 0x2f5   :  { %v8554_v1 = vld [vmem:[%s11226_s3 + $0xb8] sm:$0xff]  }
 0x2f7   :  { %5423 = vmatpush1.bf16.msra.mxu0 %v8481_v2  ;;  %5956 = vmatpush1.bf16.msra.mxu1 %v8484_v3  ;;  %v822_v2 = vsub.s32 2, %v8731_v42  ;;  %v810_v3 = vld [vmem:[%s11225_s2] sm:$0xf] }
 0x2f8   :  { %5424 = vmatprep.subr.bf16.mxu0 %v8489_v4  ;;  %5957 = vmatprep.subr.bf16.mxu1 %v8492_v60  ;;  %v818_v4 = vsub.s32 1, %v8731_v42  ;;  %v826_v60 = vsub.s32 3, %v8731_v42 }
 0x2fb   :  { %5425 = vmatpush1.bf16.msra.mxu0 %v8487_v5  ;;  %5958 = vmatpush1.bf16.msra.mxu1 %v8490_v6  ;;  %v815_v5 = vrot.slane %v810_v3, %v814_v51  ;;  %v823_v6 = vrot.slane %v810_v3, %v822_v2 }
 0x2fc   :  { %5426 = vmatprep.subr.bf16.mxu0 %v8495_v7  ;;  %5959 = vmatprep.subr.bf16.mxu1 %v8498_v62  ;;  %v819_v7 = vrot.slane %v810_v3, %v818_v4  ;;  %v827_v62 = vrot.slane %v810_v3, %v826_v60 }
 0x2ff   :  { %5427 = vmatpush1.bf16.msra.mxu0 %v8493_v10  ;;  %5960 = vmatpush1.bf16.msra.mxu1 %v8496_v11 }
 0x300   :  { %5437 = vmatprep.subr.bf16.mxu0 %v8501_v12  ;;  %5970 = vmatprep.subr.bf16.mxu1 %v8504_v0 }
 0x302   :  { %5429 = vmatmul.mubr.bf16.vlgmr.msra.gmra.mrb[0].mxu0 %v980_v52  ;;  %5962 = vmatmul.mubr.bf16.vlgmr.msra.gmra.mrb[0].mxu1 %v980_v52 }
 0x303   :  { %5438 = vmatpush1.bf16.msra.mxu0 %v8499_v15  ;;  %5971 = vmatpush1.bf16.msra.mxu1 %v8502_v16 }
 0x304   :  { %5439 = vmatprep.subr.bf16.mxu0 %v8507_v8  ;;  %5972 = vmatprep.subr.bf16.mxu1 %v8510_v9 }
 0x305   :  { %5469 = vmatprep.mubr.bf16.mxu0 %v8582_v22  ;;  %6002 = vmatprep.mubr.bf16.mxu1 %v8582_v22 }
 0x307   :  { %5440 = vmatpush1.bf16.msra.mxu0 %v8505_v17  ;;  %5973 = vmatpush1.bf16.msra.mxu1 %v8508_v18 }
 0x308   :  { %5441 = vmatprep.subr.bf16.mxu0 %v8513_v19  ;;  %5974 = vmatprep.subr.bf16.mxu1 %v8516_v20 }
 0x30b   :  { %5442 = vmatpush1.bf16.msra.mxu0 %v8511_v23  ;;  %5975 = vmatpush1.bf16.msra.mxu1 %v8514_v24 }
 0x30c   :  { %5443 = vmatprep.subr.bf16.mxu0 %v8519_v13  ;;  %5976 = vmatprep.subr.bf16.mxu1 %v8522_v27 }
 0x30f   :  { %5444 = vmatpush1.bf16.msra.mxu0 %v8517_v28  ;;  %5977 = vmatpush1.bf16.msra.mxu1 %v8520_v29 }
 0x310   :  { %7197 = vmatprep.subr.bf16.mxu0 %v8523_v30  ;;  %7219 = vmatprep.subr.bf16.mxu1 %v8524_v31  ;;  %v7164_v30 = vld [vmem:[%s11227_s4] ss:$0 sm:$0xff] }
 0x312   :  { %7162 = vmatmul.mubr.msk.bf16.vlgmr.msra.gmra.mrb[0].mxu0 %vm4941_vm0, %v996_v25  ;;  %7163 = vmatmul.mubr.msk.bf16.vlgmr.msra.gmra.mrb[0].mxu1 %vm4941_vm0, %v996_v25 }
 0x313   :  { %7198 = vmatpush3.bf16.msra.mxu0 %v8525_v32  ;;  %7220 = vmatpush3.bf16.msra.mxu1 %v8526_v33 }
 0x314   :  { %7199 = vmatprep.subr.bf16.mxu0 %v8527_v26  ;;  %7221 = vmatprep.subr.bf16.mxu1 %v8528_v49 }
 0x317   :  { %7200 = vmatpush3.bf16.msra.mxu0 %v8529_v36  ;;  %7222 = vmatpush3.bf16.msra.mxu1 %v8530_v37 }
 0x318   :  { %7201 = vmatprep.subr.bf16.mxu0 %v8531_v21  ;;  %7223 = vmatprep.subr.bf16.mxu1 %v8532_v39 }
 0x31b   :  { %7202 = vmatpush3.bf16.msra.mxu0 %v8533_v40  ;;  %7224 = vmatpush3.bf16.msra.mxu1 %v8534_v41 }
 0x31c   :  { %7203 = vmatprep.subr.bf16.mxu0 %v8535_v34  ;;  %7225 = vmatprep.subr.bf16.mxu1 %v8536_v43 }
 0x31f   :  { %7204 = vmatpush3.bf16.msra.mxu0 %v8537_v45  ;;  %7226 = vmatpush3.bf16.msra.mxu1 %v8538_v46 }
 0x320   :  { %7205 = vmatprep.subr.bf16.mxu0 %v8539_v35  ;;  %7227 = vmatprep.subr.bf16.mxu1 %v8540_v50 }
 0x323   :  { %7206 = vmatpush3.bf16.msra.mxu0 %v8541_v53  ;;  %7228 = vmatpush3.bf16.msra.mxu1 %v8542_v38 }
 0x324   :  { %7207 = vmatprep.subr.bf16.mxu0 %v8543_v54  ;;  %7229 = vmatprep.subr.bf16.mxu1 %v8544_v55 }
 0x327   :  { %7208 = vmatpush3.bf16.msra.mxu0 %v8545_v56  ;;  %7230 = vmatpush3.bf16.msra.mxu1 %v8546_v47 }
 0x328   :  { %7209 = vmatprep.subr.bf16.mxu0 %v8547_v57  ;;  %7231 = vmatprep.subr.bf16.mxu1 %v8548_v58 }
 0x32b   :  { %7210 = vmatpush3.bf16.msra.mxu0 %v8549_v59  ;;  %7232 = vmatpush3.bf16.msra.mxu1 %v8550_v48 }
 0x32c   :  { %7211 = vmatprep.subr.bf16.mxu0 %v8551_v61  ;;  %7233 = vmatprep.subr.bf16.mxu1 %v8552_v63 }
 0x32f   :  { %7212 = vmatpush3.bf16.msra.mxu0 %v8553_v44  ;;  %7234 = vmatpush3.bf16.msra.mxu1 %v8554_v1 }
 0x3e5   :  { %v5471_v10 = vpop.f32.mrb[0].mxu0  ;;  %v6004_v11 = vpop.f32.mrb[0].mxu1 }
 0x3e6   :  { %v7241_v12 = vadd.f32 %v5471_v10, %v815_v5  ;;  %v7243_v0 = vadd.f32 %v6004_v11, %v823_v6  ;;  %v5473_v52 = vpop.f32.mrb[1].mxu0  ;;  %v6006_v15 = vpop.f32.mrb[1].mxu1 }
 0x3e7   :  { %v7242_v16 = vadd.f32 %v5473_v52, %v819_v7  ;;  %v7244_v8 = vadd.f32 %v6006_v15, %v827_v62  ;;  %v5475_v9 = vpop.f32.mrb[2].mxu0  ;;  %v6008_v17 = vpop.f32.mrb[2].mxu1 }
 0x3e8   :  { %v6011_v18 = vmax.f32 %v7241_v12, 0.0  ;;  %v6013_v19 = vmax.f32 %v7243_v0, 0.0  ;;  %v5476_v20 = vpop.f32.mrb[3].mxu0  ;;  %v6009_v22 = vpop.f32.mrb[3].mxu1 }
 0x3e9   :  { %v6012_v23 = vmax.f32 %v7242_v16, 0.0  ;;  %v6014_v42 = vmax.f32 %v7244_v8, 0.0 }
 0x3ea   :  { %v6015_v27 = vpack.c.bf16 %v6011_v18, %v6011_v18  ;;  %v6017_v28 = vpack.c.bf16 %v6013_v19, %v6013_v19 }
 0x3eb   :  { %v6016_v24 = vpack.c.bf16 %v6012_v23, %v6012_v23  ;;  %v6018_v13 = vpack.c.bf16 %v6014_v42, %v6014_v42 }
 0x3ed   :  { %6314 = vmatprep.mubr.bf16.mxu0 %v6016_v24  ;;  %6354 = vmatprep.mubr.bf16.mxu1 %v6018_v13 }
 0x3ee   :  { %6315 = vmatmul.mubr.bf16.vlgmr.msra.gmra.mrb[4].mxu0 %v6015_v27  ;;  %6355 = vmatmul.mubr.bf16.vlgmr.msra.gmra.mrb[4].mxu1 %v6017_v28 }
 0x4c1   :  { %v7213_v29 = vpop.f32.mrb[4].mxu0  ;;  %v7235_v14 = vpop.f32.mrb[4].mxu1 }
 0x4c2   :  { %v7214_v31 = vpop.f32.mrb[5].mxu0  ;;  %v7236_v25 = vpop.f32.mrb[5].mxu1 }
 0x4c3   :  { %v7215_v32 = vadd.f32 %v7214_v31, %v7213_v29  ;;  %v7237_v33 = vadd.f32 %v7236_v25, %v7235_v14  ;;  %v7216_v26 = vpop.f32.mrb[6].mxu0  ;;  %v7238_v49 = vpop.f32.mrb[6].mxu1 }
 0x4c4   :  { %v7217_v36 = vpop.f32.mrb[7].mxu0  ;;  %v7239_v37 = vpop.f32.mrb[7].mxu1 }
 0x4c5   :  { %v6317_v21 = vadd.f32 %v7215_v32, %v7164_v30 }
 0x4c7   :  { %v6357_v39 = vadd.f32 %v7237_v33, %v6317_v21 }
 0x4c9   :  { %6362 = vst [vmem:[#allocation2] sm:$0x3] %v6357_v39 }
 0x4ca   :  { %8568 = shalt.err (!%p8565_p4)
}
 0x4cb   :  { %s8569_s10 = scalar_lea.hbm %s11228_s5, 32 }
 0x4cc   :  { %p8570_p5 = scmp.ne.s32.totalorder %s11228_s5, %s8569_s10  ;;  %p8573_p6 = scmp.lt.u32.totalorder %s8569_s10, %s11228_s5 }
 0x4ce   :  { %p8575_p7 = pnand %p8573_p6, %p8570_p5 }
 0x4d0   :  { %8578 = shalt.err (!%p8575_p7)
}
 0x4d1   :  { %6372 = dma.vmem_to_hbm [thread:$0]  %s6370_s7, 32, %s11228_s5, [#allocation3]  }
 0x4d2   :  { %8579 = dma.done.wait [#allocation3], 32  }
 0x4d3   :  { %8580 = vsyncadd [#allocation3], 4294967264 }
 0x4d4   :  { %6376 = vsyncpa [#allocation3], 1 }

</bundles_post_ra>
